<compile_context>
chip_gen: v6e
topology: v6e:2x2x1
jax: 0.10.0
libtpu: 0.0.40
codegen_flags: <defaults>
</compile_context>

<pallas_src>
import functools

import jax
import jax.numpy as jnp
from jax.experimental import pallas as pl
from jax.experimental.pallas import tpu as pltpu

# ---------------- small, MTGNN-consistent configuration ----------------
B = 2
IN_DIM = 2
NUM_NODES = 8
SEQ_LEN = 12
LAYERS = 3
CONV_CH = 16          # conv_channels (divisible by 4 for the inception branches)
RESID_CH = 16         # residual_channels
SKIP_CH = 32          # skip_channels
END_CH = 32           # end_channels
OUT_DIM = 12
NODE_DIM = 16
SUBGRAPH_K = 4
GCN_DEPTH = 2
PROP_ALPHA = 0.05
TANH_ALPHA = 3.0
KERNEL_SET = (2, 3, 6, 7)
KERNEL_SIZE = 7
RECEPTIVE_FIELD = LAYERS * (KERNEL_SIZE - 1) + 1      # 19 (> SEQ_LEN -> left pad)
T_LAYERS = [RECEPTIVE_FIELD - (KERNEL_SIZE - 1) * j for j in range(1, LAYERS + 1)]  # [13,7,1]
LN_EPS = 1e-5
CN = CONV_CH * NUM_NODES        # 128 lanes: (channel, node) pairs


def _bspec(shape):
    """Full-array block, broadcast across the (single-axis) grid."""
    nd = len(shape)
    return pl.BlockSpec(shape, lambda b, _nd=nd: (0,) * _nd)


# =====================================================================
# Kernel 1: graph constructor (dense adjacency)
# =====================================================================
def graph_adj_kernel(e1_ref, e2_ref, w1t_ref, b1_ref, w2t_ref, b2_ref, adj_ref, *, alpha):
    f32 = jnp.float32
    nv1 = jnp.tanh(alpha * (jnp.dot(e1_ref[...], w1t_ref[...],
                                    preferred_element_type=f32) + b1_ref[...]))
    nv2 = jnp.tanh(alpha * (jnp.dot(e2_ref[...], w2t_ref[...],
                                    preferred_element_type=f32) + b2_ref[...]))
    a = (jnp.dot(nv1, nv2.T, preferred_element_type=f32)
         - jnp.dot(nv2, nv1.T, preferred_element_type=f32))
    adj_ref[...] = jnp.maximum(jnp.tanh(alpha * a), 0.0)


def build_adjacency(params):
    n, d = NUM_NODES, NODE_DIM
    adj = pl.pallas_call(
        functools.partial(graph_adj_kernel, alpha=float(TANH_ALPHA)),
        out_shape=jax.ShapeDtypeStruct((n, n), jnp.float32),
        grid=(1,),
        in_specs=[_bspec((n, d)), _bspec((n, d)),
                  _bspec((d, d)), _bspec((1, d)),
                  _bspec((d, d)), _bspec((1, d))],
        out_specs=_bspec((n, n)),
    )(params["emb1"], params["emb2"],
      params["gc_lin1_w"].T, params["gc_lin1_b"][None, :],
      params["gc_lin2_w"].T, params["gc_lin2_b"][None, :])
    # TODO(synk): torch adds rand_like(adj)*0.01 before topk purely for tie-breaking;
    # deterministic jax.lax.top_k is used here instead (kept in XLA, not Pallas).
    _, idxs = jax.lax.top_k(adj, SUBGRAPH_K)
    mask = jnp.zeros_like(adj).at[jnp.arange(NUM_NODES)[:, None], idxs].set(1.0)
    return adj * mask


# =====================================================================
# Kernel 2: the whole rest of the forward, one program per batch element
# =====================================================================
def mtgnn_main_kernel(*refs):
    out_ref = refs[-1]
    it = iter(refs[:-1])
    x0_ref, x0f_ref = next(it), next(it)
    w_start, b_start = next(it), next(it)
    w_skip0, b_skip0 = next(it), next(it)
    mix1_ref, mix2_ref = next(it), next(it)
    layer_refs = [tuple(next(it) for _ in range(10)) for _ in range(LAYERS)]
    w_skipE, b_skipE = next(it), next(it)
    w_end1, b_end1 = next(it), next(it)
    w_end2, b_end2 = next(it), next(it)

    f32 = jnp.float32
    xin = x0_ref[0]                      # (RF, IN_DIM*N)
    mix1 = mix1_ref[...]                 # (128, 128) = I_C (x) a1^T
    mix2 = mix2_ref[...]

    # start conv (1x1):  (RF, 16) @ (16, 128)
    x = jnp.dot(xin, w_start[...], preferred_element_type=f32) + b_start[...]

    # skip0: full (c, t) contraction on the (pre-flattened) padded input
    skip = jnp.dot(x0f_ref[0], w_skip0[...], preferred_element_type=f32) + b_skip0[...]

    for i in range(LAYERS):
        (w_inc, b_inc, w_skc, b_skc,
         w_m1, b_m1, w_m2, b_m2, lnw, lnb) = layer_refs[i]
        t_out = lnw.shape[0]
        residual = x                     # (t_prev, 128)

        # fused dilated-inception (all 4 kernel sizes, filter+gate) -> 1 matmul
        taps = jnp.concatenate([x[j:j + t_out, :] for j in range(KERNEL_SIZE)], axis=1)
        y = jnp.dot(taps, w_inc[...], preferred_element_type=f32) + b_inc[...]
        xg = jnp.tanh(y[:, :CN]) * jax.nn.sigmoid(y[:, CN:])      # (t_out, 128)

        # skip conv: joint (c, t) contraction -> flatten rows onto lanes
        xg_flat = jnp.concatenate([xg[t:t + 1, :] for t in range(t_out)], axis=1)
        skip = skip + jnp.dot(xg_flat, w_skc[...], preferred_element_type=f32) + b_skc[...]

        # two mix-propagation branches (graph conv), GCN_DEPTH hops each
        def run_mixprop(mix, w_mlp, b_mlp):
            h = xg
            hops = [xg]
            for _ in range(GCN_DEPTH):
                h = PROP_ALPHA * xg + (1.0 - PROP_ALPHA) * jnp.dot(
                    h, mix, preferred_element_type=f32)
                hops.append(h)
            ho = jnp.concatenate(hops, axis=1)                     # (t_out, 3*128)
            return jnp.dot(ho, w_mlp[...], preferred_element_type=f32) + b_mlp[...]

        xn = run_mixprop(mix1, w_m1, b_m1) + run_mixprop(mix2, w_m2, b_m2)
        xn = xn + residual[residual.shape[0] - t_out:, :]

        # LayerNorm over (C, N, T) per batch sample (= the whole slab)
        cnt = float(t_out * CN)
        mean = jnp.sum(jnp.sum(xn, axis=1, keepdims=True), axis=0, keepdims=True) / cnt
        xc = xn - mean
        var = jnp.sum(jnp.sum(xc * xc, axis=1, keepdims=True), axis=0, keepdims=True) / cnt
        x = xc * jax.lax.rsqrt(var + LN_EPS) * lnw[...] + lnb[...]

    # epilogue: skipE + relu + end1(relu) + end2   (all (1, .) rows)
    skip = skip + jnp.dot(x, w_skipE[...], preferred_element_type=f32) + b_skipE[...]
    h = jnp.maximum(skip, 0.0)
    h = jnp.maximum(jnp.dot(h, w_end1[...], preferred_element_type=f32) + b_end1[...], 0.0)
    out = jnp.dot(h, w_end2[...], preferred_element_type=f32) + b_end2[...]   # (1, 96)
    out_ref[...] = out[None]


# ---------------- host-side weight re-layout helpers (XLA, tiny) ----------------
def _kron_nodes(w):
    """W (r, c) -> W (x) I_N  of shape (r*N, c*N): per-node independent mixing."""
    return jnp.kron(w.astype(jnp.float32), jnp.eye(NUM_NODES, dtype=jnp.float32))


def _bias_row(b):
    return jnp.repeat(b.astype(jnp.float32), NUM_NODES)[None, :]


def _time_conv_weights(w):
    """Conv2d weight (Cout, Cin, k) contracting the FULL time axis ->
    ((k*Cin*N), Cout*N), row index = t*Cin*N + c*N + n."""
    cout, cin, k = w.shape
    a = jnp.transpose(w.astype(jnp.float32), (2, 1, 0)).reshape(k * cin, cout)
    return _kron_nodes(a)


def _inception_weights(filter_params, gate_params):
    """Merge the 4 filter + 4 gate dilated-inception branches (cropped to the
    common output length) into one (7*Cin*N, 2*Cout*N) weight."""
    cb = CONV_CH // len(KERNEL_SET)
    wc = jnp.zeros((2 * CONV_CH, RESID_CH, KERNEL_SIZE), jnp.float32)
    bc = jnp.zeros((2 * CONV_CH,), jnp.float32)
    for br, kk in enumerate(KERNEL_SET):
        wf, bf = filter_params[br]
        wg, bg = gate_params[br]
        wc = wc.at[br * cb:(br + 1) * cb, :, KERNEL_SIZE - kk:].set(wf)
        bc = bc.at[br * cb:(br + 1) * cb].set(bf)
        wc = wc.at[CONV_CH + br * cb:CONV_CH + (br + 1) * cb, :, KERNEL_SIZE - kk:].set(wg)
        bc = bc.at[CONV_CH + br * cb:CONV_CH + (br + 1) * cb].set(bg)
    w3 = jnp.transpose(wc, (2, 1, 0)).reshape(KERNEL_SIZE * RESID_CH, 2 * CONV_CH)
    return _kron_nodes(w3), _bias_row(bc)


def _mix_matrix(adj):
    """Row-normalised (adj+I) propagation as a (C*N, C*N) right-multiplier."""
    adj = adj + jnp.eye(NUM_NODES, dtype=jnp.float32)
    a = adj / jnp.sum(adj, axis=1, keepdims=True)
    return jnp.kron(jnp.eye(CONV_CH, dtype=jnp.float32), a.T)


# ---------------- full forward ----------------
def mtgnn_forward(params, x_in):
    adp = build_adjacency(params)
    mix1 = _mix_matrix(adp)
    mix2 = _mix_matrix(adp.T)

    # input layout: (B, RF, IN_DIM*N), rows = time (left-padded), cols = c*N + n
    x_pad = jnp.pad(x_in.astype(jnp.float32),
                    ((0, 0), (0, 0), (0, 0), (RECEPTIVE_FIELD - SEQ_LEN, 0)))
    x0 = jnp.transpose(x_pad, (0, 3, 1, 2)).reshape(B, RECEPTIVE_FIELD, IN_DIM * NUM_NODES)
    x0_flat = x0.reshape(B, 1, RECEPTIVE_FIELD * IN_DIM * NUM_NODES)

    inputs = [x0, x0_flat]
    specs = [
        pl.BlockSpec((1, RECEPTIVE_FIELD, IN_DIM * NUM_NODES), lambda b: (b, 0, 0)),
        pl.BlockSpec((1, 1, RECEPTIVE_FIELD * IN_DIM * NUM_NODES), lambda b: (b, 0, 0)),
    ]

    def add(arr):
        arr = arr.astype(jnp.float32)
        inputs.append(arr)
        specs.append(_bspec(arr.shape))

    add(_kron_nodes(params["start_w"].T)); add(_bias_row(params["start_b"]))
    add(_time_conv_weights(params["skip0_w"])); add(_bias_row(params["skip0_b"]))
    add(mix1); add(mix2)
    for i in range(LAYERS):
        w_inc, b_inc = _inception_weights(params["filter"][i], params["gate"][i])
        add(w_inc); add(b_inc)
        add(_time_conv_weights(params["skipc_w"][i])); add(_bias_row(params["skipc_b"][i]))
        add(_kron_nodes(params["gc1_w"][i].T)); add(_bias_row(params["gc1_b"][i]))
        add(_kron_nodes(params["gc2_w"][i].T)); add(_bias_row(params["gc2_b"][i]))
        t_i = T_LAYERS[i]
        add(jnp.transpose(params["ln_w"][i], (2, 0, 1)).reshape(t_i, CN))
        add(jnp.transpose(params["ln_b"][i], (2, 0, 1)).reshape(t_i, CN))
    add(_kron_nodes(params["skipE_w"].T)); add(_bias_row(params["skipE_b"]))
    add(_kron_nodes(params["end1_w"].T)); add(_bias_row(params["end1_b"]))
    add(_kron_nodes(params["end2_w"].T)); add(_bias_row(params["end2_b"]))

    out = pl.pallas_call(
        mtgnn_main_kernel,
        out_shape=jax.ShapeDtypeStruct((B, 1, OUT_DIM * NUM_NODES), jnp.float32),
        grid=(B,),
        in_specs=specs,
        out_specs=pl.BlockSpec((1, 1, OUT_DIM * NUM_NODES), lambda b: (b, 0, 0)),
        compiler_params=pltpu.CompilerParams(
            dimension_semantics=("parallel",),
            vmem_limit_bytes=56 * 1024 * 1024),
    )(*inputs)
    return out.reshape(B, OUT_DIM, NUM_NODES)[..., None]


# ---------------- pure-JAX reference (for in-script validation) ----------------
def _reference_forward(params, x_in):
    x = jnp.pad(x_in, ((0, 0), (0, 0), (0, 0), (RECEPTIVE_FIELD - SEQ_LEN, 0)))
    nv1 = jnp.tanh(TANH_ALPHA * (params["emb1"] @ params["gc_lin1_w"].T + params["gc_lin1_b"]))
    nv2 = jnp.tanh(TANH_ALPHA * (params["emb2"] @ params["gc_lin2_w"].T + params["gc_lin2_b"]))
    a = nv1 @ nv2.T - nv2 @ nv1.T
    adj = jnp.maximum(jnp.tanh(TANH_ALPHA * a), 0.0)
    _, idxs = jax.lax.top_k(adj, SUBGRAPH_K)
    mask = jnp.zeros_like(adj).at[jnp.arange(NUM_NODES)[:, None], idxs].set(1.0)
    adp = adj * mask

    def conv1x1(z, W, b):
        return jnp.einsum('bcnt,oc->bont', z, W) + b[None, :, None, None]

    def tconv(z, W, b):
        k = W.shape[2]
        tout = z.shape[3] - k + 1
        y = sum(jnp.einsum('bcnt,oc->bont', z[:, :, :, j:j + tout], W[:, :, j])
                for j in range(k))
        return y + b[None, :, None, None]

    def inception(z, branch):
        outs = [tconv(z, W, b) for (W, b) in branch]
        tmin = outs[-1].shape[3]
        return jnp.concatenate([o[:, :, :, -tmin:] for o in outs], axis=1)

    def mixprop(z, adjm, W, b):
        adjI = adjm + jnp.eye(NUM_NODES)
        aa = adjI / jnp.sum(adjI, axis=1, keepdims=True)
        h = z
        outs = [z]
        for _ in range(GCN_DEPTH):
            h = PROP_ALPHA * z + (1 - PROP_ALPHA) * jnp.einsum('bcwt,vw->bcvt', h, aa)
            outs.append(h)
        return conv1x1(jnp.concatenate(outs, axis=1), W, b)

    xr = conv1x1(x, params["start_w"], params["start_b"])
    skip = tconv(x, params["skip0_w"], params["skip0_b"])
    for i in range(LAYERS):
        residual = xr
        f = inception(xr, params["filter"][i])
        g = inception(xr, params["gate"][i])
        xg = jnp.tanh(f) * jax.nn.sigmoid(g)
        skip = tconv(xg, params["skipc_w"][i], params["skipc_b"][i]) + skip
        x1 = mixprop(xg, adp, params["gc1_w"][i], params["gc1_b"][i])
        x2 = mixprop(xg, adp.T, params["gc2_w"][i], params["gc2_b"][i])
        xr = x1 + x2 + residual[:, :, :, -x1.shape[3]:]
        mean = jnp.mean(xr, axis=(1, 2, 3), keepdims=True)
        var = jnp.mean((xr - mean) ** 2, axis=(1, 2, 3), keepdims=True)
        xr = (xr - mean) / jnp.sqrt(var + LN_EPS) * params["ln_w"][i][None] + params["ln_b"][i][None]
    skip = conv1x1(xr, params["skipE_w"], params["skipE_b"]) + skip
    out = jnp.maximum(skip, 0.0)
    out = jnp.maximum(conv1x1(out, params["end1_w"], params["end1_b"]), 0.0)
    return conv1x1(out, params["end2_w"], params["end2_b"])


# ---------------- deterministic parameter init ----------------
def init_params(key):
    keys = iter(jax.random.split(key, 200))

    def w(shape, scale=0.1):
        return scale * jax.random.normal(next(keys), shape, dtype=jnp.float32)

    p = {}
    p["emb1"] = w((NUM_NODES, NODE_DIM), 1.0)
    p["emb2"] = w((NUM_NODES, NODE_DIM), 1.0)
    p["gc_lin1_w"] = w((NODE_DIM, NODE_DIM))
    p["gc_lin1_b"] = w((NODE_DIM,))
    p["gc_lin2_w"] = w((NODE_DIM, NODE_DIM))
    p["gc_lin2_b"] = w((NODE_DIM,))

    p["start_w"] = w((RESID_CH, IN_DIM))
    p["start_b"] = w((RESID_CH,))
    p["skip0_w"] = w((SKIP_CH, IN_DIM, RECEPTIVE_FIELD))
    p["skip0_b"] = w((SKIP_CH,))

    c_branch = CONV_CH // len(KERNEL_SET)
    p["filter"], p["gate"] = [], []
    p["skipc_w"], p["skipc_b"] = [], []
    p["gc1_w"], p["gc1_b"], p["gc2_w"], p["gc2_b"] = [], [], [], []
    p["ln_w"], p["ln_b"] = [], []
    for j in range(1, LAYERS + 1):
        rf_size_j = 1 + j * (KERNEL_SIZE - 1)
        t_j = RECEPTIVE_FIELD - rf_size_j + 1     # 13, 7, 1
        p["filter"].append([(w((c_branch, RESID_CH, kk)), w((c_branch,))) for kk in KERNEL_SET])
        p["gate"].append([(w((c_branch, RESID_CH, kk)), w((c_branch,))) for kk in KERNEL_SET])
        p["skipc_w"].append(w((SKIP_CH, CONV_CH, t_j)))
        p["skipc_b"].append(w((SKIP_CH,)))
        p["gc1_w"].append(w((RESID_CH, (GCN_DEPTH + 1) * CONV_CH)))
        p["gc1_b"].append(w((RESID_CH,)))
        p["gc2_w"].append(w((RESID_CH, (GCN_DEPTH + 1) * CONV_CH)))
        p["gc2_b"].append(w((RESID_CH,)))
        p["ln_w"].append(jnp.ones((RESID_CH, NUM_NODES, t_j), jnp.float32))
        p["ln_b"].append(jnp.zeros((RESID_CH, NUM_NODES, t_j), jnp.float32))

    p["skipE_w"] = w((SKIP_CH, RESID_CH))
    p["skipE_b"] = w((SKIP_CH,))
    p["end1_w"] = w((END_CH, SKIP_CH))
    p["end1_b"] = w((END_CH,))
    p["end2_w"] = w((OUT_DIM, END_CH))
    p["end2_b"] = w((OUT_DIM,))
    return p


if __name__ == "__main__":
    key = jax.random.PRNGKey(0)
    k_in, k_par = jax.random.split(key)
    x = jax.random.normal(k_in, (B, IN_DIM, NUM_NODES, SEQ_LEN), dtype=jnp.float32)
    params = init_params(k_par)

    fwd = jax.jit(mtgnn_forward)
    out = jax.block_until_ready(fwd(params, x))

    assert out.shape == (B, OUT_DIM, NUM_NODES, 1), out.shape
    assert bool(jnp.all(jnp.isfinite(out)))

    ref = jax.block_until_ready(jax.jit(_reference_forward)(params, x))
    err = float(jnp.max(jnp.abs(out - ref)))
    scale = float(jnp.max(jnp.abs(ref))) + 1.0
    assert err <= 0.05 * scale, ("mismatch vs reference", err, scale)

    print("KERNEL_OK")
</pallas_src>

<mosaic_0001>
module attributes {stable_mosaic.version = 11 : i64} {
  func.func @graph_adj_kernel(%arg0: i32, %arg1: memref<8x16xf32, #tpu.memory_space<vmem>>, %arg2: memref<8x16xf32, #tpu.memory_space<vmem>>, %arg3: memref<16x16xf32, #tpu.memory_space<vmem>>, %arg4: memref<1x16xf32, #tpu.memory_space<vmem>>, %arg5: memref<16x16xf32, #tpu.memory_space<vmem>>, %arg6: memref<1x16xf32, #tpu.memory_space<vmem>>, %arg7: memref<8x8xf32, #tpu.memory_space<vmem>>) attributes {dimension_semantics = [#tpu.dimension_semantics<arbitrary>], iteration_bounds = array<i64: 1>, scalar_prefetch = 0 : i64, scratch_operands = 0 : i64, tpu.core_type = #tpu.core_type<tc>, window_params = [{pipeline_mode = #tpu.pipeline_mode<synchronous>, transform_indices = @transform_0, window_bounds = array<i64: 8, 16>}, {pipeline_mode = #tpu.pipeline_mode<synchronous>, transform_indices = @transform_1, window_bounds = array<i64: 8, 16>}, {pipeline_mode = #tpu.pipeline_mode<synchronous>, transform_indices = @transform_2, window_bounds = array<i64: 16, 16>}, {pipeline_mode = #tpu.pipeline_mode<synchronous>, transform_indices = @transform_3, window_bounds = array<i64: 1, 16>}, {pipeline_mode = #tpu.pipeline_mode<synchronous>, transform_indices = @transform_4, window_bounds = array<i64: 16, 16>}, {pipeline_mode = #tpu.pipeline_mode<synchronous>, transform_indices = @transform_5, window_bounds = array<i64: 1, 16>}, {pipeline_mode = #tpu.pipeline_mode<synchronous>, transform_indices = @transform_6, window_bounds = array<i64: 8, 8>}]} {
    %c0 = arith.constant 0 : index
    %c0_0 = arith.constant 0 : index
    %0 = vector.load %arg1[%c0, %c0_0] : memref<8x16xf32, #tpu.memory_space<vmem>>, vector<8x16xf32>
    %c0_1 = arith.constant 0 : index
    %c0_2 = arith.constant 0 : index
    %1 = vector.load %arg3[%c0_1, %c0_2] : memref<16x16xf32, #tpu.memory_space<vmem>>, vector<16x16xf32>
    %cst = arith.constant dense<0.000000e+00> : vector<8x16xf32>
    %2 = tpu.matmul %0, %1, %cst {dimension_numbers = #tpu.dot_dimension_numbers<[1], [0], [0], [1], [0, 0, 1, 1], [], []>} : vector<8x16xf32>, vector<16x16xf32>, vector<8x16xf32> -> vector<8x16xf32>
    %c0_3 = arith.constant 0 : index
    %c0_4 = arith.constant 0 : index
    %3 = vector.load %arg4[%c0_3, %c0_4] : memref<1x16xf32, #tpu.memory_space<vmem>>, vector<1x16xf32>
    %4 = vector.broadcast %3 : vector<1x16xf32> to vector<8x16xf32>
    %5 = arith.addf %2, %4 : vector<8x16xf32>
    %cst_5 = arith.constant 3.000000e+00 : f32
    %6 = vector.broadcast %cst_5 : f32 to vector<8x16xf32>
    %7 = arith.mulf %6, %5 : vector<8x16xf32>
    %8 = math.tanh %7 : vector<8x16xf32>
    %c0_6 = arith.constant 0 : index
    %c0_7 = arith.constant 0 : index
    %9 = vector.load %arg2[%c0_6, %c0_7] : memref<8x16xf32, #tpu.memory_space<vmem>>, vector<8x16xf32>
    %c0_8 = arith.constant 0 : index
    %c0_9 = arith.constant 0 : index
    %10 = vector.load %arg5[%c0_8, %c0_9] : memref<16x16xf32, #tpu.memory_space<vmem>>, vector<16x16xf32>
    %cst_10 = arith.constant dense<0.000000e+00> : vector<8x16xf32>
    %11 = tpu.matmul %9, %10, %cst_10 {dimension_numbers = #tpu.dot_dimension_numbers<[1], [0], [0], [1], [0, 0, 1, 1], [], []>} : vector<8x16xf32>, vector<16x16xf32>, vector<8x16xf32> -> vector<8x16xf32>
    %c0_11 = arith.constant 0 : index
    %c0_12 = arith.constant 0 : index
    %12 = vector.load %arg6[%c0_11, %c0_12] : memref<1x16xf32, #tpu.memory_space<vmem>>, vector<1x16xf32>
    %13 = vector.broadcast %12 : vector<1x16xf32> to vector<8x16xf32>
    %14 = arith.addf %11, %13 : vector<8x16xf32>
    %cst_13 = arith.constant 3.000000e+00 : f32
    %15 = vector.broadcast %cst_13 : f32 to vector<8x16xf32>
    %16 = arith.mulf %15, %14 : vector<8x16xf32>
    %17 = math.tanh %16 : vector<8x16xf32>
    %18 = tpu.transpose %17, [1, 0] : vector<8x16xf32> -> vector<16x8xf32>
    %cst_14 = arith.constant dense<0.000000e+00> : vector<8x8xf32>
    %19 = tpu.matmul %8, %18, %cst_14 {dimension_numbers = #tpu.dot_dimension_numbers<[1], [0], [0], [1], [0, 0, 1, 1], [], []>} : vector<8x16xf32>, vector<16x8xf32>, vector<8x8xf32> -> vector<8x8xf32>
    %20 = tpu.transpose %8, [1, 0] : vector<8x16xf32> -> vector<16x8xf32>
    %cst_15 = arith.constant dense<0.000000e+00> : vector<8x8xf32>
    %21 = tpu.matmul %17, %20, %cst_15 {dimension_numbers = #tpu.dot_dimension_numbers<[1], [0], [0], [1], [0, 0, 1, 1], [], []>} : vector<8x16xf32>, vector<16x8xf32>, vector<8x8xf32> -> vector<8x8xf32>
    %22 = arith.subf %19, %21 : vector<8x8xf32>
    %cst_16 = arith.constant 3.000000e+00 : f32
    %23 = vector.broadcast %cst_16 : f32 to vector<8x8xf32>
    %24 = arith.mulf %23, %22 : vector<8x8xf32>
    %25 = math.tanh %24 : vector<8x8xf32>
    %cst_17 = arith.constant 0.000000e+00 : f32
    %26 = vector.broadcast %cst_17 : f32 to vector<8x8xf32>
    %27 = arith.maximumf %25, %26 : vector<8x8xf32>
    %c0_18 = arith.constant 0 : index
    %c0_19 = arith.constant 0 : index
    %28 = vector.load %arg7[%c0_18, %c0_19] : memref<8x8xf32, #tpu.memory_space<vmem>>, vector<8x8xf32>
    tpu.vector_store %arg7[%c0_18, %c0_19], %27 {strides = array<i32>} : memref<8x8xf32, #tpu.memory_space<vmem>>, vector<8x8xf32>,
    return
  }
  func.func @transform_0(%arg0: i32) -> (i32, i32) {
    %c0_i32 = arith.constant 0 : i32
    %c0_i32_0 = arith.constant 0 : i32
    %c0_i32_1 = arith.constant 0 : i32
    return %c0_i32, %c0_i32_0 : i32, i32
  }
  func.func @transform_1(%arg0: i32) -> (i32, i32) {
    %c0_i32 = arith.constant 0 : i32
    %c0_i32_0 = arith.constant 0 : i32
    %c0_i32_1 = arith.constant 0 : i32
    return %c0_i32, %c0_i32_0 : i32, i32
  }
  func.func @transform_2(%arg0: i32) -> (i32, i32) {
    %c0_i32 = arith.constant 0 : i32
    %c0_i32_0 = arith.constant 0 : i32
    %c0_i32_1 = arith.constant 0 : i32
    return %c0_i32, %c0_i32_0 : i32, i32
  }
  func.func @transform_3(%arg0: i32) -> (i32, i32) {
    %c0_i32 = arith.constant 0 : i32
    %c0_i32_0 = arith.constant 0 : i32
    %c0_i32_1 = arith.constant 0 : i32
    return %c0_i32, %c0_i32_0 : i32, i32
  }
  func.func @transform_4(%arg0: i32) -> (i32, i32) {
    %c0_i32 = arith.constant 0 : i32
    %c0_i32_0 = arith.constant 0 : i32
    %c0_i32_1 = arith.constant 0 : i32
    return %c0_i32, %c0_i32_0 : i32, i32
  }
  func.func @transform_5(%arg0: i32) -> (i32, i32) {
    %c0_i32 = arith.constant 0 : i32
    %c0_i32_0 = arith.constant 0 : i32
    %c0_i32_1 = arith.constant 0 : i32
    return %c0_i32, %c0_i32_0 : i32, i32
  }
  func.func @transform_6(%arg0: i32) -> (i32, i32) {
    %c0_i32 = arith.constant 0 : i32
    %c0_i32_0 = arith.constant 0 : i32
    %c0_i32_1 = arith.constant 0 : i32
    return %c0_i32, %c0_i32_0 : i32, i32
  }
}

module attributes {stable_mosaic.version = 11 : i64} {
  func.func @mtgnn_main_kernel(%arg0: i32, %arg1: memref<1x19x16xf32, #tpu.memory_space<vmem>>, %arg2: memref<1x1x304xf32, #tpu.memory_space<vmem>>, %arg3: memref<16x128xf32, #tpu.memory_space<vmem>>, %arg4: memref<1x128xf32, #tpu.memory_space<vmem>>, %arg5: memref<304x256xf32, #tpu.memory_space<vmem>>, %arg6: memref<1x256xf32, #tpu.memory_space<vmem>>, %arg7: memref<128x128xf32, #tpu.memory_space<vmem>>, %arg8: memref<128x128xf32, #tpu.memory_space<vmem>>, %arg9: memref<896x256xf32, #tpu.memory_space<vmem>>, %arg10: memref<1x256xf32, #tpu.memory_space<vmem>>, %arg11: memref<1664x256xf32, #tpu.memory_space<vmem>>, %arg12: memref<1x256xf32, #tpu.memory_space<vmem>>, %arg13: memref<384x128xf32, #tpu.memory_space<vmem>>, %arg14: memref<1x128xf32, #tpu.memory_space<vmem>>, %arg15: memref<384x128xf32, #tpu.memory_space<vmem>>, %arg16: memref<1x128xf32, #tpu.memory_space<vmem>>, %arg17: memref<13x128xf32, #tpu.memory_space<vmem>>, %arg18: memref<13x128xf32, #tpu.memory_space<vmem>>, %arg19: memref<896x256xf32, #tpu.memory_space<vmem>>, %arg20: memref<1x256xf32, #tpu.memory_space<vmem>>, %arg21: memref<896x256xf32, #tpu.memory_space<vmem>>, %arg22: memref<1x256xf32, #tpu.memory_space<vmem>>, %arg23: memref<384x128xf32, #tpu.memory_space<vmem>>, %arg24: memref<1x128xf32, #tpu.memory_space<vmem>>, %arg25: memref<384x128xf32, #tpu.memory_space<vmem>>, %arg26: memref<1x128xf32, #tpu.memory_space<vmem>>, %arg27: memref<7x128xf32, #tpu.memory_space<vmem>>, %arg28: memref<7x128xf32, #tpu.memory_space<vmem>>, %arg29: memref<896x256xf32, #tpu.memory_space<vmem>>, %arg30: memref<1x256xf32, #tpu.memory_space<vmem>>, %arg31: memref<128x256xf32, #tpu.memory_space<vmem>>, %arg32: memref<1x256xf32, #tpu.memory_space<vmem>>, %arg33: memref<384x128xf32, #tpu.memory_space<vmem>>, %arg34: memref<1x128xf32, #tpu.memory_space<vmem>>, %arg35: memref<384x128xf32, #tpu.memory_space<vmem>>, %arg36: memref<1x128xf32, #tpu.memory_space<vmem>>, %arg37: memref<1x128xf32, #tpu.memory_space<vmem>>, %arg38: memref<1x128xf32, #tpu.memory_space<vmem>>, %arg39: memref<128x256xf32, #tpu.memory_space<vmem>>, %arg40: memref<1x256xf32, #tpu.memory_space<vmem>>, %arg41: memref<256x256xf32, #tpu.memory_space<vmem>>, %arg42: memref<1x256xf32, #tpu.memory_space<vmem>>, %arg43: memref<256x96xf32, #tpu.memory_space<vmem>>, %arg44: memref<1x96xf32, #tpu.memory_space<vmem>>, %arg45: memref<1x1x96xf32, #tpu.memory_space<vmem>>) attributes {dimension_semantics = [#tpu.dimension_semantics<parallel>], iteration_bounds = array<i64: 2>, scalar_prefetch = 0 : i64, scratch_operands = 0 : i64, tpu.core_type = #tpu.core_type<tc>, window_params = [{transform_indices = @transform_0, window_bounds = array<i64: 1, 19, 16>}, {transform_indices = @transform_1, window_bounds = array<i64: 1, 1, 304>}, {pipeline_mode = #tpu.pipeline_mode<synchronous>, transform_indices = @transform_2, window_bounds = array<i64: 16, 128>}, {pipeline_mode = #tpu.pipeline_mode<synchronous>, transform_indices = @transform_3, window_bounds = array<i64: 1, 128>}, {pipeline_mode = #tpu.pipeline_mode<synchronous>, transform_indices = @transform_4, window_bounds = array<i64: 304, 256>}, {pipeline_mode = #tpu.pipeline_mode<synchronous>, transform_indices = @transform_5, window_bounds = array<i64: 1, 256>}, {pipeline_mode = #tpu.pipeline_mode<synchronous>, transform_indices = @transform_6, window_bounds = array<i64: 128, 128>}, {pipeline_mode = #tpu.pipeline_mode<synchronous>, transform_indices = @transform_7, window_bounds = array<i64: 128, 128>}, {pipeline_mode = #tpu.pipeline_mode<synchronous>, transform_indices = @transform_8, window_bounds = array<i64: 896, 256>}, {pipeline_mode = #tpu.pipeline_mode<synchronous>, transform_indices = @transform_9, window_bounds = array<i64: 1, 256>}, {pipeline_mode = #tpu.pipeline_mode<synchronous>, transform_indices = @transform_10, window_bounds = array<i64: 1664, 256>}, {pipeline_mode = #tpu.pipeline_mode<synchronous>, transform_indices = @transform_11, window_bounds = array<i64: 1, 256>}, {pipeline_mode = #tpu.pipeline_mode<synchronous>, transform_indices = @transform_12, window_bounds = array<i64: 384, 128>}, {pipeline_mode = #tpu.pipeline_mode<synchronous>, transform_indices = @transform_13, window_bounds = array<i64: 1, 128>}, {pipeline_mode = #tpu.pipeline_mode<synchronous>, transform_indices = @transform_14, window_bounds = array<i64: 384, 128>}, {pipeline_mode = #tpu.pipeline_mode<synchronous>, transform_indices = @transform_15, window_bounds = array<i64: 1, 128>}, {pipeline_mode = #tpu.pipeline_mode<synchronous>, transform_indices = @transform_16, window_bounds = array<i64: 13, 128>}, {pipeline_mode = #tpu.pipeline_mode<synchronous>, transform_indices = @transform_17, window_bounds = array<i64: 13, 128>}, {pipeline_mode = #tpu.pipeline_mode<synchronous>, transform_indices = @transform_18, window_bounds = array<i64: 896, 256>}, {pipeline_mode = #tpu.pipeline_mode<synchronous>, transform_indices = @transform_19, window_bounds = array<i64: 1, 256>}, {pipeline_mode = #tpu.pipeline_mode<synchronous>, transform_indices = @transform_20, window_bounds = array<i64: 896, 256>}, {pipeline_mode = #tpu.pipeline_mode<synchronous>, transform_indices = @transform_21, window_bounds = array<i64: 1, 256>}, {pipeline_mode = #tpu.pipeline_mode<synchronous>, transform_indices = @transform_22, window_bounds = array<i64: 384, 128>}, {pipeline_mode = #tpu.pipeline_mode<synchronous>, transform_indices = @transform_23, window_bounds = array<i64: 1, 128>}, {pipeline_mode = #tpu.pipeline_mode<synchronous>, transform_indices = @transform_24, window_bounds = array<i64: 384, 128>}, {pipeline_mode = #tpu.pipeline_mode<synchronous>, transform_indices = @transform_25, window_bounds = array<i64: 1, 128>}, {pipeline_mode = #tpu.pipeline_mode<synchronous>, transform_indices = @transform_26, window_bounds = array<i64: 7, 128>}, {pipeline_mode = #tpu.pipeline_mode<synchronous>, transform_indices = @transform_27, window_bounds = array<i64: 7, 128>}, {pipeline_mode = #tpu.pipeline_mode<synchronous>, transform_indices = @transform_28, window_bounds = array<i64: 896, 256>}, {pipeline_mode = #tpu.pipeline_mode<synchronous>, transform_indices = @transform_29, window_bounds = array<i64: 1, 256>}, {pipeline_mode = #tpu.pipeline_mode<synchronous>, transform_indices = @transform_30, window_bounds = array<i64: 128, 256>}, {pipeline_mode = #tpu.pipeline_mode<synchronous>, transform_indices = @transform_31, window_bounds = array<i64: 1, 256>}, {pipeline_mode = #tpu.pipeline_mode<synchronous>, transform_indices = @transform_32, window_bounds = array<i64: 384, 128>}, {pipeline_mode = #tpu.pipeline_mode<synchronous>, transform_indices = @transform_33, window_bounds = array<i64: 1, 128>}, {pipeline_mode = #tpu.pipeline_mode<synchronous>, transform_indices = @transform_34, window_bounds = array<i64: 384, 128>}, {pipeline_mode = #tpu.pipeline_mode<synchronous>, transform_indices = @transform_35, window_bounds = array<i64: 1, 128>}, {pipeline_mode = #tpu.pipeline_mode<synchronous>, transform_indices = @transform_36, window_bounds = array<i64: 1, 128>}, {pipeline_mode = #tpu.pipeline_mode<synchronous>, transform_indices = @transform_37, window_bounds = array<i64: 1, 128>}, {pipeline_mode = #tpu.pipeline_mode<synchronous>, transform_indices = @transform_38, window_bounds = array<i64: 128, 256>}, {pipeline_mode = #tpu.pipeline_mode<synchronous>, transform_indices = @transform_39, window_bounds = array<i64: 1, 256>}, {pipeline_mode = #tpu.pipeline_mode<synchronous>, transform_indices = @transform_40, window_bounds = array<i64: 256, 256>}, {pipeline_mode = #tpu.pipeline_mode<synchronous>, transform_indices = @transform_41, window_bounds = array<i64: 1, 256>}, {pipeline_mode = #tpu.pipeline_mode<synchronous>, transform_indices = @transform_42, window_bounds = array<i64: 256, 96>}, {pipeline_mode = #tpu.pipeline_mode<synchronous>, transform_indices = @transform_43, window_bounds = array<i64: 1, 96>}, {transform_indices = @transform_44, window_bounds = array<i64: 1, 1, 96>}]} {
    %c0 = arith.constant 0 : index
    %c0_0 = arith.constant 0 : index
    %c0_1 = arith.constant 0 : index
    %0 = vector.load %arg1[%c0, %c0_0, %c0_1] : memref<1x19x16xf32, #tpu.memory_space<vmem>>, vector<1x19x16xf32>
    %1 = vector.shape_cast %0 : vector<1x19x16xf32> to vector<19x16xf32>
    %c0_2 = arith.constant 0 : index
    %c0_3 = arith.constant 0 : index
    %2 = vector.load %arg7[%c0_2, %c0_3] : memref<128x128xf32, #tpu.memory_space<vmem>>, vector<128x128xf32>
    %c0_4 = arith.constant 0 : index
    %c0_5 = arith.constant 0 : index
    %3 = vector.load %arg8[%c0_4, %c0_5] : memref<128x128xf32, #tpu.memory_space<vmem>>, vector<128x128xf32>
    %c0_6 = arith.constant 0 : index
    %c0_7 = arith.constant 0 : index
    %4 = vector.load %arg3[%c0_6, %c0_7] : memref<16x128xf32, #tpu.memory_space<vmem>>, vector<16x128xf32>
    %cst = arith.constant dense<0.000000e+00> : vector<19x128xf32>
    %5 = tpu.matmul %1, %4, %cst {dimension_numbers = #tpu.dot_dimension_numbers<[1], [0], [0], [1], [0, 0, 1, 1], [], []>} : vector<19x16xf32>, vector<16x128xf32>, vector<19x128xf32> -> vector<19x128xf32>
    %c0_8 = arith.constant 0 : index
    %c0_9 = arith.constant 0 : index
    %6 = vector.load %arg4[%c0_8, %c0_9] : memref<1x128xf32, #tpu.memory_space<vmem>>, vector<1x128xf32>
    %7 = vector.broadcast %6 : vector<1x128xf32> to vector<19x128xf32>
    %8 = arith.addf %5, %7 : vector<19x128xf32>
    %c0_10 = arith.constant 0 : index
    %c0_11 = arith.constant 0 : index
    %c0_12 = arith.constant 0 : index
    %9 = vector.load %arg2[%c0_10, %c0_11, %c0_12] : memref<1x1x304xf32, #tpu.memory_space<vmem>>, vector<1x1x304xf32>
    %10 = vector.shape_cast %9 : vector<1x1x304xf32> to vector<1x304xf32>
    %c0_13 = arith.constant 0 : index
    %c0_14 = arith.constant 0 : index
    %11 = vector.load %arg5[%c0_13, %c0_14] : memref<304x256xf32, #tpu.memory_space<vmem>>, vector<304x256xf32>
    %cst_15 = arith.constant dense<0.000000e+00> : vector<1x256xf32>
    %12 = tpu.matmul %10, %11, %cst_15 {dimension_numbers = #tpu.dot_dimension_numbers<[1], [0], [0], [1], [0, 0, 1, 1], [], []>} : vector<1x304xf32>, vector<304x256xf32>, vector<1x256xf32> -> vector<1x256xf32>
    %c0_16 = arith.constant 0 : index
    %c0_17 = arith.constant 0 : index
    %13 = vector.load %arg6[%c0_16, %c0_17] : memref<1x256xf32, #tpu.memory_space<vmem>>, vector<1x256xf32>
    %14 = arith.addf %12, %13 : vector<1x256xf32>
    %15 = vector.extract_strided_slice %8 {offsets = [0, 0], sizes = [13, 128], strides = [1, 1]} : vector<19x128xf32> to vector<13x128xf32>
    %16 = vector.extract_strided_slice %8 {offsets = [1, 0], sizes = [13, 128], strides = [1, 1]} : vector<19x128xf32> to vector<13x128xf32>
    %17 = vector.extract_strided_slice %8 {offsets = [2, 0], sizes = [13, 128], strides = [1, 1]} : vector<19x128xf32> to vector<13x128xf32>
    %18 = vector.extract_strided_slice %8 {offsets = [3, 0], sizes = [13, 128], strides = [1, 1]} : vector<19x128xf32> to vector<13x128xf32>
    %19 = vector.extract_strided_slice %8 {offsets = [4, 0], sizes = [13, 128], strides = [1, 1]} : vector<19x128xf32> to vector<13x128xf32>
    %20 = vector.extract_strided_slice %8 {offsets = [5, 0], sizes = [13, 128], strides = [1, 1]} : vector<19x128xf32> to vector<13x128xf32>
    %21 = vector.extract_strided_slice %8 {offsets = [6, 0], sizes = [13, 128], strides = [1, 1]} : vector<19x128xf32> to vector<13x128xf32>
    %22 = tpu.concatenate %15, %16, %17, %18, %19, %20, %21 in 1 : vector<13x128xf32>, vector<13x128xf32>, vector<13x128xf32>, vector<13x128xf32>, vector<13x128xf32>, vector<13x128xf32>, vector<13x128xf32> -> vector<13x896xf32>
    %c0_18 = arith.constant 0 : index
    %c0_19 = arith.constant 0 : index
    %23 = vector.load %arg9[%c0_18, %c0_19] : memref<896x256xf32, #tpu.memory_space<vmem>>, vector<896x256xf32>
    %cst_20 = arith.constant dense<0.000000e+00> : vector<13x256xf32>
    %24 = tpu.matmul %22, %23, %cst_20 {dimension_numbers = #tpu.dot_dimension_numbers<[1], [0], [0], [1], [0, 0, 1, 1], [], []>} : vector<13x896xf32>, vector<896x256xf32>, vector<13x256xf32> -> vector<13x256xf32>
    %c0_21 = arith.constant 0 : index
    %c0_22 = arith.constant 0 : index
    %25 = vector.load %arg10[%c0_21, %c0_22] : memref<1x256xf32, #tpu.memory_space<vmem>>, vector<1x256xf32>
    %26 = vector.broadcast %25 : vector<1x256xf32> to vector<13x256xf32>
    %27 = arith.addf %24, %26 : vector<13x256xf32>
    %28 = vector.extract_strided_slice %27 {offsets = [0, 0], sizes = [13, 128], strides = [1, 1]} : vector<13x256xf32> to vector<13x128xf32>
    %29 = math.tanh %28 : vector<13x128xf32>
    %30 = vector.extract_strided_slice %27 {offsets = [0, 128], sizes = [13, 128], strides = [1, 1]} : vector<13x256xf32> to vector<13x128xf32>
    %31 = arith.negf %30 : vector<13x128xf32>
    %32 = math.exp %31 : vector<13x128xf32>
    %cst_23 = arith.constant 1.000000e+00 : f32
    %33 = vector.broadcast %cst_23 : f32 to vector<13x128xf32>
    %34 = arith.addf %33, %32 : vector<13x128xf32>
    %35 = arith.divf %33, %34 : vector<13x128xf32>
    %36 = arith.mulf %29, %35 : vector<13x128xf32>
    %37 = vector.extract_strided_slice %36 {offsets = [0, 0], sizes = [1, 128], strides = [1, 1]} : vector<13x128xf32> to vector<1x128xf32>
    %38 = vector.extract_strided_slice %36 {offsets = [1, 0], sizes = [1, 128], strides = [1, 1]} : vector<13x128xf32> to vector<1x128xf32>
    %39 = vector.extract_strided_slice %36 {offsets = [2, 0], sizes = [1, 128], strides = [1, 1]} : vector<13x128xf32> to vector<1x128xf32>
    %40 = vector.extract_strided_slice %36 {offsets = [3, 0], sizes = [1, 128], strides = [1, 1]} : vector<13x128xf32> to vector<1x128xf32>
    %41 = vector.extract_strided_slice %36 {offsets = [4, 0], sizes = [1, 128], strides = [1, 1]} : vector<13x128xf32> to vector<1x128xf32>
    %42 = vector.extract_strided_slice %36 {offsets = [5, 0], sizes = [1, 128], strides = [1, 1]} : vector<13x128xf32> to vector<1x128xf32>
    %43 = vector.extract_strided_slice %36 {offsets = [6, 0], sizes = [1, 128], strides = [1, 1]} : vector<13x128xf32> to vector<1x128xf32>
    %44 = vector.extract_strided_slice %36 {offsets = [7, 0], sizes = [1, 128], strides = [1, 1]} : vector<13x128xf32> to vector<1x128xf32>
    %45 = vector.extract_strided_slice %36 {offsets = [8, 0], sizes = [1, 128], strides = [1, 1]} : vector<13x128xf32> to vector<1x128xf32>
    %46 = vector.extract_strided_slice %36 {offsets = [9, 0], sizes = [1, 128], strides = [1, 1]} : vector<13x128xf32> to vector<1x128xf32>
    %47 = vector.extract_strided_slice %36 {offsets = [10, 0], sizes = [1, 128], strides = [1, 1]} : vector<13x128xf32> to vector<1x128xf32>
    %48 = vector.extract_strided_slice %36 {offsets = [11, 0], sizes = [1, 128], strides = [1, 1]} : vector<13x128xf32> to vector<1x128xf32>
    %49 = vector.extract_strided_slice %36 {offsets = [12, 0], sizes = [1, 128], strides = [1, 1]} : vector<13x128xf32> to vector<1x128xf32>
    %50 = tpu.concatenate %37, %38, %39, %40, %41, %42, %43, %44, %45, %46, %47, %48, %49 in 1 : vector<1x128xf32>, vector<1x128xf32>, vector<1x128xf32>, vector<1x128xf32>, vector<1x128xf32>, vector<1x128xf32>, vector<1x128xf32>, vector<1x128xf32>, vector<1x128xf32>, vector<1x128xf32>, vector<1x128xf32>, vector<1x128xf32>, vector<1x128xf32> -> vector<1x1664xf32>
    %c0_24 = arith.constant 0 : index
    %c0_25 = arith.constant 0 : index
    %51 = vector.load %arg11[%c0_24, %c0_25] : memref<1664x256xf32, #tpu.memory_space<vmem>>, vector<1664x256xf32>
    %cst_26 = arith.constant dense<0.000000e+00> : vector<1x256xf32>
    %52 = tpu.matmul %50, %51, %cst_26 {dimension_numbers = #tpu.dot_dimension_numbers<[1], [0], [0], [1], [0, 0, 1, 1], [], []>} : vector<1x1664xf32>, vector<1664x256xf32>, vector<1x256xf32> -> vector<1x256xf32>
    %53 = arith.addf %14, %52 : vector<1x256xf32>
    %c0_27 = arith.constant 0 : index
    %c0_28 = arith.constant 0 : index
    %54 = vector.load %arg12[%c0_27, %c0_28] : memref<1x256xf32, #tpu.memory_space<vmem>>, vector<1x256xf32>
    %55 = arith.addf %53, %54 : vector<1x256xf32>
    %cst_29 = arith.constant 5.000000e-02 : f32
    %56 = vector.broadcast %cst_29 : f32 to vector<13x128xf32>
    %57 = arith.mulf %56, %36 : vector<13x128xf32>
    %cst_30 = arith.constant dense<0.000000e+00> : vector<13x128xf32>
    %58 = tpu.matmul %36, %2, %cst_30 {dimension_numbers = #tpu.dot_dimension_numbers<[1], [0], [0], [1], [0, 0, 1, 1], [], []>} : vector<13x128xf32>, vector<128x128xf32>, vector<13x128xf32> -> vector<13x128xf32>
    %cst_31 = arith.constant 0.949999988 : f32
    %59 = vector.broadcast %cst_31 : f32 to vector<13x128xf32>
    %60 = arith.mulf %59, %58 : vector<13x128xf32>
    %61 = arith.addf %57, %60 : vector<13x128xf32>
    %cst_32 = arith.constant 5.000000e-02 : f32
    %62 = vector.broadcast %cst_32 : f32 to vector<13x128xf32>
    %63 = arith.mulf %62, %36 : vector<13x128xf32>
    %cst_33 = arith.constant dense<0.000000e+00> : vector<13x128xf32>
    %64 = tpu.matmul %61, %2, %cst_33 {dimension_numbers = #tpu.dot_dimension_numbers<[1], [0], [0], [1], [0, 0, 1, 1], [], []>} : vector<13x128xf32>, vector<128x128xf32>, vector<13x128xf32> -> vector<13x128xf32>
    %cst_34 = arith.constant 0.949999988 : f32
    %65 = vector.broadcast %cst_34 : f32 to vector<13x128xf32>
    %66 = arith.mulf %65, %64 : vector<13x128xf32>
    %67 = arith.addf %63, %66 : vector<13x128xf32>
    %68 = tpu.concatenate %36, %61, %67 in 1 : vector<13x128xf32>, vector<13x128xf32>, vector<13x128xf32> -> vector<13x384xf32>
    %c0_35 = arith.constant 0 : index
    %c0_36 = arith.constant 0 : index
    %69 = vector.load %arg13[%c0_35, %c0_36] : memref<384x128xf32, #tpu.memory_space<vmem>>, vector<384x128xf32>
    %cst_37 = arith.constant dense<0.000000e+00> : vector<13x128xf32>
    %70 = tpu.matmul %68, %69, %cst_37 {dimension_numbers = #tpu.dot_dimension_numbers<[1], [0], [0], [1], [0, 0, 1, 1], [], []>} : vector<13x384xf32>, vector<384x128xf32>, vector<13x128xf32> -> vector<13x128xf32>
    %c0_38 = arith.constant 0 : index
    %c0_39 = arith.constant 0 : index
    %71 = vector.load %arg14[%c0_38, %c0_39] : memref<1x128xf32, #tpu.memory_space<vmem>>, vector<1x128xf32>
    %72 = vector.broadcast %71 : vector<1x128xf32> to vector<13x128xf32>
    %73 = arith.addf %70, %72 : vector<13x128xf32>
    %cst_40 = arith.constant 5.000000e-02 : f32
    %74 = vector.broadcast %cst_40 : f32 to vector<13x128xf32>
    %75 = arith.mulf %74, %36 : vector<13x128xf32>
    %cst_41 = arith.constant dense<0.000000e+00> : vector<13x128xf32>
    %76 = tpu.matmul %36, %3, %cst_41 {dimension_numbers = #tpu.dot_dimension_numbers<[1], [0], [0], [1], [0, 0, 1, 1], [], []>} : vector<13x128xf32>, vector<128x128xf32>, vector<13x128xf32> -> vector<13x128xf32>
    %cst_42 = arith.constant 0.949999988 : f32
    %77 = vector.broadcast %cst_42 : f32 to vector<13x128xf32>
    %78 = arith.mulf %77, %76 : vector<13x128xf32>
    %79 = arith.addf %75, %78 : vector<13x128xf32>
    %cst_43 = arith.constant 5.000000e-02 : f32
    %80 = vector.broadcast %cst_43 : f32 to vector<13x128xf32>
    %81 = arith.mulf %80, %36 : vector<13x128xf32>
    %cst_44 = arith.constant dense<0.000000e+00> : vector<13x128xf32>
    %82 = tpu.matmul %79, %3, %cst_44 {dimension_numbers = #tpu.dot_dimension_numbers<[1], [0], [0], [1], [0, 0, 1, 1], [], []>} : vector<13x128xf32>, vector<128x128xf32>, vector<13x128xf32> -> vector<13x128xf32>
    %cst_45 = arith.constant 0.949999988 : f32
    %83 = vector.broadcast %cst_45 : f32 to vector<13x128xf32>
    %84 = arith.mulf %83, %82 : vector<13x128xf32>
    %85 = arith.addf %81, %84 : vector<13x128xf32>
    %86 = tpu.concatenate %36, %79, %85 in 1 : vector<13x128xf32>, vector<13x128xf32>, vector<13x128xf32> -> vector<13x384xf32>
    %c0_46 = arith.constant 0 : index
    %c0_47 = arith.constant 0 : index
    %87 = vector.load %arg15[%c0_46, %c0_47] : memref<384x128xf32, #tpu.memory_space<vmem>>, vector<384x128xf32>
    %cst_48 = arith.constant dense<0.000000e+00> : vector<13x128xf32>
    %88 = tpu.matmul %86, %87, %cst_48 {dimension_numbers = #tpu.dot_dimension_numbers<[1], [0], [0], [1], [0, 0, 1, 1], [], []>} : vector<13x384xf32>, vector<384x128xf32>, vector<13x128xf32> -> vector<13x128xf32>
    %c0_49 = arith.constant 0 : index
    %c0_50 = arith.constant 0 : index
    %89 = vector.load %arg16[%c0_49, %c0_50] : memref<1x128xf32, #tpu.memory_space<vmem>>, vector<1x128xf32>
    %90 = vector.broadcast %89 : vector<1x128xf32> to vector<13x128xf32>
    %91 = arith.addf %88, %90 : vector<13x128xf32>
    %92 = arith.addf %73, %91 : vector<13x128xf32>
    %93 = vector.extract_strided_slice %8 {offsets = [6, 0], sizes = [13, 128], strides = [1, 1]} : vector<19x128xf32> to vector<13x128xf32>
    %94 = arith.addf %92, %93 : vector<13x128xf32>
    %cst_51 = arith.constant dense<0.000000e+00> : vector<13xf32>
    %95 = vector.multi_reduction <add>, %94, %cst_51 [1] : vector<13x128xf32> to vector<13xf32>
    %96 = vector.shape_cast %95 : vector<13xf32> to vector<13x1xf32>
    %cst_52 = arith.constant dense<0.000000e+00> : vector<1xf32>
    %97 = vector.multi_reduction <add>, %96, %cst_52 [0] : vector<13x1xf32> to vector<1xf32>
    %98 = vector.shape_cast %97 : vector<1xf32> to vector<1x1xf32>
    %cst_53 = arith.constant 1.664000e+03 : f32
    %99 = vector.broadcast %cst_53 : f32 to vector<1x1xf32>
    %100 = arith.divf %98, %99 : vector<1x1xf32>
    %101 = vector.broadcast %100 : vector<1x1xf32> to vector<13x128xf32>
    %102 = arith.subf %94, %101 : vector<13x128xf32>
    %103 = arith.mulf %102, %102 : vector<13x128xf32>
    %cst_54 = arith.constant dense<0.000000e+00> : vector<13xf32>
    %104 = vector.multi_reduction <add>, %103, %cst_54 [1] : vector<13x128xf32> to vector<13xf32>
    %105 = vector.shape_cast %104 : vector<13xf32> to vector<13x1xf32>
    %cst_55 = arith.constant dense<0.000000e+00> : vector<1xf32>
    %106 = vector.multi_reduction <add>, %105, %cst_55 [0] : vector<13x1xf32> to vector<1xf32>
    %107 = vector.shape_cast %106 : vector<1xf32> to vector<1x1xf32>
    %cst_56 = arith.constant 1.664000e+03 : f32
    %108 = vector.broadcast %cst_56 : f32 to vector<1x1xf32>
    %109 = arith.divf %107, %108 : vector<1x1xf32>
    %cst_57 = arith.constant 9.99999974E-6 : f32
    %110 = vector.broadcast %cst_57 : f32 to vector<1x1xf32>
    %111 = arith.addf %109, %110 : vector<1x1xf32>
    %112 = math.rsqrt %111 : vector<1x1xf32>
    %113 = vector.broadcast %112 : vector<1x1xf32> to vector<13x128xf32>
    %114 = arith.mulf %102, %113 : vector<13x128xf32>
    %c0_58 = arith.constant 0 : index
    %c0_59 = arith.constant 0 : index
    %115 = vector.load %arg17[%c0_58, %c0_59] : memref<13x128xf32, #tpu.memory_space<vmem>>, vector<13x128xf32>
    %116 = arith.mulf %114, %115 : vector<13x128xf32>
    %c0_60 = arith.constant 0 : index
    %c0_61 = arith.constant 0 : index
    %117 = vector.load %arg18[%c0_60, %c0_61] : memref<13x128xf32, #tpu.memory_space<vmem>>, vector<13x128xf32>
    %118 = arith.addf %116, %117 : vector<13x128xf32>
    %119 = vector.extract_strided_slice %118 {offsets = [0, 0], sizes = [7, 128], strides = [1, 1]} : vector<13x128xf32> to vector<7x128xf32>
    %120 = vector.extract_strided_slice %118 {offsets = [1, 0], sizes = [7, 128], strides = [1, 1]} : vector<13x128xf32> to vector<7x128xf32>
    %121 = vector.extract_strided_slice %118 {offsets = [2, 0], sizes = [7, 128], strides = [1, 1]} : vector<13x128xf32> to vector<7x128xf32>
    %122 = vector.extract_strided_slice %118 {offsets = [3, 0], sizes = [7, 128], strides = [1, 1]} : vector<13x128xf32> to vector<7x128xf32>
    %123 = vector.extract_strided_slice %118 {offsets = [4, 0], sizes = [7, 128], strides = [1, 1]} : vector<13x128xf32> to vector<7x128xf32>
    %124 = vector.extract_strided_slice %118 {offsets = [5, 0], sizes = [7, 128], strides = [1, 1]} : vector<13x128xf32> to vector<7x128xf32>
    %125 = vector.extract_strided_slice %118 {offsets = [6, 0], sizes = [7, 128], strides = [1, 1]} : vector<13x128xf32> to vector<7x128xf32>
    %126 = tpu.concatenate %119, %120, %121, %122, %123, %124, %125 in 1 : vector<7x128xf32>, vector<7x128xf32>, vector<7x128xf32>, vector<7x128xf32>, vector<7x128xf32>, vector<7x128xf32>, vector<7x128xf32> -> vector<7x896xf32>
    %c0_62 = arith.constant 0 : index
    %c0_63 = arith.constant 0 : index
    %127 = vector.load %arg19[%c0_62, %c0_63] : memref<896x256xf32, #tpu.memory_space<vmem>>, vector<896x256xf32>
    %cst_64 = arith.constant dense<0.000000e+00> : vector<7x256xf32>
    %128 = tpu.matmul %126, %127, %cst_64 {dimension_numbers = #tpu.dot_dimension_numbers<[1], [0], [0], [1], [0, 0, 1, 1], [], []>} : vector<7x896xf32>, vector<896x256xf32>, vector<7x256xf32> -> vector<7x256xf32>
    %c0_65 = arith.constant 0 : index
    %c0_66 = arith.constant 0 : index
    %129 = vector.load %arg20[%c0_65, %c0_66] : memref<1x256xf32, #tpu.memory_space<vmem>>, vector<1x256xf32>
    %130 = vector.broadcast %129 : vector<1x256xf32> to vector<7x256xf32>
    %131 = arith.addf %128, %130 : vector<7x256xf32>
    %132 = vector.extract_strided_slice %131 {offsets = [0, 0], sizes = [7, 128], strides = [1, 1]} : vector<7x256xf32> to vector<7x128xf32>
    %133 = math.tanh %132 : vector<7x128xf32>
    %134 = vector.extract_strided_slice %131 {offsets = [0, 128], sizes = [7, 128], strides = [1, 1]} : vector<7x256xf32> to vector<7x128xf32>
    %135 = arith.negf %134 : vector<7x128xf32>
    %136 = math.exp %135 : vector<7x128xf32>
    %cst_67 = arith.constant 1.000000e+00 : f32
    %137 = vector.broadcast %cst_67 : f32 to vector<7x128xf32>
    %138 = arith.addf %137, %136 : vector<7x128xf32>
    %139 = arith.divf %137, %138 : vector<7x128xf32>
    %140 = arith.mulf %133, %139 : vector<7x128xf32>
    %141 = vector.extract_strided_slice %140 {offsets = [0, 0], sizes = [1, 128], strides = [1, 1]} : vector<7x128xf32> to vector<1x128xf32>
    %142 = vector.extract_strided_slice %140 {offsets = [1, 0], sizes = [1, 128], strides = [1, 1]} : vector<7x128xf32> to vector<1x128xf32>
    %143 = vector.extract_strided_slice %140 {offsets = [2, 0], sizes = [1, 128], strides = [1, 1]} : vector<7x128xf32> to vector<1x128xf32>
    %144 = vector.extract_strided_slice %140 {offsets = [3, 0], sizes = [1, 128], strides = [1, 1]} : vector<7x128xf32> to vector<1x128xf32>
    %145 = vector.extract_strided_slice %140 {offsets = [4, 0], sizes = [1, 128], strides = [1, 1]} : vector<7x128xf32> to vector<1x128xf32>
    %146 = vector.extract_strided_slice %140 {offsets = [5, 0], sizes = [1, 128], strides = [1, 1]} : vector<7x128xf32> to vector<1x128xf32>
    %147 = vector.extract_strided_slice %140 {offsets = [6, 0], sizes = [1, 128], strides = [1, 1]} : vector<7x128xf32> to vector<1x128xf32>
    %148 = tpu.concatenate %141, %142, %143, %144, %145, %146, %147 in 1 : vector<1x128xf32>, vector<1x128xf32>, vector<1x128xf32>, vector<1x128xf32>, vector<1x128xf32>, vector<1x128xf32>, vector<1x128xf32> -> vector<1x896xf32>
    %c0_68 = arith.constant 0 : index
    %c0_69 = arith.constant 0 : index
    %149 = vector.load %arg21[%c0_68, %c0_69] : memref<896x256xf32, #tpu.memory_space<vmem>>, vector<896x256xf32>
    %cst_70 = arith.constant dense<0.000000e+00> : vector<1x256xf32>
    %150 = tpu.matmul %148, %149, %cst_70 {dimension_numbers = #tpu.dot_dimension_numbers<[1], [0], [0], [1], [0, 0, 1, 1], [], []>} : vector<1x896xf32>, vector<896x256xf32>, vector<1x256xf32> -> vector<1x256xf32>
    %151 = arith.addf %55, %150 : vector<1x256xf32>
    %c0_71 = arith.constant 0 : index
    %c0_72 = arith.constant 0 : index
    %152 = vector.load %arg22[%c0_71, %c0_72] : memref<1x256xf32, #tpu.memory_space<vmem>>, vector<1x256xf32>
    %153 = arith.addf %151, %152 : vector<1x256xf32>
    %cst_73 = arith.constant 5.000000e-02 : f32
    %154 = vector.broadcast %cst_73 : f32 to vector<7x128xf32>
    %155 = arith.mulf %154, %140 : vector<7x128xf32>
    %cst_74 = arith.constant dense<0.000000e+00> : vector<7x128xf32>
    %156 = tpu.matmul %140, %2, %cst_74 {dimension_numbers = #tpu.dot_dimension_numbers<[1], [0], [0], [1], [0, 0, 1, 1], [], []>} : vector<7x128xf32>, vector<128x128xf32>, vector<7x128xf32> -> vector<7x128xf32>
    %cst_75 = arith.constant 0.949999988 : f32
    %157 = vector.broadcast %cst_75 : f32 to vector<7x128xf32>
    %158 = arith.mulf %157, %156 : vector<7x128xf32>
    %159 = arith.addf %155, %158 : vector<7x128xf32>
    %cst_76 = arith.constant 5.000000e-02 : f32
    %160 = vector.broadcast %cst_76 : f32 to vector<7x128xf32>
    %161 = arith.mulf %160, %140 : vector<7x128xf32>
    %cst_77 = arith.constant dense<0.000000e+00> : vector<7x128xf32>
    %162 = tpu.matmul %159, %2, %cst_77 {dimension_numbers = #tpu.dot_dimension_numbers<[1], [0], [0], [1], [0, 0, 1, 1], [], []>} : vector<7x128xf32>, vector<128x128xf32>, vector<7x128xf32> -> vector<7x128xf32>
    %cst_78 = arith.constant 0.949999988 : f32
    %163 = vector.broadcast %cst_78 : f32 to vector<7x128xf32>
    %164 = arith.mulf %163, %162 : vector<7x128xf32>
    %165 = arith.addf %161, %164 : vector<7x128xf32>
    %166 = tpu.concatenate %140, %159, %165 in 1 : vector<7x128xf32>, vector<7x128xf32>, vector<7x128xf32> -> vector<7x384xf32>
    %c0_79 = arith.constant 0 : index
    %c0_80 = arith.constant 0 : index
    %167 = vector.load %arg23[%c0_79, %c0_80] : memref<384x128xf32, #tpu.memory_space<vmem>>, vector<384x128xf32>
    %cst_81 = arith.constant dense<0.000000e+00> : vector<7x128xf32>
    %168 = tpu.matmul %166, %167, %cst_81 {dimension_numbers = #tpu.dot_dimension_numbers<[1], [0], [0], [1], [0, 0, 1, 1], [], []>} : vector<7x384xf32>, vector<384x128xf32>, vector<7x128xf32> -> vector<7x128xf32>
    %c0_82 = arith.constant 0 : index
    %c0_83 = arith.constant 0 : index
    %169 = vector.load %arg24[%c0_82, %c0_83] : memref<1x128xf32, #tpu.memory_space<vmem>>, vector<1x128xf32>
    %170 = vector.broadcast %169 : vector<1x128xf32> to vector<7x128xf32>
    %171 = arith.addf %168, %170 : vector<7x128xf32>
    %cst_84 = arith.constant 5.000000e-02 : f32
    %172 = vector.broadcast %cst_84 : f32 to vector<7x128xf32>
    %173 = arith.mulf %172, %140 : vector<7x128xf32>
    %cst_85 = arith.constant dense<0.000000e+00> : vector<7x128xf32>
    %174 = tpu.matmul %140, %3, %cst_85 {dimension_numbers = #tpu.dot_dimension_numbers<[1], [0], [0], [1], [0, 0, 1, 1], [], []>} : vector<7x128xf32>, vector<128x128xf32>, vector<7x128xf32> -> vector<7x128xf32>
    %cst_86 = arith.constant 0.949999988 : f32
    %175 = vector.broadcast %cst_86 : f32 to vector<7x128xf32>
    %176 = arith.mulf %175, %174 : vector<7x128xf32>
    %177 = arith.addf %173, %176 : vector<7x128xf32>
    %cst_87 = arith.constant 5.000000e-02 : f32
    %178 = vector.broadcast %cst_87 : f32 to vector<7x128xf32>
    %179 = arith.mulf %178, %140 : vector<7x128xf32>
    %cst_88 = arith.constant dense<0.000000e+00> : vector<7x128xf32>
    %180 = tpu.matmul %177, %3, %cst_88 {dimension_numbers = #tpu.dot_dimension_numbers<[1], [0], [0], [1], [0, 0, 1, 1], [], []>} : vector<7x128xf32>, vector<128x128xf32>, vector<7x128xf32> -> vector<7x128xf32>
    %cst_89 = arith.constant 0.949999988 : f32
    %181 = vector.broadcast %cst_89 : f32 to vector<7x128xf32>
    %182 = arith.mulf %181, %180 : vector<7x128xf32>
    %183 = arith.addf %179, %182 : vector<7x128xf32>
    %184 = tpu.concatenate %140, %177, %183 in 1 : vector<7x128xf32>, vector<7x128xf32>, vector<7x128xf32> -> vector<7x384xf32>
    %c0_90 = arith.constant 0 : index
    %c0_91 = arith.constant 0 : index
    %185 = vector.load %arg25[%c0_90, %c0_91] : memref<384x128xf32, #tpu.memory_space<vmem>>, vector<384x128xf32>
    %cst_92 = arith.constant dense<0.000000e+00> : vector<7x128xf32>
    %186 = tpu.matmul %184, %185, %cst_92 {dimension_numbers = #tpu.dot_dimension_numbers<[1], [0], [0], [1], [0, 0, 1, 1], [], []>} : vector<7x384xf32>, vector<384x128xf32>, vector<7x128xf32> -> vector<7x128xf32>
    %c0_93 = arith.constant 0 : index
    %c0_94 = arith.constant 0 : index
    %187 = vector.load %arg26[%c0_93, %c0_94] : memref<1x128xf32, #tpu.memory_space<vmem>>, vector<1x128xf32>
    %188 = vector.broadcast %187 : vector<1x128xf32> to vector<7x128xf32>
    %189 = arith.addf %186, %188 : vector<7x128xf32>
    %190 = arith.addf %171, %189 : vector<7x128xf32>
    %191 = vector.extract_strided_slice %118 {offsets = [6, 0], sizes = [7, 128], strides = [1, 1]} : vector<13x128xf32> to vector<7x128xf32>
    %192 = arith.addf %190, %191 : vector<7x128xf32>
    %cst_95 = arith.constant dense<0.000000e+00> : vector<7xf32>
    %193 = vector.multi_reduction <add>, %192, %cst_95 [1] : vector<7x128xf32> to vector<7xf32>
    %194 = vector.shape_cast %193 : vector<7xf32> to vector<7x1xf32>
    %cst_96 = arith.constant dense<0.000000e+00> : vector<1xf32>
    %195 = vector.multi_reduction <add>, %194, %cst_96 [0] : vector<7x1xf32> to vector<1xf32>
    %196 = vector.shape_cast %195 : vector<1xf32> to vector<1x1xf32>
    %cst_97 = arith.constant 8.960000e+02 : f32
    %197 = vector.broadcast %cst_97 : f32 to vector<1x1xf32>
    %198 = arith.divf %196, %197 : vector<1x1xf32>
    %199 = vector.broadcast %198 : vector<1x1xf32> to vector<7x128xf32>
    %200 = arith.subf %192, %199 : vector<7x128xf32>
    %201 = arith.mulf %200, %200 : vector<7x128xf32>
    %cst_98 = arith.constant dense<0.000000e+00> : vector<7xf32>
    %202 = vector.multi_reduction <add>, %201, %cst_98 [1] : vector<7x128xf32> to vector<7xf32>
    %203 = vector.shape_cast %202 : vector<7xf32> to vector<7x1xf32>
    %cst_99 = arith.constant dense<0.000000e+00> : vector<1xf32>
    %204 = vector.multi_reduction <add>, %203, %cst_99 [0] : vector<7x1xf32> to vector<1xf32>
    %205 = vector.shape_cast %204 : vector<1xf32> to vector<1x1xf32>
    %cst_100 = arith.constant 8.960000e+02 : f32
    %206 = vector.broadcast %cst_100 : f32 to vector<1x1xf32>
    %207 = arith.divf %205, %206 : vector<1x1xf32>
    %cst_101 = arith.constant 9.99999974E-6 : f32
    %208 = vector.broadcast %cst_101 : f32 to vector<1x1xf32>
    %209 = arith.addf %207, %208 : vector<1x1xf32>
    %210 = math.rsqrt %209 : vector<1x1xf32>
    %211 = vector.broadcast %210 : vector<1x1xf32> to vector<7x128xf32>
    %212 = arith.mulf %200, %211 : vector<7x128xf32>
    %c0_102 = arith.constant 0 : index
    %c0_103 = arith.constant 0 : index
    %213 = vector.load %arg27[%c0_102, %c0_103] : memref<7x128xf32, #tpu.memory_space<vmem>>, vector<7x128xf32>
    %214 = arith.mulf %212, %213 : vector<7x128xf32>
    %c0_104 = arith.constant 0 : index
    %c0_105 = arith.constant 0 : index
    %215 = vector.load %arg28[%c0_104, %c0_105] : memref<7x128xf32, #tpu.memory_space<vmem>>, vector<7x128xf32>
    %216 = arith.addf %214, %215 : vector<7x128xf32>
    %217 = vector.extract_strided_slice %216 {offsets = [0, 0], sizes = [1, 128], strides = [1, 1]} : vector<7x128xf32> to vector<1x128xf32>
    %218 = vector.extract_strided_slice %216 {offsets = [1, 0], sizes = [1, 128], strides = [1, 1]} : vector<7x128xf32> to vector<1x128xf32>
    %219 = vector.extract_strided_slice %216 {offsets = [2, 0], sizes = [1, 128], strides = [1, 1]} : vector<7x128xf32> to vector<1x128xf32>
    %220 = vector.extract_strided_slice %216 {offsets = [3, 0], sizes = [1, 128], strides = [1, 1]} : vector<7x128xf32> to vector<1x128xf32>
    %221 = vector.extract_strided_slice %216 {offsets = [4, 0], sizes = [1, 128], strides = [1, 1]} : vector<7x128xf32> to vector<1x128xf32>
    %222 = vector.extract_strided_slice %216 {offsets = [5, 0], sizes = [1, 128], strides = [1, 1]} : vector<7x128xf32> to vector<1x128xf32>
    %223 = vector.extract_strided_slice %216 {offsets = [6, 0], sizes = [1, 128], strides = [1, 1]} : vector<7x128xf32> to vector<1x128xf32>
    %224 = tpu.concatenate %217, %218, %219, %220, %221, %222, %223 in 1 : vector<1x128xf32>, vector<1x128xf32>, vector<1x128xf32>, vector<1x128xf32>, vector<1x128xf32>, vector<1x128xf32>, vector<1x128xf32> -> vector<1x896xf32>
    %c0_106 = arith.constant 0 : index
    %c0_107 = arith.constant 0 : index
    %225 = vector.load %arg29[%c0_106, %c0_107] : memref<896x256xf32, #tpu.memory_space<vmem>>, vector<896x256xf32>
    %cst_108 = arith.constant dense<0.000000e+00> : vector<1x256xf32>
    %226 = tpu.matmul %224, %225, %cst_108 {dimension_numbers = #tpu.dot_dimension_numbers<[1], [0], [0], [1], [0, 0, 1, 1], [], []>} : vector<1x896xf32>, vector<896x256xf32>, vector<1x256xf32> -> vector<1x256xf32>
    %c0_109 = arith.constant 0 : index
    %c0_110 = arith.constant 0 : index
    %227 = vector.load %arg30[%c0_109, %c0_110] : memref<1x256xf32, #tpu.memory_space<vmem>>, vector<1x256xf32>
    %228 = arith.addf %226, %227 : vector<1x256xf32>
    %229 = vector.extract_strided_slice %228 {offsets = [0, 0], sizes = [1, 128], strides = [1, 1]} : vector<1x256xf32> to vector<1x128xf32>
    %230 = math.tanh %229 : vector<1x128xf32>
    %231 = vector.extract_strided_slice %228 {offsets = [0, 128], sizes = [1, 128], strides = [1, 1]} : vector<1x256xf32> to vector<1x128xf32>
    %232 = arith.negf %231 : vector<1x128xf32>
    %233 = math.exp %232 : vector<1x128xf32>
    %cst_111 = arith.constant 1.000000e+00 : f32
    %234 = vector.broadcast %cst_111 : f32 to vector<1x128xf32>
    %235 = arith.addf %234, %233 : vector<1x128xf32>
    %236 = arith.divf %234, %235 : vector<1x128xf32>
    %237 = arith.mulf %230, %236 : vector<1x128xf32>
    %c0_112 = arith.constant 0 : index
    %c0_113 = arith.constant 0 : index
    %238 = vector.load %arg31[%c0_112, %c0_113] : memref<128x256xf32, #tpu.memory_space<vmem>>, vector<128x256xf32>
    %cst_114 = arith.constant dense<0.000000e+00> : vector<1x256xf32>
    %239 = tpu.matmul %237, %238, %cst_114 {dimension_numbers = #tpu.dot_dimension_numbers<[1], [0], [0], [1], [0, 0, 1, 1], [], []>} : vector<1x128xf32>, vector<128x256xf32>, vector<1x256xf32> -> vector<1x256xf32>
    %240 = arith.addf %153, %239 : vector<1x256xf32>
    %c0_115 = arith.constant 0 : index
    %c0_116 = arith.constant 0 : index
    %241 = vector.load %arg32[%c0_115, %c0_116] : memref<1x256xf32, #tpu.memory_space<vmem>>, vector<1x256xf32>
    %242 = arith.addf %240, %241 : vector<1x256xf32>
    %cst_117 = arith.constant 5.000000e-02 : f32
    %243 = vector.broadcast %cst_117 : f32 to vector<1x128xf32>
    %244 = arith.mulf %243, %237 : vector<1x128xf32>
    %cst_118 = arith.constant dense<0.000000e+00> : vector<1x128xf32>
    %245 = tpu.matmul %237, %2, %cst_118 {dimension_numbers = #tpu.dot_dimension_numbers<[1], [0], [0], [1], [0, 0, 1, 1], [], []>} : vector<1x128xf32>, vector<128x128xf32>, vector<1x128xf32> -> vector<1x128xf32>
    %cst_119 = arith.constant 0.949999988 : f32
    %246 = vector.broadcast %cst_119 : f32 to vector<1x128xf32>
    %247 = arith.mulf %246, %245 : vector<1x128xf32>
    %248 = arith.addf %244, %247 : vector<1x128xf32>
    %cst_120 = arith.constant 5.000000e-02 : f32
    %249 = vector.broadcast %cst_120 : f32 to vector<1x128xf32>
    %250 = arith.mulf %249, %237 : vector<1x128xf32>
    %cst_121 = arith.constant dense<0.000000e+00> : vector<1x128xf32>
    %251 = tpu.matmul %248, %2, %cst_121 {dimension_numbers = #tpu.dot_dimension_numbers<[1], [0], [0], [1], [0, 0, 1, 1], [], []>} : vector<1x128xf32>, vector<128x128xf32>, vector<1x128xf32> -> vector<1x128xf32>
    %cst_122 = arith.constant 0.949999988 : f32
    %252 = vector.broadcast %cst_122 : f32 to vector<1x128xf32>
    %253 = arith.mulf %252, %251 : vector<1x128xf32>
    %254 = arith.addf %250, %253 : vector<1x128xf32>
    %255 = tpu.concatenate %237, %248, %254 in 1 : vector<1x128xf32>, vector<1x128xf32>, vector<1x128xf32> -> vector<1x384xf32>
    %c0_123 = arith.constant 0 : index
    %c0_124 = arith.constant 0 : index
    %256 = vector.load %arg33[%c0_123, %c0_124] : memref<384x128xf32, #tpu.memory_space<vmem>>, vector<384x128xf32>
    %cst_125 = arith.constant dense<0.000000e+00> : vector<1x128xf32>
    %257 = tpu.matmul %255, %256, %cst_125 {dimension_numbers = #tpu.dot_dimension_numbers<[1], [0], [0], [1], [0, 0, 1, 1], [], []>} : vector<1x384xf32>, vector<384x128xf32>, vector<1x128xf32> -> vector<1x128xf32>
    %c0_126 = arith.constant 0 : index
    %c0_127 = arith.constant 0 : index
    %258 = vector.load %arg34[%c0_126, %c0_127] : memref<1x128xf32, #tpu.memory_space<vmem>>, vector<1x128xf32>
    %259 = arith.addf %257, %258 : vector<1x128xf32>
    %cst_128 = arith.constant 5.000000e-02 : f32
    %260 = vector.broadcast %cst_128 : f32 to vector<1x128xf32>
    %261 = arith.mulf %260, %237 : vector<1x128xf32>
    %cst_129 = arith.constant dense<0.000000e+00> : vector<1x128xf32>
    %262 = tpu.matmul %237, %3, %cst_129 {dimension_numbers = #tpu.dot_dimension_numbers<[1], [0], [0], [1], [0, 0, 1, 1], [], []>} : vector<1x128xf32>, vector<128x128xf32>, vector<1x128xf32> -> vector<1x128xf32>
    %cst_130 = arith.constant 0.949999988 : f32
    %263 = vector.broadcast %cst_130 : f32 to vector<1x128xf32>
    %264 = arith.mulf %263, %262 : vector<1x128xf32>
    %265 = arith.addf %261, %264 : vector<1x128xf32>
    %cst_131 = arith.constant 5.000000e-02 : f32
    %266 = vector.broadcast %cst_131 : f32 to vector<1x128xf32>
    %267 = arith.mulf %266, %237 : vector<1x128xf32>
    %cst_132 = arith.constant dense<0.000000e+00> : vector<1x128xf32>
    %268 = tpu.matmul %265, %3, %cst_132 {dimension_numbers = #tpu.dot_dimension_numbers<[1], [0], [0], [1], [0, 0, 1, 1], [], []>} : vector<1x128xf32>, vector<128x128xf32>, vector<1x128xf32> -> vector<1x128xf32>
    %cst_133 = arith.constant 0.949999988 : f32
    %269 = vector.broadcast %cst_133 : f32 to vector<1x128xf32>
    %270 = arith.mulf %269, %268 : vector<1x128xf32>
    %271 = arith.addf %267, %270 : vector<1x128xf32>
    %272 = tpu.concatenate %237, %265, %271 in 1 : vector<1x128xf32>, vector<1x128xf32>, vector<1x128xf32> -> vector<1x384xf32>
    %c0_134 = arith.constant 0 : index
    %c0_135 = arith.constant 0 : index
    %273 = vector.load %arg35[%c0_134, %c0_135] : memref<384x128xf32, #tpu.memory_space<vmem>>, vector<384x128xf32>
    %cst_136 = arith.constant dense<0.000000e+00> : vector<1x128xf32>
    %274 = tpu.matmul %272, %273, %cst_136 {dimension_numbers = #tpu.dot_dimension_numbers<[1], [0], [0], [1], [0, 0, 1, 1], [], []>} : vector<1x384xf32>, vector<384x128xf32>, vector<1x128xf32> -> vector<1x128xf32>
    %c0_137 = arith.constant 0 : index
    %c0_138 = arith.constant 0 : index
    %275 = vector.load %arg36[%c0_137, %c0_138] : memref<1x128xf32, #tpu.memory_space<vmem>>, vector<1x128xf32>
    %276 = arith.addf %274, %275 : vector<1x128xf32>
    %277 = arith.addf %259, %276 : vector<1x128xf32>
    %278 = vector.extract_strided_slice %216 {offsets = [6, 0], sizes = [1, 128], strides = [1, 1]} : vector<7x128xf32> to vector<1x128xf32>
    %279 = arith.addf %277, %278 : vector<1x128xf32>
    %cst_139 = arith.constant dense<0.000000e+00> : vector<1xf32>
    %280 = vector.multi_reduction <add>, %279, %cst_139 [1] : vector<1x128xf32> to vector<1xf32>
    %281 = vector.shape_cast %280 : vector<1xf32> to vector<1x1xf32>
    %cst_140 = arith.constant dense<0.000000e+00> : vector<1xf32>
    %282 = vector.multi_reduction <add>, %281, %cst_140 [0] : vector<1x1xf32> to vector<1xf32>
    %283 = vector.shape_cast %282 : vector<1xf32> to vector<1x1xf32>
    %cst_141 = arith.constant 1.280000e+02 : f32
    %284 = vector.broadcast %cst_141 : f32 to vector<1x1xf32>
    %285 = arith.divf %283, %284 : vector<1x1xf32>
    %286 = vector.broadcast %285 : vector<1x1xf32> to vector<1x128xf32>
    %287 = arith.subf %279, %286 : vector<1x128xf32>
    %288 = arith.mulf %287, %287 : vector<1x128xf32>
    %cst_142 = arith.constant dense<0.000000e+00> : vector<1xf32>
    %289 = vector.multi_reduction <add>, %288, %cst_142 [1] : vector<1x128xf32> to vector<1xf32>
    %290 = vector.shape_cast %289 : vector<1xf32> to vector<1x1xf32>
    %cst_143 = arith.constant dense<0.000000e+00> : vector<1xf32>
    %291 = vector.multi_reduction <add>, %290, %cst_143 [0] : vector<1x1xf32> to vector<1xf32>
    %292 = vector.shape_cast %291 : vector<1xf32> to vector<1x1xf32>
    %cst_144 = arith.constant 1.280000e+02 : f32
    %293 = vector.broadcast %cst_144 : f32 to vector<1x1xf32>
    %294 = arith.divf %292, %293 : vector<1x1xf32>
    %cst_145 = arith.constant 9.99999974E-6 : f32
    %295 = vector.broadcast %cst_145 : f32 to vector<1x1xf32>
    %296 = arith.addf %294, %295 : vector<1x1xf32>
    %297 = math.rsqrt %296 : vector<1x1xf32>
    %298 = vector.broadcast %297 : vector<1x1xf32> to vector<1x128xf32>
    %299 = arith.mulf %287, %298 : vector<1x128xf32>
    %c0_146 = arith.constant 0 : index
    %c0_147 = arith.constant 0 : index
    %300 = vector.load %arg37[%c0_146, %c0_147] : memref<1x128xf32, #tpu.memory_space<vmem>>, vector<1x128xf32>
    %301 = arith.mulf %299, %300 : vector<1x128xf32>
    %c0_148 = arith.constant 0 : index
    %c0_149 = arith.constant 0 : index
    %302 = vector.load %arg38[%c0_148, %c0_149] : memref<1x128xf32, #tpu.memory_space<vmem>>, vector<1x128xf32>
    %303 = arith.addf %301, %302 : vector<1x128xf32>
    %c0_150 = arith.constant 0 : index
    %c0_151 = arith.constant 0 : index
    %304 = vector.load %arg39[%c0_150, %c0_151] : memref<128x256xf32, #tpu.memory_space<vmem>>, vector<128x256xf32>
    %cst_152 = arith.constant dense<0.000000e+00> : vector<1x256xf32>
    %305 = tpu.matmul %303, %304, %cst_152 {dimension_numbers = #tpu.dot_dimension_numbers<[1], [0], [0], [1], [0, 0, 1, 1], [], []>} : vector<1x128xf32>, vector<128x256xf32>, vector<1x256xf32> -> vector<1x256xf32>
    %306 = arith.addf %242, %305 : vector<1x256xf32>
    %c0_153 = arith.constant 0 : index
    %c0_154 = arith.constant 0 : index
    %307 = vector.load %arg40[%c0_153, %c0_154] : memref<1x256xf32, #tpu.memory_space<vmem>>, vector<1x256xf32>
    %308 = arith.addf %306, %307 : vector<1x256xf32>
    %cst_155 = arith.constant 0.000000e+00 : f32
    %309 = vector.broadcast %cst_155 : f32 to vector<1x256xf32>
    %310 = arith.maximumf %308, %309 : vector<1x256xf32>
    %c0_156 = arith.constant 0 : index
    %c0_157 = arith.constant 0 : index
    %311 = vector.load %arg41[%c0_156, %c0_157] : memref<256x256xf32, #tpu.memory_space<vmem>>, vector<256x256xf32>
    %cst_158 = arith.constant dense<0.000000e+00> : vector<1x256xf32>
    %312 = tpu.matmul %310, %311, %cst_158 {dimension_numbers = #tpu.dot_dimension_numbers<[1], [0], [0], [1], [0, 0, 1, 1], [], []>} : vector<1x256xf32>, vector<256x256xf32>, vector<1x256xf32> -> vector<1x256xf32>
    %c0_159 = arith.constant 0 : index
    %c0_160 = arith.constant 0 : index
    %313 = vector.load %arg42[%c0_159, %c0_160] : memref<1x256xf32, #tpu.memory_space<vmem>>, vector<1x256xf32>
    %314 = arith.addf %312, %313 : vector<1x256xf32>
    %cst_161 = arith.constant 0.000000e+00 : f32
    %315 = vector.broadcast %cst_161 : f32 to vector<1x256xf32>
    %316 = arith.maximumf %314, %315 : vector<1x256xf32>
    %c0_162 = arith.constant 0 : index
    %c0_163 = arith.constant 0 : index
    %317 = vector.load %arg43[%c0_162, %c0_163] : memref<256x96xf32, #tpu.memory_space<vmem>>, vector<256x96xf32>
    %cst_164 = arith.constant dense<0.000000e+00> : vector<1x96xf32>
    %318 = tpu.matmul %316, %317, %cst_164 {dimension_numbers = #tpu.dot_dimension_numbers<[1], [0], [0], [1], [0, 0, 1, 1], [], []>} : vector<1x256xf32>, vector<256x96xf32>, vector<1x96xf32> -> vector<1x96xf32>
    %c0_165 = arith.constant 0 : index
    %c0_166 = arith.constant 0 : index
    %319 = vector.load %arg44[%c0_165, %c0_166] : memref<1x96xf32, #tpu.memory_space<vmem>>, vector<1x96xf32>
    %320 = arith.addf %318, %319 : vector<1x96xf32>
    %321 = vector.shape_cast %320 : vector<1x96xf32> to vector<1x1x96xf32>
    %c0_167 = arith.constant 0 : index
    %c0_168 = arith.constant 0 : index
    %c0_169 = arith.constant 0 : index
    %322 = vector.load %arg45[%c0_167, %c0_168, %c0_169] : memref<1x1x96xf32, #tpu.memory_space<vmem>>, vector<1x1x96xf32>
    tpu.vector_store %arg45[%c0_167, %c0_168, %c0_169], %321 {strides = array<i32>} : memref<1x1x96xf32, #tpu.memory_space<vmem>>, vector<1x1x96xf32>,
    return
  }
  func.func @transform_0(%arg0: i32) -> (i32, i32, i32) {
    %c0_i32 = arith.constant 0 : i32
    %c0_i32_0 = arith.constant 0 : i32
    %c0_i32_1 = arith.constant 0 : i32
    return %arg0, %c0_i32, %c0_i32_0 : i32, i32, i32
  }
  func.func @transform_1(%arg0: i32) -> (i32, i32, i32) {
    %c0_i32 = arith.constant 0 : i32
    %c0_i32_0 = arith.constant 0 : i32
    %c0_i32_1 = arith.constant 0 : i32
    return %arg0, %c0_i32, %c0_i32_0 : i32, i32, i32
  }
  func.func @transform_2(%arg0: i32) -> (i32, i32) {
    %c0_i32 = arith.constant 0 : i32
    %c0_i32_0 = arith.constant 0 : i32
    %c0_i32_1 = arith.constant 0 : i32
    return %c0_i32, %c0_i32_0 : i32, i32
  }
  func.func @transform_3(%arg0: i32) -> (i32, i32) {
    %c0_i32 = arith.constant 0 : i32
    %c0_i32_0 = arith.constant 0 : i32
    %c0_i32_1 = arith.constant 0 : i32
    return %c0_i32, %c0_i32_0 : i32, i32
  }
  func.func @transform_4(%arg0: i32) -> (i32, i32) {
    %c0_i32 = arith.constant 0 : i32
    %c0_i32_0 = arith.constant 0 : i32
    %c0_i32_1 = arith.constant 0 : i32
    return %c0_i32, %c0_i32_0 : i32, i32
  }
  func.func @transform_5(%arg0: i32) -> (i32, i32) {
    %c0_i32 = arith.constant 0 : i32
    %c0_i32_0 = arith.constant 0 : i32
    %c0_i32_1 = arith.constant 0 : i32
    return %c0_i32, %c0_i32_0 : i32, i32
  }
  func.func @transform_6(%arg0: i32) -> (i32, i32) {
    %c0_i32 = arith.constant 0 : i32
    %c0_i32_0 = arith.constant 0 : i32
    %c0_i32_1 = arith.constant 0 : i32
    return %c0_i32, %c0_i32_0 : i32, i32
  }
  func.func @transform_7(%arg0: i32) -> (i32, i32) {
    %c0_i32 = arith.constant 0 : i32
    %c0_i32_0 = arith.constant 0 : i32
    %c0_i32_1 = arith.constant 0 : i32
    return %c0_i32, %c0_i32_0 : i32, i32
  }
  func.func @transform_8(%arg0: i32) -> (i32, i32) {
    %c0_i32 = arith.constant 0 : i32
    %c0_i32_0 = arith.constant 0 : i32
    %c0_i32_1 = arith.constant 0 : i32
    return %c0_i32, %c0_i32_0 : i32, i32
  }
  func.func @transform_9(%arg0: i32) -> (i32, i32) {
    %c0_i32 = arith.constant 0 : i32
    %c0_i32_0 = arith.constant 0 : i32
    %c0_i32_1 = arith.constant 0 : i32
    return %c0_i32, %c0_i32_0 : i32, i32
  }
  func.func @transform_10(%arg0: i32) -> (i32, i32) {
    %c0_i32 = arith.constant 0 : i32
    %c0_i32_0 = arith.constant 0 : i32
    %c0_i32_1 = arith.constant 0 : i32
    return %c0_i32, %c0_i32_0 : i32, i32
  }
  func.func @transform_11(%arg0: i32) -> (i32, i32) {
    %c0_i32 = arith.constant 0 : i32
    %c0_i32_0 = arith.constant 0 : i32
    %c0_i32_1 = arith.constant 0 : i32
    return %c0_i32, %c0_i32_0 : i32, i32
  }
  func.func @transform_12(%arg0: i32) -> (i32, i32) {
    %c0_i32 = arith.constant 0 : i32
    %c0_i32_0 = arith.constant 0 : i32
    %c0_i32_1 = arith.constant 0 : i32
    return %c0_i32, %c0_i32_0 : i32, i32
  }
  func.func @transform_13(%arg0: i32) -> (i32, i32) {
    %c0_i32 = arith.constant 0 : i32
    %c0_i32_0 = arith.constant 0 : i32
    %c0_i32_1 = arith.constant 0 : i32
    return %c0_i32, %c0_i32_0 : i32, i32
  }
  func.func @transform_14(%arg0: i32) -> (i32, i32) {
    %c0_i32 = arith.constant 0 : i32
    %c0_i32_0 = arith.constant 0 : i32
    %c0_i32_1 = arith.constant 0 : i32
    return %c0_i32, %c0_i32_0 : i32, i32
  }
  func.func @transform_15(%arg0: i32) -> (i32, i32) {
    %c0_i32 = arith.constant 0 : i32
    %c0_i32_0 = arith.constant 0 : i32
    %c0_i32_1 = arith.constant 0 : i32
    return %c0_i32, %c0_i32_0 : i32, i32
  }
  func.func @transform_16(%arg0: i32) -> (i32, i32) {
    %c0_i32 = arith.constant 0 : i32
    %c0_i32_0 = arith.constant 0 : i32
    %c0_i32_1 = arith.constant 0 : i32
    return %c0_i32, %c0_i32_0 : i32, i32
  }
  func.func @transform_17(%arg0: i32) -> (i32, i32) {
    %c0_i32 = arith.constant 0 : i32
    %c0_i32_0 = arith.constant 0 : i32
    %c0_i32_1 = arith.constant 0 : i32
    return %c0_i32, %c0_i32_0 : i32, i32
  }
  func.func @transform_18(%arg0: i32) -> (i32, i32) {
    %c0_i32 = arith.constant 0 : i32
    %c0_i32_0 = arith.constant 0 : i32
    %c0_i32_1 = arith.constant 0 : i32
    return %c0_i32, %c0_i32_0 : i32, i32
  }
  func.func @transform_19(%arg0: i32) -> (i32, i32) {
    %c0_i32 = arith.constant 0 : i32
    %c0_i32_0 = arith.constant 0 : i32
    %c0_i32_1 = arith.constant 0 : i32
    return %c0_i32, %c0_i32_0 : i32, i32
  }
  func.func @transform_20(%arg0: i32) -> (i32, i32) {
    %c0_i32 = arith.constant 0 : i32
    %c0_i32_0 = arith.constant 0 : i32
    %c0_i32_1 = arith.constant 0 : i32
    return %c0_i32, %c0_i32_0 : i32, i32
  }
  func.func @transform_21(%arg0: i32) -> (i32, i32) {
    %c0_i32 = arith.constant 0 : i32
    %c0_i32_0 = arith.constant 0 : i32
    %c0_i32_1 = arith.constant 0 : i32
    return %c0_i32, %c0_i32_0 : i32, i32
  }
  func.func @transform_22(%arg0: i32) -> (i32, i32) {
    %c0_i32 = arith.constant 0 : i32
    %c0_i32_0 = arith.constant 0 : i32
    %c0_i32_1 = arith.constant 0 : i32
    return %c0_i32, %c0_i32_0 : i32, i32
  }
  func.func @transform_23(%arg0: i32) -> (i32, i32) {
    %c0_i32 = arith.constant 0 : i32
    %c0_i32_0 = arith.constant 0 : i32
    %c0_i32_1 = arith.constant 0 : i32
    return %c0_i32, %c0_i32_0 : i32, i32
  }
  func.func @transform_24(%arg0: i32) -> (i32, i32) {
    %c0_i32 = arith.constant 0 : i32
    %c0_i32_0 = arith.constant 0 : i32
    %c0_i32_1 = arith.constant 0 : i32
    return %c0_i32, %c0_i32_0 : i32, i32
  }
  func.func @transform_25(%arg0: i32) -> (i32, i32) {
    %c0_i32 = arith.constant 0 : i32
    %c0_i32_0 = arith.constant 0 : i32
    %c0_i32_1 = arith.constant 0 : i32
    return %c0_i32, %c0_i32_0 : i32, i32
  }
  func.func @transform_26(%arg0: i32) -> (i32, i32) {
    %c0_i32 = arith.constant 0 : i32
    %c0_i32_0 = arith.constant 0 : i32
    %c0_i32_1 = arith.constant 0 : i32
    return %c0_i32, %c0_i32_0 : i32, i32
  }
  func.func @transform_27(%arg0: i32) -> (i32, i32) {
    %c0_i32 = arith.constant 0 : i32
    %c0_i32_0 = arith.constant 0 : i32
    %c0_i32_1 = arith.constant 0 : i32
    return %c0_i32, %c0_i32_0 : i32, i32
  }
  func.func @transform_28(%arg0: i32) -> (i32, i32) {
    %c0_i32 = arith.constant 0 : i32
    %c0_i32_0 = arith.constant 0 : i32
    %c0_i32_1 = arith.constant 0 : i32
    return %c0_i32, %c0_i32_0 : i32, i32
  }
  func.func @transform_29(%arg0: i32) -> (i32, i32) {
    %c0_i32 = arith.constant 0 : i32
    %c0_i32_0 = arith.constant 0 : i32
    %c0_i32_1 = arith.constant 0 : i32
    return %c0_i32, %c0_i32_0 : i32, i32
  }
  func.func @transform_30(%arg0: i32) -> (i32, i32) {
    %c0_i32 = arith.constant 0 : i32
    %c0_i32_0 = arith.constant 0 : i32
    %c0_i32_1 = arith.constant 0 : i32
    return %c0_i32, %c0_i32_0 : i32, i32
  }
  func.func @transform_31(%arg0: i32) -> (i32, i32) {
    %c0_i32 = arith.constant 0 : i32
    %c0_i32_0 = arith.constant 0 : i32
    %c0_i32_1 = arith.constant 0 : i32
    return %c0_i32, %c0_i32_0 : i32, i32
  }
  func.func @transform_32(%arg0: i32) -> (i32, i32) {
    %c0_i32 = arith.constant 0 : i32
    %c0_i32_0 = arith.constant 0 : i32
    %c0_i32_1 = arith.constant 0 : i32
    return %c0_i32, %c0_i32_0 : i32, i32
  }
  func.func @transform_33(%arg0: i32) -> (i32, i32) {
    %c0_i32 = arith.constant 0 : i32
    %c0_i32_0 = arith.constant 0 : i32
    %c0_i32_1 = arith.constant 0 : i32
    return %c0_i32, %c0_i32_0 : i32, i32
  }
  func.func @transform_34(%arg0: i32) -> (i32, i32) {
    %c0_i32 = arith.constant 0 : i32
    %c0_i32_0 = arith.constant 0 : i32
    %c0_i32_1 = arith.constant 0 : i32
    return %c0_i32, %c0_i32_0 : i32, i32
  }
  func.func @transform_35(%arg0: i32) -> (i32, i32) {
    %c0_i32 = arith.constant 0 : i32
    %c0_i32_0 = arith.constant 0 : i32
    %c0_i32_1 = arith.constant 0 : i32
    return %c0_i32, %c0_i32_0 : i32, i32
  }
  func.func @transform_36(%arg0: i32) -> (i32, i32) {
    %c0_i32 = arith.constant 0 : i32
    %c0_i32_0 = arith.constant 0 : i32
    %c0_i32_1 = arith.constant 0 : i32
    return %c0_i32, %c0_i32_0 : i32, i32
  }
  func.func @transform_37(%arg0: i32) -> (i32, i32) {
    %c0_i32 = arith.constant 0 : i32
    %c0_i32_0 = arith.constant 0 : i32
    %c0_i32_1 = arith.constant 0 : i32
    return %c0_i32, %c0_i32_0 : i32, i32
  }
  func.func @transform_38(%arg0: i32) -> (i32, i32) {
    %c0_i32 = arith.constant 0 : i32
    %c0_i32_0 = arith.constant 0 : i32
    %c0_i32_1 = arith.constant 0 : i32
    return %c0_i32, %c0_i32_0 : i32, i32
  }
  func.func @transform_39(%arg0: i32) -> (i32, i32) {
    %c0_i32 = arith.constant 0 : i32
    %c0_i32_0 = arith.constant 0 : i32
    %c0_i32_1 = arith.constant 0 : i32
    return %c0_i32, %c0_i32_0 : i32, i32
  }
  func.func @transform_40(%arg0: i32) -> (i32, i32) {
    %c0_i32 = arith.constant 0 : i32
    %c0_i32_0 = arith.constant 0 : i32
    %c0_i32_1 = arith.constant 0 : i32
    return %c0_i32, %c0_i32_0 : i32, i32
  }
  func.func @transform_41(%arg0: i32) -> (i32, i32) {
    %c0_i32 = arith.constant 0 : i32
    %c0_i32_0 = arith.constant 0 : i32
    %c0_i32_1 = arith.constant 0 : i32
    return %c0_i32, %c0_i32_0 : i32, i32
  }
  func.func @transform_42(%arg0: i32) -> (i32, i32) {
    %c0_i32 = arith.constant 0 : i32
    %c0_i32_0 = arith.constant 0 : i32
    %c0_i32_1 = arith.constant 0 : i32
    return %c0_i32, %c0_i32_0 : i32, i32
  }
  func.func @transform_43(%arg0: i32) -> (i32, i32) {
    %c0_i32 = arith.constant 0 : i32
    %c0_i32_0 = arith.constant 0 : i32
    %c0_i32_1 = arith.constant 0 : i32
    return %c0_i32, %c0_i32_0 : i32, i32
  }
  func.func @transform_44(%arg0: i32) -> (i32, i32, i32) {
    %c0_i32 = arith.constant 0 : i32
    %c0_i32_0 = arith.constant 0 : i32
    %c0_i32_1 = arith.constant 0 : i32
    return %arg0, %c0_i32, %c0_i32_0 : i32, i32, i32
  }
}

</mosaic_0001>

<bundles_post_ra>
// kernel: mtgnn_forward.2
= control target key start
LH: loop header
LB: loop body
LE: loop exit
PB: predicated region body
PF: predicated region fallthrough
CT: control target
= control target key end

     0   :  { %v400_v0 = vmov 0.0   ;;  %vm33_vm0 = vcmask 130048   ;;  %vm401_vm1 = vmmov 0   ;;  %vm344_vm2 = vcmask 64512   ;;  %s470_s2 = inlined_call_operand.vmem [shape: f32[16,16], index: 2, kind: input, shape index: {}]   ;;  %s471_s4 = inlined_call_operand.vmem [shape: f32[16,16], index: 4, kind: input, shape index: {}]   ;;  %s472_s0 = inlined_call_operand.vmem [shape: f32[8,16], index: 0, kind: input, shape index: {}]   ;;  %s473_s1 = inlined_call_operand.vmem [shape: f32[8,16], index: 1, kind: input, shape index: {}]   ;;  %s474_s3 = inlined_call_operand.vmem [shape: f32[1,16], index: 3, kind: input, shape index: {}]   ;;  %s475_s5 = inlined_call_operand.vmem [shape: f32[1,16], index: 5, kind: input, shape index: {}]   ;;  %s476_s6 = inlined_call_operand.vmem [shape: f32[8,8], index: 6, kind: output, shape index: {}]  }
   0x1   :  { %368 = vmatprep.subr.mxu0 %v400_v0  ;;  %375 = vmatprep.subr.mxu1 %v400_v0  ;;  %v25_v1 = vld [vmem:[%s470_s2 + $0x8] sm:$0xff]  ;;  %v24_v3 = vld [vmem:[%s470_s2] sm:$0xff] }
   0x2   :  { %v111_v2 = vld [vmem:[%s471_s4 + $0x8] sm:$0xff]  ;;  %369 = vmatpush3.msra.mxu0 %v25_v1  ;;  %v110_v4 = vld [vmem:[%s471_s4] sm:$0xff]  ;;  %372 = vmatprep.mubr.msk.f32.mxu0 %vm401_vm1, %v400_v0 }
   0x3   :  { %376 = vmatpush3.msra.mxu1 %v111_v2  ;;  %370 = vmatprep.subr.mxu0 %v400_v0  ;;  %v23_v5 = vld [vmem:[%s472_s0] sm:$0xff] }
   0x4   :  { %377 = vmatprep.subr.mxu1 %v400_v0  ;;  %v109_v6 = vld [vmem:[%s473_s1] sm:$0xff]  ;;  %371 = vmatpush3.msra.mxu0 %v24_v3 }
   0x5   :  { %378 = vmatpush3.msra.mxu1 %v110_v4  ;;  %379 = vmatprep.mubr.msk.f32.mxu1 %vm401_vm1, %v400_v0  ;;  %v350_v7 = vld [vmem:[%s474_s3] ss:$0 sm:$0xff] }
   0x6   :  { %373 = vmatmul.mubr.msk.f32.vlgmr.msra.gmra.mxu0 %vm33_vm0, %v23_v5  ;;  %380 = vmatmul.mubr.msk.f32.vlgmr.msra.gmra.mxu1 %vm33_vm0, %v109_v6  ;;  %v352_v8 = vld [vmem:[%s475_s5] ss:$0 sm:$0xff] }
   0x7   :  { %382 = vmatprep.subr.mxu0 %v400_v0  ;;  %387 = vmatprep.subr.mxu1 %v400_v0 }
   0x8   :  { %384 = vmatprep.mubr.msk.f32.mxu0 %vm401_vm1, %v400_v0  ;;  %389 = vmatprep.mubr.msk.f32.mxu1 %vm401_vm1, %v400_v0 }
  0xc6   :  { %v103_v9 = vpop.f32.mrf.mxu0  ;;  %v188_v10 = vpop.f32.mrf.mxu1 }
  0xc7   :  { %v104_v11 = vadd.f32 %v350_v7, %v103_v9  ;;  %v189_v12 = vadd.f32 %v352_v8, %v188_v10 }
  0xc8   :  { %v374_v13 = vpop.f32.mrf.mxu0  ;;  %v381_v14 = vpop.f32.mrf.mxu1 }
  0xc9   :  { %v107_v15 = vmul.f32 3.0, %v104_v11  ;;  %v192_v16 = vmul.f32 3.0, %v189_v12 }
  0xcb   :  { %394 = vtanh.f32 %v107_v15 }
  0xcc   :  { %396 = vtanh.f32 %v192_v16 }
  0xd8   :  { %v395_v17 = vpop.eup %394 }
  0xd9   :  { %v397_v18 = vpop.eup %396  ;;  %388 = vmatpush3.xpose.msk.msra.mxu1 %vm33_vm0, %v395_v17 }
  0xda   :  { %383 = vmatpush3.xpose.msk.msra.mxu0 %vm33_vm0, %v397_v18 }
  0xdc   :  { %390 = vmatmul.mubr.msk.f32.vlgmr.msra.gmra.mxu1 %vm33_vm0, %v397_v18 }
  0xdd   :  { %385 = vmatmul.mubr.msk.f32.vlgmr.msra.gmra.mxu0 %vm33_vm0, %v395_v17 }
 0x19c   :  { %v336_v19 = vpop.f32.mrf.mxu1 }
 0x19d   :  { %v266_v20 = vpop.f32.mrf.mxu0 }
 0x19e   :  { %v340_v21 = vsub.f32 %v266_v20, %v336_v19  ;;  %v391_v22 = vpop.f32.mrf.mxu1 }
 0x19f   :  { %v386_v23 = vpop.f32.mrf.mxu0 }
 0x1a0   :  { %v341_v24 = vmul.f32 3.0, %v340_v21 }
 0x1a2   :  { %398 = vtanh.f32 %v341_v24 }
 0x1af   :  { %v399_v25 = vpop.eup %398 }
 0x1b0   :  { %v343_v26 = vmax.f32 %v399_v25, 0.0 }
 0x1b2   :  { %345 = vst.msk [vmem:[%s476_s6] sm:$0xff] %vm344_vm2, %v343_v26 }

// kernel: mul.15
= control target key start
LH: loop header
LB: loop body
LE: loop exit
PB: predicated region body
PF: predicated region fallthrough
CT: control target
= control target key end

     0   :  { %vm97_vm0 = vcmask 261120   ;;  %s385_s0 = inlined_call_operand.vmem [shape: f32[19,2,32], index: 0, kind: input, shape index: {}]   ;;  %s386_s1 = inlined_call_operand.vmem [shape: f32[38,32], index: 1, kind: output, shape index: {}]  }
   0x1   :  { %v206_v0 = vld [vmem:[%s385_s0 + $0x24] sm:$0x3]  ;;  %v207_v1 = vld [vmem:[%s385_s0 + $0x22] sm:$0x3]  ;;  %v208_v2 = vld [vmem:[%s385_s0 + $0x20] sm:$0x3] }
   0x2   :  { %9 = vst [vmem:[#allocation0 + $0x90] sm:$0x3] %v206_v0  ;;  %14 = vst [vmem:[#allocation0 + $0x58] sm:$0x3] %v207_v1  ;;  %v209_v3 = vld [vmem:[%s385_s0 + $0x1e] sm:$0x3] }
   0x3   :  { %19 = vst [vmem:[#allocation0 + $0x40] sm:$0x3] %v208_v2  ;;  %v210_v4 = vld [vmem:[%s385_s0 + $0x1c] sm:$0x3]  ;;  %v211_v5 = vld [vmem:[%s385_s0 + $0x1a] sm:$0x3] }
   0x4   :  { %24 = vst [vmem:[#allocation0 + $0x78] sm:$0x3] %v209_v3  ;;  %29 = vst [vmem:[#allocation0 + $0x60] sm:$0x3] %v210_v4  ;;  %v212_v6 = vld [vmem:[%s385_s0 + $0x18] sm:$0x3] }
   0x5   :  { %34 = vst [vmem:[#allocation0 + $0x28] sm:$0x3] %v211_v5  ;;  %v213_v7 = vld [vmem:[%s385_s0 + $0x16] sm:$0x3]  ;;  %v214_v8 = vld [vmem:[%s385_s0 + $0x14] sm:$0x3] }
   0x6   :  { %39 = vst [vmem:[#allocation0 + $0x18] sm:$0x3] %v212_v6  ;;  %44 = vst [vmem:[#allocation0 + $0x10] sm:$0x3] %v213_v7  ;;  %v215_v9 = vld [vmem:[%s385_s0 + $0x12] sm:$0x3] }
   0x7   :  { %49 = vst [vmem:[#allocation0 + $0x88] sm:$0x3] %v214_v8  ;;  %v216_v10 = vld [vmem:[%s385_s0 + $0x10] sm:$0x3]  ;;  %v217_v11 = vld [vmem:[%s385_s0 + $0xe] sm:$0x3] }
   0x8   :  { %54 = vst [vmem:[#allocation0 + $0x8] sm:$0x3] %v215_v9  ;;  %59 = vst [vmem:[#allocation0 + $0x68] sm:$0x3] %v216_v10  ;;  %v218_v12 = vld [vmem:[%s385_s0 + $0xc] sm:$0x3] }
   0x9   :  { %64 = vst [vmem:[#allocation0 + $0x50] sm:$0x3] %v217_v11  ;;  %v219_v13 = vld [vmem:[%s385_s0 + $0xa] sm:$0x3]  ;;  %v220_v14 = vld [vmem:[%s385_s0 + $0x8] sm:$0x3] }
   0xa   :  { %69 = vst [vmem:[#allocation0 + $0x38] sm:$0x3] %v218_v12  ;;  %74 = vst [vmem:[#allocation0 + $0x80] sm:$0x3] %v219_v13  ;;  %v221_v15 = vld [vmem:[%s385_s0 + $0x6] sm:$0x3] }
   0xb   :  { %79 = vst [vmem:[#allocation0 + $0x70] sm:$0x3] %v220_v14  ;;  %v222_v16 = vld [vmem:[%s385_s0 + $0x4] sm:$0x3]  ;;  %v223_v17 = vld [vmem:[%s385_s0 + $0x2] sm:$0x3] }
   0xc   :  { %84 = vst [vmem:[#allocation0 + $0x20] sm:$0x3] %v221_v15  ;;  %89 = vst [vmem:[#allocation0 + $0x30] sm:$0x3] %v222_v16  ;;  %v94_v18 = vld [vmem:[%s385_s0] sm:$0x3] }
   0xd   :  { %93 = vst [vmem:[#allocation0] sm:$0x3] %v223_v17  ;;  %95 = vst [vmem:[#allocation0 + $0x48] sm:$0x3] %v94_v18  ;;  %v175_v19 = vld [vmem:[#allocation0 + $0x40] sm:$0x3]  }
   0xe   :  { %v180_v20 = vld [vmem:[#allocation0 + $0x58] sm:$0x3]   ;;  %v185_v21 = vld [vmem:[#allocation0 + $0x90] sm:$0x3]   ;;  %v160_v22 = vld [vmem:[#allocation0 + $0x28] sm:$0x3]  }
   0xf   :  { %v165_v23 = vld [vmem:[#allocation0 + $0x60] sm:$0x3]   ;;  %v170_v24 = vld [vmem:[#allocation0 + $0x78] sm:$0x3]   ;;  %239 = vst.msk [vmem:[%s386_s1 + $0x20] sm:$0x3] %vm97_vm0, %v175_v19  }
  0x10   :  { %240 = vst.msk [vmem:[%s386_s1 + $0x22] sm:$0x3] %vm97_vm0, %v180_v20   ;;  %241 = vst.msk [vmem:[%s386_s1 + $0x24] sm:$0x3] %vm97_vm0, %v185_v21   ;;  %v145_v25 = vld [vmem:[#allocation0 + $0x88] sm:$0x3]  }
  0x11   :  { %v150_v26 = vld [vmem:[#allocation0 + $0x10] sm:$0x3]   ;;  %v155_v27 = vld [vmem:[#allocation0 + $0x18] sm:$0x3]   ;;  %236 = vst.msk [vmem:[%s386_s1 + $0x1a] sm:$0x3] %vm97_vm0, %v160_v22  }
  0x12   :  { %237 = vst.msk [vmem:[%s386_s1 + $0x1c] sm:$0x3] %vm97_vm0, %v165_v23   ;;  %238 = vst.msk [vmem:[%s386_s1 + $0x1e] sm:$0x3] %vm97_vm0, %v170_v24   ;;  %v130_v28 = vld [vmem:[#allocation0 + $0x50] sm:$0x3]  }
  0x13   :  { %v135_v29 = vld [vmem:[#allocation0 + $0x68] sm:$0x3]   ;;  %233 = vst.msk [vmem:[%s386_s1 + $0x14] sm:$0x3] %vm97_vm0, %v145_v25   ;;  %234 = vst.msk [vmem:[%s386_s1 + $0x16] sm:$0x3] %vm97_vm0, %v150_v26  }
  0x14   :  { %v140_v30 = vld [vmem:[#allocation0 + $0x8] sm:$0x3]   ;;  %235 = vst.msk [vmem:[%s386_s1 + $0x18] sm:$0x3] %vm97_vm0, %v155_v27   ;;  %v115_v31 = vld [vmem:[#allocation0 + $0x70] sm:$0x3]  }
  0x15   :  { %v120_v32 = vld [vmem:[#allocation0 + $0x80] sm:$0x3]   ;;  %v125_v33 = vld [vmem:[#allocation0 + $0x38] sm:$0x3]   ;;  %230 = vst.msk [vmem:[%s386_s1 + $0xe] sm:$0x3] %vm97_vm0, %v130_v28  }
  0x16   :  { %231 = vst.msk [vmem:[%s386_s1 + $0x10] sm:$0x3] %vm97_vm0, %v135_v29   ;;  %232 = vst.msk [vmem:[%s386_s1 + $0x12] sm:$0x3] %vm97_vm0, %v140_v30   ;;  %v100_v34 = vld [vmem:[#allocation0] sm:$0x3]  }
  0x17   :  { %v105_v35 = vld [vmem:[#allocation0 + $0x30] sm:$0x3]   ;;  %v110_v36 = vld [vmem:[#allocation0 + $0x20] sm:$0x3]   ;;  %227 = vst.msk [vmem:[%s386_s1 + $0x8] sm:$0x3] %vm97_vm0, %v115_v31  }
  0x18   :  { %228 = vst.msk [vmem:[%s386_s1 + $0xa] sm:$0x3] %vm97_vm0, %v120_v32   ;;  %229 = vst.msk [vmem:[%s386_s1 + $0xc] sm:$0x3] %vm97_vm0, %v125_v33   ;;  %v96_v37 = vld [vmem:[#allocation0 + $0x48] sm:$0x3]  }
  0x19   :  { %224 = vst.msk [vmem:[%s386_s1 + $0x2] sm:$0x3] %vm97_vm0, %v100_v34   ;;  %225 = vst.msk [vmem:[%s386_s1 + $0x4] sm:$0x3] %vm97_vm0, %v105_v35  }
  0x1a   :  { %226 = vst.msk [vmem:[%s386_s1 + $0x6] sm:$0x3] %vm97_vm0, %v110_v36   ;;  %98 = vst.msk [vmem:[%s386_s1] sm:$0x3] %vm97_vm0, %v96_v37  }

// kernel: mtgnn_forward.3
= control target key start
LH: loop header
LB: loop body
LE: loop exit
PB: predicated region body
PF: predicated region fallthrough
CT: control target
= control target key end

     0   :  { %s9076_s6 = smov 1   ;;  %s9077_s10 = smov 2   ;;  %s12265_s0 = inlined_call_operand.smem [shape: u32[45], index: -1, kind: input, shape index: {}] }
   0x1   :  { %s9130_s5 = sld [smem:[%s12265_s0]]   ;;  %s9078_s14 = smov 3  }
   0x2   :  { %s9135_s9 = sld [smem:[%s12265_s0 + %s9076_s6]]   ;;  %s9079_s18 = smov 4  }
   0x3   :  { %s9140_s13 = sld [smem:[%s12265_s0 + %s9077_s10]]   ;;  %s9080_s22 = smov 5  }
   0x4   :  { %s9145_s17 = sld [smem:[%s12265_s0 + %s9078_s14]]   ;;  %s9081_s26 = smov 6  }
   0x5   :  { %s9150_s21 = sld [smem:[%s12265_s0 + %s9079_s18]]   ;;  %s9082_s30 = smov 7  }
   0x6   :  { %s9155_s25 = sld [smem:[%s12265_s0 + %s9080_s22]]   ;;  %s9083_s4 = smov 8  }
   0x7   :  { %12282 = sst [smem:[#allocation2_spill]] %s9130_s5  ;;  %s9084_s10 = smov 9  }
   0x8   :  { %s9160_s29 = sld [smem:[%s12265_s0 + %s9081_s26]]   ;;  %s9085_s15 = smov 10  }
   0x9   :  { %s9165_s3 = sld [smem:[%s12265_s0 + %s9082_s30]]   ;;  %s9086_s20 = smov 11  }
   0xa   :  { %s9170_s8 = sld [smem:[%s12265_s0 + %s9083_s4]]   ;;  %s9087_s26 = smov 12  }
   0xb   :  { %s9175_s14 = sld [smem:[%s12265_s0 + %s9084_s10]]   ;;  %s9088_s1 = smov 13  }
   0xc   :  { %s9180_s19 = sld [smem:[%s12265_s0 + %s9085_s15]]   ;;  %s9089_s7 = smov 14  }
   0xd   :  { %s9185_s24 = sld [smem:[%s12265_s0 + %s9086_s20]]   ;;  %s9090_s15 = smov 15  }
   0xe   :  { %s9190_s30 = sld [smem:[%s12265_s0 + %s9087_s26]]   ;;  %s9091_s22 = smov 16  }
   0xf   :  { %12283 = sst [smem:[#allocation3_spill]] %s9165_s3  ;;  %s9092_s28 = smov 17  }
  0x10   :  { %s9195_s6 = sld [smem:[%s12265_s0 + %s9088_s1]]  }
  0x11   :  { %s9200_s12 = sld [smem:[%s12265_s0 + %s9089_s7]]   ;;  %s9093_s7 = smov 18  }
  0x12   :  { %s9205_s20 = sld [smem:[%s12265_s0 + %s9090_s15]]   ;;  %s9094_s15 = smov 19  }
  0x13   :  { %12284 = sst [smem:[#allocation4_spill]] %s9185_s24 }
  0x14   :  { %s9210_s27 = sld [smem:[%s12265_s0 + %s9091_s22]]   ;;  %s9095_s22 = smov 20  }
  0x15   :  { %s9215_s4 = sld [smem:[%s12265_s0 + %s9092_s28]]   ;;  %s9096_s28 = smov 21  }
  0x16   :  { %s9220_s24 = sld [smem:[%s12265_s0 + %s9093_s7]]   ;;  %s9097_s7 = smov 22  }
  0x18   :  { %12285 = sst [smem:[#allocation5_spill]] %s9205_s20 }
  0x19   :  { %s9225_s20 = sld [smem:[%s12265_s0 + %s9094_s15]]   ;;  %s9098_s15 = smov 23  }
  0x1a   :  { %12286 = sst [smem:[#allocation6_spill]] %s9210_s27 }
  0x1b   :  { %12287 = sst [smem:[#allocation7_spill]] %s9215_s4 }
  0x1c   :  { %12288 = sst [smem:[#allocation8_spill]] %s9220_s24 }
  0x1d   :  { %s9230_s27 = sld [smem:[%s12265_s0 + %s9095_s22]]   ;;  %s9099_s22 = smov 24  }
  0x1e   :  { %s9235_s4 = sld [smem:[%s12265_s0 + %s9096_s28]]   ;;  %s9100_s28 = smov 25  }
  0x1f   :  { %12289 = sst [smem:[#allocation9_spill]] %s9225_s20 }
  0x20   :  { %s9240_s24 = sld [smem:[%s12265_s0 + %s9097_s7]]   ;;  %s9101_s7 = smov 26  }
  0x21   :  { %s9245_s20 = sld [smem:[%s12265_s0 + %s9098_s15]]   ;;  %s9102_s15 = smov 27  }
  0x23   :  { %12290 = sst [smem:[#allocation10_spill]] %s9230_s27 }
  0x24   :  { %12291 = sst [smem:[#allocation11_spill]] %s9235_s4 }
  0x25   :  { %s9250_s27 = sld [smem:[%s12265_s0 + %s9099_s22]]   ;;  %s9103_s22 = smov 28  }
  0x26   :  { %12292 = sst [smem:[#allocation12_spill]] %s9240_s24 }
  0x27   :  { %12293 = sst [smem:[#allocation13_spill]] %s9245_s20 }
  0x28   :  { %s9255_s4 = sld [smem:[%s12265_s0 + %s9100_s28]]   ;;  %s9104_s28 = smov 29  }
  0x29   :  { %s9260_s24 = sld [smem:[%s12265_s0 + %s9101_s7]]   ;;  %s9105_s7 = smov 30  }
  0x2a   :  { %s9265_s20 = sld [smem:[%s12265_s0 + %s9102_s15]]   ;;  %s9106_s15 = smov 31  }
  0x2b   :  { %12294 = sst [smem:[#allocation14_spill]] %s9250_s27 }
  0x2c   :  { %s9270_s27 = sld [smem:[%s12265_s0 + %s9103_s22]]   ;;  %s9107_s22 = smov 32  }
  0x2e   :  { %12295 = sst [smem:[#allocation15_spill]] %s9255_s4 }
  0x2f   :  { %12296 = sst [smem:[#allocation16_spill]] %s9260_s24 }
  0x30   :  { %12297 = sst [smem:[#allocation17_spill]] %s9265_s20 }
  0x31   :  { %s9275_s4 = sld [smem:[%s12265_s0 + %s9104_s28]]   ;;  %s9108_s28 = smov 33  }
  0x32   :  { %12298 = sst [smem:[#allocation18_spill]] %s9270_s27 }
  0x33   :  { %s9280_s24 = sld [smem:[%s12265_s0 + %s9105_s7]]   ;;  %s9109_s7 = smov 34  }
  0x34   :  { %s9285_s20 = sld [smem:[%s12265_s0 + %s9106_s15]]   ;;  %s9110_s15 = smov 35  }
  0x35   :  { %s9290_s27 = sld [smem:[%s12265_s0 + %s9107_s22]]   ;;  %s9111_s22 = smov 36  }
  0x37   :  { %12299 = sst [smem:[#allocation19_spill]] %s9275_s4 }
  0x38   :  { %s9295_s4 = sld [smem:[%s12265_s0 + %s9108_s28]]   ;;  %s9112_s28 = smov 37  }
  0x39   :  { %12300 = sst [smem:[#allocation20_spill]] %s9280_s24 }
  0x3a   :  { %12301 = sst [smem:[#allocation21_spill]] %s9285_s20 }
  0x3b   :  { %12302 = sst [smem:[#allocation22_spill]] %s9290_s27 }
  0x3c   :  { %s9300_s24 = sld [smem:[%s12265_s0 + %s9109_s7]]   ;;  %s9113_s7 = smov 38  }
  0x3d   :  { %s9305_s20 = sld [smem:[%s12265_s0 + %s9110_s15]]   ;;  %s9114_s15 = smov 39  }
  0x3e   :  { %12303 = sst [smem:[#allocation23_spill]] %s9295_s4 }
  0x3f   :  { %s9310_s27 = sld [smem:[%s12265_s0 + %s9111_s22]]   ;;  %s9115_s22 = smov 40  }
  0x40   :  { %s9315_s4 = sld [smem:[%s12265_s0 + %s9112_s28]]   ;;  %s9116_s28 = smov 41  }
  0x42   :  { %12304 = sst [smem:[#allocation24_spill]] %s9300_s24 }
  0x43   :  { %12305 = sst [smem:[#allocation25_spill]] %s9305_s20 }
  0x44   :  { %s9320_s24 = sld [smem:[%s12265_s0 + %s9113_s7]]   ;;  %s9117_s7 = smov 42  }
  0x45   :  { %12306 = sst [smem:[#allocation26_spill]] %s9310_s27 }
  0x46   :  { %12307 = sst [smem:[#allocation27_spill]] %s9315_s4 }
  0x47   :  { %s9325_s20 = sld [smem:[%s12265_s0 + %s9114_s15]]   ;;  %s9118_s15 = smov 43  }
  0x48   :  { %s9330_s27 = sld [smem:[%s12265_s0 + %s9115_s22]]   ;;  %s9119_s22 = smov 44  }
  0x49   :  { %s9335_s4 = sld [smem:[%s12265_s0 + %s9116_s28]]   ;;  %s9352_s28 = smov 0  }
  0x4a   :  { %12308 = sst [smem:[#allocation28_spill]] %s9320_s24 }
  0x4b   :  { %s9340_s24 = sld [smem:[%s12265_s0 + %s9117_s7]]  }
  0x4d   :  { %12309 = sst [smem:[#allocation29_spill]] %s9325_s20 }
  0x4e   :  { %12310 = sst [smem:[#allocation30_spill]] %s9330_s27 }
  0x4f   :  { %s9345_s20 = sld [smem:[%s12265_s0 + %s9118_s15]]  }
  0x50   :  { %s9350_s27 = sld [smem:[%s12265_s0 + %s9119_s22]]  }
  0x51 LB: > { %s12311_s3 = sld [smem:[#allocation3_spill]]  ;;  %s7684_s1 = sadd.s32 4294967295, %s9074_s28   ;;  %s9074_s28 = sphi %s9352_s28, %s99_s28  }
  0x52   : > { %p7688_p0 = scmp.ge.s32.totalorder %s9074_s28, 1  ;;  %p1216_p1 = scmp.lt.s32.totalorder %s9074_s28, 3 }
  0x54   : > { %p1217_p2 = pnand %p7688_p0, %p1216_p1 }
  0x55   : > { %s12312_s5 = sld [smem:[#allocation2_spill]] (!%p1217_p2)  ;;  %p1324_p3 = scmp.lt.s32.totalorder (!%p1217_p2), %s7684_s1, 1 }
  0x56   : > { %1220 = sbr.rel (%p1217_p2) target bundleno = 5503 (0x157f), region = 196  ;;  %s12313_s11 = sld [smem:[#allocation5_spill]] (!%p1217_p2) }
  0x57   : > { %s12314_s15 = sld [smem:[#allocation8_spill]] (!%p1217_p2) }
  0x58   : > { %s12315_s16 = sld [smem:[#allocation6_spill]] (!%p1217_p2) }
  0x59   : > { %s12316_s18 = sld [smem:[#allocation7_spill]] (!%p1217_p2) }
  0x5a   : > { %s12317_s22 = sld [smem:[#allocation10_spill]] (!%p1217_p2) }
  0x5b   : > { %v1372_v0 = vld [vmem:[%s9140_s13 + $0x8] sm:$0xff]  ;;  %v9120_v1 = vmov 0.0   ;;  %v1371_v2 = vld [vmem:[%s9140_s13] sm:$0xff]  ;;  %vm9121_vm0 = vmmov 0   ;;  %s12341_s1 = smov (!%p1324_p3, %s7684_s1), 1  ;;  %v1502_v3 = vld [vmem:[%s9150_s21 + $0xf8] sm:$0xff]  ;;  %v1549_v17 = vlaneseq }
  0x5c   : > { %8273 = vmatprep.subr.mxu1 %v9120_v1  ;;  %8277 = vmatprep.mubr.msk.f32.mxu1 %vm9121_vm0, %v9120_v1  ;;  %s8916_s0 = smul.u32 24, %s12341_s1  ;;  %vm1380_vm1 = vcmask 130048   ;;  %v1501_v4 = vld [vmem:[%s9150_s21 + $0xf0] sm:$0xff]  ;;  %v1500_v6 = vld [vmem:[%s9150_s21 + $0xe8] sm:$0xff]  ;;  %v1499_v7 = vld [vmem:[%s9150_s21 + $0xe0] sm:$0xff]  ;;  %vm1574_vm2 = vcmask 392192  }
  0x5d   : > { %8274 = vmatpush3.msra.mxu1 %v1372_v0  ;;  %1712 = vmatprep.mubr.f32.mxu0 %v9120_v1  ;;  %v1498_v9 = vld [vmem:[%s9150_s21 + $0xd8] sm:$0xff]  ;;  %v1497_v10 = vld [vmem:[%s9150_s21 + $0xd0] sm:$0xff]  ;;  %v1496_v11 = vld [vmem:[%s9150_s21 + $0xc8] sm:$0xff]  ;;  %s8917_s7 = smul.u32 3, %s12341_s1  ;;  %v9394_v22 = vshrl.u32 %v1549_v17, 7  ;;  %vm1721_vm3 = vcmask 1046528  }
  0x5e   : > { %8275 = vmatprep.subr.mxu1 %v9120_v1  ;;  %s1328_s2 = scalar_lea.vmem %s12312_s5, %s8916_s0  ;;  %v1495_v12 = vld [vmem:[%s9150_s21 + $0xc0] sm:$0xff]  ;;  %v1494_v14 = vld [vmem:[%s9150_s21 + $0xb8] sm:$0xff]  ;;  %v1493_v15 = vld [vmem:[%s9150_s21 + $0xb0] sm:$0xff]  ;;  %vm1733_vm4 = vcmask 1044480   ;;  %vm1727_vm5 = vcmask 1045504   ;;  %vm1740_vm6 = vcmask 1043456  }
  0x5f   : > { %8276 = vmatpush3.msra.mxu1 %v1371_v2  ;;  %v1336_v5 = vld [vmem:[%s1328_s2] sm:$0xff]  ;;  %v1337_v8 = vld [vmem:[%s1328_s2 + $0x8] sm:$0xff]  ;;  %v1338_v13 = vld [vmem:[%s1328_s2 + $0x10] sm:$0x7]  ;;  %s1332_s10 = scalar_lea.vmem %s9135_s9, %s8917_s7  ;;  %v9408_v33 = vsub.s32 1, %v9394_v22  ;;  %v1559_v41 = vsub.s32 2, %v9394_v22 }
  0x60   : > { %1577 = vmatprep.subr.mxu1 %v1502_v3  ;;  %8278 = vmatmul.mubr.msk.f32.vlgmr.msra.gmra.mxu1 %vm1380_vm1, %v1336_v5  ;;  %v1492_v16 = vld [vmem:[%s9150_s21 + $0xa8] sm:$0xff]  ;;  %v1491_v18 = vld [vmem:[%s9150_s21 + $0xa0] sm:$0xff]  ;;  %v1490_v19 = vld [vmem:[%s9150_s21 + $0x98] sm:$0xff]  ;;  %vm1748_vm7 = vcmask 1042432   ;;  %vm1756_vm8 = vcmask 1041408   ;;  %s12318_s23 = sld [smem:[#allocation9_spill]] }
  0x61   : > { %8280 = vmatprep.mubr.msk.f32.mxu1 %vm9121_vm0, %v9120_v1  ;;  %1578 = vmatpush1.msra.mxu1 %v1501_v4  ;;  %v1489_v20 = vld [vmem:[%s9150_s21 + $0x90] sm:$0xff]  ;;  %v1488_v21 = vld [vmem:[%s9150_s21 + $0x88] sm:$0xff]  ;;  %v1487_v23 = vld [vmem:[%s9150_s21 + $0x80] sm:$0xff]  ;;  %s12319_s26 = sld [smem:[#allocation12_spill]]  ;;  %vm7185_vm9 = vcmask 1040384   ;;  %vm7579_vm10 = vcmask 778240  }
  0x62   : > { %1579 = vmatprep.subr.mxu1 %v1500_v6  ;;  %v1546_v24 = vld [vmem:[%s9150_s21 + $0x258] sm:$0xff]  ;;  %v1545_v26 = vld [vmem:[%s9150_s21 + $0x250] sm:$0xff]  ;;  %v1544_v27 = vld [vmem:[%s9150_s21 + $0x248] sm:$0xff]  ;;  %s12320_s0 = sld [smem:[#allocation4_spill]] }
  0x63   : > { %1580 = vmatpush1.msra.mxu1 %v1499_v7  ;;  %v1486_v25 = vld [vmem:[%s9150_s21 + $0x78] sm:$0xff]  ;;  %1668 = vmatprep.subr.mxu0 %v1546_v24  ;;  %v1485_v28 = vld [vmem:[%s9150_s21 + $0x70] sm:$0xff]  ;;  %v1543_v29 = vld [vmem:[%s9150_s21 + $0x240] sm:$0xff]  ;;  %s12321_s2 = sld [smem:[#allocation14_spill]] }
  0x64   : > { %8281 = vmatmul.mubr.msk.f32.gmra.mxu1 %vm1380_vm1, %v1337_v8  ;;  %1581 = vmatprep.subr.mxu1 %v1498_v9  ;;  %v1484_v30 = vld [vmem:[%s9150_s21 + $0x68] sm:$0xff]  ;;  %v1542_v31 = vld [vmem:[%s9150_s21 + $0x238] sm:$0xff]  ;;  %v1541_v32 = vld [vmem:[%s9150_s21 + $0x230] sm:$0xff]  ;;  %s12322_s7 = sld [smem:[#allocation13_spill]] }
  0x65   : > { %8283 = vmatprep.mubr.msk.f32.mxu1 %vm9121_vm0, %v9120_v1  ;;  %1582 = vmatpush1.msra.mxu1 %v1497_v10  ;;  %v1483_v34 = vld [vmem:[%s9150_s21 + $0x60] sm:$0xff]  ;;  %v1540_v35 = vld [vmem:[%s9150_s21 + $0x228] sm:$0xff]  ;;  %v1482_v36 = vld [vmem:[%s9150_s21 + $0x58] sm:$0xff]  ;;  %s12334_s5 = sld [smem:[#allocation28_spill]] }
  0x66   : > { %1583 = vmatprep.subr.mxu1 %v1496_v11  ;;  %1669 = vmatpush1.msra.mxu0 %v1545_v26  ;;  %v1539_v37 = vld [vmem:[%s9150_s21 + $0x220] sm:$0xff]  ;;  %v1481_v38 = vld [vmem:[%s9150_s21 + $0x50] sm:$0xff]  ;;  %v1538_v39 = vld [vmem:[%s9150_s21 + $0x218] sm:$0xff] }
  0x67   : > { %1584 = vmatpush1.msra.mxu1 %v1495_v12  ;;  %1670 = vmatprep.subr.mxu0 %v1544_v27  ;;  %v9416_v40 = vld [vmem:[%s1332_s10] sm:$0x7]  ;;  %v1480_v42 = vld [vmem:[%s9150_s21 + $0x48] sm:$0xff]  ;;  %v1537_v45 = vld [vmem:[%s9150_s21 + $0x210] sm:$0xff]  ;;  %s12323_s10 = sld [smem:[#allocation15_spill]] }
  0x68   : > { %8284 = vmatmul.mubr.msk.f32.gmra.mxu1 %vm1380_vm1, %v1338_v13  ;;  %1585 = vmatprep.subr.mxu1 %v1494_v14  ;;  %v1556_v43 = vrot.slane %v9416_v40, %v9408_v33  ;;  %v1479_v44 = vld [vmem:[%s9150_s21 + $0x40] sm:$0xff]  ;;  %v1478_v46 = vld [vmem:[%s9150_s21 + $0x38] sm:$0xff]  ;;  %v1536_v47 = vld [vmem:[%s9150_s21 + $0x208] sm:$0xff]  ;;  %v1560_v50 = vrot.slane %v9416_v40, %v1559_v41 }
  0x69   : > { %1586 = vmatpush1.msra.mxu1 %v1493_v15  ;;  %1671 = vmatpush1.msra.mxu0 %v1543_v29  ;;  %v1477_v48 = vld [vmem:[%s9150_s21 + $0x30] sm:$0xff]  ;;  %v1535_v49 = vld [vmem:[%s9150_s21 + $0x200] sm:$0xff]  ;;  %v1476_v51 = vld [vmem:[%s9150_s21 + $0x28] sm:$0xff] }
  0x6a   : > { %1587 = vmatprep.subr.mxu1 %v1492_v16  ;;  %1672 = vmatprep.subr.mxu0 %v1542_v31  ;;  %v1475_v52 = vld [vmem:[%s9150_s21 + $0x20] sm:$0xff]  ;;  %v1795_v53 = vld [vmem:[%s9170_s8 + $0xf8] sm:$0xff]  ;;  %v1794_v55 = vld [vmem:[%s9170_s8 + $0xf0] sm:$0xff] }
  0x6b   : > { %1588 = vmatpush1.msra.mxu1 %v1491_v18  ;;  %1673 = vmatpush1.msra.mxu0 %v1541_v32  ;;  %v1474_v54 = vld [vmem:[%s9150_s21 + $0x18] sm:$0xff]  ;;  %v1473_v56 = vld [vmem:[%s9150_s21 + $0x10] sm:$0xff]  ;;  %v1793_v57 = vld [vmem:[%s9170_s8 + $0xe8] sm:$0xff] }
  0x6c   : > { %1589 = vmatprep.subr.mxu1 %v1490_v19  ;;  %1674 = vmatprep.subr.mxu0 %v1540_v35  ;;  %v1472_v58 = vld [vmem:[%s9150_s21 + $0x8] sm:$0xff]  ;;  %v1792_v59 = vld [vmem:[%s9170_s8 + $0xe0] sm:$0xff]  ;;  %v1791_v61 = vld [vmem:[%s9170_s8 + $0xd8] sm:$0xff] }
  0x6d   : > { %1590 = vmatpush1.msra.mxu1 %v1489_v20  ;;  %1675 = vmatpush1.msra.mxu0 %v1539_v37  ;;  %v1471_v60 = vld [vmem:[%s9150_s21] sm:$0xff]  ;;  %v1534_v62 = vld [vmem:[%s9150_s21 + $0x1f8] sm:$0xff]  ;;  %v1790_v63 = vld [vmem:[%s9170_s8 + $0xd0] sm:$0xff] }
  0x6e   : > { %1591 = vmatprep.subr.mxu1 %v1488_v21  ;;  %1676 = vmatprep.subr.mxu0 %v1538_v39  ;;  %v1533_v0 = vld [vmem:[%s9150_s21 + $0x1f0] sm:$0xff]  ;;  %v1789_v2 = vld [vmem:[%s9170_s8 + $0xc8] sm:$0xff]  ;;  %v1788_v4 = vld [vmem:[%s9170_s8 + $0xc0] sm:$0xff] }
  0x6f   : > { %1592 = vmatpush1.msra.mxu1 %v1487_v23  ;;  %1641 = vmatprep.mubr.f32.mxu1 %v1556_v43  ;;  %v1532_v3 = vld [vmem:[%s9150_s21 + $0x1e8] sm:$0xff]  ;;  %v1531_v5 = vld [vmem:[%s9150_s21 + $0x1e0] sm:$0xff]  ;;  %v1787_v6 = vld [vmem:[%s9170_s8 + $0xb8] sm:$0xff] }
  0x70   : > { %1593 = vmatprep.subr.mxu1 %v1486_v25  ;;  %1677 = vmatpush1.msra.mxu0 %v1537_v45  ;;  %v1530_v7 = vld [vmem:[%s9150_s21 + $0x1d8] sm:$0xff]  ;;  %v1786_v8 = vld [vmem:[%s9170_s8 + $0xb0] sm:$0xff]  ;;  %v1785_v10 = vld [vmem:[%s9170_s8 + $0xa8] sm:$0xff] }
  0x71   : > { %1594 = vmatpush1.msra.mxu1 %v1485_v28  ;;  %1678 = vmatprep.subr.mxu0 %v1536_v47  ;;  %v1529_v9 = vld [vmem:[%s9150_s21 + $0x1d0] sm:$0xff]  ;;  %v1528_v11 = vld [vmem:[%s9150_s21 + $0x1c8] sm:$0xff]  ;;  %v1784_v12 = vld [vmem:[%s9170_s8 + $0xa0] sm:$0xff] }
  0x72   : > { %1595 = vmatprep.subr.mxu1 %v1484_v30  ;;  %1679 = vmatpush1.msra.mxu0 %v1535_v49  ;;  %v1527_v13 = vld [vmem:[%s9150_s21 + $0x1c0] sm:$0xff]  ;;  %v1783_v14 = vld [vmem:[%s9170_s8 + $0x98] sm:$0xff]  ;;  %v1782_v16 = vld [vmem:[%s9170_s8 + $0x90] sm:$0xff] }
  0x73   : > { %1596 = vmatpush1.msra.mxu1 %v1483_v34  ;;  %7694 = vmatmul.mubr.msk.f32.vlgmr.msra.gmra.mxu0 %vm1574_vm2, %v1560_v50  ;;  %v1526_v15 = vld [vmem:[%s9150_s21 + $0x1b8] sm:$0xff]  ;;  %v1525_v17 = vld [vmem:[%s9150_s21 + $0x1b0] sm:$0xff]  ;;  %v1781_v18 = vld [vmem:[%s9170_s8 + $0x88] sm:$0xff] }
  0x74   : > { %1597 = vmatprep.subr.mxu1 %v1482_v36  ;;  %2000 = vmatprep.subr.mxu0 %v1795_v53  ;;  %v1524_v19 = vld [vmem:[%s9150_s21 + $0x1a8] sm:$0xff]  ;;  %v1780_v20 = vld [vmem:[%s9170_s8 + $0x80] sm:$0xff]  ;;  %v1779_v23 = vld [vmem:[%s9170_s8 + $0x78] sm:$0xff] }
  0x75   : > { %1598 = vmatpush1.msra.mxu1 %v1481_v38  ;;  %2001 = vmatpush1.msra.mxu0 %v1794_v55  ;;  %v1523_v21 = vld [vmem:[%s9150_s21 + $0x1a0] sm:$0xff]  ;;  %v1522_v24 = vld [vmem:[%s9150_s21 + $0x198] sm:$0xff]  ;;  %v1778_v25 = vld [vmem:[%s9170_s8 + $0x70] sm:$0xff] }
  0x76   : > { %1599 = vmatprep.subr.mxu1 %v1480_v42  ;;  %2002 = vmatprep.subr.mxu0 %v1793_v57  ;;  %v1521_v26 = vld [vmem:[%s9150_s21 + $0x190] sm:$0xff]  ;;  %v1777_v27 = vld [vmem:[%s9170_s8 + $0x68] sm:$0xff]  ;;  %v1776_v29 = vld [vmem:[%s9170_s8 + $0x60] sm:$0xff]  ;;  %v9496_v57 = vsub.s32 0, %v9394_v22 }
  0x77   : > { %1600 = vmatpush1.msra.mxu1 %v1479_v44  ;;  %2003 = vmatpush1.msra.mxu0 %v1792_v59  ;;  %v1520_v28 = vld [vmem:[%s9150_s21 + $0x188] sm:$0xff]  ;;  %v1519_v30 = vld [vmem:[%s9150_s21 + $0x180] sm:$0xff]  ;;  %v1775_v31 = vld [vmem:[%s9170_s8 + $0x58] sm:$0xff] }
  0x78   : > { %1601 = vmatprep.subr.mxu1 %v1478_v46  ;;  %2004 = vmatprep.subr.mxu0 %v1791_v61  ;;  %v1518_v32 = vld [vmem:[%s9150_s21 + $0x178] sm:$0xff]  ;;  %v1774_v34 = vld [vmem:[%s9170_s8 + $0x50] sm:$0xff]  ;;  %v1773_v36 = vld [vmem:[%s9170_s8 + $0x48] sm:$0xff] }
  0x79   : > { %1602 = vmatpush1.msra.mxu1 %v1477_v48  ;;  %2005 = vmatpush1.msra.mxu0 %v1790_v63  ;;  %v1517_v35 = vld [vmem:[%s9150_s21 + $0x170] sm:$0xff]  ;;  %v1516_v37 = vld [vmem:[%s9150_s21 + $0x168] sm:$0xff]  ;;  %v1772_v38 = vld [vmem:[%s9170_s8 + $0x40] sm:$0xff] }
  0x7a   : > { %1603 = vmatprep.subr.mxu1 %v1476_v51  ;;  %2006 = vmatprep.subr.mxu0 %v1789_v2  ;;  %v1515_v39 = vld [vmem:[%s9150_s21 + $0x160] sm:$0xff]  ;;  %v1771_v41 = vld [vmem:[%s9170_s8 + $0x38] sm:$0xff]  ;;  %v1770_v43 = vld [vmem:[%s9170_s8 + $0x30] sm:$0xff]  ;;  %v1552_v2 = vrot.slane %v9416_v40, %v9496_v57 }
  0x7b   : > { %1604 = vmatpush1.msra.mxu1 %v1475_v52  ;;  %2007 = vmatpush1.msra.mxu0 %v1788_v4  ;;  %v1514_v42 = vld [vmem:[%s9150_s21 + $0x158] sm:$0xff]  ;;  %v1513_v44 = vld [vmem:[%s9150_s21 + $0x150] sm:$0xff]  ;;  %v1769_v45 = vld [vmem:[%s9170_s8 + $0x28] sm:$0xff] }
  0x7c   : > { %1605 = vmatprep.subr.mxu1 %v1474_v54  ;;  %2008 = vmatprep.subr.mxu0 %v1787_v6  ;;  %v1512_v46 = vld [vmem:[%s9150_s21 + $0x148] sm:$0xff]  ;;  %v1768_v47 = vld [vmem:[%s9170_s8 + $0x20] sm:$0xff]  ;;  %v1767_v49 = vld [vmem:[%s9170_s8 + $0x18] sm:$0xff] }
  0x7d   : > { %1606 = vmatpush1.msra.mxu1 %v1473_v56  ;;  %2009 = vmatpush1.msra.mxu0 %v1786_v8  ;;  %v1511_v48 = vld [vmem:[%s9150_s21 + $0x140] sm:$0xff]  ;;  %v1510_v50 = vld [vmem:[%s9150_s21 + $0x138] sm:$0xff]  ;;  %v1766_v51 = vld [vmem:[%s9170_s8 + $0x10] sm:$0xff] }
  0x7e   : > { %1607 = vmatprep.subr.mxu1 %v1472_v58  ;;  %2010 = vmatprep.subr.mxu0 %v1785_v10  ;;  %v1509_v52 = vld [vmem:[%s9150_s21 + $0x130] sm:$0xff]  ;;  %v1765_v53 = vld [vmem:[%s9170_s8 + $0x8] sm:$0xff]  ;;  %v1764_v55 = vld [vmem:[%s9170_s8] sm:$0xff] }
  0x7f   : > { %1608 = vmatpush1.msra.mxu1 %v1471_v60  ;;  %2011 = vmatpush1.msra.mxu0 %v1784_v12  ;;  %v1508_v54 = vld [vmem:[%s9150_s21 + $0x128] sm:$0xff]  ;;  %v1507_v56 = vld [vmem:[%s9150_s21 + $0x120] sm:$0xff]  ;;  %v1827_v58 = vld [vmem:[%s9170_s8 + $0x1f8] sm:$0xff] }
  0x80   : > { %1609 = vmatprep.subr.mxu1 %v1534_v62  ;;  %2012 = vmatprep.subr.mxu0 %v1783_v14  ;;  %v1506_v59 = vld [vmem:[%s9150_s21 + $0x118] sm:$0xff]  ;;  %v1826_v60 = vld [vmem:[%s9170_s8 + $0x1f0] sm:$0xff]  ;;  %v1825_v62 = vld [vmem:[%s9170_s8 + $0x1e8] sm:$0xff] }
  0x81   : > { %1610 = vmatpush2.msra.mxu1 %v1533_v0  ;;  %2013 = vmatpush1.msra.mxu0 %v1782_v16  ;;  %v1505_v61 = vld [vmem:[%s9150_s21 + $0x110] sm:$0xff]  ;;  %v1504_v63 = vld [vmem:[%s9150_s21 + $0x108] sm:$0xff]  ;;  %v1824_v22 = vld [vmem:[%s9170_s8 + $0x1e0] sm:$0xff] }
  0x82   : > { %1611 = vmatprep.subr.mxu1 %v1532_v3  ;;  %2014 = vmatprep.subr.mxu0 %v1781_v18  ;;  %v1503_v0 = vld [vmem:[%s9150_s21 + $0x100] sm:$0xff]  ;;  %v1823_v3 = vld [vmem:[%s9170_s8 + $0x1d8] sm:$0xff]  ;;  %v1822_v6 = vld [vmem:[%s9170_s8 + $0x1d0] sm:$0xff] }
  0x83   : > { %1612 = vmatpush2.msra.mxu1 %v1531_v5  ;;  %2015 = vmatpush1.msra.mxu0 %v1780_v20  ;;  %v1859_v4 = vld [vmem:[%s9170_s8 + $0x2f8] sm:$0xff]  ;;  %v1858_v5 = vld [vmem:[%s9170_s8 + $0x2f0] sm:$0xff]  ;;  %v1821_v40 = vld [vmem:[%s9170_s8 + $0x1c8] sm:$0xff] }
  0x84   : > { %1613 = vmatprep.subr.mxu1 %v1530_v7  ;;  %2016 = vmatprep.subr.mxu0 %v1779_v23  ;;  %v1857_v7 = vld [vmem:[%s9170_s8 + $0x2e8] sm:$0xff]  ;;  %v1856_v8 = vld [vmem:[%s9170_s8 + $0x2e0] sm:$0xff]  ;;  %v1855_v10 = vld [vmem:[%s9170_s8 + $0x2d8] sm:$0xff] }
  0x85   : > { %1614 = vmatpush2.msra.mxu1 %v1529_v9  ;;  %2017 = vmatpush1.msra.mxu0 %v1778_v25  ;;  %v1820_v9 = vld [vmem:[%s9170_s8 + $0x1c0] sm:$0xff]  ;;  %v1854_v12 = vld [vmem:[%s9170_s8 + $0x2d0] sm:$0xff]  ;;  %v1853_v14 = vld [vmem:[%s9170_s8 + $0x2c8] sm:$0xff] }
  0x86   : > { %1615 = vmatprep.subr.mxu1 %v1528_v11  ;;  %2018 = vmatprep.subr.mxu0 %v1777_v27  ;;  %v1819_v11 = vld [vmem:[%s9170_s8 + $0x1b8] sm:$0xff]  ;;  %v1852_v16 = vld [vmem:[%s9170_s8 + $0x2c0] sm:$0xff]  ;;  %v1850_v20 = vld [vmem:[%s9170_s8 + $0x2b0] sm:$0xff] }
  0x87   : > { %1616 = vmatpush2.msra.mxu1 %v1527_v13  ;;  %2019 = vmatpush1.msra.mxu0 %v1776_v29  ;;  %v1818_v13 = vld [vmem:[%s9170_s8 + $0x1b0] sm:$0xff]  ;;  %v1851_v18 = vld [vmem:[%s9170_s8 + $0x2b8] sm:$0xff]  ;;  %v1849_v23 = vld [vmem:[%s9170_s8 + $0x2a8] sm:$0xff] }
  0x88   : > { %1617 = vmatprep.subr.mxu1 %v1526_v15  ;;  %2020 = vmatprep.subr.mxu0 %v1775_v31  ;;  %v1817_v15 = vld [vmem:[%s9170_s8 + $0x1a8] sm:$0xff]  ;;  %v1848_v25 = vld [vmem:[%s9170_s8 + $0x2a0] sm:$0xff]  ;;  %v1847_v27 = vld [vmem:[%s9170_s8 + $0x298] sm:$0xff] }
  0x89   : > { %1618 = vmatpush2.msra.mxu1 %v1525_v17  ;;  %2021 = vmatpush1.msra.mxu0 %v1774_v34  ;;  %v1816_v17 = vld [vmem:[%s9170_s8 + $0x1a0] sm:$0xff]  ;;  %v1846_v29 = vld [vmem:[%s9170_s8 + $0x290] sm:$0xff]  ;;  %v1845_v31 = vld [vmem:[%s9170_s8 + $0x288] sm:$0xff] }
  0x8a   : > { %1619 = vmatprep.subr.mxu1 %v1524_v19  ;;  %2022 = vmatprep.subr.mxu0 %v1773_v36  ;;  %v1815_v19 = vld [vmem:[%s9170_s8 + $0x198] sm:$0xff]  ;;  %v1844_v34 = vld [vmem:[%s9170_s8 + $0x280] sm:$0xff] }
  0x8b   : > { %1620 = vmatpush2.msra.mxu1 %v1523_v21  ;;  %2023 = vmatpush1.msra.mxu0 %v1772_v38  ;;  %v1814_v21 = vld [vmem:[%s9170_s8 + $0x190] sm:$0xff]  ;;  %v1843_v36 = vld [vmem:[%s9170_s8 + $0x278] sm:$0xff] }
  0x8c   : > { %1621 = vmatprep.subr.mxu1 %v1522_v24  ;;  %2024 = vmatprep.subr.mxu0 %v1771_v41  ;;  %v1813_v24 = vld [vmem:[%s9170_s8 + $0x188] sm:$0xff]  ;;  %v1842_v38 = vld [vmem:[%s9170_s8 + $0x270] sm:$0xff] }
  0x8d   : > { %1622 = vmatpush2.msra.mxu1 %v1521_v26  ;;  %2025 = vmatpush1.msra.mxu0 %v1770_v43  ;;  %v1812_v26 = vld [vmem:[%s9170_s8 + $0x180] sm:$0xff]  ;;  %v1841_v41 = vld [vmem:[%s9170_s8 + $0x268] sm:$0xff] }
  0x8e   : > { %1623 = vmatprep.subr.mxu1 %v1520_v28  ;;  %2026 = vmatprep.subr.mxu0 %v1769_v45  ;;  %v1811_v28 = vld [vmem:[%s9170_s8 + $0x178] sm:$0xff]  ;;  %v1840_v43 = vld [vmem:[%s9170_s8 + $0x260] sm:$0xff] }
  0x8f   : > { %1624 = vmatpush2.msra.mxu1 %v1519_v30  ;;  %2027 = vmatpush1.msra.mxu0 %v1768_v47  ;;  %v1810_v30 = vld [vmem:[%s9170_s8 + $0x170] sm:$0xff]  ;;  %v1839_v45 = vld [vmem:[%s9170_s8 + $0x258] sm:$0xff] }
  0x90   : > { %1625 = vmatprep.subr.mxu1 %v1518_v32  ;;  %2028 = vmatprep.subr.mxu0 %v1767_v49  ;;  %v1809_v32 = vld [vmem:[%s9170_s8 + $0x168] sm:$0xff]  ;;  %v1838_v47 = vld [vmem:[%s9170_s8 + $0x250] sm:$0xff] }
  0x91   : > { %1626 = vmatpush2.msra.mxu1 %v1517_v35  ;;  %2029 = vmatpush1.msra.mxu0 %v1766_v51  ;;  %v1808_v35 = vld [vmem:[%s9170_s8 + $0x160] sm:$0xff]  ;;  %v1837_v49 = vld [vmem:[%s9170_s8 + $0x248] sm:$0xff] }
  0x92   : > { %1627 = vmatprep.subr.mxu1 %v1516_v37  ;;  %2030 = vmatprep.subr.mxu0 %v1765_v53  ;;  %v1807_v37 = vld [vmem:[%s9170_s8 + $0x158] sm:$0xff]  ;;  %v1836_v51 = vld [vmem:[%s9170_s8 + $0x240] sm:$0xff] }
  0x93   : > { %1628 = vmatpush2.msra.mxu1 %v1515_v39  ;;  %2031 = vmatpush1.msra.mxu0 %v1764_v55  ;;  %v1806_v39 = vld [vmem:[%s9170_s8 + $0x150] sm:$0xff]  ;;  %v1835_v53 = vld [vmem:[%s9170_s8 + $0x238] sm:$0xff] }
  0x94   : > { %1629 = vmatprep.subr.mxu1 %v1514_v42  ;;  %2032 = vmatprep.subr.mxu0 %v1827_v58  ;;  %v1805_v42 = vld [vmem:[%s9170_s8 + $0x148] sm:$0xff]  ;;  %v1834_v55 = vld [vmem:[%s9170_s8 + $0x230] sm:$0xff] }
  0x95   : > { %1630 = vmatpush2.msra.mxu1 %v1513_v44  ;;  %2033 = vmatpush2.msra.mxu0 %v1826_v60  ;;  %v1804_v44 = vld [vmem:[%s9170_s8 + $0x140] sm:$0xff]  ;;  %v1833_v58 = vld [vmem:[%s9170_s8 + $0x228] sm:$0xff] }
  0x96   : > { %1631 = vmatprep.subr.mxu1 %v1512_v46  ;;  %2034 = vmatprep.subr.mxu0 %v1825_v62  ;;  %v1803_v46 = vld [vmem:[%s9170_s8 + $0x138] sm:$0xff]  ;;  %v1832_v60 = vld [vmem:[%s9170_s8 + $0x220] sm:$0xff] }
  0x97   : > { %1632 = vmatpush2.msra.mxu1 %v1511_v48  ;;  %2035 = vmatpush2.msra.mxu0 %v1824_v22  ;;  %v1802_v48 = vld [vmem:[%s9170_s8 + $0x130] sm:$0xff]  ;;  %v1831_v62 = vld [vmem:[%s9170_s8 + $0x218] sm:$0xff] }
  0x98   : > { %1633 = vmatprep.subr.mxu1 %v1510_v50  ;;  %2036 = vmatprep.subr.mxu0 %v1823_v3  ;;  %v1801_v50 = vld [vmem:[%s9170_s8 + $0x128] sm:$0xff]  ;;  %v1830_v22 = vld [vmem:[%s9170_s8 + $0x210] sm:$0xff]  ;;  %v1891_v3 = vld [vmem:[%s9170_s8 + $0x3f8] sm:$0xff] }
  0x99   : > { %1634 = vmatpush2.msra.mxu1 %v1509_v52  ;;  %2037 = vmatpush2.msra.mxu0 %v1822_v6  ;;  %v1800_v52 = vld [vmem:[%s9170_s8 + $0x120] sm:$0xff] }
  0x9a   : > { %1635 = vmatprep.subr.mxu1 %v1508_v54  ;;  %2038 = vmatprep.subr.mxu0 %v1821_v40  ;;  %v1799_v54 = vld [vmem:[%s9170_s8 + $0x118] sm:$0xff]  ;;  %v1888_v6 = vld [vmem:[%s9170_s8 + $0x3e0] sm:$0xff]  ;;  %v1886_v40 = vld [vmem:[%s9170_s8 + $0x3d0] sm:$0xff] }
  0x9b   : > { %1636 = vmatpush2.msra.mxu1 %v1507_v56  ;;  %2039 = vmatpush2.msra.mxu0 %v1820_v9  ;;  %v1798_v56 = vld [vmem:[%s9170_s8 + $0x110] sm:$0xff]  ;;  %v1884_v9 = vld [vmem:[%s9170_s8 + $0x3c0] sm:$0xff] }
  0x9c   : > { %1637 = vmatprep.subr.mxu1 %v1506_v59  ;;  %2040 = vmatprep.subr.mxu0 %v1819_v11  ;;  %v1797_v59 = vld [vmem:[%s9170_s8 + $0x108] sm:$0xff]  ;;  %v1882_v11 = vld [vmem:[%s9170_s8 + $0x3b0] sm:$0xff] }
  0x9d   : > { %1638 = vmatpush2.msra.mxu1 %v1505_v61  ;;  %2041 = vmatpush2.msra.mxu0 %v1818_v13  ;;  %v1796_v61 = vld [vmem:[%s9170_s8 + $0x100] sm:$0xff] }
  0x9e   : > { %1639 = vmatprep.subr.mxu1 %v1504_v63  ;;  %2042 = vmatprep.subr.mxu0 %v1817_v15  ;;  %v1923_v63 = vld [vmem:[%s9170_s8 + $0x4f8] sm:$0xff]  ;;  %v1880_v13 = vld [vmem:[%s9170_s8 + $0x3a0] sm:$0xff]  ;;  %v1878_v15 = vld [vmem:[%s9170_s8 + $0x390] sm:$0xff] }
  0x9f   : > { %1640 = vmatpush2.msra.mxu1 %v1503_v0  ;;  %2043 = vmatpush2.msra.mxu0 %v1816_v17  ;;  %v1829_v0 = vld [vmem:[%s9170_s8 + $0x208] sm:$0xff]  ;;  %v1876_v17 = vld [vmem:[%s9170_s8 + $0x380] sm:$0xff] }
  0xa0   : > { %1642 = vmatmul.mubr.f32.vlgmr.msra.gmra.mxu1 %v1552_v2  ;;  %2077 = vmatprep.subr.mxu1 %v1859_v4  ;;  %v1828_v2 = vld [vmem:[%s9170_s8 + $0x200] sm:$0xff]  ;;  %v1890_v4 = vld [vmem:[%s9170_s8 + $0x3f0] sm:$0xff] }
  0xa1   : > { %2078 = vmatpush1.msra.mxu1 %v1858_v5  ;;  %2044 = vmatprep.subr.mxu0 %v1815_v19  ;;  %v1889_v5 = vld [vmem:[%s9170_s8 + $0x3e8] sm:$0xff]  ;;  %v1874_v19 = vld [vmem:[%s9170_s8 + $0x370] sm:$0xff] }
  0xa2   : > { %2079 = vmatprep.subr.mxu1 %v1857_v7  ;;  %2045 = vmatpush2.msra.mxu0 %v1814_v21  ;;  %v1887_v7 = vld [vmem:[%s9170_s8 + $0x3d8] sm:$0xff]  ;;  %v1872_v21 = vld [vmem:[%s9170_s8 + $0x360] sm:$0xff] }
  0xa3   : > { %2080 = vmatpush1.msra.mxu1 %v1856_v8  ;;  %2046 = vmatprep.subr.mxu0 %v1813_v24  ;;  %v1885_v8 = vld [vmem:[%s9170_s8 + $0x3c8] sm:$0xff]  ;;  %v1870_v24 = vld [vmem:[%s9170_s8 + $0x350] sm:$0xff] }
  0xa4   : > { %2081 = vmatprep.subr.mxu1 %v1855_v10  ;;  %2047 = vmatpush2.msra.mxu0 %v1812_v26  ;;  %v1883_v10 = vld [vmem:[%s9170_s8 + $0x3b8] sm:$0xff]  ;;  %v1868_v26 = vld [vmem:[%s9170_s8 + $0x340] sm:$0xff] }
  0xa5   : > { %2082 = vmatpush1.msra.mxu1 %v1854_v12  ;;  %2048 = vmatprep.subr.mxu0 %v1811_v28  ;;  %v1881_v12 = vld [vmem:[%s9170_s8 + $0x3a8] sm:$0xff]  ;;  %v1866_v28 = vld [vmem:[%s9170_s8 + $0x330] sm:$0xff] }
  0xa6   : > { %2083 = vmatprep.subr.mxu1 %v1853_v14  ;;  %2049 = vmatpush2.msra.mxu0 %v1810_v30  ;;  %v1879_v14 = vld [vmem:[%s9170_s8 + $0x398] sm:$0xff]  ;;  %v1864_v30 = vld [vmem:[%s9170_s8 + $0x320] sm:$0xff] }
  0xa7   : > { %2084 = vmatpush1.msra.mxu1 %v1852_v16  ;;  %2050 = vmatprep.subr.mxu0 %v1809_v32  ;;  %v1877_v16 = vld [vmem:[%s9170_s8 + $0x388] sm:$0xff]  ;;  %v1862_v32 = vld [vmem:[%s9170_s8 + $0x310] sm:$0xff] }
  0xa8   : > { %2085 = vmatprep.subr.mxu1 %v1851_v18  ;;  %2051 = vmatpush2.msra.mxu0 %v1808_v35  ;;  %v1875_v18 = vld [vmem:[%s9170_s8 + $0x378] sm:$0xff]  ;;  %v1860_v35 = vld [vmem:[%s9170_s8 + $0x300] sm:$0xff] }
  0xa9   : > { %2086 = vmatpush1.msra.mxu1 %v1850_v20  ;;  %2052 = vmatprep.subr.mxu0 %v1807_v37  ;;  %v1873_v20 = vld [vmem:[%s9170_s8 + $0x368] sm:$0xff]  ;;  %v9603_v37 = vld [vmem:[%s9145_s17] ss:$0 sm:$0xff] }
  0xaa   : > { %2087 = vmatprep.subr.mxu1 %v1849_v23  ;;  %2053 = vmatpush2.msra.mxu0 %v1806_v39  ;;  %v1871_v23 = vld [vmem:[%s9170_s8 + $0x358] sm:$0xff] }
  0xab   : > { %2088 = vmatpush1.msra.mxu1 %v1848_v25  ;;  %2054 = vmatprep.subr.mxu0 %v1805_v42  ;;  %v1869_v25 = vld [vmem:[%s9170_s8 + $0x348] sm:$0xff] }
  0xac   : > { %2089 = vmatprep.subr.mxu1 %v1847_v27  ;;  %2055 = vmatpush2.msra.mxu0 %v1804_v44  ;;  %v1867_v27 = vld [vmem:[%s9170_s8 + $0x338] sm:$0xff] }
  0xad   : > { %2090 = vmatpush1.msra.mxu1 %v1846_v29  ;;  %2056 = vmatprep.subr.mxu0 %v1803_v46  ;;  %v1865_v29 = vld [vmem:[%s9170_s8 + $0x328] sm:$0xff] }
  0xae   : > { %2091 = vmatprep.subr.mxu1 %v1845_v31  ;;  %2057 = vmatpush2.msra.mxu0 %v1802_v48  ;;  %v1863_v31 = vld [vmem:[%s9170_s8 + $0x318] sm:$0xff] }
  0xaf   : > { %2092 = vmatpush1.msra.mxu1 %v1844_v34  ;;  %2058 = vmatprep.subr.mxu0 %v1801_v50  ;;  %v1861_v34 = vld [vmem:[%s9170_s8 + $0x308] sm:$0xff] }
  0xb0   : > { %2093 = vmatprep.subr.mxu1 %v1843_v36  ;;  %2059 = vmatpush2.msra.mxu0 %v1800_v52  ;;  %v1987_v36 = vld [vmem:[%s9170_s8 + $0x6f8] sm:$0xff] }
  0xb1   : > { %2094 = vmatpush1.msra.mxu1 %v1842_v38  ;;  %2060 = vmatprep.subr.mxu0 %v1799_v54 }
  0xb2   : > { %2095 = vmatprep.subr.mxu1 %v1841_v41  ;;  %2061 = vmatpush2.msra.mxu0 %v1798_v56 }
  0xb3   : > { %2096 = vmatpush1.msra.mxu1 %v1840_v43  ;;  %2062 = vmatprep.subr.mxu0 %v1797_v59  ;;  %v1986_v59 = vld [vmem:[%s9170_s8 + $0x6f0] sm:$0xff] }
  0xb4   : > { %2097 = vmatprep.subr.mxu1 %v1839_v45  ;;  %2063 = vmatpush2.msra.mxu0 %v1796_v61 }
  0xb5   : > { %2098 = vmatpush1.msra.mxu1 %v1838_v47  ;;  %2154 = vmatprep.subr.mxu0 %v1923_v63  ;;  %v1985_v63 = vld [vmem:[%s9170_s8 + $0x6e8] sm:$0xff] }
  0xb6   : > { %2099 = vmatprep.subr.mxu1 %v1837_v49 }
  0xb7   : > { %2100 = vmatpush1.msra.mxu1 %v1836_v51 }
  0xb8   : > { %2101 = vmatprep.subr.mxu1 %v1835_v53 }
  0xb9   : > { %2102 = vmatpush1.msra.mxu1 %v1834_v55 }
  0xba   : > { %2103 = vmatprep.subr.mxu1 %v1833_v58  ;;  %v1922_v58 = vld [vmem:[%s9170_s8 + $0x4f0] sm:$0xff] }
  0xbb   : > { %2104 = vmatpush1.msra.mxu1 %v1832_v60 }
  0xbc   : > { %2105 = vmatprep.subr.mxu1 %v1831_v62  ;;  %v1921_v62 = vld [vmem:[%s9170_s8 + $0x4e8] sm:$0xff] }
  0xbd   : > { %2106 = vmatpush1.msra.mxu1 %v1830_v22  ;;  %v1920_v22 = vld [vmem:[%s9170_s8 + $0x4e0] sm:$0xff] }
  0xbe   : > { %2107 = vmatprep.subr.mxu1 %v1829_v0  ;;  %v1984_v0 = vld [vmem:[%s9170_s8 + $0x6e0] sm:$0xff] }
  0xbf   : > { %2108 = vmatpush1.msra.mxu1 %v1828_v2  ;;  %v1919_v2 = vld [vmem:[%s9170_s8 + $0x4d8] sm:$0xff] }
  0xc0   : > { %2109 = vmatprep.subr.mxu1 %v1891_v3  ;;  %v1983_v3 = vld [vmem:[%s9170_s8 + $0x6d8] sm:$0xff] }
  0xc1   : > { %2110 = vmatpush2.msra.mxu1 %v1890_v4 }
  0xc2   : > { %2111 = vmatprep.subr.mxu1 %v1889_v5  ;;  %v1918_v5 = vld [vmem:[%s9170_s8 + $0x4d0] sm:$0xff] }
  0xc3   : > { %2112 = vmatpush2.msra.mxu1 %v1888_v6  ;;  %v1982_v6 = vld [vmem:[%s9170_s8 + $0x6d0] sm:$0xff] }
  0xc4   : > { %2113 = vmatprep.subr.mxu1 %v1887_v7  ;;  %v1917_v7 = vld [vmem:[%s9170_s8 + $0x4c8] sm:$0xff] }
  0xc5   : > { %2114 = vmatpush2.msra.mxu1 %v1886_v40 }
  0xc6   : > { %2115 = vmatprep.subr.mxu1 %v1885_v8  ;;  %v1981_v8 = vld [vmem:[%s9170_s8 + $0x6c8] sm:$0xff] }
  0xc7   : > { %2116 = vmatpush2.msra.mxu1 %v1884_v9  ;;  %v1916_v9 = vld [vmem:[%s9170_s8 + $0x4c0] sm:$0xff] }
  0xc8   : > { %2117 = vmatprep.subr.mxu1 %v1883_v10 }
  0xc9   : > { %2118 = vmatpush2.msra.mxu1 %v1882_v11  ;;  %v1980_v11 = vld [vmem:[%s9170_s8 + $0x6c0] sm:$0xff] }
  0xca   : > { %2119 = vmatprep.subr.mxu1 %v1881_v12  ;;  %v1915_v12 = vld [vmem:[%s9170_s8 + $0x4b8] sm:$0xff] }
  0xcb   : > { %2120 = vmatpush2.msra.mxu1 %v1880_v13  ;;  %v1979_v13 = vld [vmem:[%s9170_s8 + $0x6b8] sm:$0xff] }
  0xcc   : > { %2121 = vmatprep.subr.mxu1 %v1879_v14  ;;  %v1914_v14 = vld [vmem:[%s9170_s8 + $0x4b0] sm:$0xff] }
  0xcd   : > { %2122 = vmatpush2.msra.mxu1 %v1878_v15  ;;  %v1978_v15 = vld [vmem:[%s9170_s8 + $0x6b0] sm:$0xff] }
  0xce   : > { %2123 = vmatprep.subr.mxu1 %v1877_v16  ;;  %v1913_v16 = vld [vmem:[%s9170_s8 + $0x4a8] sm:$0xff] }
  0xcf   : > { %2124 = vmatpush2.msra.mxu1 %v1876_v17  ;;  %v1977_v17 = vld [vmem:[%s9170_s8 + $0x6a8] sm:$0xff] }
  0xd0   : > { %2125 = vmatprep.subr.mxu1 %v1875_v18  ;;  %v1912_v18 = vld [vmem:[%s9170_s8 + $0x4a0] sm:$0xff] }
  0xd1   : > { %2126 = vmatpush2.msra.mxu1 %v1874_v19  ;;  %v1976_v19 = vld [vmem:[%s9170_s8 + $0x6a0] sm:$0xff] }
  0xd2   : > { %2127 = vmatprep.subr.mxu1 %v1873_v20  ;;  %v1911_v20 = vld [vmem:[%s9170_s8 + $0x498] sm:$0xff] }
  0xd3   : > { %2128 = vmatpush2.msra.mxu1 %v1872_v21  ;;  %v1975_v21 = vld [vmem:[%s9170_s8 + $0x698] sm:$0xff] }
  0xd4   : > { %2129 = vmatprep.subr.mxu1 %v1871_v23  ;;  %v1910_v23 = vld [vmem:[%s9170_s8 + $0x490] sm:$0xff] }
  0xd5   : > { %2130 = vmatpush2.msra.mxu1 %v1870_v24  ;;  %v1974_v24 = vld [vmem:[%s9170_s8 + $0x690] sm:$0xff] }
  0xd6   : > { %2131 = vmatprep.subr.mxu1 %v1869_v25  ;;  %v1909_v25 = vld [vmem:[%s9170_s8 + $0x488] sm:$0xff] }
  0xd7   : > { %2132 = vmatpush2.msra.mxu1 %v1868_v26  ;;  %v1973_v26 = vld [vmem:[%s9170_s8 + $0x688] sm:$0xff] }
  0xd8   : > { %2133 = vmatprep.subr.mxu1 %v1867_v27  ;;  %v1908_v27 = vld [vmem:[%s9170_s8 + $0x480] sm:$0xff] }
  0xd9   : > { %2134 = vmatpush2.msra.mxu1 %v1866_v28  ;;  %v1972_v28 = vld [vmem:[%s9170_s8 + $0x680] sm:$0xff] }
  0xda   : > { %2135 = vmatprep.subr.mxu1 %v1865_v29  ;;  %v1907_v29 = vld [vmem:[%s9170_s8 + $0x478] sm:$0xff] }
  0xdb   : > { %2136 = vmatpush2.msra.mxu1 %v1864_v30  ;;  %v1971_v30 = vld [vmem:[%s9170_s8 + $0x678] sm:$0xff] }
  0xdc   : > { %2137 = vmatprep.subr.mxu1 %v1863_v31  ;;  %v1906_v31 = vld [vmem:[%s9170_s8 + $0x470] sm:$0xff] }
  0xdd   : > { %2138 = vmatpush2.msra.mxu1 %v1862_v32  ;;  %v1970_v32 = vld [vmem:[%s9170_s8 + $0x670] sm:$0xff] }
  0xde   : > { %2139 = vmatprep.subr.mxu1 %v1861_v34  ;;  %v1905_v34 = vld [vmem:[%s9170_s8 + $0x468] sm:$0xff] }
  0xdf   : > { %2140 = vmatpush2.msra.mxu1 %v1860_v35  ;;  %v1969_v35 = vld [vmem:[%s9170_s8 + $0x668] sm:$0xff] }
  0xe0   : > { %2231 = vmatprep.subr.mxu1 %v1987_v36  ;;  %v1904_v36 = vld [vmem:[%s9170_s8 + $0x460] sm:$0xff] }
 0x120   : > { %v1456_v38 = vpop.f32.mrf.mxu1 }
 0x121   : > { %v9606_v39 = vadd.f32 %v9603_v37, %v1456_v38  ;;  %v1968_v38 = vld [vmem:[%s9170_s8 + $0x660] sm:$0xff] }
 0x122   : > { %v8279_v41 = vpop.f32.mrf.mxu1 }
 0x123   : > { %v1722_v45 = vrot.slane %v9606_v39, 1  ;;  %v1734_v46 = vrot.slane %v9606_v39, 3  ;;  %v1728_v49 = vrot.slane %v9606_v39, 2  ;;  %v1741_v52 = vrot.slane %v9606_v39, 4  ;;  %v1903_v41 = vld [vmem:[%s9170_s8 + $0x458] sm:$0xff] }
 0x124   : > { %v1461_v42 = vpop.f32.mrf.mxu1  ;;  %v1749_v40 = vrot.slane %v9606_v39, 5 }
 0x125   : > { %v9609_v43 = vadd.f32 %v9603_v37, %v1461_v42  ;;  %v1967_v42 = vld [vmem:[%s9170_s8 + $0x658] sm:$0xff] }
 0x126   : > { %v8282_v44 = vpop.f32.mrf.mxu1 }
 0x127   : > { %v1723_v47 = vrot.slane %v9609_v43, 1  ;;  %v1735_v48 = vrot.slane %v9609_v43, 3  ;;  %v1729_v50 = vrot.slane %v9609_v43, 2  ;;  %v1742_v53 = vrot.slane %v9609_v43, 4  ;;  %v1902_v44 = vld [vmem:[%s9170_s8 + $0x450] sm:$0xff] }
 0x128   : > { %v9617_v51 = vpop.f32.mrf.mxu1  ;;  %v1750_v4 = vrot.slane %v9609_v43, 5 }
 0x129   : > { %v1724_v54 = vsel %vm1721_vm3, %v1722_v45, %v1723_v47  ;;  %v1736_v55 = vsel %vm1733_vm4, %v1734_v46, %v1735_v48  ;;  %v1730_v56 = vsel %vm1727_vm5, %v1728_v49, %v1729_v50  ;;  %v9629_v60 = vsel %vm1740_vm6, %v1741_v52, %v1742_v53  ;;  %v1966_v45 = vld [vmem:[%s9170_s8 + $0x650] sm:$0xff]  ;;  %v1901_v46 = vld [vmem:[%s9170_s8 + $0x448] sm:$0xff]  ;;  %v1964_v49 = vld [vmem:[%s9170_s8 + $0x640] sm:$0xff] }
 0x12a   : > { %2064 = vmatprep.mubr.f32.mxu0 %v1724_v54  ;;  %2141 = vmatprep.mubr.f32.mxu1 %v1736_v55  ;;  %v8285_v61 = vpop.f32.mrf.mxu1  ;;  %v1751_v10 = vsel %vm1748_vm7, %v1749_v40, %v1750_v4  ;;  %v1963_v52 = vld [vmem:[%s9170_s8 + $0x638] sm:$0xff]  ;;  %v1898_v54 = vld [vmem:[%s9170_s8 + $0x430] sm:$0xff]  ;;  %v1956_v40 = vld [vmem:[%s9170_s8 + $0x600] sm:$0xff] }
 0x12b   : > { %2065 = vmatmul.mubr.f32.vlgmr.msra.gmra.mxu0 %v9606_v39  ;;  %2142 = vmatmul.mubr.f32.vlgmr.msra.gmra.mxu1 %v1730_v56  ;;  %v1962_v55 = vld [vmem:[%s9170_s8 + $0x630] sm:$0xff]  ;;  %v1897_v56 = vld [vmem:[%s9170_s8 + $0x428] sm:$0xff]  ;;  %v1960_v61 = vld [vmem:[%s9170_s8 + $0x620] sm:$0xff] }
 0x12c   : > { %2155 = vmatpush1.msra.mxu0 %v1922_v58  ;;  %2232 = vmatpush1.msra.mxu1 %v1986_v59  ;;  %v1961_v58 = vld [vmem:[%s9170_s8 + $0x628] sm:$0xff]  ;;  %v1896_v59 = vld [vmem:[%s9170_s8 + $0x420] sm:$0xff] }
 0x12d   : > { %2070 = vmatprep.mubr.f32.mxu0 %v1723_v47  ;;  %2147 = vmatprep.mubr.f32.mxu1 %v1735_v48  ;;  %v1965_v47 = vld [vmem:[%s9170_s8 + $0x648] sm:$0xff]  ;;  %v1900_v48 = vld [vmem:[%s9170_s8 + $0x440] sm:$0xff] }
 0x12e   : > { %2156 = vmatprep.subr.mxu0 %v1921_v62  ;;  %2233 = vmatprep.subr.mxu1 %v1985_v63  ;;  %v1895_v62 = vld [vmem:[%s9170_s8 + $0x418] sm:$0xff] }
 0x12f   : > { %2157 = vmatpush1.msra.mxu0 %v1920_v22  ;;  %2234 = vmatpush1.msra.mxu1 %v1984_v0  ;;  %v1959_v63 = vld [vmem:[%s9170_s8 + $0x618] sm:$0xff]  ;;  %v1894_v22 = vld [vmem:[%s9170_s8 + $0x410] sm:$0xff] }
 0x130   : > { %2158 = vmatprep.subr.mxu0 %v1919_v2  ;;  %2235 = vmatprep.subr.mxu1 %v1983_v3  ;;  %v1958_v0 = vld [vmem:[%s9170_s8 + $0x610] sm:$0xff]  ;;  %v1893_v2 = vld [vmem:[%s9170_s8 + $0x408] sm:$0xff]  ;;  %v9697_v3 = vadd.f32 %v9603_v37, %v9617_v51  ;;  %v1757_v37 = vrot.slane %v9606_v39, 6  ;;  %v1952_v39 = vld [vmem:[%s9170_s8 + $0x5e0] sm:$0xff] }
 0x131   : > { %2071 = vmatmul.mubr.f32.gmra.mxu0 %v9609_v43  ;;  %2148 = vmatmul.mubr.f32.gmra.mxu1 %v1729_v50  ;;  %v1899_v50 = vld [vmem:[%s9170_s8 + $0x438] sm:$0xff]  ;;  %v1954_v51 = vld [vmem:[%s9170_s8 + $0x5f0] sm:$0xff] }
 0x132   : > { %2159 = vmatpush1.msra.mxu0 %v1918_v5  ;;  %2236 = vmatpush1.msra.mxu1 %v1982_v6  ;;  %v1957_v5 = vld [vmem:[%s9170_s8 + $0x608] sm:$0xff]  ;;  %v1892_v6 = vld [vmem:[%s9170_s8 + $0x400] sm:$0xff] }
 0x133   : > { %2160 = vmatprep.subr.mxu0 %v1917_v7  ;;  %2218 = vmatprep.mubr.f32.mxu0 %v1751_v10  ;;  %v1758_v7 = vrot.slane %v9609_v43, 6  ;;  %v2376_v43 = vld [vmem:[%s9180_s19 + $0xe0] sm:$0xff] }
 0x134   : > { %2237 = vmatprep.subr.mxu1 %v1981_v8  ;;  %2161 = vmatpush1.msra.mxu0 %v1916_v9  ;;  %v1955_v8 = vld [vmem:[%s9170_s8 + $0x5f8] sm:$0xff]  ;;  %v1760_v9 = vrot.slane %v9697_v3, 6 }
 0x135   : > { %2238 = vmatpush1.msra.mxu1 %v1980_v11  ;;  %2162 = vmatprep.subr.mxu0 %v1915_v12  ;;  %v9709_v10 = vsel %vm1756_vm8, %v1757_v37, %v1758_v7  ;;  %v1953_v11 = vld [vmem:[%s9170_s8 + $0x5e8] sm:$0xff]  ;;  %v1951_v12 = vld [vmem:[%s9170_s8 + $0x5d8] sm:$0xff] }
 0x136   : > { %2239 = vmatprep.subr.mxu1 %v1979_v13  ;;  %2163 = vmatpush1.msra.mxu0 %v1914_v14  ;;  %v1950_v13 = vld [vmem:[%s9170_s8 + $0x5d0] sm:$0xff]  ;;  %v9718_v14 = vsel %vm1756_vm8, %v1758_v7, %v1760_v9  ;;  %v2437_v7 = vld [vmem:[%s9180_s19 + $0x2c8] sm:$0xff]  ;;  %v2371_v37 = vld [vmem:[%s9180_s19 + $0xb8] sm:$0xff] }
 0x137   : > { %2240 = vmatpush1.msra.mxu1 %v1978_v15  ;;  %2164 = vmatprep.subr.mxu0 %v1913_v16  ;;  %v1949_v15 = vld [vmem:[%s9170_s8 + $0x5c8] sm:$0xff]  ;;  %v1948_v16 = vld [vmem:[%s9170_s8 + $0x5c0] sm:$0xff]  ;;  %v2370_v9 = vld [vmem:[%s9180_s19 + $0xb0] sm:$0xff] }
 0x138   : > { %2241 = vmatprep.subr.mxu1 %v1977_v17  ;;  %2165 = vmatpush1.msra.mxu0 %v1912_v18  ;;  %v1947_v17 = vld [vmem:[%s9170_s8 + $0x5b8] sm:$0xff]  ;;  %v1946_v18 = vld [vmem:[%s9170_s8 + $0x5b0] sm:$0xff] }
 0x139   : > { %2242 = vmatpush1.msra.mxu1 %v1976_v19  ;;  %2166 = vmatprep.subr.mxu0 %v1911_v20  ;;  %v1945_v19 = vld [vmem:[%s9170_s8 + $0x5a8] sm:$0xff]  ;;  %v1944_v20 = vld [vmem:[%s9170_s8 + $0x5a0] sm:$0xff] }
 0x13a   : > { %2243 = vmatprep.subr.mxu1 %v1975_v21  ;;  %2167 = vmatpush1.msra.mxu0 %v1910_v23  ;;  %v1943_v21 = vld [vmem:[%s9170_s8 + $0x598] sm:$0xff]  ;;  %v1942_v23 = vld [vmem:[%s9170_s8 + $0x590] sm:$0xff] }
 0x13b   : > { %2244 = vmatpush1.msra.mxu1 %v1974_v24  ;;  %2168 = vmatprep.subr.mxu0 %v1909_v25  ;;  %v1941_v24 = vld [vmem:[%s9170_s8 + $0x588] sm:$0xff]  ;;  %v1940_v25 = vld [vmem:[%s9170_s8 + $0x580] sm:$0xff] }
 0x13c   : > { %2245 = vmatprep.subr.mxu1 %v1973_v26  ;;  %2169 = vmatpush1.msra.mxu0 %v1908_v27  ;;  %v1547_v26 = vld [vmem:[%s9155_s25] sm:$0x3]  ;;  %v1939_v27 = vld [vmem:[%s9170_s8 + $0x578] sm:$0xff] }
 0x13d   : > { %2246 = vmatpush1.msra.mxu1 %v1972_v28  ;;  %2170 = vmatprep.subr.mxu0 %v1907_v29  ;;  %v1938_v28 = vld [vmem:[%s9170_s8 + $0x570] sm:$0xff]  ;;  %v1937_v29 = vld [vmem:[%s9170_s8 + $0x568] sm:$0xff] }
 0x13e   : > { %2247 = vmatprep.subr.mxu1 %v1971_v30  ;;  %2171 = vmatpush1.msra.mxu0 %v1906_v31  ;;  %v1567_v30 = vrot.slane %v1547_v26, %v9496_v57  ;;  %v1936_v31 = vld [vmem:[%s9170_s8 + $0x560] sm:$0xff]  ;;  %v2427_v26 = vld [vmem:[%s9180_s19 + $0x278] sm:$0xff] }
 0x13f   : > { %2248 = vmatpush1.msra.mxu1 %v1970_v32  ;;  %2172 = vmatprep.subr.mxu0 %v1905_v34  ;;  %v1935_v32 = vld [vmem:[%s9170_s8 + $0x558] sm:$0xff]  ;;  %v1934_v34 = vld [vmem:[%s9170_s8 + $0x550] sm:$0xff] }
 0x140   : > { %2249 = vmatprep.subr.mxu1 %v1969_v35  ;;  %2173 = vmatpush1.msra.mxu0 %v1904_v36  ;;  %v1933_v36 = vld [vmem:[%s9170_s8 + $0x548] sm:$0xff] }
 0x141   : > { %2250 = vmatpush1.msra.mxu1 %v1968_v38  ;;  %2174 = vmatprep.subr.mxu0 %v1903_v41  ;;  %v1932_v41 = vld [vmem:[%s9170_s8 + $0x540] sm:$0xff] }
 0x142   : > { %2251 = vmatprep.subr.mxu1 %v1967_v42  ;;  %2175 = vmatpush1.msra.mxu0 %v1902_v44  ;;  %v1714_v42 = vpop.f32.mrf.mxu0  ;;  %v1931_v44 = vld [vmem:[%s9170_s8 + $0x538] sm:$0xff] }
 0x143   : > { %2252 = vmatpush1.msra.mxu1 %v1966_v45  ;;  %2176 = vmatprep.subr.mxu0 %v1901_v46  ;;  %v1930_v46 = vld [vmem:[%s9170_s8 + $0x530] sm:$0xff] }
 0x144   : > { %2253 = vmatprep.subr.mxu1 %v1965_v47  ;;  %2177 = vmatpush1.msra.mxu0 %v1900_v48  ;;  %v1929_v47 = vld [vmem:[%s9170_s8 + $0x528] sm:$0xff]  ;;  %v1928_v48 = vld [vmem:[%s9170_s8 + $0x520] sm:$0xff] }
 0x145   : > { %2254 = vmatpush1.msra.mxu1 %v1964_v49  ;;  %2178 = vmatprep.subr.mxu0 %v1899_v50  ;;  %v1927_v49 = vld [vmem:[%s9170_s8 + $0x518] sm:$0xff]  ;;  %v1926_v50 = vld [vmem:[%s9170_s8 + $0x510] sm:$0xff] }
 0x146   : > { %2255 = vmatprep.subr.mxu1 %v1963_v52  ;;  %2179 = vmatpush1.msra.mxu0 %v1898_v54  ;;  %v1925_v52 = vld [vmem:[%s9170_s8 + $0x508] sm:$0xff]  ;;  %v1752_v54 = vrot.slane %v9697_v3, 5 }
 0x147   : > { %2256 = vmatpush1.msra.mxu1 %v1962_v55  ;;  %2180 = vmatprep.subr.mxu0 %v1897_v56  ;;  %v1924_v55 = vld [vmem:[%s9170_s8 + $0x500] sm:$0xff]  ;;  %v1744_v56 = vrot.slane %v9697_v3, 4  ;;  %v2374_v3 = vld [vmem:[%s9180_s19 + $0xd0] sm:$0xff] }
 0x148   : > { %2257 = vmatprep.subr.mxu1 %v1961_v58  ;;  %2181 = vmatpush1.msra.mxu0 %v1896_v59  ;;  %v1753_v58 = vsel %vm1748_vm7, %v1750_v4, %v1752_v54  ;;  %v2441_v4 = vld [vmem:[%s9180_s19 + $0x2e8] sm:$0xff] }
 0x149   : > { %2258 = vmatpush1.msra.mxu1 %v1960_v61  ;;  %2182 = vmatprep.subr.mxu0 %v1895_v62  ;;  %v1745_v59 = vsel %vm1740_vm6, %v1742_v53, %v1744_v56  ;;  %v2379_v61 = vld [vmem:[%s9180_s19 + $0xf8] sm:$0xff]  ;;  %v2440_v53 = vld [vmem:[%s9180_s19 + $0x2e0] sm:$0xff]  ;;  %v2417_v54 = vld [vmem:[%s9180_s19 + $0x228] sm:$0xff] }
 0x14a   : > { %2259 = vmatprep.subr.mxu1 %v1959_v63  ;;  %2183 = vmatpush1.msra.mxu0 %v1894_v22  ;;  %v2443_v62 = vld [vmem:[%s9180_s19 + $0x2f8] sm:$0xff]  ;;  %v2378_v63 = vld [vmem:[%s9180_s19 + $0xf0] sm:$0xff]  ;;  %v2377_v22 = vld [vmem:[%s9180_s19 + $0xe8] sm:$0xff] }
 0x14b   : > { %2260 = vmatpush1.msra.mxu1 %v1958_v0  ;;  %2184 = vmatprep.subr.mxu0 %v1893_v2  ;;  %v2375_v0 = vld [vmem:[%s9180_s19 + $0xd8] sm:$0xff]  ;;  %v2416_v56 = vld [vmem:[%s9180_s19 + $0x220] sm:$0xff] }
 0x14c   : > { %2261 = vmatprep.subr.mxu1 %v1957_v5  ;;  %2185 = vmatpush1.msra.mxu0 %v1892_v6  ;;  %v2439_v2 = vld [vmem:[%s9180_s19 + $0x2d8] sm:$0xff]  ;;  %v2438_v5 = vld [vmem:[%s9180_s19 + $0x2d0] sm:$0xff]  ;;  %v2373_v6 = vld [vmem:[%s9180_s19 + $0xc8] sm:$0xff] }
 0x14d   : > { %2262 = vmatpush1.msra.mxu1 %v1956_v40  ;;  %2295 = vmatprep.mubr.f32.mxu1 %v9120_v1  ;;  %v2372_v40 = vld [vmem:[%s9180_s19 + $0xc0] sm:$0xff] }
 0x14e   : > { %2186 = vmatprep.subr.mxu0 %v1955_v8  ;;  %2296 = vmatmul.mubr.f32.vlgmr.msra.gmra.mxu1 %v9709_v10  ;;  %v2436_v8 = vld [vmem:[%s9180_s19 + $0x2c0] sm:$0xff] }
 0x14f   : > { %2187 = vmatpush2.msra.mxu0 %v1954_v51  ;;  %2301 = vmatprep.mubr.f32.mxu1 %v9120_v1  ;;  %v2435_v51 = vld [vmem:[%s9180_s19 + $0x2b8] sm:$0xff] }
 0x150   : > { %2188 = vmatprep.subr.mxu0 %v1953_v11  ;;  %2835 = vmatprep.subr.mxu1 %v2443_v62  ;;  %v2434_v11 = vld [vmem:[%s9180_s19 + $0x2b0] sm:$0xff] }
 0x151   : > { %2189 = vmatpush2.msra.mxu0 %v1952_v39  ;;  %v2369_v39 = vld [vmem:[%s9180_s19 + $0xa8] sm:$0xff]  ;;  %v2414_v62 = vld [vmem:[%s9180_s19 + $0x210] sm:$0xff] }
 0x152   : > { %2190 = vmatprep.subr.mxu0 %v1951_v12  ;;  %2302 = vmatmul.mubr.f32.gmra.mxu1 %v9718_v14  ;;  %v2433_v12 = vld [vmem:[%s9180_s19 + $0x2a8] sm:$0xff] }
 0x153   : > { %2191 = vmatpush2.msra.mxu0 %v1950_v13  ;;  %v2368_v13 = vld [vmem:[%s9180_s19 + $0xa0] sm:$0xff] }
 0x154   : > { %2192 = vmatprep.subr.mxu0 %v1949_v15  ;;  %v2432_v15 = vld [vmem:[%s9180_s19 + $0x2a0] sm:$0xff] }
 0x155   : > { %2193 = vmatpush2.msra.mxu0 %v1948_v16  ;;  %v2367_v16 = vld [vmem:[%s9180_s19 + $0x98] sm:$0xff] }
 0x156   : > { %2194 = vmatprep.subr.mxu0 %v1947_v17  ;;  %v2431_v17 = vld [vmem:[%s9180_s19 + $0x298] sm:$0xff] }
 0x157   : > { %2195 = vmatpush2.msra.mxu0 %v1946_v18  ;;  %v2366_v18 = vld [vmem:[%s9180_s19 + $0x90] sm:$0xff] }
 0x158   : > { %2196 = vmatprep.subr.mxu0 %v1945_v19  ;;  %v2430_v19 = vld [vmem:[%s9180_s19 + $0x290] sm:$0xff] }
 0x159   : > { %2197 = vmatpush2.msra.mxu0 %v1944_v20  ;;  %v2365_v20 = vld [vmem:[%s9180_s19 + $0x88] sm:$0xff] }
 0x15a   : > { %2198 = vmatprep.subr.mxu0 %v1943_v21  ;;  %v2429_v21 = vld [vmem:[%s9180_s19 + $0x288] sm:$0xff] }
 0x15b   : > { %2199 = vmatpush2.msra.mxu0 %v1942_v23  ;;  %v2364_v23 = vld [vmem:[%s9180_s19 + $0x80] sm:$0xff] }
 0x15c   : > { %2200 = vmatprep.subr.mxu0 %v1941_v24  ;;  %v2428_v24 = vld [vmem:[%s9180_s19 + $0x280] sm:$0xff] }
 0x15d   : > { %2201 = vmatpush2.msra.mxu0 %v1940_v25  ;;  %v2363_v25 = vld [vmem:[%s9180_s19 + $0x78] sm:$0xff] }
 0x15e   : > { %2202 = vmatprep.subr.mxu0 %v1939_v27  ;;  %v2362_v27 = vld [vmem:[%s9180_s19 + $0x70] sm:$0xff] }
 0x15f   : > { %2203 = vmatpush2.msra.mxu0 %v1938_v28  ;;  %v2426_v28 = vld [vmem:[%s9180_s19 + $0x270] sm:$0xff] }
 0x160   : > { %2204 = vmatprep.subr.mxu0 %v1937_v29  ;;  %v1643_v35 = vpop.f32.mrf.mxu1  ;;  %v2361_v29 = vld [vmem:[%s9180_s19 + $0x68] sm:$0xff] }
 0x161   : > { %2205 = vmatpush2.msra.mxu0 %v1936_v31  ;;  %v1644_v38 = vadd.f32 %v1643_v35, %v1567_v30  ;;  %v2425_v30 = vld [vmem:[%s9180_s19 + $0x268] sm:$0xff]  ;;  %v2360_v31 = vld [vmem:[%s9180_s19 + $0x60] sm:$0xff]  ;;  %v2423_v35 = vld [vmem:[%s9180_s19 + $0x258] sm:$0xff] }
 0x162   : > { %2206 = vmatprep.subr.mxu0 %v1935_v32  ;;  %v2424_v32 = vld [vmem:[%s9180_s19 + $0x260] sm:$0xff] }
 0x163   : > { %2207 = vmatpush2.msra.mxu0 %v1934_v34  ;;  %v9742_v45 = vadd.f32 %v1714_v42, %v1644_v38  ;;  %v2359_v34 = vld [vmem:[%s9180_s19 + $0x58] sm:$0xff]  ;;  %v2422_v38 = vld [vmem:[%s9180_s19 + $0x250] sm:$0xff]  ;;  %v2421_v42 = vld [vmem:[%s9180_s19 + $0x248] sm:$0xff] }
 0x164   : > { %2208 = vmatprep.subr.mxu0 %v1933_v36  ;;  %v2358_v36 = vld [vmem:[%s9180_s19 + $0x50] sm:$0xff] }
 0x165   : > { %2209 = vmatpush2.msra.mxu0 %v1932_v41  ;;  %v2357_v41 = vld [vmem:[%s9180_s19 + $0x48] sm:$0xff] }
 0x166   : > { %2210 = vmatprep.subr.mxu0 %v1931_v44  ;;  %v2356_v44 = vld [vmem:[%s9180_s19 + $0x40] sm:$0xff] }
 0x167   : > { %2211 = vmatpush2.msra.mxu0 %v1930_v46  ;;  %v2420_v46 = vld [vmem:[%s9180_s19 + $0x240] sm:$0xff] }
 0x168   : > { %2212 = vmatprep.subr.mxu0 %v1929_v47  ;;  %v2355_v47 = vld [vmem:[%s9180_s19 + $0x38] sm:$0xff] }
 0x169   : > { %2213 = vmatpush2.msra.mxu0 %v1928_v48  ;;  %v2419_v48 = vld [vmem:[%s9180_s19 + $0x238] sm:$0xff] }
 0x16a   : > { %2214 = vmatprep.subr.mxu0 %v1927_v49  ;;  %v2354_v49 = vld [vmem:[%s9180_s19 + $0x30] sm:$0xff] }
 0x16b   : > { %2215 = vmatpush2.msra.mxu0 %v1926_v50  ;;  %v2418_v50 = vld [vmem:[%s9180_s19 + $0x230] sm:$0xff] }
 0x16c   : > { %2216 = vmatprep.subr.mxu0 %v1925_v52  ;;  %v2353_v52 = vld [vmem:[%s9180_s19 + $0x28] sm:$0xff] }
 0x16d   : > { %2217 = vmatpush2.msra.mxu0 %v1924_v55  ;;  %v2352_v55 = vld [vmem:[%s9180_s19 + $0x20] sm:$0xff] }
 0x16e   : > { %2219 = vmatmul.mubr.f32.vlgmr.msra.gmra.mxu0 %v9629_v60  ;;  %2764 = vmatprep.subr.mxu0 %v2379_v61  ;;  %v2442_v60 = vld [vmem:[%s9180_s19 + $0x2f0] sm:$0xff] }
 0x16f   : > { %2224 = vmatprep.mubr.f32.mxu0 %v1753_v58  ;;  %2765 = vmatpush1.msra.mxu0 %v2378_v63  ;;  %v2351_v58 = vld [vmem:[%s9180_s19 + $0x18] sm:$0xff]  ;;  %v2350_v61 = vld [vmem:[%s9180_s19 + $0x10] sm:$0xff]  ;;  %v2349_v63 = vld [vmem:[%s9180_s19 + $0x8] sm:$0xff] }
 0x170   : > { %2836 = vmatpush1.msra.mxu1 %v2442_v60  ;;  %2766 = vmatprep.subr.mxu0 %v2377_v22  ;;  %v2413_v60 = vld [vmem:[%s9180_s19 + $0x208] sm:$0xff]  ;;  %v2348_v22 = vld [vmem:[%s9180_s19] sm:$0xff] }
 0x171   : > { %2837 = vmatprep.subr.mxu1 %v2441_v4  ;;  %2767 = vmatpush1.msra.mxu0 %v2376_v43  ;;  %v2412_v4 = vld [vmem:[%s9180_s19 + $0x200] sm:$0xff]  ;;  %v2411_v43 = vld [vmem:[%s9180_s19 + $0x1f8] sm:$0xff] }
 0x172   : > { %2225 = vmatmul.mubr.f32.gmra.mxu0 %v1745_v59  ;;  %2838 = vmatpush1.msra.mxu1 %v2440_v53  ;;  %v2415_v59 = vld [vmem:[%s9180_s19 + $0x218] sm:$0xff] }
 0x173   : > { %2768 = vmatprep.subr.mxu0 %v2375_v0  ;;  %2839 = vmatprep.subr.mxu1 %v2439_v2  ;;  %v2475_v53 = vld [vmem:[%s9180_s19 + $0x3f8] sm:$0xff]  ;;  %v2410_v0 = vld [vmem:[%s9180_s19 + $0x1f0] sm:$0xff] }
 0x174   : > { %2769 = vmatpush1.msra.mxu0 %v2374_v3  ;;  %2840 = vmatpush1.msra.mxu1 %v2438_v5  ;;  %v2474_v2 = vld [vmem:[%s9180_s19 + $0x3f0] sm:$0xff]  ;;  %v2409_v3 = vld [vmem:[%s9180_s19 + $0x1e8] sm:$0xff] }
 0x175   : > { %2770 = vmatprep.subr.mxu0 %v2373_v6  ;;  %2841 = vmatprep.subr.mxu1 %v2437_v7  ;;  %v2473_v5 = vld [vmem:[%s9180_s19 + $0x3e8] sm:$0xff]  ;;  %v2408_v6 = vld [vmem:[%s9180_s19 + $0x1e0] sm:$0xff] }
 0x176   : > { %2771 = vmatpush1.msra.mxu0 %v2372_v40  ;;  %2842 = vmatpush1.msra.mxu1 %v2436_v8  ;;  %v2472_v7 = vld [vmem:[%s9180_s19 + $0x3e0] sm:$0xff]  ;;  %v2407_v40 = vld [vmem:[%s9180_s19 + $0x1d8] sm:$0xff] }
 0x177   : > { %2772 = vmatprep.subr.mxu0 %v2371_v37  ;;  %2843 = vmatprep.subr.mxu1 %v2435_v51  ;;  %v2471_v8 = vld [vmem:[%s9180_s19 + $0x3d8] sm:$0xff]  ;;  %v2406_v37 = vld [vmem:[%s9180_s19 + $0x1d0] sm:$0xff] }
 0x178   : > { %2773 = vmatpush1.msra.mxu0 %v2370_v9  ;;  %2844 = vmatpush1.msra.mxu1 %v2434_v11  ;;  %v2470_v51 = vld [vmem:[%s9180_s19 + $0x3d0] sm:$0xff]  ;;  %v2405_v9 = vld [vmem:[%s9180_s19 + $0x1c8] sm:$0xff] }
 0x179   : > { %2774 = vmatprep.subr.mxu0 %v2369_v39  ;;  %2845 = vmatprep.subr.mxu1 %v2433_v12  ;;  %v2469_v11 = vld [vmem:[%s9180_s19 + $0x3c8] sm:$0xff]  ;;  %v2404_v39 = vld [vmem:[%s9180_s19 + $0x1c0] sm:$0xff] }
 0x17a   : > { %2775 = vmatpush1.msra.mxu0 %v2368_v13  ;;  %2846 = vmatpush1.msra.mxu1 %v2432_v15  ;;  %v2468_v12 = vld [vmem:[%s9180_s19 + $0x3c0] sm:$0xff]  ;;  %v2403_v13 = vld [vmem:[%s9180_s19 + $0x1b8] sm:$0xff] }
 0x17b   : > { %2776 = vmatprep.subr.mxu0 %v2367_v16  ;;  %2847 = vmatprep.subr.mxu1 %v2431_v17  ;;  %v2467_v15 = vld [vmem:[%s9180_s19 + $0x3b8] sm:$0xff]  ;;  %v2402_v16 = vld [vmem:[%s9180_s19 + $0x1b0] sm:$0xff] }
 0x17c   : > { %2777 = vmatpush1.msra.mxu0 %v2366_v18  ;;  %2848 = vmatpush1.msra.mxu1 %v2430_v19  ;;  %v2466_v17 = vld [vmem:[%s9180_s19 + $0x3b0] sm:$0xff]  ;;  %v2401_v18 = vld [vmem:[%s9180_s19 + $0x1a8] sm:$0xff] }
 0x17d   : > { %2778 = vmatprep.subr.mxu0 %v2365_v20  ;;  %2849 = vmatprep.subr.mxu1 %v2429_v21  ;;  %v2465_v19 = vld [vmem:[%s9180_s19 + $0x3a8] sm:$0xff]  ;;  %v2400_v20 = vld [vmem:[%s9180_s19 + $0x1a0] sm:$0xff] }
 0x17e   : > { %2779 = vmatpush1.msra.mxu0 %v2364_v23  ;;  %2850 = vmatpush1.msra.mxu1 %v2428_v24  ;;  %v2464_v21 = vld [vmem:[%s9180_s19 + $0x3a0] sm:$0xff]  ;;  %v2399_v23 = vld [vmem:[%s9180_s19 + $0x198] sm:$0xff] }
 0x17f   : > { %2780 = vmatprep.subr.mxu0 %v2363_v25  ;;  %2851 = vmatprep.subr.mxu1 %v2427_v26  ;;  %v2463_v24 = vld [vmem:[%s9180_s19 + $0x398] sm:$0xff]  ;;  %v2398_v25 = vld [vmem:[%s9180_s19 + $0x190] sm:$0xff] }
 0x180   : > { %2781 = vmatpush1.msra.mxu0 %v2362_v27  ;;  %2852 = vmatpush1.msra.mxu1 %v2426_v28  ;;  %v2462_v26 = vld [vmem:[%s9180_s19 + $0x390] sm:$0xff]  ;;  %v2397_v27 = vld [vmem:[%s9180_s19 + $0x188] sm:$0xff] }
 0x181   : > { %2782 = vmatprep.subr.mxu0 %v2361_v29  ;;  %2853 = vmatprep.subr.mxu1 %v2425_v30  ;;  %v2461_v28 = vld [vmem:[%s9180_s19 + $0x388] sm:$0xff]  ;;  %v2396_v29 = vld [vmem:[%s9180_s19 + $0x180] sm:$0xff] }
 0x182   : > { %2783 = vmatpush1.msra.mxu0 %v2360_v31  ;;  %2854 = vmatpush1.msra.mxu1 %v2424_v32  ;;  %v2460_v30 = vld [vmem:[%s9180_s19 + $0x380] sm:$0xff]  ;;  %v2395_v31 = vld [vmem:[%s9180_s19 + $0x178] sm:$0xff] }
 0x183   : > { %2784 = vmatprep.subr.mxu0 %v2359_v34  ;;  %2855 = vmatprep.subr.mxu1 %v2423_v35  ;;  %v2459_v32 = vld [vmem:[%s9180_s19 + $0x378] sm:$0xff]  ;;  %v2394_v34 = vld [vmem:[%s9180_s19 + $0x170] sm:$0xff] }
 0x184   : > { %2785 = vmatpush1.msra.mxu0 %v2358_v36  ;;  %2856 = vmatpush1.msra.mxu1 %v2422_v38  ;;  %v2458_v35 = vld [vmem:[%s9180_s19 + $0x370] sm:$0xff]  ;;  %v2393_v36 = vld [vmem:[%s9180_s19 + $0x168] sm:$0xff] }
 0x185   : > { %2786 = vmatprep.subr.mxu0 %v2357_v41  ;;  %2857 = vmatprep.subr.mxu1 %v2421_v42  ;;  %v2457_v38 = vld [vmem:[%s9180_s19 + $0x368] sm:$0xff]  ;;  %v2392_v41 = vld [vmem:[%s9180_s19 + $0x160] sm:$0xff] }
 0x186   : > { %2787 = vmatpush1.msra.mxu0 %v2356_v44  ;;  %2858 = vmatpush1.msra.mxu1 %v2420_v46  ;;  %v2456_v42 = vld [vmem:[%s9180_s19 + $0x360] sm:$0xff]  ;;  %v2391_v44 = vld [vmem:[%s9180_s19 + $0x158] sm:$0xff] }
 0x187   : > { %2788 = vmatprep.subr.mxu0 %v2355_v47  ;;  %2859 = vmatprep.subr.mxu1 %v2419_v48  ;;  %v2455_v46 = vld [vmem:[%s9180_s19 + $0x358] sm:$0xff]  ;;  %v2390_v47 = vld [vmem:[%s9180_s19 + $0x150] sm:$0xff] }
 0x188   : > { %2789 = vmatpush1.msra.mxu0 %v2354_v49  ;;  %2860 = vmatpush1.msra.mxu1 %v2418_v50  ;;  %v2454_v48 = vld [vmem:[%s9180_s19 + $0x350] sm:$0xff]  ;;  %v2389_v49 = vld [vmem:[%s9180_s19 + $0x148] sm:$0xff] }
 0x189   : > { %2790 = vmatprep.subr.mxu0 %v2353_v52  ;;  %2861 = vmatprep.subr.mxu1 %v2417_v54  ;;  %v2453_v50 = vld [vmem:[%s9180_s19 + $0x348] sm:$0xff]  ;;  %v2388_v52 = vld [vmem:[%s9180_s19 + $0x140] sm:$0xff] }
 0x18a   : > { %2791 = vmatpush1.msra.mxu0 %v2352_v55  ;;  %2862 = vmatpush1.msra.mxu1 %v2416_v56  ;;  %v2452_v54 = vld [vmem:[%s9180_s19 + $0x340] sm:$0xff]  ;;  %v2387_v55 = vld [vmem:[%s9180_s19 + $0x138] sm:$0xff] }
 0x18b   : > { %2792 = vmatprep.subr.mxu0 %v2351_v58  ;;  %2863 = vmatprep.subr.mxu1 %v2415_v59  ;;  %v2451_v56 = vld [vmem:[%s9180_s19 + $0x338] sm:$0xff]  ;;  %v2386_v58 = vld [vmem:[%s9180_s19 + $0x130] sm:$0xff] }
 0x18c   : > { %2793 = vmatpush1.msra.mxu0 %v2350_v61  ;;  %2864 = vmatpush1.msra.mxu1 %v2414_v62  ;;  %v2450_v59 = vld [vmem:[%s9180_s19 + $0x330] sm:$0xff]  ;;  %v2385_v61 = vld [vmem:[%s9180_s19 + $0x128] sm:$0xff] }
 0x18d   : > { %2794 = vmatprep.subr.mxu0 %v2349_v63  ;;  %2865 = vmatprep.subr.mxu1 %v2413_v60  ;;  %v2449_v62 = vld [vmem:[%s9180_s19 + $0x328] sm:$0xff]  ;;  %v2384_v63 = vld [vmem:[%s9180_s19 + $0x120] sm:$0xff] }
 0x18e   : > { %2795 = vmatpush1.msra.mxu0 %v2348_v22  ;;  %2866 = vmatpush1.msra.mxu1 %v2412_v4  ;;  %v2448_v60 = vld [vmem:[%s9180_s19 + $0x320] sm:$0xff]  ;;  %v2383_v22 = vld [vmem:[%s9180_s19 + $0x118] sm:$0xff] }
 0x18f   : > { %2796 = vmatprep.subr.mxu0 %v2411_v43  ;;  %2867 = vmatprep.subr.mxu1 %v2475_v53  ;;  %v2447_v4 = vld [vmem:[%s9180_s19 + $0x318] sm:$0xff]  ;;  %v2382_v43 = vld [vmem:[%s9180_s19 + $0x110] sm:$0xff] }
 0x190   : > { %2797 = vmatpush2.msra.mxu0 %v2410_v0  ;;  %2868 = vmatpush2.msra.mxu1 %v2474_v2  ;;  %v2446_v53 = vld [vmem:[%s9180_s19 + $0x310] sm:$0xff]  ;;  %v2381_v0 = vld [vmem:[%s9180_s19 + $0x108] sm:$0xff] }
 0x191   : > { %2798 = vmatprep.subr.mxu0 %v2409_v3  ;;  %2869 = vmatprep.subr.mxu1 %v2473_v5  ;;  %v2445_v2 = vld [vmem:[%s9180_s19 + $0x308] sm:$0xff]  ;;  %v2380_v3 = vld [vmem:[%s9180_s19 + $0x100] sm:$0xff] }
 0x192   : > { %2799 = vmatpush2.msra.mxu0 %v2408_v6  ;;  %2870 = vmatpush2.msra.mxu1 %v2472_v7  ;;  %v2444_v5 = vld [vmem:[%s9180_s19 + $0x300] sm:$0xff]  ;;  %v2507_v6 = vld [vmem:[%s9180_s19 + $0x4f8] sm:$0xff] }
 0x193   : > { %2800 = vmatprep.subr.mxu0 %v2407_v40  ;;  %2871 = vmatprep.subr.mxu1 %v2471_v8  ;;  %v2571_v7 = vld [vmem:[%s9180_s19 + $0x6f8] sm:$0xff]  ;;  %v9890_v40 = vpop.f32.mrf.mxu1  ;;  %v9892_v8 = vpop.f32.mrf.mxu0 }
 0x194   : > { %2801 = vmatpush2.msra.mxu0 %v2406_v37  ;;  %2872 = vmatpush2.msra.mxu1 %v2470_v51 }
 0x195   : > { %2802 = vmatprep.subr.mxu0 %v2405_v9  ;;  %2873 = vmatprep.subr.mxu1 %v2469_v11  ;;  %v1988_v9 = vld [vmem:[%s9175_s14] sm:$0x3] }
 0x196   : > { %2803 = vmatpush2.msra.mxu0 %v2404_v39  ;;  %2874 = vmatpush2.msra.mxu1 %v2468_v12  ;;  %v1993_v12 = vrot.slane %v1988_v9, %v9496_v57 }
 0x197   : > { %2804 = vmatprep.subr.mxu0 %v2403_v13  ;;  %2875 = vmatprep.subr.mxu1 %v2467_v15 }
 0x198   : > { %2805 = vmatpush2.msra.mxu0 %v2402_v16  ;;  %2876 = vmatpush2.msra.mxu1 %v2466_v17  ;;  %v1997_v16 = vrot.slane %v1988_v9, %v9408_v33  ;;  %v2503_v9 = vld [vmem:[%s9180_s19 + $0x4d8] sm:$0xff] }
 0x199   : > { %2806 = vmatprep.subr.mxu0 %v2401_v18  ;;  %2877 = vmatprep.subr.mxu1 %v2465_v19 }
 0x19a   : > { %2807 = vmatpush2.msra.mxu0 %v2400_v20  ;;  %2878 = vmatpush2.msra.mxu1 %v2464_v21 }
 0x19b   : > { %2808 = vmatprep.subr.mxu0 %v2399_v23  ;;  %2879 = vmatprep.subr.mxu1 %v2463_v24 }
 0x19c   : > { %2809 = vmatpush2.msra.mxu0 %v2398_v25  ;;  %2880 = vmatpush2.msra.mxu1 %v2462_v26 }
 0x19d   : > { %2810 = vmatprep.subr.mxu0 %v2397_v27  ;;  %2881 = vmatprep.subr.mxu1 %v2461_v28 }
 0x19e   : > { %2811 = vmatpush2.msra.mxu0 %v2396_v29  ;;  %2882 = vmatpush2.msra.mxu1 %v2460_v30 }
 0x19f   : > { %2812 = vmatprep.subr.mxu0 %v2395_v31  ;;  %2883 = vmatprep.subr.mxu1 %v2459_v32 }
 0x1a0   : > { %2813 = vmatpush2.msra.mxu0 %v2394_v34  ;;  %2884 = vmatpush2.msra.mxu1 %v2458_v35 }
 0x1a1   : > { %2814 = vmatprep.subr.mxu0 %v2393_v36  ;;  %2885 = vmatprep.subr.mxu1 %v2457_v38 }
 0x1a2   : > { %2815 = vmatpush2.msra.mxu0 %v2392_v41  ;;  %2886 = vmatpush2.msra.mxu1 %v2456_v42 }
 0x1a3   : > { %2816 = vmatprep.subr.mxu0 %v2391_v44  ;;  %2887 = vmatprep.subr.mxu1 %v2455_v46 }
 0x1a4   : > { %2817 = vmatpush2.msra.mxu0 %v2390_v47  ;;  %2888 = vmatpush2.msra.mxu1 %v2454_v48 }
 0x1a5   : > { %2818 = vmatprep.subr.mxu0 %v2389_v49  ;;  %2889 = vmatprep.subr.mxu1 %v2453_v50 }
 0x1a6   : > { %2819 = vmatpush2.msra.mxu0 %v2388_v52  ;;  %2890 = vmatpush2.msra.mxu1 %v2452_v54 }
 0x1a7   : > { %2820 = vmatprep.subr.mxu0 %v2387_v55  ;;  %2891 = vmatprep.subr.mxu1 %v2451_v56 }
 0x1a8   : > { %2821 = vmatpush2.msra.mxu0 %v2386_v58  ;;  %2892 = vmatpush2.msra.mxu1 %v2450_v59 }
 0x1a9   : > { %2822 = vmatprep.subr.mxu0 %v2385_v61  ;;  %2893 = vmatprep.subr.mxu1 %v2449_v62 }
 0x1aa   : > { %2823 = vmatpush2.msra.mxu0 %v2384_v63  ;;  %2894 = vmatpush2.msra.mxu1 %v2448_v60 }
 0x1ab   : > { %2824 = vmatprep.subr.mxu0 %v2383_v22  ;;  %2895 = vmatprep.subr.mxu1 %v2447_v4 }
 0x1ac   : > { %2825 = vmatpush2.msra.mxu0 %v2382_v43  ;;  %2896 = vmatpush2.msra.mxu1 %v2446_v53  ;;  %v2506_v53 = vld [vmem:[%s9180_s19 + $0x4f0] sm:$0xff] }
 0x1ad   : > { %2826 = vmatprep.subr.mxu0 %v2381_v0  ;;  %2897 = vmatprep.subr.mxu1 %v2445_v2  ;;  %v2570_v0 = vld [vmem:[%s9180_s19 + $0x6f0] sm:$0xff] }
 0x1ae   : > { %2827 = vmatpush2.msra.mxu0 %v2380_v3  ;;  %2898 = vmatpush2.msra.mxu1 %v2444_v5  ;;  %v2505_v3 = vld [vmem:[%s9180_s19 + $0x4e8] sm:$0xff] }
 0x1af   : > { %2906 = vmatprep.subr.mxu0 %v2507_v6  ;;  %2977 = vmatprep.subr.mxu1 %v2571_v7  ;;  %v2569_v6 = vld [vmem:[%s9180_s19 + $0x6e8] sm:$0xff] }
 0x1eb   : > { %v2066_v37 = vpop.f32.mrf.mxu0  ;;  %v2143_v51 = vpop.f32.mrf.mxu1 }
 0x1ec   : > { %v2067_v44 = vadd.f32 %v2066_v37, %v1993_v12  ;;  %v2504_v37 = vld [vmem:[%s9180_s19 + $0x4e0] sm:$0xff] }
 0x1ed   : > { %v2068_v11 = vpop.f32.mrf.mxu0  ;;  %v2145_v39 = vpop.f32.mrf.mxu1 }
 0x1ee   : > { %v2069_v25 = vadd.f32 %v2068_v11, %v1997_v16  ;;  %v2144_v47 = vadd.f32 %v2143_v51, %v2067_v44  ;;  %v2568_v51 = vld [vmem:[%s9180_s19 + $0x6e0] sm:$0xff]  ;;  %v2567_v11 = vld [vmem:[%s9180_s19 + $0x6d8] sm:$0xff]  ;;  %v2489_v44 = vld [vmem:[%s9180_s19 + $0x468] sm:$0xff] }
 0x1f0   : > { %v2146_v28 = vadd.f32 %v2145_v39, %v2069_v25  ;;  %v2502_v39 = vld [vmem:[%s9180_s19 + $0x4d0] sm:$0xff]  ;;  %v2496_v25 = vld [vmem:[%s9180_s19 + $0x4a0] sm:$0xff] }
 0x1f1   : > { %v2072_v13 = vpop.f32.mrf.mxu0  ;;  %v2149_v15 = vpop.f32.mrf.mxu1 }
 0x1f2   : > { %v2073_v17 = vadd.f32 %v2072_v13, %v1993_v12  ;;  %v2566_v12 = vld [vmem:[%s9180_s19 + $0x6d0] sm:$0xff]  ;;  %v2501_v13 = vld [vmem:[%s9180_s19 + $0x4c8] sm:$0xff] }
 0x1f3   : > { %v2074_v18 = vpop.f32.mrf.mxu0  ;;  %v2151_v21 = vpop.f32.mrf.mxu1 }
 0x1f4   : > { %v2150_v19 = vadd.f32 %v2149_v15, %v2073_v17  ;;  %v2075_v20 = vadd.f32 %v2074_v18, %v1997_v16  ;;  %v2565_v15 = vld [vmem:[%s9180_s19 + $0x6c8] sm:$0xff]  ;;  %v2500_v16 = vld [vmem:[%s9180_s19 + $0x4c0] sm:$0xff]  ;;  %v2499_v18 = vld [vmem:[%s9180_s19 + $0x4b8] sm:$0xff] }
 0x1f5   : > { %v2564_v17 = vld [vmem:[%s9180_s19 + $0x6c0] sm:$0xff] }
 0x1f6   : > { %v2152_v23 = vadd.f32 %v2151_v21, %v2075_v20  ;;  %v2498_v20 = vld [vmem:[%s9180_s19 + $0x4b0] sm:$0xff] }
 0x1f7   : > { %v2562_v21 = vld [vmem:[%s9180_s19 + $0x6b0] sm:$0xff] }
 0x20e   : > { %v2297_v24 = vpop.f32.mrf.mxu1 }
 0x210   : > { %v2299_v26 = vpop.f32.mrf.mxu1 }
 0x212   : > { %v2303_v31 = vpop.f32.mrf.mxu1 }
 0x214   : > { %v2305_v41 = vpop.f32.mrf.mxu1 }
 0x22e   : > { %v2220_v27 = vpop.f32.mrf.mxu0 }
 0x22f   : > { %v2221_v48 = vadd.f32 %v2220_v27, %v2144_v47  ;;  %v2495_v27 = vld [vmem:[%s9180_s19 + $0x498] sm:$0xff]  ;;  %v2488_v47 = vld [vmem:[%s9180_s19 + $0x460] sm:$0xff] }
 0x230   : > { %v2222_v29 = vpop.f32.mrf.mxu0 }
 0x231   : > { %v2223_v30 = vadd.f32 %v2222_v29, %v2146_v28  ;;  %v2298_v49 = vadd.f32 %v2297_v24, %v2221_v48  ;;  %v2561_v24 = vld [vmem:[%s9180_s19 + $0x6a8] sm:$0xff]  ;;  %v2559_v28 = vld [vmem:[%s9180_s19 + $0x698] sm:$0xff]  ;;  %v2494_v29 = vld [vmem:[%s9180_s19 + $0x490] sm:$0xff] }
 0x232   : > { %v2226_v32 = vpop.f32.mrf.mxu0  ;;  %v2552_v48 = vld [vmem:[%s9180_s19 + $0x660] sm:$0xff] }
 0x233   : > { %v2300_v34 = vadd.f32 %v2299_v26, %v2223_v30  ;;  %v2227_v50 = vadd.f32 %v2226_v32, %v2150_v19  ;;  %v2563_v19 = vld [vmem:[%s9180_s19 + $0x6b8] sm:$0xff]  ;;  %v2560_v26 = vld [vmem:[%s9180_s19 + $0x6a0] sm:$0xff]  ;;  %v2558_v30 = vld [vmem:[%s9180_s19 + $0x690] sm:$0xff] }
 0x234   : > { %v2228_v35 = vpop.f32.mrf.mxu0  ;;  %v2557_v32 = vld [vmem:[%s9180_s19 + $0x688] sm:$0xff] }
 0x235   : > { %v7695_v36 = vmul.f32 -1.442695, %v2300_v34  ;;  %v2229_v38 = vadd.f32 %v2228_v35, %v2152_v23  ;;  %v2304_v55 = vadd.f32 %v2303_v31, %v2227_v50  ;;  %v2497_v23 = vld [vmem:[%s9180_s19 + $0x4a8] sm:$0xff]  ;;  %v2492_v34 = vld [vmem:[%s9180_s19 + $0x480] sm:$0xff]  ;;  %v2551_v50 = vld [vmem:[%s9180_s19 + $0x658] sm:$0xff] }
 0x236   : > { %v2493_v31 = vld [vmem:[%s9180_s19 + $0x488] sm:$0xff]  ;;  %v2556_v35 = vld [vmem:[%s9180_s19 + $0x680] sm:$0xff] }
 0x237   : > { %8972 = vpow2.f32 %v7695_v36  ;;  %v2306_v42 = vadd.f32 %v2305_v41, %v2229_v38  ;;  %v2491_v36 = vld [vmem:[%s9180_s19 + $0x478] sm:$0xff]  ;;  %v2490_v41 = vld [vmem:[%s9180_s19 + $0x470] sm:$0xff] }
 0x238   : > { %v2555_v38 = vld [vmem:[%s9180_s19 + $0x678] sm:$0xff] }
 0x239   : > { %v7696_v46 = vmul.f32 -1.442695, %v2306_v42  ;;  %v2554_v42 = vld [vmem:[%s9180_s19 + $0x670] sm:$0xff] }
 0x23b   : > { %8974 = vpow2.f32 %v7696_v46  ;;  %v2553_v46 = vld [vmem:[%s9180_s19 + $0x668] sm:$0xff] }
 0x23c   : > { %8976 = vtanh.f32 %v2298_v49  ;;  %v2487_v49 = vld [vmem:[%s9180_s19 + $0x458] sm:$0xff] }
 0x244   : > { %v8973_v52 = vpop.eup %8972 }
 0x245   : > { %v2316_v54 = vadd.f32 1.0, %v8973_v52  ;;  %v2486_v52 = vld [vmem:[%s9180_s19 + $0x450] sm:$0xff] }
 0x247   : > { %8978 = vrcp.f32 %v2316_v54  ;;  %v2550_v54 = vld [vmem:[%s9180_s19 + $0x650] sm:$0xff] }
 0x248   : > { %v8975_v56 = vpop.eup %8974  ;;  %8980 = vtanh.f32 %v2304_v55  ;;  %v2485_v55 = vld [vmem:[%s9180_s19 + $0x448] sm:$0xff] }
 0x249   : > { %v2317_v58 = vadd.f32 1.0, %v8975_v56  ;;  %v8977_v59 = vpop.eup %8976  ;;  %v2549_v56 = vld [vmem:[%s9180_s19 + $0x648] sm:$0xff] }
 0x24b   : > { %8982 = vrcp.f32 %v2317_v58  ;;  %v2484_v58 = vld [vmem:[%s9180_s19 + $0x440] sm:$0xff] }
 0x254   : > { %v8979_v61 = vpop.eup %8978 }
 0x255   : > { %v9897_v62 = vmul.f32 %v8979_v61, %v8977_v59  ;;  %v8981_v63 = vpop.eup %8980  ;;  %v2548_v59 = vld [vmem:[%s9180_s19 + $0x640] sm:$0xff]  ;;  %v2483_v61 = vld [vmem:[%s9180_s19 + $0x438] sm:$0xff] }
 0x257   : > { %v2325_v60 = vrot.slane %v9897_v62, 1  ;;  %v2329_v22 = vrot.slane %v9897_v62, 3  ;;  %v2327_v4 = vrot.slane %v9897_v62, 2  ;;  %v2333_v5 = vrot.slane %v9897_v62, 5 }
 0x258   : > { %v8983_v43 = vpop.eup %8982  ;;  %v2337_v7 = vrot.slane %v9897_v62, 7 }
 0x259   : > { %v9904_v2 = vmul.f32 %v8983_v43, %v8981_v63  ;;  %2828 = vmatprep.mubr.f32.mxu0 %v2325_v60  ;;  %2899 = vmatprep.mubr.f32.mxu1 %v2329_v22  ;;  %v2547_v63 = vld [vmem:[%s9180_s19 + $0x638] sm:$0xff]  ;;  %v2482_v60 = vld [vmem:[%s9180_s19 + $0x430] sm:$0xff]  ;;  %v2545_v43 = vld [vmem:[%s9180_s19 + $0x628] sm:$0xff] }
 0x25a   : > { %2829 = vmatmul.mubr.f32.vlgmr.msra.gmra.mxu0 %v9897_v62  ;;  %2900 = vmatmul.mubr.f32.vlgmr.msra.gmra.mxu1 %v2327_v4  ;;  %v2546_v22 = vld [vmem:[%s9180_s19 + $0x630] sm:$0xff]  ;;  %v2481_v4 = vld [vmem:[%s9180_s19 + $0x428] sm:$0xff] }
 0x25b   : > { %2907 = vmatpush1.msra.mxu0 %v2506_v53  ;;  %2978 = vmatpush1.msra.mxu1 %v2570_v0  ;;  %v2480_v53 = vld [vmem:[%s9180_s19 + $0x420] sm:$0xff] }
 0x25c   : > { %2908 = vmatprep.subr.mxu0 %v2505_v3  ;;  %2970 = vmatprep.mubr.f32.mxu0 %v2333_v5  ;;  %v2544_v0 = vld [vmem:[%s9180_s19 + $0x620] sm:$0xff]  ;;  %v2479_v3 = vld [vmem:[%s9180_s19 + $0x418] sm:$0xff] }
 0x25d   : > { %2979 = vmatprep.subr.mxu1 %v2569_v6  ;;  %3041 = vmatprep.mubr.f32.mxu1 %v2337_v7  ;;  %v2543_v5 = vld [vmem:[%s9180_s19 + $0x618] sm:$0xff]  ;;  %v2478_v6 = vld [vmem:[%s9180_s19 + $0x410] sm:$0xff] }
 0x25e   : > { %2909 = vmatpush1.msra.mxu0 %v2504_v37  ;;  %2980 = vmatpush1.msra.mxu1 %v2568_v51  ;;  %v2542_v7 = vld [vmem:[%s9180_s19 + $0x610] sm:$0xff]  ;;  %v2477_v37 = vld [vmem:[%s9180_s19 + $0x408] sm:$0xff] }
 0x25f   : > { %2910 = vmatprep.subr.mxu0 %v2503_v9  ;;  %2981 = vmatprep.subr.mxu1 %v2567_v11  ;;  %v2541_v51 = vld [vmem:[%s9180_s19 + $0x608] sm:$0xff]  ;;  %v2476_v9 = vld [vmem:[%s9180_s19 + $0x400] sm:$0xff] }
 0x260   : > { %2911 = vmatpush1.msra.mxu0 %v2502_v39  ;;  %2982 = vmatpush1.msra.mxu1 %v2566_v12  ;;  %v2540_v11 = vld [vmem:[%s9180_s19 + $0x600] sm:$0xff]  ;;  %v2539_v39 = vld [vmem:[%s9180_s19 + $0x5f8] sm:$0xff] }
 0x261   : > { %2912 = vmatprep.subr.mxu0 %v2501_v13  ;;  %2983 = vmatprep.subr.mxu1 %v2565_v15  ;;  %v2603_v12 = vld [vmem:[%s9180_s19 + $0x7f8] sm:$0xff]  ;;  %v2538_v13 = vld [vmem:[%s9180_s19 + $0x5f0] sm:$0xff] }
 0x262   : > { %2913 = vmatpush1.msra.mxu0 %v2500_v16  ;;  %2984 = vmatpush1.msra.mxu1 %v2564_v17  ;;  %v2602_v15 = vld [vmem:[%s9180_s19 + $0x7f0] sm:$0xff]  ;;  %v2537_v16 = vld [vmem:[%s9180_s19 + $0x5e8] sm:$0xff] }
 0x263   : > { %2914 = vmatprep.subr.mxu0 %v2499_v18  ;;  %2985 = vmatprep.subr.mxu1 %v2563_v19  ;;  %v2601_v17 = vld [vmem:[%s9180_s19 + $0x7e8] sm:$0xff]  ;;  %v2536_v18 = vld [vmem:[%s9180_s19 + $0x5e0] sm:$0xff] }
 0x264   : > { %2915 = vmatpush1.msra.mxu0 %v2498_v20  ;;  %2986 = vmatpush1.msra.mxu1 %v2562_v21  ;;  %v2600_v19 = vld [vmem:[%s9180_s19 + $0x7e0] sm:$0xff]  ;;  %v2535_v20 = vld [vmem:[%s9180_s19 + $0x5d8] sm:$0xff] }
 0x265   : > { %2916 = vmatprep.subr.mxu0 %v2497_v23  ;;  %2987 = vmatprep.subr.mxu1 %v2561_v24  ;;  %v2599_v21 = vld [vmem:[%s9180_s19 + $0x7d8] sm:$0xff]  ;;  %v2534_v23 = vld [vmem:[%s9180_s19 + $0x5d0] sm:$0xff] }
 0x266   : > { %2917 = vmatpush1.msra.mxu0 %v2496_v25  ;;  %2988 = vmatpush1.msra.mxu1 %v2560_v26  ;;  %v2598_v24 = vld [vmem:[%s9180_s19 + $0x7d0] sm:$0xff]  ;;  %v2533_v25 = vld [vmem:[%s9180_s19 + $0x5c8] sm:$0xff] }
 0x267   : > { %2918 = vmatprep.subr.mxu0 %v2495_v27  ;;  %2989 = vmatprep.subr.mxu1 %v2559_v28  ;;  %v2597_v26 = vld [vmem:[%s9180_s19 + $0x7c8] sm:$0xff]  ;;  %v2532_v27 = vld [vmem:[%s9180_s19 + $0x5c0] sm:$0xff] }
 0x268   : > { %2919 = vmatpush1.msra.mxu0 %v2494_v29  ;;  %2990 = vmatpush1.msra.mxu1 %v2558_v30  ;;  %v2596_v28 = vld [vmem:[%s9180_s19 + $0x7c0] sm:$0xff]  ;;  %v2531_v29 = vld [vmem:[%s9180_s19 + $0x5b8] sm:$0xff] }
 0x269   : > { %2920 = vmatprep.subr.mxu0 %v2493_v31  ;;  %2991 = vmatprep.subr.mxu1 %v2557_v32  ;;  %v2595_v30 = vld [vmem:[%s9180_s19 + $0x7b8] sm:$0xff]  ;;  %v2530_v31 = vld [vmem:[%s9180_s19 + $0x5b0] sm:$0xff] }
 0x26a   : > { %2921 = vmatpush1.msra.mxu0 %v2492_v34  ;;  %2992 = vmatpush1.msra.mxu1 %v2556_v35  ;;  %v2594_v32 = vld [vmem:[%s9180_s19 + $0x7b0] sm:$0xff]  ;;  %v2529_v34 = vld [vmem:[%s9180_s19 + $0x5a8] sm:$0xff] }
 0x26b   : > { %2922 = vmatprep.subr.mxu0 %v2491_v36  ;;  %2993 = vmatprep.subr.mxu1 %v2555_v38  ;;  %v2593_v35 = vld [vmem:[%s9180_s19 + $0x7a8] sm:$0xff]  ;;  %v2528_v36 = vld [vmem:[%s9180_s19 + $0x5a0] sm:$0xff] }
 0x26c   : > { %2923 = vmatpush1.msra.mxu0 %v2490_v41  ;;  %2994 = vmatpush1.msra.mxu1 %v2554_v42  ;;  %v2592_v38 = vld [vmem:[%s9180_s19 + $0x7a0] sm:$0xff]  ;;  %v2527_v41 = vld [vmem:[%s9180_s19 + $0x598] sm:$0xff] }
 0x26d   : > { %2924 = vmatprep.subr.mxu0 %v2489_v44  ;;  %2995 = vmatprep.subr.mxu1 %v2553_v46  ;;  %v2591_v42 = vld [vmem:[%s9180_s19 + $0x798] sm:$0xff]  ;;  %v2526_v44 = vld [vmem:[%s9180_s19 + $0x590] sm:$0xff] }
 0x26e   : > { %2925 = vmatpush1.msra.mxu0 %v2488_v47  ;;  %2996 = vmatpush1.msra.mxu1 %v2552_v48  ;;  %v2590_v46 = vld [vmem:[%s9180_s19 + $0x790] sm:$0xff]  ;;  %v2525_v47 = vld [vmem:[%s9180_s19 + $0x588] sm:$0xff] }
 0x26f   : > { %2926 = vmatprep.subr.mxu0 %v2487_v49  ;;  %2997 = vmatprep.subr.mxu1 %v2551_v50  ;;  %v2589_v48 = vld [vmem:[%s9180_s19 + $0x788] sm:$0xff]  ;;  %v2524_v49 = vld [vmem:[%s9180_s19 + $0x580] sm:$0xff] }
 0x270   : > { %2927 = vmatpush1.msra.mxu0 %v2486_v52  ;;  %2998 = vmatpush1.msra.mxu1 %v2550_v54  ;;  %v2588_v50 = vld [vmem:[%s9180_s19 + $0x780] sm:$0xff]  ;;  %v2523_v52 = vld [vmem:[%s9180_s19 + $0x578] sm:$0xff] }
 0x271   : > { %2928 = vmatprep.subr.mxu0 %v2485_v55  ;;  %2999 = vmatprep.subr.mxu1 %v2549_v56  ;;  %v2587_v54 = vld [vmem:[%s9180_s19 + $0x778] sm:$0xff]  ;;  %v2522_v55 = vld [vmem:[%s9180_s19 + $0x570] sm:$0xff] }
 0x272   : > { %2929 = vmatpush1.msra.mxu0 %v2484_v58  ;;  %3000 = vmatpush1.msra.mxu1 %v2548_v59  ;;  %v2586_v56 = vld [vmem:[%s9180_s19 + $0x770] sm:$0xff]  ;;  %v2521_v58 = vld [vmem:[%s9180_s19 + $0x568] sm:$0xff] }
 0x273   : > { %2930 = vmatprep.subr.mxu0 %v2483_v61  ;;  %3001 = vmatprep.subr.mxu1 %v2547_v63  ;;  %v2585_v59 = vld [vmem:[%s9180_s19 + $0x768] sm:$0xff]  ;;  %v2520_v61 = vld [vmem:[%s9180_s19 + $0x560] sm:$0xff] }
 0x274   : > { %2931 = vmatpush1.msra.mxu0 %v2482_v60  ;;  %3002 = vmatpush1.msra.mxu1 %v2546_v22  ;;  %v2584_v63 = vld [vmem:[%s9180_s19 + $0x760] sm:$0xff]  ;;  %v2519_v60 = vld [vmem:[%s9180_s19 + $0x558] sm:$0xff] }
 0x275   : > { %2932 = vmatprep.subr.mxu0 %v2481_v4  ;;  %3003 = vmatprep.subr.mxu1 %v2545_v43  ;;  %v2583_v22 = vld [vmem:[%s9180_s19 + $0x758] sm:$0xff]  ;;  %v2518_v4 = vld [vmem:[%s9180_s19 + $0x550] sm:$0xff] }
 0x276   : > { %2933 = vmatpush1.msra.mxu0 %v2480_v53  ;;  %3004 = vmatpush1.msra.mxu1 %v2544_v0  ;;  %v2582_v43 = vld [vmem:[%s9180_s19 + $0x750] sm:$0xff]  ;;  %v2517_v53 = vld [vmem:[%s9180_s19 + $0x548] sm:$0xff] }
 0x277   : > { %2934 = vmatprep.subr.mxu0 %v2479_v3  ;;  %3005 = vmatprep.subr.mxu1 %v2543_v5  ;;  %v2581_v0 = vld [vmem:[%s9180_s19 + $0x748] sm:$0xff]  ;;  %v2516_v3 = vld [vmem:[%s9180_s19 + $0x540] sm:$0xff] }
 0x278   : > { %2935 = vmatpush1.msra.mxu0 %v2478_v6  ;;  %3006 = vmatpush1.msra.mxu1 %v2542_v7  ;;  %v2580_v5 = vld [vmem:[%s9180_s19 + $0x740] sm:$0xff]  ;;  %v2515_v6 = vld [vmem:[%s9180_s19 + $0x538] sm:$0xff] }
 0x279   : > { %2936 = vmatprep.subr.mxu0 %v2477_v37  ;;  %3007 = vmatprep.subr.mxu1 %v2541_v51  ;;  %v2579_v7 = vld [vmem:[%s9180_s19 + $0x738] sm:$0xff]  ;;  %v2514_v37 = vld [vmem:[%s9180_s19 + $0x530] sm:$0xff] }
 0x27a   : > { %2937 = vmatpush1.msra.mxu0 %v2476_v9  ;;  %3008 = vmatpush1.msra.mxu1 %v2540_v11  ;;  %v2578_v51 = vld [vmem:[%s9180_s19 + $0x730] sm:$0xff]  ;;  %v2513_v9 = vld [vmem:[%s9180_s19 + $0x528] sm:$0xff] }
 0x27b   : > { %2938 = vmatprep.subr.mxu0 %v2539_v39  ;;  %3009 = vmatprep.subr.mxu1 %v2603_v12  ;;  %v2577_v11 = vld [vmem:[%s9180_s19 + $0x728] sm:$0xff]  ;;  %v2512_v39 = vld [vmem:[%s9180_s19 + $0x520] sm:$0xff] }
 0x27c   : > { %2939 = vmatpush2.msra.mxu0 %v2538_v13  ;;  %3010 = vmatpush2.msra.mxu1 %v2602_v15  ;;  %v2576_v12 = vld [vmem:[%s9180_s19 + $0x720] sm:$0xff]  ;;  %v2511_v13 = vld [vmem:[%s9180_s19 + $0x518] sm:$0xff] }
 0x27d   : > { %2940 = vmatprep.subr.mxu0 %v2537_v16  ;;  %3011 = vmatprep.subr.mxu1 %v2601_v17  ;;  %v2575_v15 = vld [vmem:[%s9180_s19 + $0x718] sm:$0xff]  ;;  %v2510_v16 = vld [vmem:[%s9180_s19 + $0x510] sm:$0xff] }
 0x27e   : > { %2941 = vmatpush2.msra.mxu0 %v2536_v18  ;;  %3012 = vmatpush2.msra.mxu1 %v2600_v19  ;;  %v2574_v17 = vld [vmem:[%s9180_s19 + $0x710] sm:$0xff]  ;;  %v2509_v18 = vld [vmem:[%s9180_s19 + $0x508] sm:$0xff] }
 0x27f   : > { %2942 = vmatprep.subr.mxu0 %v2535_v20  ;;  %3013 = vmatprep.subr.mxu1 %v2599_v21  ;;  %v2573_v19 = vld [vmem:[%s9180_s19 + $0x708] sm:$0xff]  ;;  %v2508_v20 = vld [vmem:[%s9180_s19 + $0x500] sm:$0xff] }
 0x280   : > { %2943 = vmatpush2.msra.mxu0 %v2534_v23  ;;  %3014 = vmatpush2.msra.mxu1 %v2598_v24  ;;  %v2572_v21 = vld [vmem:[%s9180_s19 + $0x700] sm:$0xff]  ;;  %v2331_v23 = vrot.slane %v9897_v62, 4  ;;  %v2335_v24 = vrot.slane %v9897_v62, 6 }
 0x281   : > { %2944 = vmatprep.subr.mxu0 %v2533_v25  ;;  %3015 = vmatprep.subr.mxu1 %v2597_v26  ;;  %v2635_v25 = vld [vmem:[%s9180_s19 + $0x8f8] sm:$0xff] }
 0x282   : > { %2945 = vmatpush2.msra.mxu0 %v2532_v27  ;;  %3016 = vmatpush2.msra.mxu1 %v2596_v28  ;;  %v2699_v26 = vld [vmem:[%s9180_s19 + $0xaf8] sm:$0xff]  ;;  %v2634_v27 = vld [vmem:[%s9180_s19 + $0x8f0] sm:$0xff]  ;;  %v2340_v28 = vrot.slane %v9904_v2, 1 }
 0x283   : > { %2946 = vmatprep.subr.mxu0 %v2531_v29  ;;  %3017 = vmatprep.subr.mxu1 %v2595_v30  ;;  %v2698_v29 = vld [vmem:[%s9180_s19 + $0xaf0] sm:$0xff]  ;;  %v2344_v30 = vrot.slane %v9904_v2, 3 }
 0x284   : > { %2947 = vmatpush2.msra.mxu0 %v2530_v31  ;;  %3018 = vmatpush2.msra.mxu1 %v2594_v32  ;;  %v2633_v31 = vld [vmem:[%s9180_s19 + $0x8e8] sm:$0xff] }
 0x285   : > { %2948 = vmatprep.subr.mxu0 %v2529_v34  ;;  %3019 = vmatprep.subr.mxu1 %v2593_v35  ;;  %v2697_v32 = vld [vmem:[%s9180_s19 + $0xae8] sm:$0xff]  ;;  %v2632_v34 = vld [vmem:[%s9180_s19 + $0x8e0] sm:$0xff] }
 0x286   : > { %2949 = vmatpush2.msra.mxu0 %v2528_v36  ;;  %3020 = vmatpush2.msra.mxu1 %v2592_v38  ;;  %v2696_v35 = vld [vmem:[%s9180_s19 + $0xae0] sm:$0xff]  ;;  %v2631_v36 = vld [vmem:[%s9180_s19 + $0x8d8] sm:$0xff] }
 0x287   : > { %2950 = vmatprep.subr.mxu0 %v2527_v41  ;;  %3021 = vmatprep.subr.mxu1 %v2591_v42  ;;  %v2695_v38 = vld [vmem:[%s9180_s19 + $0xad8] sm:$0xff]  ;;  %v2630_v41 = vld [vmem:[%s9180_s19 + $0x8d0] sm:$0xff] }
 0x288   : > { %2951 = vmatpush2.msra.mxu0 %v2526_v44  ;;  %3022 = vmatpush2.msra.mxu1 %v2590_v46  ;;  %v2694_v42 = vld [vmem:[%s9180_s19 + $0xad0] sm:$0xff]  ;;  %v2629_v44 = vld [vmem:[%s9180_s19 + $0x8c8] sm:$0xff] }
 0x289   : > { %2952 = vmatprep.subr.mxu0 %v2525_v47  ;;  %3023 = vmatprep.subr.mxu1 %v2589_v48  ;;  %v2693_v46 = vld [vmem:[%s9180_s19 + $0xac8] sm:$0xff]  ;;  %v2628_v47 = vld [vmem:[%s9180_s19 + $0x8c0] sm:$0xff] }
 0x28a   : > { %2953 = vmatpush2.msra.mxu0 %v2524_v49  ;;  %3024 = vmatpush2.msra.mxu1 %v2588_v50  ;;  %v2692_v48 = vld [vmem:[%s9180_s19 + $0xac0] sm:$0xff]  ;;  %v2627_v49 = vld [vmem:[%s9180_s19 + $0x8b8] sm:$0xff] }
 0x28b   : > { %2954 = vmatprep.subr.mxu0 %v2523_v52  ;;  %3025 = vmatprep.subr.mxu1 %v2587_v54  ;;  %v2691_v50 = vld [vmem:[%s9180_s19 + $0xab8] sm:$0xff]  ;;  %v2626_v52 = vld [vmem:[%s9180_s19 + $0x8b0] sm:$0xff] }
 0x28c   : > { %2955 = vmatpush2.msra.mxu0 %v2522_v55  ;;  %3026 = vmatpush2.msra.mxu1 %v2586_v56  ;;  %v2690_v54 = vld [vmem:[%s9180_s19 + $0xab0] sm:$0xff]  ;;  %v2625_v55 = vld [vmem:[%s9180_s19 + $0x8a8] sm:$0xff] }
 0x28d   : > { %2956 = vmatprep.subr.mxu0 %v2521_v58  ;;  %3027 = vmatprep.subr.mxu1 %v2585_v59  ;;  %v2689_v56 = vld [vmem:[%s9180_s19 + $0xaa8] sm:$0xff]  ;;  %v2624_v58 = vld [vmem:[%s9180_s19 + $0x8a0] sm:$0xff] }
 0x28e   : > { %2957 = vmatpush2.msra.mxu0 %v2520_v61  ;;  %3028 = vmatpush2.msra.mxu1 %v2584_v63  ;;  %v2688_v59 = vld [vmem:[%s9180_s19 + $0xaa0] sm:$0xff]  ;;  %v2623_v61 = vld [vmem:[%s9180_s19 + $0x898] sm:$0xff] }
 0x28f   : > { %2958 = vmatprep.subr.mxu0 %v2519_v60  ;;  %3029 = vmatprep.subr.mxu1 %v2583_v22  ;;  %v2687_v63 = vld [vmem:[%s9180_s19 + $0xa98] sm:$0xff]  ;;  %v2622_v60 = vld [vmem:[%s9180_s19 + $0x890] sm:$0xff] }
 0x290   : > { %2959 = vmatpush2.msra.mxu0 %v2518_v4  ;;  %3030 = vmatpush2.msra.mxu1 %v2582_v43  ;;  %v2686_v22 = vld [vmem:[%s9180_s19 + $0xa90] sm:$0xff]  ;;  %v2621_v4 = vld [vmem:[%s9180_s19 + $0x888] sm:$0xff] }
 0x291   : > { %2960 = vmatprep.subr.mxu0 %v2517_v53  ;;  %3031 = vmatprep.subr.mxu1 %v2581_v0  ;;  %v2685_v43 = vld [vmem:[%s9180_s19 + $0xa88] sm:$0xff]  ;;  %v2620_v53 = vld [vmem:[%s9180_s19 + $0x880] sm:$0xff] }
 0x292   : > { %2961 = vmatpush2.msra.mxu0 %v2516_v3  ;;  %3032 = vmatpush2.msra.mxu1 %v2580_v5  ;;  %v2684_v0 = vld [vmem:[%s9180_s19 + $0xa80] sm:$0xff]  ;;  %v2619_v3 = vld [vmem:[%s9180_s19 + $0x878] sm:$0xff] }
 0x293   : > { %2962 = vmatprep.subr.mxu0 %v2515_v6  ;;  %3033 = vmatprep.subr.mxu1 %v2579_v7  ;;  %v2683_v5 = vld [vmem:[%s9180_s19 + $0xa78] sm:$0xff]  ;;  %v2618_v6 = vld [vmem:[%s9180_s19 + $0x870] sm:$0xff] }
 0x294   : > { %2963 = vmatpush2.msra.mxu0 %v2514_v37  ;;  %3034 = vmatpush2.msra.mxu1 %v2578_v51  ;;  %v2682_v7 = vld [vmem:[%s9180_s19 + $0xa70] sm:$0xff]  ;;  %v2617_v37 = vld [vmem:[%s9180_s19 + $0x868] sm:$0xff] }
 0x295   : > { %2964 = vmatprep.subr.mxu0 %v2513_v9  ;;  %3035 = vmatprep.subr.mxu1 %v2577_v11  ;;  %v2681_v51 = vld [vmem:[%s9180_s19 + $0xa68] sm:$0xff]  ;;  %v2616_v9 = vld [vmem:[%s9180_s19 + $0x860] sm:$0xff] }
 0x296   : > { %2965 = vmatpush2.msra.mxu0 %v2512_v39  ;;  %3036 = vmatpush2.msra.mxu1 %v2576_v12  ;;  %v2680_v11 = vld [vmem:[%s9180_s19 + $0xa60] sm:$0xff]  ;;  %v2615_v39 = vld [vmem:[%s9180_s19 + $0x858] sm:$0xff] }
 0x297   : > { %2966 = vmatprep.subr.mxu0 %v2511_v13  ;;  %3037 = vmatprep.subr.mxu1 %v2575_v15  ;;  %v2679_v12 = vld [vmem:[%s9180_s19 + $0xa58] sm:$0xff]  ;;  %v2614_v13 = vld [vmem:[%s9180_s19 + $0x850] sm:$0xff] }
 0x298   : > { %2967 = vmatpush2.msra.mxu0 %v2510_v16  ;;  %3038 = vmatpush2.msra.mxu1 %v2574_v17  ;;  %v2678_v15 = vld [vmem:[%s9180_s19 + $0xa50] sm:$0xff]  ;;  %v2613_v16 = vld [vmem:[%s9180_s19 + $0x848] sm:$0xff] }
 0x299   : > { %2968 = vmatprep.subr.mxu0 %v2509_v18  ;;  %3039 = vmatprep.subr.mxu1 %v2573_v19  ;;  %v2677_v17 = vld [vmem:[%s9180_s19 + $0xa48] sm:$0xff]  ;;  %v2612_v18 = vld [vmem:[%s9180_s19 + $0x840] sm:$0xff] }
 0x29a   : > { %2969 = vmatpush2.msra.mxu0 %v2508_v20  ;;  %3040 = vmatpush2.msra.mxu1 %v2572_v21  ;;  %v2676_v19 = vld [vmem:[%s9180_s19 + $0xa40] sm:$0xff]  ;;  %v2611_v20 = vld [vmem:[%s9180_s19 + $0x838] sm:$0xff] }
 0x29b   : > { %2971 = vmatmul.mubr.f32.vlgmr.msra.gmra.mxu0 %v2331_v23  ;;  %3042 = vmatmul.mubr.f32.vlgmr.msra.gmra.mxu1 %v2335_v24  ;;  %v2675_v21 = vld [vmem:[%s9180_s19 + $0xa38] sm:$0xff]  ;;  %v2610_v23 = vld [vmem:[%s9180_s19 + $0x830] sm:$0xff] }
 0x29c   : > { %3048 = vmatprep.subr.mxu0 %v2635_v25  ;;  %3119 = vmatprep.subr.mxu1 %v2699_v26  ;;  %v2674_v24 = vld [vmem:[%s9180_s19 + $0xa30] sm:$0xff]  ;;  %v2609_v25 = vld [vmem:[%s9180_s19 + $0x828] sm:$0xff] }
 0x29d   : > { %3049 = vmatpush1.msra.mxu0 %v2634_v27  ;;  %3112 = vmatprep.mubr.f32.mxu0 %v2340_v28  ;;  %v2673_v26 = vld [vmem:[%s9180_s19 + $0xa28] sm:$0xff]  ;;  %v2608_v27 = vld [vmem:[%s9180_s19 + $0x820] sm:$0xff] }
 0x29e   : > { %3120 = vmatpush1.msra.mxu1 %v2698_v29  ;;  %3183 = vmatprep.mubr.f32.mxu1 %v2344_v30  ;;  %v2672_v28 = vld [vmem:[%s9180_s19 + $0xa20] sm:$0xff]  ;;  %v2607_v29 = vld [vmem:[%s9180_s19 + $0x818] sm:$0xff] }
 0x29f   : > { %3050 = vmatprep.subr.mxu0 %v2633_v31  ;;  %3121 = vmatprep.subr.mxu1 %v2697_v32  ;;  %v2671_v30 = vld [vmem:[%s9180_s19 + $0xa18] sm:$0xff]  ;;  %v2606_v31 = vld [vmem:[%s9180_s19 + $0x810] sm:$0xff] }
 0x2a0   : > { %3051 = vmatpush1.msra.mxu0 %v2632_v34  ;;  %3122 = vmatpush1.msra.mxu1 %v2696_v35  ;;  %v2670_v32 = vld [vmem:[%s9180_s19 + $0xa10] sm:$0xff]  ;;  %v2605_v34 = vld [vmem:[%s9180_s19 + $0x808] sm:$0xff] }
 0x2a1   : > { %3052 = vmatprep.subr.mxu0 %v2631_v36  ;;  %3123 = vmatprep.subr.mxu1 %v2695_v38  ;;  %v2669_v35 = vld [vmem:[%s9180_s19 + $0xa08] sm:$0xff]  ;;  %v2604_v36 = vld [vmem:[%s9180_s19 + $0x800] sm:$0xff] }
 0x2a2   : > { %3053 = vmatpush1.msra.mxu0 %v2630_v41  ;;  %3124 = vmatpush1.msra.mxu1 %v2694_v42  ;;  %v2668_v38 = vld [vmem:[%s9180_s19 + $0xa00] sm:$0xff]  ;;  %v2667_v41 = vld [vmem:[%s9180_s19 + $0x9f8] sm:$0xff] }
 0x2a3   : > { %3054 = vmatprep.subr.mxu0 %v2629_v44  ;;  %3125 = vmatprep.subr.mxu1 %v2693_v46  ;;  %v2731_v42 = vld [vmem:[%s9180_s19 + $0xbf8] sm:$0xff]  ;;  %v2666_v44 = vld [vmem:[%s9180_s19 + $0x9f0] sm:$0xff] }
 0x2a4   : > { %3055 = vmatpush1.msra.mxu0 %v2628_v47  ;;  %3126 = vmatpush1.msra.mxu1 %v2692_v48  ;;  %v2730_v46 = vld [vmem:[%s9180_s19 + $0xbf0] sm:$0xff]  ;;  %v2665_v47 = vld [vmem:[%s9180_s19 + $0x9e8] sm:$0xff] }
 0x2a5   : > { %3056 = vmatprep.subr.mxu0 %v2627_v49  ;;  %3127 = vmatprep.subr.mxu1 %v2691_v50  ;;  %v2729_v48 = vld [vmem:[%s9180_s19 + $0xbe8] sm:$0xff]  ;;  %v2664_v49 = vld [vmem:[%s9180_s19 + $0x9e0] sm:$0xff] }
 0x2a6   : > { %3057 = vmatpush1.msra.mxu0 %v2626_v52  ;;  %3128 = vmatpush1.msra.mxu1 %v2690_v54  ;;  %v2728_v50 = vld [vmem:[%s9180_s19 + $0xbe0] sm:$0xff]  ;;  %v2663_v52 = vld [vmem:[%s9180_s19 + $0x9d8] sm:$0xff] }
 0x2a7   : > { %3058 = vmatprep.subr.mxu0 %v2625_v55  ;;  %3129 = vmatprep.subr.mxu1 %v2689_v56  ;;  %v2727_v54 = vld [vmem:[%s9180_s19 + $0xbd8] sm:$0xff]  ;;  %v2662_v55 = vld [vmem:[%s9180_s19 + $0x9d0] sm:$0xff] }
 0x2a8   : > { %3059 = vmatpush1.msra.mxu0 %v2624_v58  ;;  %3130 = vmatpush1.msra.mxu1 %v2688_v59  ;;  %v2726_v56 = vld [vmem:[%s9180_s19 + $0xbd0] sm:$0xff]  ;;  %v2661_v58 = vld [vmem:[%s9180_s19 + $0x9c8] sm:$0xff] }
 0x2a9   : > { %3060 = vmatprep.subr.mxu0 %v2623_v61  ;;  %3131 = vmatprep.subr.mxu1 %v2687_v63  ;;  %v2725_v59 = vld [vmem:[%s9180_s19 + $0xbc8] sm:$0xff]  ;;  %v2660_v61 = vld [vmem:[%s9180_s19 + $0x9c0] sm:$0xff] }
 0x2aa   : > { %3061 = vmatpush1.msra.mxu0 %v2622_v60  ;;  %3132 = vmatpush1.msra.mxu1 %v2686_v22  ;;  %v2724_v63 = vld [vmem:[%s9180_s19 + $0xbc0] sm:$0xff]  ;;  %v2659_v60 = vld [vmem:[%s9180_s19 + $0x9b8] sm:$0xff] }
 0x2ab   : > { %3062 = vmatprep.subr.mxu0 %v2621_v4  ;;  %3133 = vmatprep.subr.mxu1 %v2685_v43  ;;  %v2723_v22 = vld [vmem:[%s9180_s19 + $0xbb8] sm:$0xff]  ;;  %v2658_v4 = vld [vmem:[%s9180_s19 + $0x9b0] sm:$0xff] }
 0x2ac   : > { %3063 = vmatpush1.msra.mxu0 %v2620_v53  ;;  %3134 = vmatpush1.msra.mxu1 %v2684_v0  ;;  %v2722_v43 = vld [vmem:[%s9180_s19 + $0xbb0] sm:$0xff]  ;;  %v2657_v53 = vld [vmem:[%s9180_s19 + $0x9a8] sm:$0xff] }
 0x2ad   : > { %3064 = vmatprep.subr.mxu0 %v2619_v3  ;;  %3135 = vmatprep.subr.mxu1 %v2683_v5  ;;  %v2721_v0 = vld [vmem:[%s9180_s19 + $0xba8] sm:$0xff]  ;;  %v2656_v3 = vld [vmem:[%s9180_s19 + $0x9a0] sm:$0xff] }
 0x2ae   : > { %3065 = vmatpush1.msra.mxu0 %v2618_v6  ;;  %3136 = vmatpush1.msra.mxu1 %v2682_v7  ;;  %v2720_v5 = vld [vmem:[%s9180_s19 + $0xba0] sm:$0xff]  ;;  %v2655_v6 = vld [vmem:[%s9180_s19 + $0x998] sm:$0xff] }
 0x2af   : > { %3066 = vmatprep.subr.mxu0 %v2617_v37  ;;  %3137 = vmatprep.subr.mxu1 %v2681_v51  ;;  %v2719_v7 = vld [vmem:[%s9180_s19 + $0xb98] sm:$0xff]  ;;  %v2654_v37 = vld [vmem:[%s9180_s19 + $0x990] sm:$0xff] }
 0x2b0   : > { %3067 = vmatpush1.msra.mxu0 %v2616_v9  ;;  %3138 = vmatpush1.msra.mxu1 %v2680_v11  ;;  %v2718_v51 = vld [vmem:[%s9180_s19 + $0xb90] sm:$0xff]  ;;  %v2653_v9 = vld [vmem:[%s9180_s19 + $0x988] sm:$0xff] }
 0x2b1   : > { %3068 = vmatprep.subr.mxu0 %v2615_v39  ;;  %3139 = vmatprep.subr.mxu1 %v2679_v12  ;;  %v2717_v11 = vld [vmem:[%s9180_s19 + $0xb88] sm:$0xff]  ;;  %v2652_v39 = vld [vmem:[%s9180_s19 + $0x980] sm:$0xff] }
 0x2b2   : > { %3069 = vmatpush1.msra.mxu0 %v2614_v13  ;;  %3140 = vmatpush1.msra.mxu1 %v2678_v15  ;;  %v2716_v12 = vld [vmem:[%s9180_s19 + $0xb80] sm:$0xff]  ;;  %v2651_v13 = vld [vmem:[%s9180_s19 + $0x978] sm:$0xff] }
 0x2b3   : > { %3070 = vmatprep.subr.mxu0 %v2613_v16  ;;  %3141 = vmatprep.subr.mxu1 %v2677_v17  ;;  %v2715_v15 = vld [vmem:[%s9180_s19 + $0xb78] sm:$0xff]  ;;  %v2650_v16 = vld [vmem:[%s9180_s19 + $0x970] sm:$0xff] }
 0x2b4   : > { %3071 = vmatpush1.msra.mxu0 %v2612_v18  ;;  %3142 = vmatpush1.msra.mxu1 %v2676_v19  ;;  %v2714_v17 = vld [vmem:[%s9180_s19 + $0xb70] sm:$0xff]  ;;  %v2649_v18 = vld [vmem:[%s9180_s19 + $0x968] sm:$0xff] }
 0x2b5   : > { %3072 = vmatprep.subr.mxu0 %v2611_v20  ;;  %3143 = vmatprep.subr.mxu1 %v2675_v21  ;;  %v2713_v19 = vld [vmem:[%s9180_s19 + $0xb68] sm:$0xff]  ;;  %v2648_v20 = vld [vmem:[%s9180_s19 + $0x960] sm:$0xff] }
 0x2b6   : > { %3073 = vmatpush1.msra.mxu0 %v2610_v23  ;;  %3144 = vmatpush1.msra.mxu1 %v2674_v24  ;;  %v2712_v21 = vld [vmem:[%s9180_s19 + $0xb60] sm:$0xff]  ;;  %v2647_v23 = vld [vmem:[%s9180_s19 + $0x958] sm:$0xff] }
 0x2b7   : > { %3074 = vmatprep.subr.mxu0 %v2609_v25  ;;  %3145 = vmatprep.subr.mxu1 %v2673_v26  ;;  %v2711_v24 = vld [vmem:[%s9180_s19 + $0xb58] sm:$0xff]  ;;  %v2646_v25 = vld [vmem:[%s9180_s19 + $0x950] sm:$0xff] }
 0x2b8   : > { %3075 = vmatpush1.msra.mxu0 %v2608_v27  ;;  %3146 = vmatpush1.msra.mxu1 %v2672_v28  ;;  %v2710_v26 = vld [vmem:[%s9180_s19 + $0xb50] sm:$0xff]  ;;  %v2645_v27 = vld [vmem:[%s9180_s19 + $0x948] sm:$0xff] }
 0x2b9   : > { %3076 = vmatprep.subr.mxu0 %v2607_v29  ;;  %3147 = vmatprep.subr.mxu1 %v2671_v30  ;;  %v2709_v28 = vld [vmem:[%s9180_s19 + $0xb48] sm:$0xff]  ;;  %v2644_v29 = vld [vmem:[%s9180_s19 + $0x940] sm:$0xff] }
 0x2ba   : > { %3077 = vmatpush1.msra.mxu0 %v2606_v31  ;;  %3148 = vmatpush1.msra.mxu1 %v2670_v32  ;;  %v2708_v30 = vld [vmem:[%s9180_s19 + $0xb40] sm:$0xff]  ;;  %v2643_v31 = vld [vmem:[%s9180_s19 + $0x938] sm:$0xff] }
 0x2bb   : > { %3078 = vmatprep.subr.mxu0 %v2605_v34  ;;  %3149 = vmatprep.subr.mxu1 %v2669_v35  ;;  %v2707_v32 = vld [vmem:[%s9180_s19 + $0xb38] sm:$0xff]  ;;  %v2642_v34 = vld [vmem:[%s9180_s19 + $0x930] sm:$0xff] }
 0x2bc   : > { %3079 = vmatpush1.msra.mxu0 %v2604_v36  ;;  %3150 = vmatpush1.msra.mxu1 %v2668_v38  ;;  %v2706_v35 = vld [vmem:[%s9180_s19 + $0xb30] sm:$0xff]  ;;  %v2641_v36 = vld [vmem:[%s9180_s19 + $0x928] sm:$0xff] }
 0x2bd   : > { %3080 = vmatprep.subr.mxu0 %v2667_v41  ;;  %3151 = vmatprep.subr.mxu1 %v2731_v42  ;;  %v2705_v38 = vld [vmem:[%s9180_s19 + $0xb28] sm:$0xff]  ;;  %v2640_v41 = vld [vmem:[%s9180_s19 + $0x920] sm:$0xff] }
 0x2be   : > { %3081 = vmatpush2.msra.mxu0 %v2666_v44  ;;  %3152 = vmatpush2.msra.mxu1 %v2730_v46  ;;  %v2704_v42 = vld [vmem:[%s9180_s19 + $0xb20] sm:$0xff]  ;;  %v2639_v44 = vld [vmem:[%s9180_s19 + $0x918] sm:$0xff] }
 0x2bf   : > { %3082 = vmatprep.subr.mxu0 %v2665_v47  ;;  %3153 = vmatprep.subr.mxu1 %v2729_v48  ;;  %v2703_v46 = vld [vmem:[%s9180_s19 + $0xb18] sm:$0xff]  ;;  %v2638_v47 = vld [vmem:[%s9180_s19 + $0x910] sm:$0xff] }
 0x2c0   : > { %3083 = vmatpush2.msra.mxu0 %v2664_v49  ;;  %3154 = vmatpush2.msra.mxu1 %v2728_v50  ;;  %v2702_v48 = vld [vmem:[%s9180_s19 + $0xb10] sm:$0xff]  ;;  %v2637_v49 = vld [vmem:[%s9180_s19 + $0x908] sm:$0xff] }
 0x2c1   : > { %3084 = vmatprep.subr.mxu0 %v2663_v52  ;;  %3155 = vmatprep.subr.mxu1 %v2727_v54  ;;  %v2701_v50 = vld [vmem:[%s9180_s19 + $0xb08] sm:$0xff]  ;;  %v2636_v52 = vld [vmem:[%s9180_s19 + $0x900] sm:$0xff] }
 0x2c2   : > { %3085 = vmatpush2.msra.mxu0 %v2662_v55  ;;  %3156 = vmatpush2.msra.mxu1 %v2726_v56  ;;  %v2700_v54 = vld [vmem:[%s9180_s19 + $0xb00] sm:$0xff]  ;;  %v2342_v55 = vrot.slane %v9904_v2, 2  ;;  %v2763_v56 = vld [vmem:[%s9180_s19 + $0xcf8] sm:$0xff] }
 0x2c3   : > { %3086 = vmatprep.subr.mxu0 %v2661_v58  ;;  %3157 = vmatprep.subr.mxu1 %v2725_v59  ;;  %v10168_v58 = vld [vmem:[%s9160_s29 + $0x78] sm:$0xff]  ;;  %v2762_v59 = vld [vmem:[%s9180_s19 + $0xcf0] sm:$0xff] }
 0x2c4   : > { %3087 = vmatpush2.msra.mxu0 %v2660_v61  ;;  %3158 = vmatpush2.msra.mxu1 %v2724_v63  ;;  %v2761_v61 = vld [vmem:[%s9180_s19 + $0xce8] sm:$0xff]  ;;  %v10175_v63 = vld [vmem:[%s9160_s29 + $0x70] sm:$0xff] }
 0x2c5   : > { %3088 = vmatprep.subr.mxu0 %v2659_v60  ;;  %3159 = vmatprep.subr.mxu1 %v2723_v22  ;;  %v2760_v60 = vld [vmem:[%s9180_s19 + $0xce0] sm:$0xff]  ;;  %v2759_v22 = vld [vmem:[%s9180_s19 + $0xcd8] sm:$0xff] }
 0x2c6   : > { %3089 = vmatpush2.msra.mxu0 %v2658_v4  ;;  %3160 = vmatpush2.msra.mxu1 %v2722_v43  ;;  %v10182_v4 = vld [vmem:[%s9160_s29 + $0x68] sm:$0xff]  ;;  %v2758_v43 = vld [vmem:[%s9180_s19 + $0xcd0] sm:$0xff] }
 0x2c7   : > { %3090 = vmatprep.subr.mxu0 %v2657_v53  ;;  %3161 = vmatprep.subr.mxu1 %v2721_v0  ;;  %v2757_v53 = vld [vmem:[%s9180_s19 + $0xcc8] sm:$0xff]  ;;  %v10189_v0 = vld [vmem:[%s9160_s29 + $0x60] sm:$0xff] }
 0x2c8   : > { %3091 = vmatpush2.msra.mxu0 %v2656_v3  ;;  %3162 = vmatpush2.msra.mxu1 %v2720_v5  ;;  %v2756_v3 = vld [vmem:[%s9180_s19 + $0xcc0] sm:$0xff]  ;;  %v2755_v5 = vld [vmem:[%s9180_s19 + $0xcb8] sm:$0xff] }
 0x2c9   : > { %3092 = vmatprep.subr.mxu0 %v2655_v6  ;;  %3163 = vmatprep.subr.mxu1 %v2719_v7  ;;  %v10196_v6 = vld [vmem:[%s9160_s29 + $0x58] sm:$0xff]  ;;  %v2754_v7 = vld [vmem:[%s9180_s19 + $0xcb0] sm:$0xff] }
 0x2ca   : > { %3093 = vmatpush2.msra.mxu0 %v2654_v37  ;;  %3164 = vmatpush2.msra.mxu1 %v2718_v51  ;;  %v2753_v37 = vld [vmem:[%s9180_s19 + $0xca8] sm:$0xff]  ;;  %v10203_v51 = vld [vmem:[%s9160_s29 + $0x50] sm:$0xff] }
 0x2cb   : > { %3094 = vmatprep.subr.mxu0 %v2653_v9  ;;  %3165 = vmatprep.subr.mxu1 %v2717_v11  ;;  %v2752_v9 = vld [vmem:[%s9180_s19 + $0xca0] sm:$0xff]  ;;  %v2751_v11 = vld [vmem:[%s9180_s19 + $0xc98] sm:$0xff] }
 0x2cc   : > { %3095 = vmatpush2.msra.mxu0 %v2652_v39  ;;  %3166 = vmatpush2.msra.mxu1 %v2716_v12  ;;  %v10210_v39 = vld [vmem:[%s9160_s29 + $0x48] sm:$0xff]  ;;  %v2750_v12 = vld [vmem:[%s9180_s19 + $0xc90] sm:$0xff] }
 0x2cd   : > { %3096 = vmatprep.subr.mxu0 %v2651_v13  ;;  %3167 = vmatprep.subr.mxu1 %v2715_v15  ;;  %v2749_v13 = vld [vmem:[%s9180_s19 + $0xc88] sm:$0xff]  ;;  %v10217_v15 = vld [vmem:[%s9160_s29 + $0x40] sm:$0xff] }
 0x2ce   : > { %3097 = vmatpush2.msra.mxu0 %v2650_v16  ;;  %3168 = vmatpush2.msra.mxu1 %v2714_v17  ;;  %v2748_v16 = vld [vmem:[%s9180_s19 + $0xc80] sm:$0xff]  ;;  %v2747_v17 = vld [vmem:[%s9180_s19 + $0xc78] sm:$0xff] }
 0x2cf   : > { %3098 = vmatprep.subr.mxu0 %v2649_v18  ;;  %3169 = vmatprep.subr.mxu1 %v2713_v19  ;;  %v10224_v18 = vld [vmem:[%s9160_s29 + $0x38] sm:$0xff]  ;;  %v2746_v19 = vld [vmem:[%s9180_s19 + $0xc70] sm:$0xff] }
 0x2d0   : > { %3099 = vmatpush2.msra.mxu0 %v2648_v20  ;;  %3170 = vmatpush2.msra.mxu1 %v2712_v21  ;;  %v2745_v20 = vld [vmem:[%s9180_s19 + $0xc68] sm:$0xff]  ;;  %v10231_v21 = vld [vmem:[%s9160_s29 + $0x30] sm:$0xff] }
 0x2d1   : > { %3100 = vmatprep.subr.mxu0 %v2647_v23  ;;  %3171 = vmatprep.subr.mxu1 %v2711_v24  ;;  %v2744_v23 = vld [vmem:[%s9180_s19 + $0xc60] sm:$0xff]  ;;  %v2743_v24 = vld [vmem:[%s9180_s19 + $0xc58] sm:$0xff] }
 0x2d2   : > { %3101 = vmatpush2.msra.mxu0 %v2646_v25  ;;  %3172 = vmatpush2.msra.mxu1 %v2710_v26  ;;  %v10238_v25 = vld [vmem:[%s9160_s29 + $0x28] sm:$0xff]  ;;  %v2742_v26 = vld [vmem:[%s9180_s19 + $0xc50] sm:$0xff] }
 0x2d3   : > { %3102 = vmatprep.subr.mxu0 %v2645_v27  ;;  %3173 = vmatprep.subr.mxu1 %v2709_v28  ;;  %v2741_v27 = vld [vmem:[%s9180_s19 + $0xc48] sm:$0xff]  ;;  %v10245_v28 = vld [vmem:[%s9160_s29 + $0x20] sm:$0xff] }
 0x2d4   : > { %3103 = vmatpush2.msra.mxu0 %v2644_v29  ;;  %3174 = vmatpush2.msra.mxu1 %v2708_v30  ;;  %v2740_v29 = vld [vmem:[%s9180_s19 + $0xc40] sm:$0xff]  ;;  %v2739_v30 = vld [vmem:[%s9180_s19 + $0xc38] sm:$0xff] }
 0x2d5   : > { %3104 = vmatprep.subr.mxu0 %v2643_v31  ;;  %3175 = vmatprep.subr.mxu1 %v2707_v32  ;;  %v1342_v31 = vld [vmem:[%s9160_s29 + $0x18] sm:$0xff]  ;;  %v2738_v32 = vld [vmem:[%s9180_s19 + $0xc30] sm:$0xff] }
 0x2d6   : > { %3105 = vmatpush2.msra.mxu0 %v2642_v34  ;;  %3176 = vmatpush2.msra.mxu1 %v2706_v35  ;;  %v2737_v34 = vld [vmem:[%s9180_s19 + $0xc28] sm:$0xff]  ;;  %v1341_v35 = vld [vmem:[%s9160_s29 + $0x10] sm:$0xff] }
 0x2d7   : > { %3106 = vmatprep.subr.mxu0 %v2641_v36  ;;  %3177 = vmatprep.subr.mxu1 %v2705_v38  ;;  %v2736_v36 = vld [vmem:[%s9180_s19 + $0xc20] sm:$0xff]  ;;  %v2735_v38 = vld [vmem:[%s9180_s19 + $0xc18] sm:$0xff] }
 0x2d8   : > { %3107 = vmatpush2.msra.mxu0 %v2640_v41  ;;  %3178 = vmatpush2.msra.mxu1 %v2704_v42  ;;  %v1340_v41 = vld [vmem:[%s9160_s29 + $0x8] sm:$0xff]  ;;  %v2734_v42 = vld [vmem:[%s9180_s19 + $0xc10] sm:$0xff] }
 0x2d9   : > { %3108 = vmatprep.subr.mxu0 %v2639_v44  ;;  %3179 = vmatprep.subr.mxu1 %v2703_v46  ;;  %v2733_v44 = vld [vmem:[%s9180_s19 + $0xc08] sm:$0xff]  ;;  %v1339_v46 = vld [vmem:[%s9160_s29] sm:$0xff] }
 0x2da   : > { %3109 = vmatpush2.msra.mxu0 %v2638_v47  ;;  %3180 = vmatpush2.msra.mxu1 %v2702_v48  ;;  %v2732_v47 = vld [vmem:[%s9180_s19 + $0xc00] sm:$0xff]  ;;  %v2346_v48 = vrot.slane %v9904_v2, 4 }
 0x2db   : > { %3110 = vmatprep.subr.mxu0 %v2637_v49  ;;  %3181 = vmatprep.subr.mxu1 %v2701_v50 }
 0x2dc   : > { %3111 = vmatpush2.msra.mxu0 %v2636_v52  ;;  %3182 = vmatpush2.msra.mxu1 %v2700_v54 }
 0x2dd   : > { %3113 = vmatmul.mubr.f32.vlgmr.msra.gmra.mxu0 %v9904_v2  ;;  %3184 = vmatmul.mubr.f32.vlgmr.msra.gmra.mxu1 %v2342_v55 }
 0x2de   : > { %3190 = vmatprep.subr.mxu0 %v2763_v56  ;;  %8286 = vmatprep.subr.mxu1 %v10168_v58 }
 0x2df   : > { %3191 = vmatpush1.msra.mxu0 %v2762_v59  ;;  %8287 = vmatpush3.msra.mxu1 %v10168_v58  ;;  %v3452_v59 = vld [vmem:[%s9190_s30 + $0x78] sm:$0xff] }
 0x2e0   : > { %8318 = vmatprep.mubr.f32.mxu1 %v9897_v62  ;;  %3192 = vmatprep.subr.mxu0 %v2761_v61  ;;  %v3467_v61 = vld [vmem:[%s9190_s30 + $0xf0] sm:$0xff] }
 0x2e1   : > { %8288 = vmatprep.subr.mxu1 %v10175_v63  ;;  %3193 = vmatpush1.msra.mxu0 %v2760_v60  ;;  %v3466_v60 = vld [vmem:[%s9190_s30 + $0xe8] sm:$0xff] }
 0x2e2   : > { %8289 = vmatpush3.msra.mxu1 %v10175_v63  ;;  %3194 = vmatprep.subr.mxu0 %v2759_v22  ;;  %v3450_v22 = vld [vmem:[%s9190_s30 + $0x68] sm:$0xff] }
 0x2e3   : > { %8290 = vmatprep.subr.mxu1 %v10182_v4  ;;  %3195 = vmatpush1.msra.mxu0 %v2758_v43  ;;  %v3449_v43 = vld [vmem:[%s9190_s30 + $0x60] sm:$0xff] }
 0x2e4   : > { %8291 = vmatpush3.msra.mxu1 %v10182_v4  ;;  %3196 = vmatprep.subr.mxu0 %v2757_v53  ;;  %v3464_v53 = vld [vmem:[%s9190_s30 + $0xd8] sm:$0xff] }
 0x2e5   : > { %8292 = vmatprep.subr.mxu1 %v10189_v0  ;;  %3197 = vmatpush1.msra.mxu0 %v2756_v3  ;;  %v3463_v3 = vld [vmem:[%s9190_s30 + $0xd0] sm:$0xff] }
 0x2e6   : > { %8293 = vmatpush3.msra.mxu1 %v10189_v0  ;;  %3198 = vmatprep.subr.mxu0 %v2755_v5  ;;  %v3447_v5 = vld [vmem:[%s9190_s30 + $0x50] sm:$0xff] }
 0x2e7   : > { %8294 = vmatprep.subr.mxu1 %v10196_v6  ;;  %3199 = vmatpush1.msra.mxu0 %v2754_v7  ;;  %v3446_v7 = vld [vmem:[%s9190_s30 + $0x48] sm:$0xff] }
 0x2e8   : > { %8295 = vmatpush3.msra.mxu1 %v10196_v6  ;;  %3200 = vmatprep.subr.mxu0 %v2753_v37  ;;  %v3461_v37 = vld [vmem:[%s9190_s30 + $0xc0] sm:$0xff] }
 0x2e9   : > { %8296 = vmatprep.subr.mxu1 %v10203_v51  ;;  %3201 = vmatpush1.msra.mxu0 %v2752_v9  ;;  %v3460_v9 = vld [vmem:[%s9190_s30 + $0xb8] sm:$0xff] }
 0x2ea   : > { %8297 = vmatpush3.msra.mxu1 %v10203_v51  ;;  %3202 = vmatprep.subr.mxu0 %v2751_v11  ;;  %v3444_v11 = vld [vmem:[%s9190_s30 + $0x38] sm:$0xff] }
 0x2eb   : > { %8298 = vmatprep.subr.mxu1 %v10210_v39  ;;  %3203 = vmatpush1.msra.mxu0 %v2750_v12  ;;  %v3443_v12 = vld [vmem:[%s9190_s30 + $0x30] sm:$0xff] }
 0x2ec   : > { %8299 = vmatpush3.msra.mxu1 %v10210_v39  ;;  %3204 = vmatprep.subr.mxu0 %v2749_v13  ;;  %v3458_v13 = vld [vmem:[%s9190_s30 + $0xa8] sm:$0xff] }
 0x2ed   : > { %8300 = vmatprep.subr.mxu1 %v10217_v15  ;;  %3205 = vmatpush1.msra.mxu0 %v2748_v16  ;;  %v3457_v16 = vld [vmem:[%s9190_s30 + $0xa0] sm:$0xff] }
 0x2ee   : > { %8301 = vmatpush3.msra.mxu1 %v10217_v15  ;;  %3206 = vmatprep.subr.mxu0 %v2747_v17  ;;  %v3441_v17 = vld [vmem:[%s9190_s30 + $0x20] sm:$0xff] }
 0x2ef   : > { %8302 = vmatprep.subr.mxu1 %v10224_v18  ;;  %3207 = vmatpush1.msra.mxu0 %v2746_v19  ;;  %v3440_v19 = vld [vmem:[%s9190_s30 + $0x18] sm:$0xff] }
 0x2f0   : > { %8303 = vmatpush3.msra.mxu1 %v10224_v18  ;;  %3208 = vmatprep.subr.mxu0 %v2745_v20  ;;  %v3455_v20 = vld [vmem:[%s9190_s30 + $0x90] sm:$0xff] }
 0x2f1   : > { %8304 = vmatprep.subr.mxu1 %v10231_v21  ;;  %3209 = vmatpush1.msra.mxu0 %v2744_v23  ;;  %v3454_v23 = vld [vmem:[%s9190_s30 + $0x88] sm:$0xff] }
 0x2f2   : > { %8305 = vmatpush3.msra.mxu1 %v10231_v21  ;;  %3210 = vmatprep.subr.mxu0 %v2743_v24  ;;  %v3438_v24 = vld [vmem:[%s9190_s30 + $0x8] sm:$0xff] }
 0x2f3   : > { %8306 = vmatprep.subr.mxu1 %v10238_v25  ;;  %3211 = vmatpush1.msra.mxu0 %v2742_v26  ;;  %v3437_v26 = vld [vmem:[%s9190_s30] sm:$0xff] }
 0x2f4   : > { %8307 = vmatpush3.msra.mxu1 %v10238_v25  ;;  %3212 = vmatprep.subr.mxu0 %v2741_v27  ;;  %v10328_v27 = vld [vmem:[%s12311_s3 + $0x78] sm:$0xff] }
 0x2f5   : > { %8308 = vmatprep.subr.mxu1 %v10245_v28  ;;  %3213 = vmatpush1.msra.mxu0 %v2740_v29 }
 0x2f6   : > { %8309 = vmatpush3.msra.mxu1 %v10245_v28  ;;  %3214 = vmatprep.subr.mxu0 %v2739_v30 }
 0x2f7   : > { %8310 = vmatprep.subr.mxu1 %v1342_v31  ;;  %3215 = vmatpush1.msra.mxu0 %v2738_v32 }
 0x2f8   : > { %8311 = vmatpush3.msra.mxu1 %v1342_v31  ;;  %3216 = vmatprep.subr.mxu0 %v2737_v34 }
 0x2f9   : > { %8312 = vmatprep.subr.mxu1 %v1341_v35  ;;  %3217 = vmatpush1.msra.mxu0 %v2736_v36 }
 0x2fa   : > { %8313 = vmatpush3.msra.mxu1 %v1341_v35  ;;  %3218 = vmatprep.subr.mxu0 %v2735_v38  ;;  %v3484_v38 = vld [vmem:[%s9190_s30 + $0x178] sm:$0xff] }
 0x2fb   : > { %8314 = vmatprep.subr.mxu1 %v1340_v41  ;;  %3219 = vmatpush1.msra.mxu0 %v2734_v42 }
 0x2fc   : > { %8315 = vmatpush3.msra.mxu1 %v1340_v41  ;;  %3220 = vmatprep.subr.mxu0 %v2733_v44 }
 0x2fd   : > { %8316 = vmatprep.subr.mxu1 %v1339_v46  ;;  %3221 = vmatpush1.msra.mxu0 %v2732_v47 }
 0x2fe   : > { %3254 = vmatprep.mubr.f32.mxu0 %v9120_v1  ;;  %8317 = vmatpush3.msra.mxu1 %v1339_v46 }
 0x2ff   : > { %3255 = vmatmul.mubr.f32.vlgmr.msra.gmra.mxu0 %v2346_v48  ;;  %8319 = vmatmul.mubr.f32.vlgmr.msra.gmra.mxu1 %v9904_v2 }
 0x300   : > { %8321 = vmatprep.subr.mxu0 %v10168_v58 }
 0x301   : > { %8322 = vmatpush3.msra.mxu0 %v10168_v58  ;;  %v3468_v58 = vld [vmem:[%s9190_s30 + $0xf8] sm:$0xff] }
 0x302   : > { %8323 = vmatprep.subr.mxu0 %v10175_v63  ;;  %7746 = vmatprep.subr.mxu1 %v3468_v58 }
 0x303   : > { %8324 = vmatpush3.msra.mxu0 %v10175_v63  ;;  %v3451_v63 = vld [vmem:[%s9190_s30 + $0x70] sm:$0xff]  ;;  %7747 = vmatpush3.msra.mxu1 %v3452_v59 }
 0x304   : > { %8325 = vmatprep.subr.mxu0 %v10182_v4  ;;  %7748 = vmatprep.subr.mxu1 %v3467_v61  ;;  %v10340_v61 = vmul.f32 0.05, %v9897_v62 }
 0x305   : > { %8326 = vmatpush3.msra.mxu0 %v10182_v4  ;;  %7749 = vmatpush3.msra.mxu1 %v3451_v63  ;;  %v3465_v4 = vld [vmem:[%s9190_s30 + $0xe0] sm:$0xff] }
 0x306   : > { %8327 = vmatprep.subr.mxu0 %v10189_v0  ;;  %7750 = vmatprep.subr.mxu1 %v3466_v60  ;;  %v10343_v60 = vmul.f32 0.05, %v9904_v2 }
 0x307   : > { %8328 = vmatpush3.msra.mxu0 %v10189_v0  ;;  %7751 = vmatpush3.msra.mxu1 %v3450_v22  ;;  %v3448_v0 = vld [vmem:[%s9190_s30 + $0x58] sm:$0xff] }
 0x308   : > { %8329 = vmatprep.subr.mxu0 %v10196_v6  ;;  %7752 = vmatprep.subr.mxu1 %v3465_v4 }
 0x309   : > { %8330 = vmatpush3.msra.mxu0 %v10196_v6  ;;  %7753 = vmatpush3.msra.mxu1 %v3449_v43  ;;  %v3462_v6 = vld [vmem:[%s9190_s30 + $0xc8] sm:$0xff]  ;;  %v10348_v43 = vld [vmem:[%s12311_s3 + $0x70] sm:$0xff] }
 0x30a   : > { %8331 = vmatprep.subr.mxu0 %v10203_v51  ;;  %7754 = vmatprep.subr.mxu1 %v3464_v53  ;;  %v10354_v53 = vld [vmem:[%s12311_s3 + $0x68] sm:$0xff] }
 0x30b   : > { %8332 = vmatpush3.msra.mxu0 %v10203_v51  ;;  %7755 = vmatpush3.msra.mxu1 %v3448_v0  ;;  %v3445_v51 = vld [vmem:[%s9190_s30 + $0x40] sm:$0xff] }
 0x30c   : > { %8333 = vmatprep.subr.mxu0 %v10210_v39  ;;  %7756 = vmatprep.subr.mxu1 %v3463_v3  ;;  %v10359_v0 = vld [vmem:[%s12311_s3 + $0x60] sm:$0xff]  ;;  %v3482_v3 = vld [vmem:[%s9190_s30 + $0x168] sm:$0xff] }
 0x30d   : > { %8334 = vmatpush3.msra.mxu0 %v10210_v39  ;;  %7757 = vmatpush3.msra.mxu1 %v3447_v5  ;;  %v3459_v39 = vld [vmem:[%s9190_s30 + $0xb0] sm:$0xff]  ;;  %v10367_v5 = vld [vmem:[%s12311_s3 + $0x58] sm:$0xff] }
 0x30e   : > { %8335 = vmatprep.subr.mxu0 %v10217_v15  ;;  %7758 = vmatprep.subr.mxu1 %v3462_v6  ;;  %v3481_v6 = vld [vmem:[%s9190_s30 + $0x160] sm:$0xff] }
 0x30f   : > { %8336 = vmatpush3.msra.mxu0 %v10217_v15  ;;  %7759 = vmatpush3.msra.mxu1 %v3446_v7  ;;  %v3442_v15 = vld [vmem:[%s9190_s30 + $0x28] sm:$0xff]  ;;  %v10373_v7 = vld [vmem:[%s12311_s3 + $0x50] sm:$0xff] }
 0x310   : > { %8337 = vmatprep.subr.mxu0 %v10224_v18  ;;  %7760 = vmatprep.subr.mxu1 %v3461_v37  ;;  %v3480_v37 = vld [vmem:[%s9190_s30 + $0x158] sm:$0xff] }
 0x311   : > { %8338 = vmatpush3.msra.mxu0 %v10224_v18  ;;  %7761 = vmatpush3.msra.mxu1 %v3445_v51  ;;  %v3456_v18 = vld [vmem:[%s9190_s30 + $0x98] sm:$0xff]  ;;  %v10379_v51 = vld [vmem:[%s12311_s3 + $0x48] sm:$0xff] }
 0x312   : > { %8339 = vmatprep.subr.mxu0 %v10231_v21  ;;  %7762 = vmatprep.subr.mxu1 %v3460_v9  ;;  %v3479_v9 = vld [vmem:[%s9190_s30 + $0x150] sm:$0xff] }
 0x313   : > { %8340 = vmatpush3.msra.mxu0 %v10231_v21  ;;  %7763 = vmatpush3.msra.mxu1 %v3444_v11  ;;  %v3439_v21 = vld [vmem:[%s9190_s30 + $0x10] sm:$0xff]  ;;  %v10385_v11 = vld [vmem:[%s12311_s3 + $0x40] sm:$0xff] }
 0x314   : > { %8341 = vmatprep.subr.mxu0 %v10238_v25  ;;  %7764 = vmatprep.subr.mxu1 %v3459_v39  ;;  %v3478_v39 = vld [vmem:[%s9190_s30 + $0x148] sm:$0xff] }
 0x315   : > { %8342 = vmatpush3.msra.mxu0 %v10238_v25  ;;  %7765 = vmatpush3.msra.mxu1 %v3443_v12  ;;  %v3453_v25 = vld [vmem:[%s9190_s30 + $0x80] sm:$0xff]  ;;  %v10391_v12 = vld [vmem:[%s12311_s3 + $0x38] sm:$0xff] }
 0x316   : > { %8343 = vmatprep.subr.mxu0 %v10245_v28  ;;  %7766 = vmatprep.subr.mxu1 %v3458_v13  ;;  %v3477_v13 = vld [vmem:[%s9190_s30 + $0x140] sm:$0xff] }
 0x317   : > { %8344 = vmatpush3.msra.mxu0 %v10245_v28  ;;  %7767 = vmatpush3.msra.mxu1 %v3442_v15  ;;  %v10397_v15 = vld [vmem:[%s12311_s3 + $0x30] sm:$0xff] }
 0x318   : > { %8345 = vmatprep.subr.mxu0 %v1342_v31  ;;  %7768 = vmatprep.subr.mxu1 %v3457_v16  ;;  %v3476_v16 = vld [vmem:[%s9190_s30 + $0x138] sm:$0xff] }
 0x319   : > { %8346 = vmatpush3.msra.mxu0 %v1342_v31  ;;  %7769 = vmatpush3.msra.mxu1 %v3441_v17  ;;  %v10403_v17 = vld [vmem:[%s12311_s3 + $0x28] sm:$0xff] }
 0x31a   : > { %v2830_v49 = vpop.f32.mrf.mxu0  ;;  %v2901_v50 = vpop.f32.mrf.mxu1  ;;  %8347 = vmatprep.subr.mxu0 %v1341_v35  ;;  %7770 = vmatprep.subr.mxu1 %v3456_v18  ;;  %v3475_v18 = vld [vmem:[%s9190_s30 + $0x130] sm:$0xff] }
 0x31b   : > { %v10291_v52 = vadd.f32 %v2901_v50, %v2830_v49  ;;  %8348 = vmatpush3.msra.mxu0 %v1341_v35  ;;  %7771 = vmatpush3.msra.mxu1 %v3440_v19  ;;  %v10409_v19 = vld [vmem:[%s12311_s3 + $0x20] sm:$0xff] }
 0x31c   : > { %v2832_v54 = vpop.f32.mrf.mxu0  ;;  %v2903_v55 = vpop.f32.mrf.mxu1  ;;  %8349 = vmatprep.subr.mxu0 %v1340_v41  ;;  %7772 = vmatprep.subr.mxu1 %v3455_v20  ;;  %v3474_v20 = vld [vmem:[%s9190_s30 + $0x128] sm:$0xff] }
 0x31d   : > { %v10293_v56 = vadd.f32 %v2903_v55, %v2832_v54  ;;  %8350 = vmatpush3.msra.mxu0 %v1340_v41  ;;  %7773 = vmatpush3.msra.mxu1 %v3439_v21  ;;  %v10415_v21 = vld [vmem:[%s12311_s3 + $0x18] sm:$0xff] }
 0x31e   : > { %8351 = vmatprep.subr.mxu0 %v1339_v46  ;;  %7774 = vmatprep.subr.mxu1 %v3454_v23  ;;  %v3473_v23 = vld [vmem:[%s9190_s30 + $0x120] sm:$0xff] }
 0x31f   : > { %8352 = vmatpush3.msra.mxu0 %v1339_v46  ;;  %7775 = vmatpush3.msra.mxu1 %v3438_v24  ;;  %v10421_v24 = vld [vmem:[%s12311_s3 + $0x10] sm:$0xff] }
 0x320   : > { %7776 = vmatprep.subr.mxu1 %v3453_v25  ;;  %8356 = vmatprep.subr.mxu0 %v3484_v38  ;;  %v3472_v25 = vld [vmem:[%s9190_s30 + $0x118] sm:$0xff] }
 0x321   : > { %7777 = vmatpush3.msra.mxu1 %v3437_v26  ;;  %v10427_v26 = vld [vmem:[%s12311_s3 + $0x8] sm:$0xff] }
 0x322   : > { %8391 = vmatprep.subr.mxu1 %v10328_v27 }
 0x35b   : > { %v2972_v28 = vpop.f32.mrf.mxu0  ;;  %v3043_v29 = vpop.f32.mrf.mxu1 }
 0x35c   : > { %v2973_v30 = vadd.f32 %v2972_v28, %v10291_v52  ;;  %v10432_v28 = vld [vmem:[%s12311_s3] sm:$0xff] }
 0x35d   : > { %v2974_v31 = vpop.f32.mrf.mxu0  ;;  %v3045_v35 = vpop.f32.mrf.mxu1 }
 0x35e   : > { %v3044_v32 = vadd.f32 %v3043_v29, %v2973_v30  ;;  %v2975_v34 = vadd.f32 %v2974_v31, %v10293_v56  ;;  %v3471_v29 = vld [vmem:[%s9190_s30 + $0x110] sm:$0xff]  ;;  %v3470_v30 = vld [vmem:[%s9190_s30 + $0x108] sm:$0xff]  ;;  %v3469_v31 = vld [vmem:[%s9190_s30 + $0x100] sm:$0xff] }
 0x360   : > { %v3046_v36 = vadd.f32 %v3045_v35, %v2975_v34  ;;  %v3815_v34 = vld [vmem:[%s9200_s12 + $0x78] sm:$0xff]  ;;  %v3830_v35 = vld [vmem:[%s9200_s12 + $0xf0] sm:$0xff] }
 0x39d   : > { %v3114_v41 = vpop.f32.mrf.mxu0  ;;  %v3185_v42 = vpop.f32.mrf.mxu1 }
 0x39e   : > { %v3115_v44 = vadd.f32 %v3114_v41, %v3044_v32  ;;  %v3831_v32 = vld [vmem:[%s9200_s12 + $0xf8] sm:$0xff]  ;;  %v3813_v41 = vld [vmem:[%s9200_s12 + $0x68] sm:$0xff] }
 0x39f   : > { %v3116_v46 = vpop.f32.mrf.mxu0  ;;  %v3187_v49 = vpop.f32.mrf.mxu1 }
 0x3a0   : > { %v3186_v47 = vadd.f32 %v3185_v42, %v3115_v44  ;;  %v3117_v48 = vadd.f32 %v3116_v46, %v3046_v36  ;;  %v3814_v36 = vld [vmem:[%s9200_s12 + $0x70] sm:$0xff]  ;;  %v3828_v42 = vld [vmem:[%s9200_s12 + $0xe0] sm:$0xff]  ;;  %v3827_v46 = vld [vmem:[%s9200_s12 + $0xd8] sm:$0xff] }
 0x3a1   : > { %v3812_v44 = vld [vmem:[%s9200_s12 + $0x60] sm:$0xff] }
 0x3a2   : > { %v10334_v50 = vadd.f32 %v3187_v49, %v3117_v48  ;;  %v3826_v48 = vld [vmem:[%s9200_s12 + $0xd0] sm:$0xff] }
 0x3a3   : > { %v3810_v49 = vld [vmem:[%s9200_s12 + $0x50] sm:$0xff] }
 0x3bf   : > { %v3256_v54 = vpop.f32.mrf.mxu0  ;;  %v8320_v52 = vpop.f32.mrf.mxu1 }
 0x3c0   : > { %v3257_v55 = vadd.f32 %v3256_v54, %v3186_v47  ;;  %v3355_v58 = vmul.f32 0.95, %v8320_v52  ;;  %v3811_v47 = vld [vmem:[%s9200_s12 + $0x58] sm:$0xff]  ;;  %v3825_v54 = vld [vmem:[%s9200_s12 + $0xc8] sm:$0xff] }
 0x3c1   : > { %v3345_v56 = vpop.f32.mrf.mxu1  ;;  %v3809_v52 = vld [vmem:[%s9200_s12 + $0x48] sm:$0xff] }
 0x3c2   : > { %v10337_v59 = vadd.f32 %v3257_v55, %v9742_v45  ;;  %v3354_v63 = vmul.f32 0.95, %v3345_v56  ;;  %v3357_v4 = vadd.f32 %v3355_v58, %v10343_v60  ;;  %v3483_v45 = vld [vmem:[%s9190_s30 + $0x170] sm:$0xff]  ;;  %v3824_v55 = vld [vmem:[%s9200_s12 + $0xc0] sm:$0xff]  ;;  %v3823_v56 = vld [vmem:[%s9200_s12 + $0xb8] sm:$0xff] }
 0x3c3   : > { %v3808_v58 = vld [vmem:[%s9200_s12 + $0x40] sm:$0xff] }
 0x3c4   : > { %v3356_v22 = vadd.f32 %v3354_v63, %v10340_v61  ;;  %v3807_v63 = vld [vmem:[%s9200_s12 + $0x38] sm:$0xff] }
 0x3c6   : > { %8353 = vmatprep.mubr.f32.mxu0 %v3356_v22  ;;  %3556 = vmatprep.mubr.f32.mxu1 %v3356_v22  ;;  %v3822_v22 = vld [vmem:[%s9200_s12 + $0xb0] sm:$0xff] }
 0x3c7   : > { %8354 = vmatmul.mubr.f32.vlgmr.msra.gmra.mxu0 %v3357_v4  ;;  %3557 = vmatmul.mubr.f32.vlgmr.msra.gmra.mxu1 %v9897_v62 }
 0x3c8   : > { %8392 = vmatpush3.msra.mxu1 %v10328_v27  ;;  %3561 = vmatprep.mubr.f32.mxu1 %v3357_v4  ;;  %v3806_v4 = vld [vmem:[%s9200_s12 + $0x30] sm:$0xff] }
 0x3c9   : > { %8393 = vmatprep.subr.mxu1 %v10348_v43  ;;  %8357 = vmatpush3.msra.mxu0 %v3484_v38  ;;  %v3829_v38 = vld [vmem:[%s9200_s12 + $0xe8] sm:$0xff] }
 0x3ca   : > { %8394 = vmatpush3.msra.mxu1 %v10348_v43  ;;  %8358 = vmatprep.subr.mxu0 %v3483_v45 }
 0x3cb   : > { %8395 = vmatprep.subr.mxu1 %v10354_v53  ;;  %3562 = vmatmul.mubr.f32.gmra.mxu1 %v9904_v2 }
 0x3cc   : > { %8396 = vmatpush3.msra.mxu1 %v10354_v53  ;;  %8423 = vmatprep.mubr.f32.mxu1 %v9897_v62 }
 0x3cd   : > { %8397 = vmatprep.subr.mxu1 %v10359_v0  ;;  %8359 = vmatpush3.msra.mxu0 %v3483_v45  ;;  %v3821_v45 = vld [vmem:[%s9200_s12 + $0xa8] sm:$0xff] }
 0x3ce   : > { %8398 = vmatpush3.msra.mxu1 %v10359_v0  ;;  %8360 = vmatprep.subr.mxu0 %v3482_v3 }
 0x3cf   : > { %8399 = vmatprep.subr.mxu1 %v10367_v5  ;;  %8361 = vmatpush3.msra.mxu0 %v3482_v3  ;;  %v3805_v3 = vld [vmem:[%s9200_s12 + $0x28] sm:$0xff] }
 0x3d0   : > { %8400 = vmatpush3.msra.mxu1 %v10367_v5  ;;  %8362 = vmatprep.subr.mxu0 %v3481_v6 }
 0x3d1   : > { %8401 = vmatprep.subr.mxu1 %v10373_v7  ;;  %8363 = vmatpush3.msra.mxu0 %v3481_v6  ;;  %v3820_v6 = vld [vmem:[%s9200_s12 + $0xa0] sm:$0xff] }
 0x3d2   : > { %8402 = vmatpush3.msra.mxu1 %v10373_v7  ;;  %8364 = vmatprep.subr.mxu0 %v3480_v37 }
 0x3d3   : > { %8403 = vmatprep.subr.mxu1 %v10379_v51  ;;  %8365 = vmatpush3.msra.mxu0 %v3480_v37  ;;  %v3804_v37 = vld [vmem:[%s9200_s12 + $0x20] sm:$0xff] }
 0x3d4   : > { %8404 = vmatpush3.msra.mxu1 %v10379_v51  ;;  %8366 = vmatprep.subr.mxu0 %v3479_v9 }
 0x3d5   : > { %8405 = vmatprep.subr.mxu1 %v10385_v11  ;;  %8367 = vmatpush3.msra.mxu0 %v3479_v9  ;;  %v3819_v9 = vld [vmem:[%s9200_s12 + $0x98] sm:$0xff] }
 0x3d6   : > { %8406 = vmatpush3.msra.mxu1 %v10385_v11  ;;  %8368 = vmatprep.subr.mxu0 %v3478_v39 }
 0x3d7   : > { %8407 = vmatprep.subr.mxu1 %v10391_v12  ;;  %8369 = vmatpush3.msra.mxu0 %v3478_v39  ;;  %v3803_v39 = vld [vmem:[%s9200_s12 + $0x18] sm:$0xff] }
 0x3d8   : > { %8408 = vmatpush3.msra.mxu1 %v10391_v12  ;;  %8370 = vmatprep.subr.mxu0 %v3477_v13 }
 0x3d9   : > { %8409 = vmatprep.subr.mxu1 %v10397_v15  ;;  %8371 = vmatpush3.msra.mxu0 %v3477_v13  ;;  %v3818_v13 = vld [vmem:[%s9200_s12 + $0x90] sm:$0xff] }
 0x3da   : > { %8410 = vmatpush3.msra.mxu1 %v10397_v15  ;;  %8372 = vmatprep.subr.mxu0 %v3476_v16 }
 0x3db   : > { %8411 = vmatprep.subr.mxu1 %v10403_v17  ;;  %8373 = vmatpush3.msra.mxu0 %v3476_v16  ;;  %v3802_v16 = vld [vmem:[%s9200_s12 + $0x10] sm:$0xff] }
 0x3dc   : > { %8412 = vmatpush3.msra.mxu1 %v10403_v17  ;;  %8374 = vmatprep.subr.mxu0 %v3475_v18 }
 0x3dd   : > { %8413 = vmatprep.subr.mxu1 %v10409_v19  ;;  %8375 = vmatpush3.msra.mxu0 %v3475_v18  ;;  %v3817_v18 = vld [vmem:[%s9200_s12 + $0x88] sm:$0xff] }
 0x3de   : > { %8414 = vmatpush3.msra.mxu1 %v10409_v19  ;;  %8376 = vmatprep.subr.mxu0 %v3474_v20 }
 0x3df   : > { %8415 = vmatprep.subr.mxu1 %v10415_v21  ;;  %8377 = vmatpush3.msra.mxu0 %v3474_v20  ;;  %v3801_v20 = vld [vmem:[%s9200_s12 + $0x8] sm:$0xff] }
 0x3e0   : > { %8416 = vmatpush3.msra.mxu1 %v10415_v21  ;;  %8378 = vmatprep.subr.mxu0 %v3473_v23 }
 0x3e1   : > { %8417 = vmatprep.subr.mxu1 %v10421_v24  ;;  %8379 = vmatpush3.msra.mxu0 %v3473_v23  ;;  %v3816_v23 = vld [vmem:[%s9200_s12 + $0x80] sm:$0xff] }
 0x3e2   : > { %8418 = vmatpush3.msra.mxu1 %v10421_v24  ;;  %8380 = vmatprep.subr.mxu0 %v3472_v25 }
 0x3e3   : > { %8419 = vmatprep.subr.mxu1 %v10427_v26  ;;  %8381 = vmatpush3.msra.mxu0 %v3472_v25  ;;  %v3800_v25 = vld [vmem:[%s9200_s12] sm:$0xff] }
 0x3e4   : > { %8420 = vmatpush3.msra.mxu1 %v10427_v26  ;;  %8382 = vmatprep.subr.mxu0 %v3471_v29 }
 0x3e5   : > { %8421 = vmatprep.subr.mxu1 %v10432_v28  ;;  %8383 = vmatpush3.msra.mxu0 %v3471_v29  ;;  %v10475_v29 = vpop.f32.mrf.mxu0 }
 0x3e6   : > { %8422 = vmatpush3.msra.mxu1 %v10432_v28  ;;  %8384 = vmatprep.subr.mxu0 %v3470_v30 }
 0x3e7   : > { %8424 = vmatmul.mubr.f32.vlgmr.msra.gmra.mxu1 %v9904_v2  ;;  %8385 = vmatpush3.msra.mxu0 %v3470_v30 }
 0x3e8   : > { %8386 = vmatprep.subr.mxu0 %v3469_v31  ;;  %7838 = vmatprep.subr.mxu1 %v3831_v32 }
 0x3e9   : > { %8387 = vmatpush3.msra.mxu0 %v3469_v31  ;;  %7839 = vmatpush3.msra.mxu1 %v3815_v34 }
 0x3ea   : > { %8426 = vmatprep.subr.mxu0 %v10328_v27  ;;  %7840 = vmatprep.subr.mxu1 %v3830_v35 }
 0x3eb   : > { %7841 = vmatpush3.msra.mxu1 %v3814_v36 }
 0x3ec   : > { %7842 = vmatprep.subr.mxu1 %v3829_v38 }
 0x3ed   : > { %7843 = vmatpush3.msra.mxu1 %v3813_v41 }
 0x3ee   : > { %7844 = vmatprep.subr.mxu1 %v3828_v42 }
 0x3ef   : > { %7845 = vmatpush3.msra.mxu1 %v3812_v44 }
 0x3f0   : > { %7846 = vmatprep.subr.mxu1 %v3827_v46 }
 0x3f1   : > { %7847 = vmatpush3.msra.mxu1 %v3811_v47 }
 0x3f2   : > { %7848 = vmatprep.subr.mxu1 %v3826_v48  ;;  %v3835_v48 = vld [vmem:[%s9200_s12 + $0x118] sm:$0xff] }
 0x3f3   : > { %7849 = vmatpush3.msra.mxu1 %v3810_v49  ;;  %v3834_v49 = vld [vmem:[%s9200_s12 + $0x110] sm:$0xff] }
 0x3f4   : > { %7850 = vmatprep.subr.mxu1 %v3825_v54  ;;  %v3833_v54 = vld [vmem:[%s9200_s12 + $0x108] sm:$0xff] }
 0x3f5   : > { %7851 = vmatpush3.msra.mxu1 %v3809_v52  ;;  %v3832_v52 = vld [vmem:[%s9200_s12 + $0x100] sm:$0xff] }
 0x3f6   : > { %7852 = vmatprep.subr.mxu1 %v3824_v55  ;;  %v7697_v55 = vld [vmem:[%s9195_s6] ss:$0 sm:$0xff] }
 0x3f7   : > { %7853 = vmatpush3.msra.mxu1 %v3808_v58 }
 0x3f8   : > { %7854 = vmatprep.subr.mxu1 %v3823_v56 }
 0x3f9   : > { %7855 = vmatpush3.msra.mxu1 %v3807_v63 }
 0x3fa   : > { %7856 = vmatprep.subr.mxu1 %v3822_v22 }
 0x3fb   : > { %7857 = vmatpush3.msra.mxu1 %v3806_v4 }
 0x3fc   : > { %7858 = vmatprep.subr.mxu1 %v3821_v45 }
 0x3fd   : > { %7859 = vmatpush3.msra.mxu1 %v3805_v3 }
 0x3fe   : > { %7860 = vmatprep.subr.mxu1 %v3820_v6 }
 0x3ff   : > { %7861 = vmatpush3.msra.mxu1 %v3804_v37 }
 0x400   : > { %7862 = vmatprep.subr.mxu1 %v3819_v9 }
 0x401   : > { %7863 = vmatpush3.msra.mxu1 %v3803_v39 }
 0x402   : > { %7864 = vmatprep.subr.mxu1 %v3818_v13 }
 0x403   : > { %7865 = vmatpush3.msra.mxu1 %v3802_v16 }
 0x404   : > { %7866 = vmatprep.subr.mxu1 %v3817_v18 }
 0x405   : > { %7867 = vmatpush3.msra.mxu1 %v3801_v20 }
 0x406   : > { %7868 = vmatprep.subr.mxu1 %v3816_v23 }
 0x407   : > { %7869 = vmatpush3.msra.mxu1 %v3800_v25 }
 0x487   : > { %v8355_v30 = vpop.f32.mrf.mxu0  ;;  %v7778_v31 = vpop.f32.mrf.mxu1 }
 0x488   : > { %v3434_v32 = vmul.f32 0.95, %v8355_v30 }
 0x489   : > { %v3424_v34 = vpop.f32.mrf.mxu0  ;;  %v7779_v35 = vpop.f32.mrf.mxu1 }
 0x48a   : > { %v3433_v36 = vmul.f32 0.95, %v3424_v34  ;;  %v10477_v38 = vadd.f32 %v7779_v35, %v7778_v31  ;;  %v3436_v44 = vadd.f32 %v3434_v32, %v10343_v60  ;;  %v7698_v31 = vld [vmem:[%s12313_s11] ss:$0 sm:$0xff]  ;;  %s12324_s11 = sld [smem:[#allocation18_spill]] }
 0x48b   : > { %v7781_v41 = vpop.f32.mrf.mxu1 }
 0x48c   : > { %v3435_v42 = vadd.f32 %v3433_v36, %v10340_v61  ;;  %v3559_v22 = vadd.f32 %v10477_v38, %v7697_v55 }
 0x48d   : > { %v7782_v46 = vpop.f32.mrf.mxu1 }
 0x48e   : > { %v10481_v47 = vadd.f32 %v7782_v46, %v7781_v41  ;;  %8388 = vmatprep.mubr.f32.mxu0 %v3435_v42 }
 0x48f   : > { %8389 = vmatmul.mubr.f32.vlgmr.msra.gmra.mxu0 %v3436_v44 }
 0x490   : > { %8427 = vmatpush3.msra.mxu0 %v10328_v27  ;;  %v3564_v58 = vadd.f32 %v10481_v47, %v7697_v55  ;;  %v4109_v47 = vld [vmem:[%s12314_s15 + $0xf8] sm:$0xff] }
 0x491   : > { %8428 = vmatprep.subr.mxu0 %v10348_v43  ;;  %4314 = vmatprep.subr.mxu1 %v4109_v47  ;;  %v4161_v55 = vld [vmem:[%s12314_s15 + $0x298] sm:$0xff] }
 0x492   : > { %8429 = vmatpush3.msra.mxu0 %v10348_v43 }
 0x493   : > { %8430 = vmatprep.subr.mxu0 %v10354_v53 }
 0x494   : > { %8431 = vmatpush3.msra.mxu0 %v10354_v53 }
 0x495   : > { %8432 = vmatprep.subr.mxu0 %v10359_v0 }
 0x496   : > { %8433 = vmatpush3.msra.mxu0 %v10359_v0 }
 0x497   : > { %8434 = vmatprep.subr.mxu0 %v10367_v5 }
 0x498   : > { %8435 = vmatpush3.msra.mxu0 %v10367_v5 }
 0x499   : > { %8436 = vmatprep.subr.mxu0 %v10373_v7 }
 0x49a   : > { %8437 = vmatpush3.msra.mxu0 %v10373_v7 }
 0x49b   : > { %8438 = vmatprep.subr.mxu0 %v10379_v51 }
 0x49c   : > { %8439 = vmatpush3.msra.mxu0 %v10379_v51  ;;  %v3847_v51 = vld [vmem:[%s9200_s12 + $0x178] sm:$0xff] }
 0x49d   : > { %8440 = vmatprep.subr.mxu0 %v10385_v11 }
 0x49e   : > { %8441 = vmatpush3.msra.mxu0 %v10385_v11  ;;  %v3846_v11 = vld [vmem:[%s9200_s12 + $0x170] sm:$0xff] }
 0x49f   : > { %8442 = vmatprep.subr.mxu0 %v10391_v12 }
 0x4a0   : > { %8443 = vmatpush3.msra.mxu0 %v10391_v12  ;;  %v3845_v12 = vld [vmem:[%s9200_s12 + $0x168] sm:$0xff] }
 0x4a1   : > { %8444 = vmatprep.subr.mxu0 %v10397_v15 }
 0x4a2   : > { %8445 = vmatpush3.msra.mxu0 %v10397_v15  ;;  %v3844_v15 = vld [vmem:[%s9200_s12 + $0x160] sm:$0xff] }
 0x4a3   : > { %8446 = vmatprep.subr.mxu0 %v10403_v17 }
 0x4a4   : > { %8447 = vmatpush3.msra.mxu0 %v10403_v17  ;;  %v3843_v17 = vld [vmem:[%s9200_s12 + $0x158] sm:$0xff] }
 0x4a5   : > { %8448 = vmatprep.subr.mxu0 %v10409_v19 }
 0x4a6   : > { %8449 = vmatpush3.msra.mxu0 %v10409_v19  ;;  %v3840_v19 = vld [vmem:[%s9200_s12 + $0x140] sm:$0xff] }
 0x4a7   : > { %v8425_v27 = vpop.f32.mrf.mxu1  ;;  %8450 = vmatprep.subr.mxu0 %v10415_v21 }
 0x4a8   : > { %8451 = vmatpush3.msra.mxu0 %v10415_v21  ;;  %v3718_v43 = vmul.f32 0.95, %v8425_v27  ;;  %v3839_v21 = vld [vmem:[%s9200_s12 + $0x138] sm:$0xff]  ;;  %v4108_v27 = vld [vmem:[%s12314_s15 + $0xf0] sm:$0xff] }
 0x4a9   : > { %v3708_v53 = vpop.f32.mrf.mxu1  ;;  %8452 = vmatprep.subr.mxu0 %v10421_v24 }
 0x4aa   : > { %v3717_v0 = vmul.f32 0.95, %v3708_v53  ;;  %8453 = vmatpush3.msra.mxu0 %v10421_v24  ;;  %v3720_v7 = vadd.f32 %v3718_v43, %v10343_v60  ;;  %v3838_v24 = vld [vmem:[%s9200_s12 + $0x130] sm:$0xff]  ;;  %v4173_v43 = vld [vmem:[%s12314_s15 + $0x2f8] sm:$0xff] }
 0x4ab   : > { %8454 = vmatprep.subr.mxu0 %v10427_v26  ;;  %v4172_v53 = vld [vmem:[%s12314_s15 + $0x2f0] sm:$0xff] }
 0x4ac   : > { %v3719_v5 = vadd.f32 %v3717_v0, %v10340_v61  ;;  %8455 = vmatpush3.msra.mxu0 %v10427_v26  ;;  %v3837_v26 = vld [vmem:[%s9200_s12 + $0x128] sm:$0xff]  ;;  %v4106_v0 = vld [vmem:[%s12314_s15 + $0xe0] sm:$0xff] }
 0x4ad   : > { %8456 = vmatprep.subr.mxu0 %v10432_v28 }
 0x4ae   : > { %8457 = vmatpush3.msra.mxu0 %v10432_v28  ;;  %8458 = vmatprep.mubr.f32.mxu0 %v3719_v5  ;;  %v3836_v28 = vld [vmem:[%s9200_s12 + $0x120] sm:$0xff] }
 0x4af   : > { %3919 = vmatprep.mubr.f32.mxu1 %v3719_v5  ;;  %8459 = vmatmul.mubr.f32.vlgmr.msra.gmra.mxu0 %v3720_v7  ;;  %v4105_v5 = vld [vmem:[%s12314_s15 + $0xd8] sm:$0xff] }
 0x4b0   : > { %3920 = vmatmul.mubr.f32.vlgmr.msra.gmra.mxu1 %v9897_v62  ;;  %8461 = vmatprep.subr.mxu0 %v3847_v51  ;;  %v3842_v62 = vld [vmem:[%s9200_s12 + $0x150] sm:$0xff] }
 0x4b1   : > { %3924 = vmatprep.mubr.f32.mxu1 %v3720_v7  ;;  %8462 = vmatpush3.msra.mxu0 %v3847_v51  ;;  %v4170_v7 = vld [vmem:[%s12314_s15 + $0x2e0] sm:$0xff]  ;;  %v4104_v51 = vld [vmem:[%s12314_s15 + $0xd0] sm:$0xff] }
 0x4b2   : > { %8463 = vmatprep.subr.mxu0 %v3846_v11  ;;  %4315 = vmatpush1.msra.mxu1 %v4108_v27  ;;  %v4089_v27 = vld [vmem:[%s12314_s15 + $0x58] sm:$0xff] }
 0x4b3   : > { %8464 = vmatpush3.msra.mxu0 %v3846_v11  ;;  %v4169_v11 = vld [vmem:[%s12314_s15 + $0x2d8] sm:$0xff] }
 0x4b4   : > { %3925 = vmatmul.mubr.f32.gmra.mxu1 %v9904_v2  ;;  %8465 = vmatprep.subr.mxu0 %v3845_v12  ;;  %v3841_v2 = vld [vmem:[%s9200_s12 + $0x148] sm:$0xff] }
 0x4b5   : > { %8466 = vmatpush3.msra.mxu0 %v3845_v12  ;;  %v4103_v12 = vld [vmem:[%s12314_s15 + $0xc8] sm:$0xff] }
 0x4b6   : > { %8467 = vmatprep.subr.mxu0 %v3844_v15 }
 0x4b7   : > { %8468 = vmatpush3.msra.mxu0 %v3844_v15  ;;  %v4168_v15 = vld [vmem:[%s12314_s15 + $0x2d0] sm:$0xff] }
 0x4b8   : > { %8469 = vmatprep.subr.mxu0 %v3843_v17 }
 0x4b9   : > { %8470 = vmatpush3.msra.mxu0 %v3843_v17  ;;  %v4167_v17 = vld [vmem:[%s12314_s15 + $0x2c8] sm:$0xff] }
 0x4ba   : > { %8471 = vmatprep.subr.mxu0 %v3842_v62 }
 0x4bb   : > { %8472 = vmatpush3.msra.mxu0 %v3842_v62  ;;  %v4102_v62 = vld [vmem:[%s12314_s15 + $0xc0] sm:$0xff] }
 0x4bc   : > { %8473 = vmatprep.subr.mxu0 %v3841_v2 }
 0x4bd   : > { %8474 = vmatpush3.msra.mxu0 %v3841_v2  ;;  %v4166_v2 = vld [vmem:[%s12314_s15 + $0x2c0] sm:$0xff] }
 0x4be   : > { %8475 = vmatprep.subr.mxu0 %v3840_v19 }
 0x4bf   : > { %8476 = vmatpush3.msra.mxu0 %v3840_v19  ;;  %v4101_v19 = vld [vmem:[%s12314_s15 + $0xb8] sm:$0xff] }
 0x4c0   : > { %8477 = vmatprep.subr.mxu0 %v3839_v21 }
 0x4c1   : > { %8478 = vmatpush3.msra.mxu0 %v3839_v21  ;;  %v4165_v21 = vld [vmem:[%s12314_s15 + $0x2b8] sm:$0xff] }
 0x4c2   : > { %8479 = vmatprep.subr.mxu0 %v3838_v24 }
 0x4c3   : > { %8480 = vmatpush3.msra.mxu0 %v3838_v24  ;;  %v4100_v24 = vld [vmem:[%s12314_s15 + $0xb0] sm:$0xff] }
 0x4c4   : > { %8481 = vmatprep.subr.mxu0 %v3837_v26 }
 0x4c5   : > { %8482 = vmatpush3.msra.mxu0 %v3837_v26  ;;  %v4164_v26 = vld [vmem:[%s12314_s15 + $0x2b0] sm:$0xff] }
 0x4c6   : > { %8483 = vmatprep.subr.mxu0 %v3836_v28 }
 0x4c7   : > { %8484 = vmatpush3.msra.mxu0 %v3836_v28  ;;  %v4099_v28 = vld [vmem:[%s12314_s15 + $0xa8] sm:$0xff] }
 0x4c8   : > { %8485 = vmatprep.subr.mxu0 %v3835_v48 }
 0x4c9   : > { %8486 = vmatpush3.msra.mxu0 %v3835_v48  ;;  %v4163_v48 = vld [vmem:[%s12314_s15 + $0x2a8] sm:$0xff] }
 0x4ca   : > { %8487 = vmatprep.subr.mxu0 %v3834_v49 }
 0x4cb   : > { %8488 = vmatpush3.msra.mxu0 %v3834_v49  ;;  %v4098_v49 = vld [vmem:[%s12314_s15 + $0xa0] sm:$0xff] }
 0x4cc   : > { %8489 = vmatprep.subr.mxu0 %v3833_v54 }
 0x4cd   : > { %8490 = vmatpush3.msra.mxu0 %v3833_v54  ;;  %v4162_v54 = vld [vmem:[%s12314_s15 + $0x2a0] sm:$0xff] }
 0x4ce   : > { %8491 = vmatprep.subr.mxu0 %v3832_v52 }
 0x4cf   : > { %8492 = vmatpush3.msra.mxu0 %v3832_v52  ;;  %v4097_v52 = vld [vmem:[%s12314_s15 + $0x98] sm:$0xff] }
 0x4d0   : > { %4385 = vmatprep.subr.mxu0 %v4173_v43  ;;  %v4154_v43 = vld [vmem:[%s12314_s15 + $0x260] sm:$0xff] }
 0x54f   : > { %v8390_v56 = vpop.f32.mrf.mxu0 }
 0x550   : > { %v3639_v63 = vadd.f32 %v8390_v56, %v3564_v58  ;;  %v4096_v58 = vld [vmem:[%s12314_s15 + $0x90] sm:$0xff] }
 0x551   : > { %v3633_v4 = vpop.f32.mrf.mxu0  ;;  %v4160_v56 = vld [vmem:[%s12314_s15 + $0x290] sm:$0xff] }
 0x552   : > { %v3634_v45 = vadd.f32 %v3633_v4, %v3559_v22  ;;  %v4159_v22 = vld [vmem:[%s12314_s15 + $0x288] sm:$0xff]  ;;  %v4094_v4 = vld [vmem:[%s12314_s15 + $0x80] sm:$0xff] }
 0x56f   : > { %v8460_v3 = vpop.f32.mrf.mxu0 }
 0x570   : > { %v3797_v6 = vmul.f32 0.95, %v8460_v3  ;;  %v7870_v16 = vpop.f32.mrf.mxu1  ;;  %v4093_v3 = vld [vmem:[%s12314_s15 + $0x78] sm:$0xff] }
 0x571   : > { %v3787_v37 = vpop.f32.mrf.mxu0 }
 0x572   : > { %v3796_v9 = vmul.f32 0.95, %v3787_v37  ;;  %v3799_v13 = vadd.f32 %v3797_v6, %v10343_v60  ;;  %v7871_v18 = vpop.f32.mrf.mxu1  ;;  %v4157_v6 = vld [vmem:[%s12314_s15 + $0x278] sm:$0xff]  ;;  %v4092_v37 = vld [vmem:[%s12314_s15 + $0x70] sm:$0xff] }
 0x573   : > { %v7872_v30 = vadd.f32 %v7871_v18, %v7870_v16  ;;  %v4090_v16 = vld [vmem:[%s12314_s15 + $0x60] sm:$0xff] }
 0x574   : > { %v3798_v39 = vadd.f32 %v3796_v9, %v10340_v61  ;;  %v7873_v20 = vpop.f32.mrf.mxu1  ;;  %v4156_v9 = vld [vmem:[%s12314_s15 + $0x270] sm:$0xff] }
 0x575   : > { %v3922_v36 = vadd.f32 %v7872_v30, %v7698_v31 }
 0x576   : > { %8493 = vmatprep.mubr.f32.mxu0 %v3798_v39  ;;  %v7874_v23 = vpop.f32.mrf.mxu1  ;;  %v4091_v39 = vld [vmem:[%s12314_s15 + $0x68] sm:$0xff] }
 0x577   : > { %8494 = vmatmul.mubr.f32.vlgmr.msra.gmra.mxu0 %v3799_v13  ;;  %v7875_v25 = vadd.f32 %v7874_v23, %v7873_v20  ;;  %v4155_v13 = vld [vmem:[%s12314_s15 + $0x268] sm:$0xff] }
 0x578   : > { %4386 = vmatpush1.msra.mxu0 %v4172_v53  ;;  %v4152_v53 = vld [vmem:[%s12314_s15 + $0x250] sm:$0xff] }
 0x579   : > { %v3927_v32 = vadd.f32 %v7875_v25, %v7698_v31 }
 0x637   : > { %v8495_v34 = vpop.f32.mrf.mxu0 }
 0x638   : > { %v4002_v35 = vadd.f32 %v8495_v34, %v3927_v32 }
 0x639   : > { %v3996_v61 = vpop.f32.mrf.mxu0 }
 0x63a   : > { %v4006_v60 = vadd.f32 %v4002_v35, %v3639_v63  ;;  %v3997_v38 = vadd.f32 %v3996_v61, %v3922_v36  ;;  %v4095_v63 = vld [vmem:[%s12314_s15 + $0x88] sm:$0xff] }
 0x63c   : > { %v10541_v41 = vadd.f32 %v4006_v60, %v9718_v14  ;;  %v4005_v42 = vadd.f32 %v3997_v38, %v3634_v45  ;;  %v4107_v14 = vld [vmem:[%s12314_s15 + $0xe8] sm:$0xff]  ;;  %v4158_v45 = vld [vmem:[%s12314_s15 + $0x280] sm:$0xff] }
 0x63d   : > { %4316 = vmatprep.subr.mxu1 %v4107_v14  ;;  %v4153_v14 = vld [vmem:[%s12314_s15 + $0x258] sm:$0xff] }
 0x63e   : > { %v4011_v44 = vsel %vm1733_vm4, %v10541_v41, 0.0  ;;  %v10546_v46 = vadd.f32 %v4005_v42, %v9709_v10  ;;  %v4171_v10 = vld [vmem:[%s12314_s15 + $0x2e8] sm:$0xff]  ;;  %4317 = vmatpush1.msra.mxu1 %v4106_v0  ;;  %v4086_v0 = vld [vmem:[%s12314_s15 + $0x40] sm:$0xff] }
 0x63f   : > { %4012 = vadd.xlane.f32.xlu0 %v4011_v44  ;;  %4387 = vmatprep.subr.mxu0 %v4171_v10  ;;  %v4151_v10 = vld [vmem:[%s12314_s15 + $0x248] sm:$0xff] }
 0x640   : > { %4388 = vmatpush1.msra.mxu0 %v4170_v7  ;;  %4318 = vmatprep.subr.mxu1 %v4105_v5  ;;  %v4085_v5 = vld [vmem:[%s12314_s15 + $0x38] sm:$0xff]  ;;  %v4150_v7 = vld [vmem:[%s12314_s15 + $0x240] sm:$0xff] }
 0x641   : > { %4389 = vmatprep.subr.mxu0 %v4169_v11  ;;  %4319 = vmatpush1.msra.mxu1 %v4104_v51  ;;  %v4084_v51 = vld [vmem:[%s12314_s15 + $0x30] sm:$0xff]  ;;  %v4149_v11 = vld [vmem:[%s12314_s15 + $0x238] sm:$0xff] }
 0x642   : > { %4390 = vmatpush1.msra.mxu0 %v4168_v15  ;;  %4320 = vmatprep.subr.mxu1 %v4103_v12  ;;  %v4083_v12 = vld [vmem:[%s12314_s15 + $0x28] sm:$0xff]  ;;  %v4148_v15 = vld [vmem:[%s12314_s15 + $0x230] sm:$0xff] }
 0x643   : > { %4009 = vadd.xlane.f32.xlu0 %v10546_v46  ;;  %4391 = vmatprep.subr.mxu0 %v4167_v17  ;;  %v4082_v17 = vld [vmem:[%s12314_s15 + $0x20] sm:$0xff] }
 0x644   : > { %4321 = vmatpush1.msra.mxu1 %v4102_v62  ;;  %4392 = vmatpush1.msra.mxu0 %v4166_v2  ;;  %v4147_v62 = vld [vmem:[%s12314_s15 + $0x228] sm:$0xff]  ;;  %v4081_v2 = vld [vmem:[%s12314_s15 + $0x18] sm:$0xff] }
 0x645   : > { %4322 = vmatprep.subr.mxu1 %v4101_v19  ;;  %4393 = vmatprep.subr.mxu0 %v4165_v21  ;;  %v4146_v19 = vld [vmem:[%s12314_s15 + $0x220] sm:$0xff]  ;;  %v4080_v21 = vld [vmem:[%s12314_s15 + $0x10] sm:$0xff] }
 0x646   : > { %4323 = vmatpush1.msra.mxu1 %v4100_v24  ;;  %4394 = vmatpush1.msra.mxu0 %v4164_v26  ;;  %v4145_v24 = vld [vmem:[%s12314_s15 + $0x218] sm:$0xff]  ;;  %v4079_v26 = vld [vmem:[%s12314_s15 + $0x8] sm:$0xff] }
 0x647   : > { %4324 = vmatprep.subr.mxu1 %v4099_v28  ;;  %4395 = vmatprep.subr.mxu0 %v4163_v48  ;;  %v4144_v28 = vld [vmem:[%s12314_s15 + $0x210] sm:$0xff]  ;;  %v4078_v48 = vld [vmem:[%s12314_s15] sm:$0xff] }
 0x648   : > { %4325 = vmatpush1.msra.mxu1 %v4098_v49  ;;  %4396 = vmatpush1.msra.mxu0 %v4162_v54  ;;  %v4143_v49 = vld [vmem:[%s12314_s15 + $0x208] sm:$0xff]  ;;  %v4141_v54 = vld [vmem:[%s12314_s15 + $0x1f8] sm:$0xff] }
 0x649   : > { %4326 = vmatprep.subr.mxu1 %v4097_v52  ;;  %4397 = vmatprep.subr.mxu0 %v4161_v55  ;;  %v4142_v52 = vld [vmem:[%s12314_s15 + $0x200] sm:$0xff]  ;;  %v4140_v55 = vld [vmem:[%s12314_s15 + $0x1f0] sm:$0xff] }
 0x64a   : > { %4327 = vmatpush1.msra.mxu1 %v4096_v58  ;;  %4398 = vmatpush1.msra.mxu0 %v4160_v56  ;;  %v4205_v58 = vld [vmem:[%s12314_s15 + $0x3f8] sm:$0xff]  ;;  %v4139_v56 = vld [vmem:[%s12314_s15 + $0x1e8] sm:$0xff] }
 0x64b   : > { %4328 = vmatprep.subr.mxu1 %v4095_v63  ;;  %4399 = vmatprep.subr.mxu0 %v4159_v22  ;;  %v4204_v63 = vld [vmem:[%s12314_s15 + $0x3f0] sm:$0xff]  ;;  %v4138_v22 = vld [vmem:[%s12314_s15 + $0x1e0] sm:$0xff] }
 0x64c   : > { %4329 = vmatpush1.msra.mxu1 %v4094_v4  ;;  %4400 = vmatpush1.msra.mxu0 %v4158_v45  ;;  %v4203_v4 = vld [vmem:[%s12314_s15 + $0x3e8] sm:$0xff]  ;;  %v4137_v45 = vld [vmem:[%s12314_s15 + $0x1d8] sm:$0xff] }
 0x64d   : > { %4330 = vmatprep.subr.mxu1 %v4093_v3  ;;  %4401 = vmatprep.subr.mxu0 %v4157_v6  ;;  %v4202_v3 = vld [vmem:[%s12314_s15 + $0x3e0] sm:$0xff]  ;;  %v4136_v6 = vld [vmem:[%s12314_s15 + $0x1d0] sm:$0xff] }
 0x64e   : > { %4331 = vmatpush1.msra.mxu1 %v4092_v37  ;;  %4402 = vmatpush1.msra.mxu0 %v4156_v9  ;;  %v4201_v37 = vld [vmem:[%s12314_s15 + $0x3d8] sm:$0xff]  ;;  %v4135_v9 = vld [vmem:[%s12314_s15 + $0x1c8] sm:$0xff] }
 0x64f   : > { %4332 = vmatprep.subr.mxu1 %v4091_v39  ;;  %4403 = vmatprep.subr.mxu0 %v4155_v13  ;;  %v4200_v39 = vld [vmem:[%s12314_s15 + $0x3d0] sm:$0xff]  ;;  %v4134_v13 = vld [vmem:[%s12314_s15 + $0x1c0] sm:$0xff] }
 0x650   : > { %4333 = vmatpush1.msra.mxu1 %v4090_v16  ;;  %4404 = vmatpush1.msra.mxu0 %v4154_v43  ;;  %v4199_v16 = vld [vmem:[%s12314_s15 + $0x3c8] sm:$0xff] }
 0x651   : > { %4334 = vmatprep.subr.mxu1 %v4089_v27  ;;  %4405 = vmatprep.subr.mxu0 %v4153_v14  ;;  %v4126_v27 = vld [vmem:[%s12314_s15 + $0x180] sm:$0xff]  ;;  %v4191_v43 = vld [vmem:[%s12314_s15 + $0x388] sm:$0xff] }
 0x652   : > { %4406 = vmatpush1.msra.mxu0 %v4152_v53  ;;  %v4190_v14 = vld [vmem:[%s12314_s15 + $0x380] sm:$0xff]  ;;  %v4189_v53 = vld [vmem:[%s12314_s15 + $0x378] sm:$0xff] }
 0x653   : > { %4407 = vmatprep.subr.mxu0 %v4151_v10  ;;  %v4188_v10 = vld [vmem:[%s12314_s15 + $0x370] sm:$0xff] }
 0x654   : > { %4408 = vmatpush1.msra.mxu0 %v4150_v7  ;;  %v4187_v7 = vld [vmem:[%s12314_s15 + $0x368] sm:$0xff] }
 0x655   : > { %4409 = vmatprep.subr.mxu0 %v4149_v11  ;;  %v4186_v11 = vld [vmem:[%s12314_s15 + $0x360] sm:$0xff] }
 0x656   : > { %4410 = vmatpush1.msra.mxu0 %v4148_v15  ;;  %v4185_v15 = vld [vmem:[%s12314_s15 + $0x358] sm:$0xff] }
 0x657   : > { %4411 = vmatprep.subr.mxu0 %v4147_v62  ;;  %v4184_v62 = vld [vmem:[%s12314_s15 + $0x350] sm:$0xff] }
 0x658   : > { %4412 = vmatpush1.msra.mxu0 %v4146_v19  ;;  %v4183_v19 = vld [vmem:[%s12314_s15 + $0x348] sm:$0xff] }
 0x659   : > { %4413 = vmatprep.subr.mxu0 %v4145_v24  ;;  %v4182_v24 = vld [vmem:[%s12314_s15 + $0x340] sm:$0xff] }
 0x65a   : > { %4414 = vmatpush1.msra.mxu0 %v4144_v28  ;;  %v4181_v28 = vld [vmem:[%s12314_s15 + $0x338] sm:$0xff] }
 0x65b   : > { %4415 = vmatprep.subr.mxu0 %v4143_v49  ;;  %v4180_v49 = vld [vmem:[%s12314_s15 + $0x330] sm:$0xff] }
 0x65c   : > { %4416 = vmatpush1.msra.mxu0 %v4142_v52  ;;  %v4179_v52 = vld [vmem:[%s12314_s15 + $0x328] sm:$0xff] }
 0x65d   : > { %4417 = vmatprep.subr.mxu0 %v4205_v58  ;;  %v4178_v58 = vld [vmem:[%s12314_s15 + $0x320] sm:$0xff] }
 0x65e   : > { %4418 = vmatpush2.msra.mxu0 %v4204_v63  ;;  %v4177_v63 = vld [vmem:[%s12314_s15 + $0x318] sm:$0xff] }
 0x65f   : > { %4419 = vmatprep.subr.mxu0 %v4203_v4  ;;  %v4176_v4 = vld [vmem:[%s12314_s15 + $0x310] sm:$0xff] }
 0x660   : > { %4420 = vmatpush2.msra.mxu0 %v4202_v3  ;;  %v4175_v3 = vld [vmem:[%s12314_s15 + $0x308] sm:$0xff] }
 0x661   : > { %4421 = vmatprep.subr.mxu0 %v4201_v37  ;;  %v4237_v37 = vld [vmem:[%s12314_s15 + $0x4f8] sm:$0xff] }
 0x662   : > { %4422 = vmatpush2.msra.mxu0 %v4200_v39 }
 0x663   : > { %4423 = vmatprep.subr.mxu0 %v4199_v16 }
 0x6c8   : > { %v4013_v18 = vpop.xlane.xlu0 %4012 }
 0x6c9   : > { %v4014_v20 = vsel %vm1733_vm4, %v4013_v18, 0.0  ;;  %v4133_v18 = vld [vmem:[%s12314_s15 + $0x1b8] sm:$0xff] }
 0x6cc   : > { %v4010_v23 = vpop.xlane.xlu0 %4009 }
 0x6cd   : > { %v4015_v25 = vadd.f32 %v4014_v20, %v4010_v23  ;;  %v4198_v20 = vld [vmem:[%s12314_s15 + $0x3c0] sm:$0xff]  ;;  %v4132_v23 = vld [vmem:[%s12314_s15 + $0x1b0] sm:$0xff] }
 0x6ce   : > { %4424 = vmatpush2.msra.mxu0 %v4198_v20 }
 0x6cf   : > { %v4016_v30 = vrot.slane %v4015_v25, 4 }
 0x6d1   : > { %v4017_v31 = vadd.f32 %v4016_v30, %v4015_v25  ;;  %v4197_v25 = vld [vmem:[%s12314_s15 + $0x3b8] sm:$0xff]  ;;  %v4131_v30 = vld [vmem:[%s12314_s15 + $0x1a8] sm:$0xff] }
 0x6d2   : > { %4425 = vmatprep.subr.mxu0 %v4197_v25 }
 0x6d3   : > { %v4018_v32 = vrot.slane %v4017_v31, 2 }
 0x6d5   : > { %v4019_v34 = vadd.f32 %v4018_v32, %v4017_v31  ;;  %v4196_v31 = vld [vmem:[%s12314_s15 + $0x3b0] sm:$0xff]  ;;  %v4130_v32 = vld [vmem:[%s12314_s15 + $0x1a0] sm:$0xff] }
 0x6d6   : > { %4426 = vmatpush2.msra.mxu0 %v4196_v31 }
 0x6d7   : > { %v4020_v35 = vrot.slane %v4019_v34, 1 }
 0x6d9   : > { %v4021_v36 = vadd.f32 %v4020_v35, %v4019_v34  ;;  %v4195_v34 = vld [vmem:[%s12314_s15 + $0x3a8] sm:$0xff]  ;;  %v4129_v35 = vld [vmem:[%s12314_s15 + $0x198] sm:$0xff] }
 0x6da   : > { %4427 = vmatprep.subr.mxu0 %v4195_v34 }
 0x6db   : > { %v4023_v61 = vmul.f32 0.00060096156, %v4021_v36  ;;  %v4194_v36 = vld [vmem:[%s12314_s15 + $0x3a0] sm:$0xff] }
 0x6dc   : > { %4428 = vmatpush2.msra.mxu0 %v4194_v36 }
 0x6dd   : > { %v10590_v60 = vsub.f32 %v10541_v41, %v4023_v61  ;;  %v10595_v42 = vsub.f32 %v10546_v46, %v4023_v61  ;;  %v4088_v41 = vld [vmem:[%s12314_s15 + $0x50] sm:$0xff]  ;;  %v4087_v46 = vld [vmem:[%s12314_s15 + $0x48] sm:$0xff] }
 0x6de   : > { %4335 = vmatpush1.msra.mxu1 %v4088_v41  ;;  %v4128_v61 = vld [vmem:[%s12314_s15 + $0x190] sm:$0xff]  ;;  %v4125_v41 = vld [vmem:[%s12314_s15 + $0x178] sm:$0xff] }
 0x6df   : > { %v4027_v38 = vmul.f32 %v10590_v60, %v10590_v60  ;;  %v4026_v47 = vmul.f32 %v10595_v42, %v10595_v42  ;;  %4336 = vmatprep.subr.mxu1 %v4087_v46  ;;  %v4124_v46 = vld [vmem:[%s12314_s15 + $0x170] sm:$0xff] }
 0x6e0   : > { %4337 = vmatpush1.msra.mxu1 %v4086_v0  ;;  %v4123_v0 = vld [vmem:[%s12314_s15 + $0x168] sm:$0xff] }
 0x6e1   : > { %v4030_v44 = vsel %vm1733_vm4, %v4027_v38, 0.0  ;;  %4338 = vmatprep.subr.mxu1 %v4085_v5  ;;  %v4193_v38 = vld [vmem:[%s12314_s15 + $0x398] sm:$0xff]  ;;  %v4122_v5 = vld [vmem:[%s12314_s15 + $0x160] sm:$0xff] }
 0x6e2   : > { %4031 = vadd.xlane.f32.xlu1 %v4030_v44  ;;  %4339 = vmatpush1.msra.mxu1 %v4084_v51  ;;  %v4127_v44 = vld [vmem:[%s12314_s15 + $0x188] sm:$0xff]  ;;  %v4121_v51 = vld [vmem:[%s12314_s15 + $0x158] sm:$0xff] }
 0x6e3   : > { %4340 = vmatprep.subr.mxu1 %v4083_v12  ;;  %4429 = vmatprep.subr.mxu0 %v4193_v38  ;;  %v4120_v12 = vld [vmem:[%s12314_s15 + $0x150] sm:$0xff]  ;;  %v4047_v38 = vld [vmem:[%s12315_s16 + $0x8] sm:$0x1f] }
 0x6e4   : > { %4341 = vmatpush1.msra.mxu1 %v4082_v17  ;;  %v4119_v17 = vld [vmem:[%s12314_s15 + $0x148] sm:$0xff] }
 0x6e5   : > { %4342 = vmatprep.subr.mxu1 %v4081_v2  ;;  %v4118_v2 = vld [vmem:[%s12314_s15 + $0x140] sm:$0xff] }
 0x6e6   : > { %4028 = vadd.xlane.f32.xlu1 %v4026_v47  ;;  %4343 = vmatpush1.msra.mxu1 %v4080_v21  ;;  %v4192_v47 = vld [vmem:[%s12314_s15 + $0x390] sm:$0xff]  ;;  %v4117_v21 = vld [vmem:[%s12314_s15 + $0x138] sm:$0xff] }
 0x6e7   : > { %4344 = vmatprep.subr.mxu1 %v4079_v26  ;;  %4430 = vmatpush2.msra.mxu0 %v4192_v47  ;;  %v4116_v26 = vld [vmem:[%s12314_s15 + $0x130] sm:$0xff] }
 0x6e8   : > { %4345 = vmatpush1.msra.mxu1 %v4078_v48  ;;  %4431 = vmatprep.subr.mxu0 %v4191_v43  ;;  %v4115_v48 = vld [vmem:[%s12314_s15 + $0x128] sm:$0xff] }
 0x6e9   : > { %4346 = vmatprep.subr.mxu1 %v4141_v54  ;;  %4432 = vmatpush2.msra.mxu0 %v4190_v14  ;;  %v4114_v54 = vld [vmem:[%s12314_s15 + $0x120] sm:$0xff]  ;;  %v4051_v43 = vld [vmem:[%s12316_s18 + $0x8] sm:$0x1f] }
 0x6ea   : > { %4347 = vmatpush2.msra.mxu1 %v4140_v55  ;;  %4433 = vmatprep.subr.mxu0 %v4189_v53  ;;  %v4113_v55 = vld [vmem:[%s12314_s15 + $0x118] sm:$0xff] }
 0x6eb   : > { %4348 = vmatprep.subr.mxu1 %v4139_v56  ;;  %4434 = vmatpush2.msra.mxu0 %v4188_v10  ;;  %v4112_v56 = vld [vmem:[%s12314_s15 + $0x110] sm:$0xff] }
 0x6ec   : > { %4349 = vmatpush2.msra.mxu1 %v4138_v22  ;;  %4435 = vmatprep.subr.mxu0 %v4187_v7  ;;  %v4111_v22 = vld [vmem:[%s12314_s15 + $0x108] sm:$0xff] }
 0x6ed   : > { %4350 = vmatprep.subr.mxu1 %v4137_v45  ;;  %4436 = vmatpush2.msra.mxu0 %v4186_v11  ;;  %v4110_v45 = vld [vmem:[%s12314_s15 + $0x100] sm:$0xff] }
 0x6ee   : > { %4351 = vmatpush2.msra.mxu1 %v4136_v6  ;;  %4437 = vmatprep.subr.mxu0 %v4185_v15  ;;  %v4174_v6 = vld [vmem:[%s12314_s15 + $0x300] sm:$0xff]  ;;  %v4235_v15 = vld [vmem:[%s12314_s15 + $0x4e8] sm:$0xff] }
 0x6ef   : > { %4352 = vmatprep.subr.mxu1 %v4135_v9  ;;  %4438 = vmatpush2.msra.mxu0 %v4184_v62  ;;  %v4301_v9 = vld [vmem:[%s12314_s15 + $0x6f8] sm:$0xff] }
 0x6f0   : > { %4353 = vmatpush2.msra.mxu1 %v4134_v13  ;;  %4439 = vmatprep.subr.mxu0 %v4183_v19 }
 0x6f1   : > { %4354 = vmatprep.subr.mxu1 %v4133_v18  ;;  %4440 = vmatpush2.msra.mxu0 %v4182_v24  ;;  %v4234_v24 = vld [vmem:[%s12314_s15 + $0x4e0] sm:$0xff] }
 0x6f2   : > { %4355 = vmatpush2.msra.mxu1 %v4132_v23  ;;  %4441 = vmatprep.subr.mxu0 %v4181_v28  ;;  %v4233_v28 = vld [vmem:[%s12314_s15 + $0x4d8] sm:$0xff] }
 0x6f3   : > { %4356 = vmatprep.subr.mxu1 %v4131_v30  ;;  %4442 = vmatpush2.msra.mxu0 %v4180_v49  ;;  %v4298_v49 = vld [vmem:[%s12314_s15 + $0x6e0] sm:$0xff] }
 0x6f4   : > { %4357 = vmatpush2.msra.mxu1 %v4130_v32  ;;  %4443 = vmatprep.subr.mxu0 %v4179_v52  ;;  %v4297_v52 = vld [vmem:[%s12314_s15 + $0x6d8] sm:$0xff] }
 0x6f5   : > { %4358 = vmatprep.subr.mxu1 %v4129_v35  ;;  %4444 = vmatpush2.msra.mxu0 %v4178_v58  ;;  %v4296_v58 = vld [vmem:[%s12314_s15 + $0x6d0] sm:$0xff] }
 0x6f6   : > { %4359 = vmatpush2.msra.mxu1 %v4128_v61  ;;  %4445 = vmatprep.subr.mxu0 %v4177_v63  ;;  %v4046_v61 = vld [vmem:[%s12315_s16] sm:$0xff]  ;;  %v4295_v63 = vld [vmem:[%s12314_s15 + $0x6c8] sm:$0xff] }
 0x6f7   : > { %4360 = vmatprep.subr.mxu1 %v4127_v44  ;;  %4446 = vmatpush2.msra.mxu0 %v4176_v4  ;;  %v4294_v4 = vld [vmem:[%s12314_s15 + $0x6c0] sm:$0xff] }
 0x6f8   : > { %4361 = vmatpush2.msra.mxu1 %v4126_v27  ;;  %4447 = vmatprep.subr.mxu0 %v4175_v3  ;;  %v4050_v27 = vld [vmem:[%s12316_s18] sm:$0xff]  ;;  %v4293_v3 = vld [vmem:[%s12314_s15 + $0x6b8] sm:$0xff] }
 0x6f9   : > { %4362 = vmatprep.subr.mxu1 %v4125_v41  ;;  %4448 = vmatpush2.msra.mxu0 %v4174_v6  ;;  %v4227_v6 = vld [vmem:[%s12314_s15 + $0x4a8] sm:$0xff] }
 0x6fa   : > { %4363 = vmatpush2.msra.mxu1 %v4124_v46  ;;  %4527 = vmatprep.subr.mxu0 %v4301_v9  ;;  %v4226_v9 = vld [vmem:[%s12314_s15 + $0x4a0] sm:$0xff] }
 0x6fb   : > { %4364 = vmatprep.subr.mxu1 %v4123_v0 }
 0x6fc   : > { %4365 = vmatpush2.msra.mxu1 %v4122_v5 }
 0x6fd   : > { %4366 = vmatprep.subr.mxu1 %v4121_v51 }
 0x6fe   : > { %4367 = vmatpush2.msra.mxu1 %v4120_v12 }
 0x6ff   : > { %4368 = vmatprep.subr.mxu1 %v4119_v17 }
 0x700   : > { %4369 = vmatpush2.msra.mxu1 %v4118_v2 }
 0x701   : > { %4370 = vmatprep.subr.mxu1 %v4117_v21  ;;  %v4300_v21 = vld [vmem:[%s12314_s15 + $0x6f0] sm:$0xff] }
 0x702   : > { %4371 = vmatpush2.msra.mxu1 %v4116_v26  ;;  %v4299_v26 = vld [vmem:[%s12314_s15 + $0x6e8] sm:$0xff] }
 0x703   : > { %4372 = vmatprep.subr.mxu1 %v4115_v48 }
 0x704   : > { %4373 = vmatpush2.msra.mxu1 %v4114_v54  ;;  %v4232_v54 = vld [vmem:[%s12314_s15 + $0x4d0] sm:$0xff] }
 0x705   : > { %4374 = vmatprep.subr.mxu1 %v4113_v55  ;;  %v4231_v55 = vld [vmem:[%s12314_s15 + $0x4c8] sm:$0xff] }
 0x706   : > { %4375 = vmatpush2.msra.mxu1 %v4112_v56  ;;  %v4230_v56 = vld [vmem:[%s12314_s15 + $0x4c0] sm:$0xff] }
 0x707   : > { %4376 = vmatprep.subr.mxu1 %v4111_v22  ;;  %v4229_v22 = vld [vmem:[%s12314_s15 + $0x4b8] sm:$0xff] }
 0x708   : > { %4377 = vmatpush2.msra.mxu1 %v4110_v45  ;;  %v4228_v45 = vld [vmem:[%s12314_s15 + $0x4b0] sm:$0xff] }
 0x709   : > { %4456 = vmatprep.subr.mxu1 %v4237_v37  ;;  %v4292_v37 = vld [vmem:[%s12314_s15 + $0x6b0] sm:$0xff] }
 0x76b   : > { %v4032_v39 = vpop.xlane.xlu1 %4031 }
 0x76c   : > { %v4033_v13 = vsel %vm1733_vm4, %v4032_v39, 0.0  ;;  %v4291_v39 = vld [vmem:[%s12314_s15 + $0x6a8] sm:$0xff] }
 0x76f   : > { %v4029_v16 = vpop.xlane.xlu1 %4028 }
 0x770   : > { %v4034_v18 = vadd.f32 %v4033_v13, %v4029_v16  ;;  %v4225_v13 = vld [vmem:[%s12314_s15 + $0x498] sm:$0xff]  ;;  %v4290_v16 = vld [vmem:[%s12314_s15 + $0x6a0] sm:$0xff] }
 0x772   : > { %v4035_v20 = vrot.slane %v4034_v18, 4 }
 0x774   : > { %v4036_v23 = vadd.f32 %v4035_v20, %v4034_v18  ;;  %v4224_v18 = vld [vmem:[%s12314_s15 + $0x490] sm:$0xff]  ;;  %v4289_v20 = vld [vmem:[%s12314_s15 + $0x698] sm:$0xff] }
 0x776   : > { %v4037_v25 = vrot.slane %v4036_v23, 2 }
 0x778   : > { %v4038_v30 = vadd.f32 %v4037_v25, %v4036_v23  ;;  %v4223_v23 = vld [vmem:[%s12314_s15 + $0x488] sm:$0xff]  ;;  %v4288_v25 = vld [vmem:[%s12314_s15 + $0x690] sm:$0xff] }
 0x77a   : > { %v4039_v31 = vrot.slane %v4038_v30, 1 }
 0x77c   : > { %v4040_v32 = vadd.f32 %v4039_v31, %v4038_v30  ;;  %v4222_v30 = vld [vmem:[%s12314_s15 + $0x480] sm:$0xff]  ;;  %v4287_v31 = vld [vmem:[%s12314_s15 + $0x688] sm:$0xff] }
 0x77e   : > { %v4041_v34 = vmul.f32 0.00060096156, %v4040_v32  ;;  %v4221_v32 = vld [vmem:[%s12314_s15 + $0x478] sm:$0xff] }
 0x780   : > { %v4042_v35 = vadd.f32 1e-05, %v4041_v34  ;;  %v4286_v34 = vld [vmem:[%s12314_s15 + $0x680] sm:$0xff] }
 0x782   : > { %8984 = vrsqrt.f32 %v4042_v35  ;;  %v4220_v35 = vld [vmem:[%s12314_s15 + $0x470] sm:$0xff] }
 0x78f   : > { %v8985_v36 = vpop.eup %8984 }
 0x790   : > { %v4044_v44 = vmul.f32 %v8985_v36, %v10595_v42  ;;  %v4045_v47 = vmul.f32 %v8985_v36, %v10590_v60  ;;  %v4236_v60 = vld [vmem:[%s12314_s15 + $0x4f0] sm:$0xff]  ;;  %v4285_v36 = vld [vmem:[%s12314_s15 + $0x678] sm:$0xff] }
 0x792   : > { %v4048_v41 = vmul.f32 %v4046_v61, %v4044_v44  ;;  %v4049_v14 = vmul.f32 %v4047_v38, %v4045_v47  ;;  %v4219_v61 = vld [vmem:[%s12314_s15 + $0x468] sm:$0xff]  ;;  %v4284_v38 = vld [vmem:[%s12314_s15 + $0x670] sm:$0xff]  ;;  %v4218_v44 = vld [vmem:[%s12314_s15 + $0x460] sm:$0xff] }
 0x793   : > { %v4283_v47 = vld [vmem:[%s12314_s15 + $0x668] sm:$0xff] }
 0x794   : > { %v10698_v46 = vadd.f32 %v4050_v27, %v4048_v41  ;;  %v10700_v53 = vadd.f32 %v4051_v43, %v4049_v14  ;;  %v4217_v27 = vld [vmem:[%s12314_s15 + $0x458] sm:$0xff]  ;;  %v4282_v43 = vld [vmem:[%s12314_s15 + $0x660] sm:$0xff]  ;;  %v4216_v41 = vld [vmem:[%s12314_s15 + $0x450] sm:$0xff] }
 0x795   : > { %v4281_v14 = vld [vmem:[%s12314_s15 + $0x658] sm:$0xff] }
 0x796   : > { %v4055_v0 = vrot.slane %v10698_v46, 1  ;;  %v4062_v10 = vrot.slane %v10698_v46, 3  ;;  %v4063_v5 = vrot.slane %v10700_v53, 3  ;;  %v4058_v42 = vrot.slane %v10698_v46, 2 }
 0x797   : > { %v4059_v7 = vrot.slane %v10700_v53, 2  ;;  %v4070_v51 = vrot.slane %v10698_v46, 5  ;;  %v4071_v11 = vrot.slane %v10700_v53, 5  ;;  %v4066_v17 = vrot.slane %v10698_v46, 4 }
 0x798   : > { %4378 = vmatprep.mubr.f32.mxu1 %v4055_v0  ;;  %v4064_v12 = vsel %vm1733_vm4, %v4062_v10, %v4063_v5  ;;  %v4067_v62 = vrot.slane %v10700_v53, 4  ;;  %v4215_v0 = vld [vmem:[%s12314_s15 + $0x448] sm:$0xff]  ;;  %v4280_v10 = vld [vmem:[%s12314_s15 + $0x650] sm:$0xff]  ;;  %v4214_v5 = vld [vmem:[%s12314_s15 + $0x440] sm:$0xff] }
 0x799   : > { %4379 = vmatmul.mubr.f32.vlgmr.msra.gmra.mxu1 %v10698_v46  ;;  %4449 = vmatprep.mubr.f32.mxu0 %v4064_v12  ;;  %v4060_v2 = vsel %vm1727_vm5, %v4058_v42, %v4059_v7  ;;  %v4072_v19 = vsel %vm1748_vm7, %v4070_v51, %v4071_v11  ;;  %v4279_v42 = vld [vmem:[%s12314_s15 + $0x648] sm:$0xff]  ;;  %v4278_v7 = vld [vmem:[%s12314_s15 + $0x640] sm:$0xff]  ;;  %v4212_v51 = vld [vmem:[%s12314_s15 + $0x430] sm:$0xff] }
 0x79a   : > { %4457 = vmatpush1.msra.mxu1 %v4236_v60  ;;  %4450 = vmatmul.mubr.f32.vlgmr.msra.gmra.mxu0 %v4060_v2  ;;  %v10722_v48 = vsel %vm1740_vm6, %v4066_v17, %v4067_v62  ;;  %v4213_v60 = vld [vmem:[%s12314_s15 + $0x438] sm:$0xff]  ;;  %v4211_v12 = vld [vmem:[%s12314_s15 + $0x428] sm:$0xff]  ;;  %v4210_v17 = vld [vmem:[%s12314_s15 + $0x420] sm:$0xff] }
 0x79b   : > { %4458 = vmatprep.subr.mxu1 %v4235_v15  ;;  %4520 = vmatprep.mubr.f32.mxu1 %v4072_v19  ;;  %v4277_v11 = vld [vmem:[%s12314_s15 + $0x638] sm:$0xff]  ;;  %v4276_v15 = vld [vmem:[%s12314_s15 + $0x630] sm:$0xff]  ;;  %v4275_v62 = vld [vmem:[%s12314_s15 + $0x628] sm:$0xff] }
 0x79c   : > { %4528 = vmatpush1.msra.mxu0 %v4300_v21  ;;  %4459 = vmatpush1.msra.mxu1 %v4234_v24  ;;  %v4209_v2 = vld [vmem:[%s12314_s15 + $0x418] sm:$0xff]  ;;  %v4274_v19 = vld [vmem:[%s12314_s15 + $0x620] sm:$0xff]  ;;  %v4208_v21 = vld [vmem:[%s12314_s15 + $0x410] sm:$0xff] }
 0x79d   : > { %4529 = vmatprep.subr.mxu0 %v4299_v26  ;;  %4460 = vmatprep.subr.mxu1 %v4233_v28  ;;  %v4273_v24 = vld [vmem:[%s12314_s15 + $0x618] sm:$0xff]  ;;  %v4207_v26 = vld [vmem:[%s12314_s15 + $0x408] sm:$0xff]  ;;  %v4272_v28 = vld [vmem:[%s12314_s15 + $0x610] sm:$0xff] }
 0x79e   : > { %4530 = vmatpush1.msra.mxu0 %v4298_v49  ;;  %4461 = vmatpush1.msra.mxu1 %v4232_v54  ;;  %v4206_v49 = vld [vmem:[%s12314_s15 + $0x400] sm:$0xff]  ;;  %v4271_v54 = vld [vmem:[%s12314_s15 + $0x608] sm:$0xff] }
 0x79f   : > { %4531 = vmatprep.subr.mxu0 %v4297_v52  ;;  %4462 = vmatprep.subr.mxu1 %v4231_v55  ;;  %v4269_v52 = vld [vmem:[%s12314_s15 + $0x5f8] sm:$0xff]  ;;  %v4074_v55 = vrot.slane %v10698_v46, 6 }
 0x7a0   : > { %4532 = vmatpush1.msra.mxu0 %v4296_v58  ;;  %4463 = vmatpush1.msra.mxu1 %v4230_v56  ;;  %v4075_v58 = vrot.slane %v10700_v53, 6  ;;  %v4270_v56 = vld [vmem:[%s12314_s15 + $0x600] sm:$0xff] }
 0x7a1   : > { %4533 = vmatprep.subr.mxu0 %v4295_v63  ;;  %4464 = vmatprep.subr.mxu1 %v4229_v22  ;;  %v4268_v63 = vld [vmem:[%s12314_s15 + $0x5f0] sm:$0xff]  ;;  %v4267_v22 = vld [vmem:[%s12314_s15 + $0x5e8] sm:$0xff]  ;;  %v4266_v53 = vld [vmem:[%s12314_s15 + $0x5e0] sm:$0xff] }
 0x7a2   : > { %4534 = vmatpush1.msra.mxu0 %v4294_v4  ;;  %4465 = vmatpush1.msra.mxu1 %v4228_v45  ;;  %v10787_v46 = vsel %vm1756_vm8, %v4074_v55, %v4075_v58  ;;  %v4265_v4 = vld [vmem:[%s12314_s15 + $0x5d8] sm:$0xff]  ;;  %v4264_v45 = vld [vmem:[%s12314_s15 + $0x5d0] sm:$0xff]  ;;  %v4704_v55 = vld [vmem:[%s12317_s22 + $0x2a8] sm:$0xff] }
 0x7a3   : > { %4535 = vmatprep.subr.mxu0 %v4293_v3  ;;  %4466 = vmatprep.subr.mxu1 %v4227_v6  ;;  %v4263_v3 = vld [vmem:[%s12314_s15 + $0x5c8] sm:$0xff]  ;;  %v4262_v6 = vld [vmem:[%s12314_s15 + $0x5c0] sm:$0xff] }
 0x7a4   : > { %4536 = vmatpush1.msra.mxu0 %v4292_v37  ;;  %4467 = vmatpush1.msra.mxu1 %v4226_v9  ;;  %v4261_v37 = vld [vmem:[%s12314_s15 + $0x5b8] sm:$0xff]  ;;  %v4260_v9 = vld [vmem:[%s12314_s15 + $0x5b0] sm:$0xff]  ;;  %v4639_v58 = vld [vmem:[%s12317_s22 + $0xa0] sm:$0xff] }
 0x7a5   : > { %4537 = vmatprep.subr.mxu0 %v4291_v39  ;;  %4468 = vmatprep.subr.mxu1 %v4225_v13  ;;  %v4259_v39 = vld [vmem:[%s12314_s15 + $0x5a8] sm:$0xff]  ;;  %v4258_v13 = vld [vmem:[%s12314_s15 + $0x5a0] sm:$0xff] }
 0x7a6   : > { %4538 = vmatpush1.msra.mxu0 %v4290_v16  ;;  %4469 = vmatpush1.msra.mxu1 %v4224_v18  ;;  %v4257_v16 = vld [vmem:[%s12314_s15 + $0x598] sm:$0xff]  ;;  %v4256_v18 = vld [vmem:[%s12314_s15 + $0x590] sm:$0xff] }
 0x7a7   : > { %4539 = vmatprep.subr.mxu0 %v4289_v20  ;;  %4470 = vmatprep.subr.mxu1 %v4223_v23  ;;  %v4255_v20 = vld [vmem:[%s12314_s15 + $0x588] sm:$0xff]  ;;  %v4254_v23 = vld [vmem:[%s12314_s15 + $0x580] sm:$0xff] }
 0x7a8   : > { %4540 = vmatpush1.msra.mxu0 %v4288_v25  ;;  %4471 = vmatpush1.msra.mxu1 %v4222_v30  ;;  %v4253_v25 = vld [vmem:[%s12314_s15 + $0x578] sm:$0xff]  ;;  %v4252_v30 = vld [vmem:[%s12314_s15 + $0x570] sm:$0xff] }
 0x7a9   : > { %4541 = vmatprep.subr.mxu0 %v4287_v31  ;;  %4472 = vmatprep.subr.mxu1 %v4221_v32  ;;  %v4251_v31 = vld [vmem:[%s12314_s15 + $0x568] sm:$0xff]  ;;  %v4250_v32 = vld [vmem:[%s12314_s15 + $0x560] sm:$0xff] }
 0x7aa   : > { %4542 = vmatpush1.msra.mxu0 %v4286_v34  ;;  %4473 = vmatpush1.msra.mxu1 %v4220_v35  ;;  %v4249_v34 = vld [vmem:[%s12314_s15 + $0x558] sm:$0xff]  ;;  %v4248_v35 = vld [vmem:[%s12314_s15 + $0x550] sm:$0xff] }
 0x7ab   : > { %4543 = vmatprep.subr.mxu0 %v4285_v36  ;;  %4474 = vmatprep.subr.mxu1 %v4219_v61  ;;  %v4247_v36 = vld [vmem:[%s12314_s15 + $0x548] sm:$0xff]  ;;  %v4246_v61 = vld [vmem:[%s12314_s15 + $0x540] sm:$0xff] }
 0x7ac   : > { %4544 = vmatpush1.msra.mxu0 %v4284_v38  ;;  %4475 = vmatpush1.msra.mxu1 %v4218_v44  ;;  %v4245_v38 = vld [vmem:[%s12314_s15 + $0x538] sm:$0xff]  ;;  %v4244_v44 = vld [vmem:[%s12314_s15 + $0x530] sm:$0xff] }
 0x7ad   : > { %4545 = vmatprep.subr.mxu0 %v4283_v47  ;;  %4476 = vmatprep.subr.mxu1 %v4217_v27  ;;  %v4243_v47 = vld [vmem:[%s12314_s15 + $0x528] sm:$0xff]  ;;  %v4242_v27 = vld [vmem:[%s12314_s15 + $0x520] sm:$0xff] }
 0x7ae   : > { %4546 = vmatpush1.msra.mxu0 %v4282_v43  ;;  %4477 = vmatpush1.msra.mxu1 %v4216_v41  ;;  %v4241_v43 = vld [vmem:[%s12314_s15 + $0x518] sm:$0xff]  ;;  %v4240_v41 = vld [vmem:[%s12314_s15 + $0x510] sm:$0xff] }
 0x7af   : > { %4547 = vmatprep.subr.mxu0 %v4281_v14  ;;  %4478 = vmatprep.subr.mxu1 %v4215_v0  ;;  %v4239_v14 = vld [vmem:[%s12314_s15 + $0x508] sm:$0xff]  ;;  %v4238_v0 = vld [vmem:[%s12314_s15 + $0x500] sm:$0xff] }
 0x7b0   : > { %4548 = vmatpush1.msra.mxu0 %v4280_v10  ;;  %4479 = vmatpush1.msra.mxu1 %v4214_v5  ;;  %v4650_v10 = vld [vmem:[%s12317_s22 + $0xf8] sm:$0xff] }
 0x7b1   : > { %4549 = vmatprep.subr.mxu0 %v4279_v42  ;;  %4480 = vmatprep.subr.mxu1 %v4213_v60  ;;  %v4714_v5 = vld [vmem:[%s12317_s22 + $0x2f8] sm:$0xff]  ;;  %v4649_v42 = vld [vmem:[%s12317_s22 + $0xf0] sm:$0xff] }
 0x7b2   : > { %4550 = vmatpush1.msra.mxu0 %v4278_v7  ;;  %4481 = vmatpush1.msra.mxu1 %v4212_v51  ;;  %v4713_v60 = vld [vmem:[%s12317_s22 + $0x2f0] sm:$0xff]  ;;  %v4648_v7 = vld [vmem:[%s12317_s22 + $0xe8] sm:$0xff] }
 0x7b3   : > { %4551 = vmatprep.subr.mxu0 %v4277_v11  ;;  %4482 = vmatprep.subr.mxu1 %v4211_v12  ;;  %v4712_v51 = vld [vmem:[%s12317_s22 + $0x2e8] sm:$0xff]  ;;  %v4647_v11 = vld [vmem:[%s12317_s22 + $0xe0] sm:$0xff] }
 0x7b4   : > { %4552 = vmatpush1.msra.mxu0 %v4276_v15  ;;  %4483 = vmatpush1.msra.mxu1 %v4210_v17  ;;  %v4711_v12 = vld [vmem:[%s12317_s22 + $0x2e0] sm:$0xff]  ;;  %v4710_v15 = vld [vmem:[%s12317_s22 + $0x2d8] sm:$0xff]  ;;  %v4645_v17 = vld [vmem:[%s12317_s22 + $0xd0] sm:$0xff] }
 0x7b5   : > { %4553 = vmatprep.subr.mxu0 %v4275_v62  ;;  %4484 = vmatprep.subr.mxu1 %v4209_v2  ;;  %v4709_v62 = vld [vmem:[%s12317_s22 + $0x2d0] sm:$0xff]  ;;  %v4644_v2 = vld [vmem:[%s12317_s22 + $0xc8] sm:$0xff] }
 0x7b6   : > { %4554 = vmatpush1.msra.mxu0 %v4274_v19  ;;  %4485 = vmatpush1.msra.mxu1 %v4208_v21  ;;  %v4708_v19 = vld [vmem:[%s12317_s22 + $0x2c8] sm:$0xff]  ;;  %v4643_v21 = vld [vmem:[%s12317_s22 + $0xc0] sm:$0xff] }
 0x7b7   : > { %4555 = vmatprep.subr.mxu0 %v4273_v24  ;;  %4486 = vmatprep.subr.mxu1 %v4207_v26  ;;  %v4707_v24 = vld [vmem:[%s12317_s22 + $0x2c0] sm:$0xff]  ;;  %v4642_v26 = vld [vmem:[%s12317_s22 + $0xb8] sm:$0xff] }
 0x7b8   : > { %4556 = vmatpush1.msra.mxu0 %v4272_v28  ;;  %4487 = vmatpush1.msra.mxu1 %v4206_v49  ;;  %v4706_v28 = vld [vmem:[%s12317_s22 + $0x2b8] sm:$0xff]  ;;  %v4641_v49 = vld [vmem:[%s12317_s22 + $0xb0] sm:$0xff] }
 0x7b9   : > { %4557 = vmatprep.subr.mxu0 %v4271_v54  ;;  %4488 = vmatprep.subr.mxu1 %v4269_v52  ;;  %v4705_v54 = vld [vmem:[%s12317_s22 + $0x2b0] sm:$0xff]  ;;  %v4640_v52 = vld [vmem:[%s12317_s22 + $0xa8] sm:$0xff] }
 0x7ba   : > { %4558 = vmatpush1.msra.mxu0 %v4270_v56  ;;  %4591 = vmatprep.mubr.f32.mxu0 %v9120_v1  ;;  %v4703_v56 = vld [vmem:[%s12317_s22 + $0x2a0] sm:$0xff] }
 0x7bb   : > { %4489 = vmatpush2.msra.mxu1 %v4268_v63  ;;  %4592 = vmatmul.mubr.f32.vlgmr.msra.gmra.mxu0 %v10787_v46  ;;  %v4638_v63 = vld [vmem:[%s12317_s22 + $0x98] sm:$0xff] }
 0x7bc   : > { %4490 = vmatprep.subr.mxu1 %v4267_v22  ;;  %4843 = vmatprep.subr.mxu0 %v4650_v10  ;;  %v4702_v22 = vld [vmem:[%s12317_s22 + $0x298] sm:$0xff]  ;;  %v4687_v10 = vld [vmem:[%s12317_s22 + $0x220] sm:$0xff] }
 0x7bd   : > { %4491 = vmatpush2.msra.mxu1 %v4266_v53  ;;  %4844 = vmatpush1.msra.mxu0 %v4649_v42  ;;  %v4637_v53 = vld [vmem:[%s12317_s22 + $0x90] sm:$0xff]  ;;  %v4686_v42 = vld [vmem:[%s12317_s22 + $0x218] sm:$0xff] }
 0x7be   : > { %4492 = vmatprep.subr.mxu1 %v4265_v4  ;;  %4845 = vmatprep.subr.mxu0 %v4648_v7  ;;  %v4701_v4 = vld [vmem:[%s12317_s22 + $0x290] sm:$0xff] }
 0x7bf   : > { %4493 = vmatpush2.msra.mxu1 %v4264_v45  ;;  %4846 = vmatpush1.msra.mxu0 %v4647_v11  ;;  %v4636_v45 = vld [vmem:[%s12317_s22 + $0x88] sm:$0xff]  ;;  %v4685_v7 = vld [vmem:[%s12317_s22 + $0x210] sm:$0xff] }
 0x7c0   : > { %4494 = vmatprep.subr.mxu1 %v4263_v3  ;;  %v4700_v3 = vld [vmem:[%s12317_s22 + $0x288] sm:$0xff] }
 0x7c1   : > { %4495 = vmatpush2.msra.mxu1 %v4262_v6  ;;  %v4635_v6 = vld [vmem:[%s12317_s22 + $0x80] sm:$0xff]  ;;  %v4684_v11 = vld [vmem:[%s12317_s22 + $0x208] sm:$0xff] }
 0x7c2   : > { %4496 = vmatprep.subr.mxu1 %v4261_v37  ;;  %v4699_v37 = vld [vmem:[%s12317_s22 + $0x280] sm:$0xff] }
 0x7c3   : > { %4497 = vmatpush2.msra.mxu1 %v4260_v9  ;;  %v4634_v9 = vld [vmem:[%s12317_s22 + $0x78] sm:$0xff] }
 0x7c4   : > { %4498 = vmatprep.subr.mxu1 %v4259_v39  ;;  %v4698_v39 = vld [vmem:[%s12317_s22 + $0x278] sm:$0xff] }
 0x7c5   : > { %4499 = vmatpush2.msra.mxu1 %v4258_v13  ;;  %v4633_v13 = vld [vmem:[%s12317_s22 + $0x70] sm:$0xff] }
 0x7c6   : > { %4500 = vmatprep.subr.mxu1 %v4257_v16  ;;  %v4697_v16 = vld [vmem:[%s12317_s22 + $0x270] sm:$0xff] }
 0x7c7   : > { %4501 = vmatpush2.msra.mxu1 %v4256_v18  ;;  %v4632_v18 = vld [vmem:[%s12317_s22 + $0x68] sm:$0xff] }
 0x7c8   : > { %4502 = vmatprep.subr.mxu1 %v4255_v20  ;;  %v4696_v20 = vld [vmem:[%s12317_s22 + $0x268] sm:$0xff] }
 0x7c9   : > { %4503 = vmatpush2.msra.mxu1 %v4254_v23  ;;  %v4631_v23 = vld [vmem:[%s12317_s22 + $0x60] sm:$0xff] }
 0x7ca   : > { %4504 = vmatprep.subr.mxu1 %v4253_v25  ;;  %v4695_v25 = vld [vmem:[%s12317_s22 + $0x260] sm:$0xff] }
 0x7cb   : > { %4505 = vmatpush2.msra.mxu1 %v4252_v30  ;;  %v4630_v30 = vld [vmem:[%s12317_s22 + $0x58] sm:$0xff] }
 0x7cc   : > { %4506 = vmatprep.subr.mxu1 %v4251_v31  ;;  %v4694_v31 = vld [vmem:[%s12317_s22 + $0x258] sm:$0xff] }
 0x7cd   : > { %4507 = vmatpush2.msra.mxu1 %v4250_v32  ;;  %v4629_v32 = vld [vmem:[%s12317_s22 + $0x50] sm:$0xff] }
 0x7ce   : > { %4508 = vmatprep.subr.mxu1 %v4249_v34  ;;  %v4693_v34 = vld [vmem:[%s12317_s22 + $0x250] sm:$0xff] }
 0x7cf   : > { %4509 = vmatpush2.msra.mxu1 %v4248_v35  ;;  %v4628_v35 = vld [vmem:[%s12317_s22 + $0x48] sm:$0xff] }
 0x7d0   : > { %4510 = vmatprep.subr.mxu1 %v4247_v36  ;;  %v4692_v36 = vld [vmem:[%s12317_s22 + $0x248] sm:$0xff] }
 0x7d1   : > { %4511 = vmatpush2.msra.mxu1 %v4246_v61  ;;  %v4627_v61 = vld [vmem:[%s12317_s22 + $0x40] sm:$0xff] }
 0x7d2   : > { %4512 = vmatprep.subr.mxu1 %v4245_v38  ;;  %v4691_v38 = vld [vmem:[%s12317_s22 + $0x240] sm:$0xff] }
 0x7d3   : > { %4513 = vmatpush2.msra.mxu1 %v4244_v44  ;;  %v4626_v44 = vld [vmem:[%s12317_s22 + $0x38] sm:$0xff] }
 0x7d4   : > { %4514 = vmatprep.subr.mxu1 %v4243_v47  ;;  %v4690_v47 = vld [vmem:[%s12317_s22 + $0x238] sm:$0xff] }
 0x7d5   : > { %4515 = vmatpush2.msra.mxu1 %v4242_v27  ;;  %v4625_v27 = vld [vmem:[%s12317_s22 + $0x30] sm:$0xff] }
 0x7d6   : > { %4516 = vmatprep.subr.mxu1 %v4241_v43  ;;  %v4689_v43 = vld [vmem:[%s12317_s22 + $0x230] sm:$0xff] }
 0x7d7   : > { %4517 = vmatpush2.msra.mxu1 %v4240_v41  ;;  %v4624_v41 = vld [vmem:[%s12317_s22 + $0x28] sm:$0xff] }
 0x7d8   : > { %4518 = vmatprep.subr.mxu1 %v4239_v14  ;;  %v4688_v14 = vld [vmem:[%s12317_s22 + $0x228] sm:$0xff] }
 0x7d9   : > { %4519 = vmatpush2.msra.mxu1 %v4238_v0  ;;  %v4623_v0 = vld [vmem:[%s12317_s22 + $0x20] sm:$0xff] }
 0x7da   : > { %4521 = vmatmul.mubr.f32.vlgmr.msra.gmra.mxu1 %v10722_v48  ;;  %4914 = vmatprep.subr.mxu1 %v4714_v5  ;;  %v4646_v48 = vld [vmem:[%s12317_s22 + $0xd8] sm:$0xff] }
 0x7db   : > { %4915 = vmatpush1.msra.mxu1 %v4713_v60  ;;  %4847 = vmatprep.subr.mxu0 %v4646_v48  ;;  %v4622_v5 = vld [vmem:[%s12317_s22 + $0x18] sm:$0xff]  ;;  %v4621_v60 = vld [vmem:[%s12317_s22 + $0x10] sm:$0xff]  ;;  %v4683_v48 = vld [vmem:[%s12317_s22 + $0x200] sm:$0xff] }
 0x7dc   : > { %4916 = vmatprep.subr.mxu1 %v4712_v51  ;;  %4848 = vmatpush1.msra.mxu0 %v4645_v17  ;;  %v4620_v51 = vld [vmem:[%s12317_s22 + $0x8] sm:$0xff]  ;;  %v4746_v17 = vld [vmem:[%s12317_s22 + $0x3f8] sm:$0xff] }
 0x7dd   : > { %4917 = vmatpush1.msra.mxu1 %v4711_v12  ;;  %4849 = vmatprep.subr.mxu0 %v4644_v2  ;;  %v4619_v12 = vld [vmem:[%s12317_s22] sm:$0xff]  ;;  %v4745_v2 = vld [vmem:[%s12317_s22 + $0x3f0] sm:$0xff] }
 0x7de   : > { %4918 = vmatprep.subr.mxu1 %v4710_v15  ;;  %4850 = vmatpush1.msra.mxu0 %v4643_v21  ;;  %v4682_v15 = vld [vmem:[%s12317_s22 + $0x1f8] sm:$0xff]  ;;  %v4744_v21 = vld [vmem:[%s12317_s22 + $0x3e8] sm:$0xff] }
 0x7df   : > { %4919 = vmatpush1.msra.mxu1 %v4709_v62  ;;  %4851 = vmatprep.subr.mxu0 %v4642_v26  ;;  %v4681_v62 = vld [vmem:[%s12317_s22 + $0x1f0] sm:$0xff]  ;;  %v4743_v26 = vld [vmem:[%s12317_s22 + $0x3e0] sm:$0xff] }
 0x7e0   : > { %4920 = vmatprep.subr.mxu1 %v4708_v19  ;;  %4852 = vmatpush1.msra.mxu0 %v4641_v49  ;;  %v4680_v19 = vld [vmem:[%s12317_s22 + $0x1e8] sm:$0xff]  ;;  %v4742_v49 = vld [vmem:[%s12317_s22 + $0x3d8] sm:$0xff] }
 0x7e1   : > { %4921 = vmatpush1.msra.mxu1 %v4707_v24  ;;  %4853 = vmatprep.subr.mxu0 %v4640_v52  ;;  %v4679_v24 = vld [vmem:[%s12317_s22 + $0x1e0] sm:$0xff]  ;;  %v4741_v52 = vld [vmem:[%s12317_s22 + $0x3d0] sm:$0xff] }
 0x7e2   : > { %4922 = vmatprep.subr.mxu1 %v4706_v28  ;;  %4854 = vmatpush1.msra.mxu0 %v4639_v58  ;;  %v4678_v28 = vld [vmem:[%s12317_s22 + $0x1d8] sm:$0xff]  ;;  %v4740_v58 = vld [vmem:[%s12317_s22 + $0x3c8] sm:$0xff] }
 0x7e3   : > { %4923 = vmatpush1.msra.mxu1 %v4705_v54  ;;  %4855 = vmatprep.subr.mxu0 %v4638_v63  ;;  %v4677_v54 = vld [vmem:[%s12317_s22 + $0x1d0] sm:$0xff]  ;;  %v4739_v63 = vld [vmem:[%s12317_s22 + $0x3c0] sm:$0xff] }
 0x7e4   : > { %4924 = vmatprep.subr.mxu1 %v4704_v55  ;;  %4856 = vmatpush1.msra.mxu0 %v4637_v53  ;;  %v4676_v55 = vld [vmem:[%s12317_s22 + $0x1c8] sm:$0xff]  ;;  %v4738_v53 = vld [vmem:[%s12317_s22 + $0x3b8] sm:$0xff] }
 0x7e5   : > { %4925 = vmatpush1.msra.mxu1 %v4703_v56  ;;  %4857 = vmatprep.subr.mxu0 %v4636_v45  ;;  %v4675_v56 = vld [vmem:[%s12317_s22 + $0x1c0] sm:$0xff]  ;;  %v4737_v45 = vld [vmem:[%s12317_s22 + $0x3b0] sm:$0xff] }
 0x7e6   : > { %4926 = vmatprep.subr.mxu1 %v4702_v22  ;;  %4858 = vmatpush1.msra.mxu0 %v4635_v6  ;;  %v4674_v22 = vld [vmem:[%s12317_s22 + $0x1b8] sm:$0xff]  ;;  %v4736_v6 = vld [vmem:[%s12317_s22 + $0x3a8] sm:$0xff] }
 0x7e7   : > { %4927 = vmatpush1.msra.mxu1 %v4701_v4  ;;  %4859 = vmatprep.subr.mxu0 %v4634_v9  ;;  %v4673_v4 = vld [vmem:[%s12317_s22 + $0x1b0] sm:$0xff]  ;;  %v4735_v9 = vld [vmem:[%s12317_s22 + $0x3a0] sm:$0xff] }
 0x7e8   : > { %4928 = vmatprep.subr.mxu1 %v4700_v3  ;;  %4860 = vmatpush1.msra.mxu0 %v4633_v13  ;;  %v4672_v3 = vld [vmem:[%s12317_s22 + $0x1a8] sm:$0xff]  ;;  %v4734_v13 = vld [vmem:[%s12317_s22 + $0x398] sm:$0xff] }
 0x7e9   : > { %4929 = vmatpush1.msra.mxu1 %v4699_v37  ;;  %4861 = vmatprep.subr.mxu0 %v4632_v18  ;;  %v4671_v37 = vld [vmem:[%s12317_s22 + $0x1a0] sm:$0xff]  ;;  %v4733_v18 = vld [vmem:[%s12317_s22 + $0x390] sm:$0xff] }
 0x7ea   : > { %4930 = vmatprep.subr.mxu1 %v4698_v39  ;;  %4862 = vmatpush1.msra.mxu0 %v4631_v23  ;;  %v4670_v39 = vld [vmem:[%s12317_s22 + $0x198] sm:$0xff]  ;;  %v4732_v23 = vld [vmem:[%s12317_s22 + $0x388] sm:$0xff] }
 0x7eb   : > { %4931 = vmatpush1.msra.mxu1 %v4697_v16  ;;  %4863 = vmatprep.subr.mxu0 %v4630_v30  ;;  %v4669_v16 = vld [vmem:[%s12317_s22 + $0x190] sm:$0xff]  ;;  %v4731_v30 = vld [vmem:[%s12317_s22 + $0x380] sm:$0xff] }
 0x7ec   : > { %4932 = vmatprep.subr.mxu1 %v4696_v20  ;;  %4864 = vmatpush1.msra.mxu0 %v4629_v32  ;;  %v4668_v20 = vld [vmem:[%s12317_s22 + $0x188] sm:$0xff]  ;;  %v4730_v32 = vld [vmem:[%s12317_s22 + $0x378] sm:$0xff] }
 0x7ed   : > { %4933 = vmatpush1.msra.mxu1 %v4695_v25  ;;  %4865 = vmatprep.subr.mxu0 %v4628_v35  ;;  %v4667_v25 = vld [vmem:[%s12317_s22 + $0x180] sm:$0xff]  ;;  %v4729_v35 = vld [vmem:[%s12317_s22 + $0x370] sm:$0xff] }
 0x7ee   : > { %4934 = vmatprep.subr.mxu1 %v4694_v31  ;;  %4866 = vmatpush1.msra.mxu0 %v4627_v61  ;;  %v4666_v31 = vld [vmem:[%s12317_s22 + $0x178] sm:$0xff]  ;;  %v4728_v61 = vld [vmem:[%s12317_s22 + $0x368] sm:$0xff] }
 0x7ef   : > { %4935 = vmatpush1.msra.mxu1 %v4693_v34  ;;  %4867 = vmatprep.subr.mxu0 %v4626_v44  ;;  %v4665_v34 = vld [vmem:[%s12317_s22 + $0x170] sm:$0xff]  ;;  %v4727_v44 = vld [vmem:[%s12317_s22 + $0x360] sm:$0xff] }
 0x7f0   : > { %4936 = vmatprep.subr.mxu1 %v4692_v36  ;;  %4868 = vmatpush1.msra.mxu0 %v4625_v27  ;;  %v4664_v36 = vld [vmem:[%s12317_s22 + $0x168] sm:$0xff]  ;;  %v4726_v27 = vld [vmem:[%s12317_s22 + $0x358] sm:$0xff] }
 0x7f1   : > { %4937 = vmatpush1.msra.mxu1 %v4691_v38  ;;  %4869 = vmatprep.subr.mxu0 %v4624_v41  ;;  %v4663_v38 = vld [vmem:[%s12317_s22 + $0x160] sm:$0xff]  ;;  %v4725_v41 = vld [vmem:[%s12317_s22 + $0x350] sm:$0xff] }
 0x7f2   : > { %4938 = vmatprep.subr.mxu1 %v4690_v47  ;;  %4870 = vmatpush1.msra.mxu0 %v4623_v0  ;;  %v4662_v47 = vld [vmem:[%s12317_s22 + $0x158] sm:$0xff]  ;;  %v4724_v0 = vld [vmem:[%s12317_s22 + $0x348] sm:$0xff] }
 0x7f3   : > { %4939 = vmatpush1.msra.mxu1 %v4689_v43  ;;  %4871 = vmatprep.subr.mxu0 %v4622_v5  ;;  %v4661_v43 = vld [vmem:[%s12317_s22 + $0x150] sm:$0xff]  ;;  %v4723_v5 = vld [vmem:[%s12317_s22 + $0x340] sm:$0xff] }
 0x7f4   : > { %4940 = vmatprep.subr.mxu1 %v4688_v14  ;;  %4872 = vmatpush1.msra.mxu0 %v4621_v60  ;;  %v4660_v14 = vld [vmem:[%s12317_s22 + $0x148] sm:$0xff]  ;;  %v4722_v60 = vld [vmem:[%s12317_s22 + $0x338] sm:$0xff] }
 0x7f5   : > { %4941 = vmatpush1.msra.mxu1 %v4687_v10  ;;  %4873 = vmatprep.subr.mxu0 %v4620_v51  ;;  %v4659_v10 = vld [vmem:[%s12317_s22 + $0x140] sm:$0xff]  ;;  %v4721_v51 = vld [vmem:[%s12317_s22 + $0x330] sm:$0xff] }
 0x7f6   : > { %4942 = vmatprep.subr.mxu1 %v4686_v42  ;;  %4874 = vmatpush1.msra.mxu0 %v4619_v12  ;;  %v4658_v42 = vld [vmem:[%s12317_s22 + $0x138] sm:$0xff]  ;;  %v4720_v12 = vld [vmem:[%s12317_s22 + $0x328] sm:$0xff] }
 0x7f7   : > { %4943 = vmatpush1.msra.mxu1 %v4685_v7  ;;  %4875 = vmatprep.subr.mxu0 %v4682_v15  ;;  %v4657_v7 = vld [vmem:[%s12317_s22 + $0x130] sm:$0xff]  ;;  %v4719_v15 = vld [vmem:[%s12317_s22 + $0x320] sm:$0xff] }
 0x7f8   : > { %4944 = vmatprep.subr.mxu1 %v4684_v11  ;;  %4876 = vmatpush2.msra.mxu0 %v4681_v62  ;;  %v4656_v11 = vld [vmem:[%s12317_s22 + $0x128] sm:$0xff]  ;;  %v4718_v62 = vld [vmem:[%s12317_s22 + $0x318] sm:$0xff] }
 0x7f9   : > { %4945 = vmatpush1.msra.mxu1 %v4683_v48  ;;  %4877 = vmatprep.subr.mxu0 %v4680_v19  ;;  %v4655_v48 = vld [vmem:[%s12317_s22 + $0x120] sm:$0xff]  ;;  %v4717_v19 = vld [vmem:[%s12317_s22 + $0x310] sm:$0xff] }
 0x7fa   : > { %4946 = vmatprep.subr.mxu1 %v4746_v17  ;;  %4878 = vmatpush2.msra.mxu0 %v4679_v24  ;;  %v4654_v17 = vld [vmem:[%s12317_s22 + $0x118] sm:$0xff]  ;;  %v4716_v24 = vld [vmem:[%s12317_s22 + $0x308] sm:$0xff] }
 0x7fb   : > { %4947 = vmatpush2.msra.mxu1 %v4745_v2  ;;  %4879 = vmatprep.subr.mxu0 %v4678_v28  ;;  %v4653_v2 = vld [vmem:[%s12317_s22 + $0x110] sm:$0xff]  ;;  %v4715_v28 = vld [vmem:[%s12317_s22 + $0x300] sm:$0xff] }
 0x7fc   : > { %4948 = vmatprep.subr.mxu1 %v4744_v21  ;;  %4880 = vmatpush2.msra.mxu0 %v4677_v54  ;;  %v4652_v21 = vld [vmem:[%s12317_s22 + $0x108] sm:$0xff]  ;;  %v4842_v54 = vld [vmem:[%s12317_s22 + $0x6f8] sm:$0xff] }
 0x7fd   : > { %4949 = vmatpush2.msra.mxu1 %v4743_v26  ;;  %4881 = vmatprep.subr.mxu0 %v4676_v55  ;;  %v4651_v26 = vld [vmem:[%s12317_s22 + $0x100] sm:$0xff] }
 0x7fe   : > { %4950 = vmatprep.subr.mxu1 %v4742_v49  ;;  %4882 = vmatpush2.msra.mxu0 %v4675_v56  ;;  %v4778_v49 = vld [vmem:[%s12317_s22 + $0x4f8] sm:$0xff]  ;;  %v4302_v55 = vld [vmem:[%s12318_s23] sm:$0x3]  ;;  %s12325_s23 = sld [smem:[#allocation16_spill]] }
 0x7ff   : > { %4951 = vmatpush2.msra.mxu1 %v4741_v52  ;;  %4883 = vmatprep.subr.mxu0 %v4674_v22 }
 0x800   : > { %4952 = vmatprep.subr.mxu1 %v4740_v58  ;;  %4884 = vmatpush2.msra.mxu0 %v4673_v4  ;;  %v4311_v58 = vrot.slane %v4302_v55, %v9408_v33 }
 0x801   : > { %4953 = vmatpush2.msra.mxu1 %v4739_v63  ;;  %4885 = vmatprep.subr.mxu0 %v4672_v3 }
 0x802   : > { %4954 = vmatprep.subr.mxu1 %v4738_v53  ;;  %4886 = vmatpush2.msra.mxu0 %v4671_v37 }
 0x803   : > { %4955 = vmatpush2.msra.mxu1 %v4737_v45  ;;  %4887 = vmatprep.subr.mxu0 %v4670_v39 }
 0x804   : > { %4956 = vmatprep.subr.mxu1 %v4736_v6  ;;  %4888 = vmatpush2.msra.mxu0 %v4669_v16 }
 0x805   : > { %4957 = vmatpush2.msra.mxu1 %v4735_v9  ;;  %4889 = vmatprep.subr.mxu0 %v4668_v20 }
 0x806   : > { %4958 = vmatprep.subr.mxu1 %v4734_v13  ;;  %4890 = vmatpush2.msra.mxu0 %v4667_v25  ;;  %v4307_v13 = vrot.slane %v4302_v55, %v9496_v57  ;;  %v4828_v55 = vld [vmem:[%s12317_s22 + $0x688] sm:$0xff] }
 0x807   : > { %4959 = vmatpush2.msra.mxu1 %v4733_v18  ;;  %4891 = vmatprep.subr.mxu0 %v4666_v31 }
 0x808   : > { %4960 = vmatprep.subr.mxu1 %v4732_v23  ;;  %4892 = vmatpush2.msra.mxu0 %v4665_v34 }
 0x809   : > { %4961 = vmatpush2.msra.mxu1 %v4731_v30  ;;  %4893 = vmatprep.subr.mxu0 %v4664_v36 }
 0x80a   : > { %4962 = vmatprep.subr.mxu1 %v4730_v32  ;;  %4894 = vmatpush2.msra.mxu0 %v4663_v38 }
 0x80b   : > { %4963 = vmatpush2.msra.mxu1 %v4729_v35  ;;  %4895 = vmatprep.subr.mxu0 %v4662_v47  ;;  %v4841_v47 = vld [vmem:[%s12317_s22 + $0x6f0] sm:$0xff] }
 0x80c   : > { %4964 = vmatprep.subr.mxu1 %v4728_v61  ;;  %4896 = vmatpush2.msra.mxu0 %v4661_v43 }
 0x80d   : > { %4965 = vmatpush2.msra.mxu1 %v4727_v44  ;;  %4897 = vmatprep.subr.mxu0 %v4660_v14  ;;  %v4777_v44 = vld [vmem:[%s12317_s22 + $0x4f0] sm:$0xff]  ;;  %v4775_v14 = vld [vmem:[%s12317_s22 + $0x4e0] sm:$0xff] }
 0x80e   : > { %4966 = vmatprep.subr.mxu1 %v4726_v27  ;;  %4898 = vmatpush2.msra.mxu0 %v4659_v10  ;;  %v4776_v27 = vld [vmem:[%s12317_s22 + $0x4e8] sm:$0xff]  ;;  %v4774_v10 = vld [vmem:[%s12317_s22 + $0x4d8] sm:$0xff] }
 0x80f   : > { %4967 = vmatpush2.msra.mxu1 %v4725_v41  ;;  %4899 = vmatprep.subr.mxu0 %v4658_v42  ;;  %v4840_v41 = vld [vmem:[%s12317_s22 + $0x6e8] sm:$0xff]  ;;  %v4773_v42 = vld [vmem:[%s12317_s22 + $0x4d0] sm:$0xff] }
 0x810   : > { %4968 = vmatprep.subr.mxu1 %v4724_v0  ;;  %4900 = vmatpush2.msra.mxu0 %v4657_v7  ;;  %v4839_v0 = vld [vmem:[%s12317_s22 + $0x6e0] sm:$0xff]  ;;  %v4772_v7 = vld [vmem:[%s12317_s22 + $0x4c8] sm:$0xff] }
 0x811   : > { %4969 = vmatpush2.msra.mxu1 %v4723_v5  ;;  %4901 = vmatprep.subr.mxu0 %v4656_v11  ;;  %v4838_v5 = vld [vmem:[%s12317_s22 + $0x6d8] sm:$0xff]  ;;  %v4771_v11 = vld [vmem:[%s12317_s22 + $0x4c0] sm:$0xff] }
 0x812   : > { %4970 = vmatprep.subr.mxu1 %v4722_v60  ;;  %4902 = vmatpush2.msra.mxu0 %v4655_v48  ;;  %v4837_v60 = vld [vmem:[%s12317_s22 + $0x6d0] sm:$0xff]  ;;  %v4770_v48 = vld [vmem:[%s12317_s22 + $0x4b8] sm:$0xff] }
 0x813   : > { %4971 = vmatpush2.msra.mxu1 %v4721_v51  ;;  %4903 = vmatprep.subr.mxu0 %v4654_v17  ;;  %v4836_v51 = vld [vmem:[%s12317_s22 + $0x6c8] sm:$0xff]  ;;  %v4769_v17 = vld [vmem:[%s12317_s22 + $0x4b0] sm:$0xff] }
 0x814   : > { %4972 = vmatprep.subr.mxu1 %v4720_v12  ;;  %4904 = vmatpush2.msra.mxu0 %v4653_v2  ;;  %v4835_v12 = vld [vmem:[%s12317_s22 + $0x6c0] sm:$0xff]  ;;  %v4768_v2 = vld [vmem:[%s12317_s22 + $0x4a8] sm:$0xff] }
 0x815   : > { %4973 = vmatpush2.msra.mxu1 %v4719_v15  ;;  %4905 = vmatprep.subr.mxu0 %v4652_v21  ;;  %v4834_v15 = vld [vmem:[%s12317_s22 + $0x6b8] sm:$0xff]  ;;  %v4767_v21 = vld [vmem:[%s12317_s22 + $0x4a0] sm:$0xff] }
 0x816   : > { %4974 = vmatprep.subr.mxu1 %v4718_v62  ;;  %4906 = vmatpush2.msra.mxu0 %v4651_v26  ;;  %v4833_v62 = vld [vmem:[%s12317_s22 + $0x6b0] sm:$0xff]  ;;  %v4766_v26 = vld [vmem:[%s12317_s22 + $0x498] sm:$0xff] }
 0x817   : > { %4975 = vmatpush2.msra.mxu1 %v4717_v19  ;;  %4985 = vmatprep.subr.mxu0 %v4778_v49  ;;  %v4832_v19 = vld [vmem:[%s12317_s22 + $0x6a8] sm:$0xff]  ;;  %v4765_v49 = vld [vmem:[%s12317_s22 + $0x490] sm:$0xff] }
 0x818   : > { %4976 = vmatprep.subr.mxu1 %v4716_v24  ;;  %v4831_v24 = vld [vmem:[%s12317_s22 + $0x6a0] sm:$0xff] }
 0x819   : > { %4977 = vmatpush2.msra.mxu1 %v4715_v28  ;;  %v4830_v28 = vld [vmem:[%s12317_s22 + $0x698] sm:$0xff] }
 0x81a   : > { %5056 = vmatprep.subr.mxu1 %v4842_v54  ;;  %v4829_v54 = vld [vmem:[%s12317_s22 + $0x690] sm:$0xff] }
 0x859   : > { %v4380_v52 = vpop.f32.mrf.mxu1 }
 0x85a   : > { %v4451_v56 = vpop.f32.mrf.mxu0  ;;  %v4381_v18 = vadd.f32 %v4380_v52, %v4307_v13  ;;  %v4764_v52 = vld [vmem:[%s12317_s22 + $0x488] sm:$0xff]  ;;  %v4757_v13 = vld [vmem:[%s12317_s22 + $0x450] sm:$0xff] }
 0x85b   : > { %v4382_v63 = vpop.f32.mrf.mxu1 }
 0x85c   : > { %v4383_v22 = vadd.f32 %v4382_v63, %v4311_v58  ;;  %v4453_v53 = vpop.f32.mrf.mxu0  ;;  %v4452_v20 = vadd.f32 %v4451_v56, %v4381_v18  ;;  %v4763_v58 = vld [vmem:[%s12317_s22 + $0x480] sm:$0xff]  ;;  %v4762_v63 = vld [vmem:[%s12317_s22 + $0x478] sm:$0xff]  ;;  %v4756_v18 = vld [vmem:[%s12317_s22 + $0x448] sm:$0xff] }
 0x85d   : > { %v4827_v56 = vld [vmem:[%s12317_s22 + $0x680] sm:$0xff] }
 0x85e   : > { %v4454_v3 = vadd.f32 %v4453_v53, %v4383_v22  ;;  %v4826_v22 = vld [vmem:[%s12317_s22 + $0x678] sm:$0xff]  ;;  %v4761_v53 = vld [vmem:[%s12317_s22 + $0x470] sm:$0xff] }
 0x87b   : > { %v4593_v4 = vpop.f32.mrf.mxu0 }
 0x87d   : > { %v4595_v9 = vpop.f32.mrf.mxu0 }
 0x89a   : > { %v4522_v45 = vpop.f32.mrf.mxu1 }
 0x89b   : > { %v4523_v23 = vadd.f32 %v4522_v45, %v4452_v20  ;;  %v4760_v45 = vld [vmem:[%s12317_s22 + $0x468] sm:$0xff] }
 0x89c   : > { %v4524_v6 = vpop.f32.mrf.mxu1  ;;  %v4820_v20 = vld [vmem:[%s12317_s22 + $0x648] sm:$0xff] }
 0x89d   : > { %v4525_v37 = vadd.f32 %v4524_v6, %v4454_v3  ;;  %v4594_v25 = vadd.f32 %v4593_v4, %v4523_v23  ;;  %v4825_v4 = vld [vmem:[%s12317_s22 + $0x670] sm:$0xff]  ;;  %v4824_v3 = vld [vmem:[%s12317_s22 + $0x668] sm:$0xff]  ;;  %v4759_v6 = vld [vmem:[%s12317_s22 + $0x460] sm:$0xff] }
 0x89e   : > { %v4755_v23 = vld [vmem:[%s12317_s22 + $0x440] sm:$0xff] }
 0x89f   : > { %v4596_v39 = vadd.f32 %v4595_v9, %v4525_v37  ;;  %v4823_v37 = vld [vmem:[%s12317_s22 + $0x660] sm:$0xff]  ;;  %v4758_v9 = vld [vmem:[%s12317_s22 + $0x458] sm:$0xff] }
 0x8a1   : > { %v7699_v16 = vmul.f32 -1.442695, %v4596_v39  ;;  %v4822_v39 = vld [vmem:[%s12317_s22 + $0x658] sm:$0xff] }
 0x8a3   : > { %8986 = vpow2.f32 %v7699_v16  ;;  %v4821_v16 = vld [vmem:[%s12317_s22 + $0x650] sm:$0xff] }
 0x8a4   : > { %8988 = vtanh.f32 %v4594_v25  ;;  %v4819_v25 = vld [vmem:[%s12317_s22 + $0x640] sm:$0xff] }
 0x8b0   : > { %v8987_v30 = vpop.eup %8986 }
 0x8b1   : > { %v4602_v31 = vadd.f32 1.0, %v8987_v30  ;;  %v8989_v32 = vpop.eup %8988  ;;  %v4754_v30 = vld [vmem:[%s12317_s22 + $0x438] sm:$0xff] }
 0x8b3   : > { %8990 = vrcp.f32 %v4602_v31  ;;  %v4818_v31 = vld [vmem:[%s12317_s22 + $0x638] sm:$0xff] }
 0x8c0   : > { %v8991_v34 = vpop.eup %8990 }
 0x8c1   : > { %v10953_v35 = vmul.f32 %v8991_v34, %v8989_v32  ;;  %v4753_v32 = vld [vmem:[%s12317_s22 + $0x430] sm:$0xff] }
 0x8c2   : > { %v4817_v34 = vld [vmem:[%s12317_s22 + $0x630] sm:$0xff] }
 0x8c3   : > { %v4607_v36 = vrot.slane %v10953_v35, 1  ;;  %v4611_v61 = vrot.slane %v10953_v35, 3  ;;  %v4609_v38 = vrot.slane %v10953_v35, 2  ;;  %v4615_v43 = vrot.slane %v10953_v35, 5 }
 0x8c5   : > { %4907 = vmatprep.mubr.f32.mxu0 %v4607_v36  ;;  %4978 = vmatprep.mubr.f32.mxu1 %v4611_v61  ;;  %v4752_v36 = vld [vmem:[%s12317_s22 + $0x428] sm:$0xff] }
 0x8c6   : > { %4908 = vmatmul.mubr.f32.vlgmr.msra.gmra.mxu0 %v10953_v35  ;;  %4979 = vmatmul.mubr.f32.vlgmr.msra.gmra.mxu1 %v4609_v38  ;;  %v4816_v61 = vld [vmem:[%s12317_s22 + $0x628] sm:$0xff]  ;;  %v4751_v38 = vld [vmem:[%s12317_s22 + $0x420] sm:$0xff] }
 0x8c7   : > { %4986 = vmatpush1.msra.mxu0 %v4777_v44  ;;  %5057 = vmatpush1.msra.mxu1 %v4841_v47  ;;  %v4815_v44 = vld [vmem:[%s12317_s22 + $0x620] sm:$0xff]  ;;  %v4750_v47 = vld [vmem:[%s12317_s22 + $0x418] sm:$0xff] }
 0x8c8   : > { %4987 = vmatprep.subr.mxu0 %v4776_v27  ;;  %5049 = vmatprep.mubr.f32.mxu0 %v4615_v43  ;;  %v4814_v27 = vld [vmem:[%s12317_s22 + $0x618] sm:$0xff]  ;;  %v4749_v43 = vld [vmem:[%s12317_s22 + $0x410] sm:$0xff] }
 0x8c9   : > { %5058 = vmatprep.subr.mxu1 %v4840_v41  ;;  %4988 = vmatpush1.msra.mxu0 %v4775_v14  ;;  %v4813_v41 = vld [vmem:[%s12317_s22 + $0x610] sm:$0xff]  ;;  %v4748_v14 = vld [vmem:[%s12317_s22 + $0x408] sm:$0xff] }
 0x8ca   : > { %5059 = vmatpush1.msra.mxu1 %v4839_v0  ;;  %4989 = vmatprep.subr.mxu0 %v4774_v10  ;;  %v4812_v0 = vld [vmem:[%s12317_s22 + $0x608] sm:$0xff]  ;;  %v4747_v10 = vld [vmem:[%s12317_s22 + $0x400] sm:$0xff] }
 0x8cb   : > { %5060 = vmatprep.subr.mxu1 %v4838_v5  ;;  %4990 = vmatpush1.msra.mxu0 %v4773_v42  ;;  %v4811_v5 = vld [vmem:[%s12317_s22 + $0x600] sm:$0xff]  ;;  %v4810_v42 = vld [vmem:[%s12317_s22 + $0x5f8] sm:$0xff] }
 0x8cc   : > { %5061 = vmatpush1.msra.mxu1 %v4837_v60  ;;  %4991 = vmatprep.subr.mxu0 %v4772_v7  ;;  %v4617_v60 = vrot.slane %v10953_v35, 6  ;;  %v4809_v7 = vld [vmem:[%s12317_s22 + $0x5f0] sm:$0xff] }
 0x8cd   : > { %5062 = vmatprep.subr.mxu1 %v4836_v51  ;;  %4992 = vmatpush1.msra.mxu0 %v4771_v11  ;;  %v4808_v51 = vld [vmem:[%s12317_s22 + $0x5e8] sm:$0xff]  ;;  %v4807_v11 = vld [vmem:[%s12317_s22 + $0x5e0] sm:$0xff] }
 0x8ce   : > { %5063 = vmatpush1.msra.mxu1 %v4835_v12  ;;  %4993 = vmatprep.subr.mxu0 %v4770_v48  ;;  %v4806_v12 = vld [vmem:[%s12317_s22 + $0x5d8] sm:$0xff] }
 0x8cf   : > { %5064 = vmatprep.subr.mxu1 %v4834_v15  ;;  %4994 = vmatpush1.msra.mxu0 %v4769_v17  ;;  %v11031_v48 = vld [vmem:[%s9160_s29 + $0x78] sm:$0xff]  ;;  %v4805_v15 = vld [vmem:[%s12317_s22 + $0x5d0] sm:$0xff]  ;;  %v4804_v17 = vld [vmem:[%s12317_s22 + $0x5c8] sm:$0xff] }
 0x8d0   : > { %5065 = vmatpush1.msra.mxu1 %v4833_v62  ;;  %4995 = vmatprep.subr.mxu0 %v4768_v2  ;;  %v11038_v62 = vld [vmem:[%s9160_s29 + $0x70] sm:$0xff]  ;;  %v4803_v2 = vld [vmem:[%s12317_s22 + $0x5c0] sm:$0xff] }
 0x8d1   : > { %5066 = vmatprep.subr.mxu1 %v4832_v19  ;;  %4996 = vmatpush1.msra.mxu0 %v4767_v21  ;;  %v4802_v19 = vld [vmem:[%s12317_s22 + $0x5b8] sm:$0xff]  ;;  %v11045_v21 = vld [vmem:[%s9160_s29 + $0x68] sm:$0xff] }
 0x8d2   : > { %5067 = vmatpush1.msra.mxu1 %v4831_v24  ;;  %4997 = vmatprep.subr.mxu0 %v4766_v26  ;;  %v4801_v24 = vld [vmem:[%s12317_s22 + $0x5b0] sm:$0xff]  ;;  %v4800_v26 = vld [vmem:[%s12317_s22 + $0x5a8] sm:$0xff] }
 0x8d3   : > { %5068 = vmatprep.subr.mxu1 %v4830_v28  ;;  %4998 = vmatpush1.msra.mxu0 %v4765_v49  ;;  %v11052_v28 = vld [vmem:[%s9160_s29 + $0x60] sm:$0xff] }
 0x8d4   : > { %5069 = vmatpush1.msra.mxu1 %v4829_v54  ;;  %4999 = vmatprep.subr.mxu0 %v4764_v52  ;;  %v4799_v49 = vld [vmem:[%s12317_s22 + $0x5a0] sm:$0xff]  ;;  %v4798_v54 = vld [vmem:[%s12317_s22 + $0x598] sm:$0xff] }
 0x8d5   : > { %5070 = vmatprep.subr.mxu1 %v4828_v55  ;;  %5000 = vmatpush1.msra.mxu0 %v4763_v58  ;;  %v11059_v52 = vld [vmem:[%s9160_s29 + $0x58] sm:$0xff]  ;;  %v4797_v55 = vld [vmem:[%s12317_s22 + $0x590] sm:$0xff]  ;;  %v4796_v58 = vld [vmem:[%s12317_s22 + $0x588] sm:$0xff] }
 0x8d6   : > { %5071 = vmatpush1.msra.mxu1 %v4827_v56  ;;  %5001 = vmatprep.subr.mxu0 %v4762_v63  ;;  %v11066_v56 = vld [vmem:[%s9160_s29 + $0x50] sm:$0xff]  ;;  %v4795_v63 = vld [vmem:[%s12317_s22 + $0x580] sm:$0xff] }
 0x8d7   : > { %5072 = vmatprep.subr.mxu1 %v4826_v22  ;;  %5002 = vmatpush1.msra.mxu0 %v4761_v53  ;;  %v4794_v22 = vld [vmem:[%s12317_s22 + $0x578] sm:$0xff]  ;;  %v11073_v53 = vld [vmem:[%s9160_s29 + $0x48] sm:$0xff] }
 0x8d8   : > { %5073 = vmatpush1.msra.mxu1 %v4825_v4  ;;  %5003 = vmatprep.subr.mxu0 %v4760_v45  ;;  %v4793_v4 = vld [vmem:[%s12317_s22 + $0x570] sm:$0xff]  ;;  %v4792_v45 = vld [vmem:[%s12317_s22 + $0x568] sm:$0xff] }
 0x8d9   : > { %5074 = vmatprep.subr.mxu1 %v4824_v3  ;;  %5004 = vmatpush1.msra.mxu0 %v4759_v6  ;;  %v11080_v3 = vld [vmem:[%s9160_s29 + $0x40] sm:$0xff] }
 0x8da   : > { %5075 = vmatpush1.msra.mxu1 %v4823_v37  ;;  %5005 = vmatprep.subr.mxu0 %v4758_v9  ;;  %v4791_v6 = vld [vmem:[%s12317_s22 + $0x560] sm:$0xff]  ;;  %v4790_v37 = vld [vmem:[%s12317_s22 + $0x558] sm:$0xff] }
 0x8db   : > { %5076 = vmatprep.subr.mxu1 %v4822_v39  ;;  %5006 = vmatpush1.msra.mxu0 %v4757_v13  ;;  %v11087_v9 = vld [vmem:[%s9160_s29 + $0x38] sm:$0xff]  ;;  %v4789_v39 = vld [vmem:[%s12317_s22 + $0x550] sm:$0xff]  ;;  %v4788_v13 = vld [vmem:[%s12317_s22 + $0x548] sm:$0xff] }
 0x8dc   : > { %5077 = vmatpush1.msra.mxu1 %v4821_v16  ;;  %5007 = vmatprep.subr.mxu0 %v4756_v18  ;;  %v11094_v16 = vld [vmem:[%s9160_s29 + $0x30] sm:$0xff]  ;;  %v4787_v18 = vld [vmem:[%s12317_s22 + $0x540] sm:$0xff] }
 0x8dd   : > { %5078 = vmatprep.subr.mxu1 %v4820_v20  ;;  %5008 = vmatpush1.msra.mxu0 %v4755_v23  ;;  %v4786_v20 = vld [vmem:[%s12317_s22 + $0x538] sm:$0xff]  ;;  %v9012_v23 = vld [vmem:[%s9160_s29 + $0x28] sm:$0xff] }
 0x8de   : > { %5079 = vmatpush1.msra.mxu1 %v4819_v25  ;;  %5009 = vmatprep.subr.mxu0 %v4754_v30  ;;  %v4785_v25 = vld [vmem:[%s12317_s22 + $0x530] sm:$0xff]  ;;  %v4784_v30 = vld [vmem:[%s12317_s22 + $0x528] sm:$0xff] }
 0x8df   : > { %5080 = vmatprep.subr.mxu1 %v4818_v31  ;;  %5010 = vmatpush1.msra.mxu0 %v4753_v32  ;;  %v9013_v31 = vld [vmem:[%s9160_s29 + $0x20] sm:$0xff] }
 0x8e0   : > { %5081 = vmatpush1.msra.mxu1 %v4817_v34  ;;  %5011 = vmatprep.subr.mxu0 %v4752_v36  ;;  %v4783_v32 = vld [vmem:[%s12317_s22 + $0x520] sm:$0xff]  ;;  %v4782_v34 = vld [vmem:[%s12317_s22 + $0x518] sm:$0xff] }
 0x8e1   : > { %5082 = vmatprep.subr.mxu1 %v4816_v61  ;;  %5012 = vmatpush1.msra.mxu0 %v4751_v38  ;;  %v9014_v36 = vld [vmem:[%s9160_s29 + $0x18] sm:$0xff]  ;;  %v4781_v61 = vld [vmem:[%s12317_s22 + $0x510] sm:$0xff]  ;;  %v4780_v38 = vld [vmem:[%s12317_s22 + $0x508] sm:$0xff] }
 0x8e2   : > { %5083 = vmatpush1.msra.mxu1 %v4815_v44  ;;  %5013 = vmatprep.subr.mxu0 %v4750_v47  ;;  %v9015_v44 = vld [vmem:[%s9160_s29 + $0x10] sm:$0xff]  ;;  %v4779_v47 = vld [vmem:[%s12317_s22 + $0x500] sm:$0xff] }
 0x8e3   : > { %5084 = vmatprep.subr.mxu1 %v4814_v27  ;;  %5014 = vmatpush1.msra.mxu0 %v4749_v43  ;;  %v9016_v27 = vld [vmem:[%s9160_s29 + $0x8] sm:$0xff]  ;;  %v4613_v43 = vrot.slane %v10953_v35, 4 }
 0x8e4   : > { %5085 = vmatpush1.msra.mxu1 %v4813_v41  ;;  %5015 = vmatprep.subr.mxu0 %v4748_v14  ;;  %v9017_v41 = vld [vmem:[%s9160_s29] sm:$0xff]  ;;  %v5319_v14 = vld [vmem:[%s12319_s26 + $0xf8] sm:$0xff] }
 0x8e5   : > { %5086 = vmatprep.subr.mxu1 %v4812_v0  ;;  %5016 = vmatpush1.msra.mxu0 %v4747_v10  ;;  %v5303_v0 = vld [vmem:[%s12319_s26 + $0x78] sm:$0xff]  ;;  %v5318_v10 = vld [vmem:[%s12319_s26 + $0xf0] sm:$0xff] }
 0x8e6   : > { %5087 = vmatpush1.msra.mxu1 %v4811_v5  ;;  %5120 = vmatprep.mubr.f32.mxu1 %v9120_v1  ;;  %v5302_v5 = vld [vmem:[%s12319_s26 + $0x70] sm:$0xff] }
 0x8e7   : > { %5017 = vmatprep.subr.mxu0 %v4810_v42  ;;  %5121 = vmatmul.mubr.f32.vlgmr.msra.gmra.mxu1 %v4617_v60  ;;  %v5317_v42 = vld [vmem:[%s12319_s26 + $0xe8] sm:$0xff] }
 0x8e8   : > { %8496 = vmatprep.subr.mxu1 %v9120_v1  ;;  %5018 = vmatpush2.msra.mxu0 %v4809_v7  ;;  %v5301_v60 = vld [vmem:[%s12319_s26 + $0x68] sm:$0xff]  ;;  %v5316_v7 = vld [vmem:[%s12319_s26 + $0xe0] sm:$0xff] }
 0x8e9   : > { %8497 = vmatpush3.msra.mxu1 %v11031_v48  ;;  %5019 = vmatprep.subr.mxu0 %v4808_v51  ;;  %v5300_v51 = vld [vmem:[%s12319_s26 + $0x60] sm:$0xff] }
 0x8ea   : > { %8498 = vmatprep.subr.mxu1 %v9120_v1  ;;  %5020 = vmatpush2.msra.mxu0 %v4807_v11  ;;  %v5315_v11 = vld [vmem:[%s12319_s26 + $0xd8] sm:$0xff] }
 0x8eb   : > { %8499 = vmatpush3.msra.mxu1 %v11038_v62  ;;  %5021 = vmatprep.subr.mxu0 %v4806_v12  ;;  %v5299_v12 = vld [vmem:[%s12319_s26 + $0x58] sm:$0xff] }
 0x8ec   : > { %8500 = vmatprep.subr.mxu1 %v9120_v1  ;;  %5022 = vmatpush2.msra.mxu0 %v4805_v15  ;;  %v5298_v15 = vld [vmem:[%s12319_s26 + $0x50] sm:$0xff] }
 0x8ed   : > { %8501 = vmatpush3.msra.mxu1 %v11045_v21  ;;  %5023 = vmatprep.subr.mxu0 %v4804_v17  ;;  %v5313_v17 = vld [vmem:[%s12319_s26 + $0xc8] sm:$0xff] }
 0x8ee   : > { %8502 = vmatprep.subr.mxu1 %v9120_v1  ;;  %5024 = vmatpush2.msra.mxu0 %v4803_v2  ;;  %v5312_v2 = vld [vmem:[%s12319_s26 + $0xc0] sm:$0xff] }
 0x8ef   : > { %8503 = vmatpush3.msra.mxu1 %v11052_v28  ;;  %5025 = vmatprep.subr.mxu0 %v4802_v19  ;;  %v5296_v19 = vld [vmem:[%s12319_s26 + $0x40] sm:$0xff] }
 0x8f0   : > { %8504 = vmatprep.subr.mxu1 %v9120_v1  ;;  %5026 = vmatpush2.msra.mxu0 %v4801_v24  ;;  %v5295_v24 = vld [vmem:[%s12319_s26 + $0x38] sm:$0xff] }
 0x8f1   : > { %8505 = vmatpush3.msra.mxu1 %v11059_v52  ;;  %5027 = vmatprep.subr.mxu0 %v4800_v26  ;;  %v5310_v26 = vld [vmem:[%s12319_s26 + $0xb0] sm:$0xff] }
 0x8f2   : > { %8506 = vmatprep.subr.mxu1 %v9120_v1  ;;  %5028 = vmatpush2.msra.mxu0 %v4799_v49  ;;  %v5309_v49 = vld [vmem:[%s12319_s26 + $0xa8] sm:$0xff] }
 0x8f3   : > { %8507 = vmatpush3.msra.mxu1 %v11066_v56  ;;  %5029 = vmatprep.subr.mxu0 %v4798_v54  ;;  %v5293_v54 = vld [vmem:[%s12319_s26 + $0x28] sm:$0xff] }
 0x8f4   : > { %8508 = vmatprep.subr.mxu1 %v9120_v1  ;;  %5030 = vmatpush2.msra.mxu0 %v4797_v55  ;;  %v5292_v55 = vld [vmem:[%s12319_s26 + $0x20] sm:$0xff] }
 0x8f5   : > { %8509 = vmatpush3.msra.mxu1 %v11073_v53  ;;  %5031 = vmatprep.subr.mxu0 %v4796_v58  ;;  %v5307_v58 = vld [vmem:[%s12319_s26 + $0x98] sm:$0xff] }
 0x8f6   : > { %8510 = vmatprep.subr.mxu1 %v9120_v1  ;;  %5032 = vmatpush2.msra.mxu0 %v4795_v63  ;;  %v5306_v63 = vld [vmem:[%s12319_s26 + $0x90] sm:$0xff] }
 0x8f7   : > { %8511 = vmatpush3.msra.mxu1 %v11080_v3  ;;  %5033 = vmatprep.subr.mxu0 %v4794_v22  ;;  %v5290_v22 = vld [vmem:[%s12319_s26 + $0x10] sm:$0xff] }
 0x8f8   : > { %8512 = vmatprep.subr.mxu1 %v9120_v1  ;;  %5034 = vmatpush2.msra.mxu0 %v4793_v4  ;;  %v5289_v4 = vld [vmem:[%s12319_s26 + $0x8] sm:$0xff] }
 0x8f9   : > { %8513 = vmatpush3.msra.mxu1 %v11087_v9  ;;  %5035 = vmatprep.subr.mxu0 %v4792_v45  ;;  %v5304_v45 = vld [vmem:[%s12319_s26 + $0x80] sm:$0xff] }
 0x8fa   : > { %8514 = vmatprep.subr.mxu1 %v9120_v1  ;;  %5036 = vmatpush2.msra.mxu0 %v4791_v6 }
 0x8fb   : > { %8515 = vmatpush3.msra.mxu1 %v11094_v16  ;;  %5037 = vmatprep.subr.mxu0 %v4790_v37 }
 0x8fc   : > { %8516 = vmatprep.subr.mxu1 %v9120_v1  ;;  %5038 = vmatpush2.msra.mxu0 %v4789_v39 }
 0x8fd   : > { %8517 = vmatpush3.msra.mxu1 %v9012_v23  ;;  %5039 = vmatprep.subr.mxu0 %v4788_v13 }
 0x8fe   : > { %8518 = vmatprep.subr.mxu1 %v9120_v1  ;;  %5040 = vmatpush2.msra.mxu0 %v4787_v18  ;;  %v9018_v18 = vld [vmem:[%s9155_s25] sm:$0x3] }
 0x8ff   : > { %8519 = vmatpush3.msra.mxu1 %v9013_v31  ;;  %5041 = vmatprep.subr.mxu0 %v4786_v20  ;;  %v1571_v20 = vrot.slane %v9018_v18, %v9408_v33  ;;  %v5642_v18 = vld [vmem:[%s12321_s2 + $0x78] sm:$0xff] }
 0x900   : > { %8520 = vmatprep.subr.mxu1 %v9120_v1  ;;  %5042 = vmatpush2.msra.mxu0 %v4785_v25 }
 0x901   : > { %8521 = vmatpush3.msra.mxu1 %v9014_v36  ;;  %5043 = vmatprep.subr.mxu0 %v4784_v30  ;;  %v1646_v25 = vadd.f32 %v9890_v40, %v1571_v20  ;;  %v3263_v30 = vld [vmem:[%s12320_s0] sm:$0x3]  ;;  %v5657_v20 = vld [vmem:[%s12321_s2 + $0xf0] sm:$0xff]  ;;  %s12326_s0 = sld [smem:[#allocation17_spill]] }
 0x902   : > { %8522 = vmatprep.subr.mxu1 %v9120_v1  ;;  %5044 = vmatpush2.msra.mxu0 %v4783_v32 }
 0x903   : > { %8523 = vmatpush3.msra.mxu1 %v9015_v44  ;;  %5045 = vmatprep.subr.mxu0 %v4782_v34  ;;  %v1717_v34 = vadd.f32 %v9892_v8, %v1646_v25  ;;  %v5656_v25 = vld [vmem:[%s12321_s2 + $0xe8] sm:$0xff] }
 0x904   : > { %8524 = vmatprep.subr.mxu1 %v9120_v1  ;;  %5046 = vmatpush2.msra.mxu0 %v4781_v61  ;;  %v3272_v61 = vrot.slane %v3263_v30, %v9408_v33 }
 0x905   : > { %8525 = vmatpush3.msra.mxu1 %v9016_v27  ;;  %5047 = vmatprep.subr.mxu0 %v4780_v38 }
 0x906   : > { %8526 = vmatprep.subr.mxu1 %v9120_v1  ;;  %5048 = vmatpush2.msra.mxu0 %v4779_v47 }
 0x907   : > { %8527 = vmatpush3.msra.mxu1 %v9017_v41  ;;  %8528 = vmatprep.mubr.msk.f32.mxu1 %vm9121_vm0, %v9120_v1 }
 0x908   : > { %5050 = vmatmul.mubr.f32.vlgmr.msra.gmra.mxu0 %v4613_v43  ;;  %8529 = vmatmul.mubr.f32.vlgmr.msra.gmra.mxu1 %v10953_v35  ;;  %v11194_v43 = vmul.f32 0.05, %v10953_v35 }
 0x909   : > { %8531 = vmatprep.subr.mxu0 %v9120_v1  ;;  %8563 = vmatprep.mubr.msk.f32.mxu0 %vm9121_vm0, %v9120_v1 }
 0x90a   : > { %8532 = vmatpush3.msra.mxu0 %v11031_v48  ;;  %7928 = vmatprep.subr.mxu1 %v5319_v14  ;;  %v5314_v48 = vld [vmem:[%s12319_s26 + $0xd0] sm:$0xff] }
 0x90b   : > { %8533 = vmatprep.subr.mxu0 %v9120_v1  ;;  %7929 = vmatpush3.msra.mxu1 %v5303_v0 }
 0x90c   : > { %8534 = vmatpush3.msra.mxu0 %v11038_v62  ;;  %7930 = vmatprep.subr.mxu1 %v5318_v10  ;;  %v5297_v62 = vld [vmem:[%s12319_s26 + $0x48] sm:$0xff]  ;;  %v5335_v10 = vld [vmem:[%s12319_s26 + $0x178] sm:$0xff] }
 0x90d   : > { %8535 = vmatprep.subr.mxu0 %v9120_v1  ;;  %7931 = vmatpush3.msra.mxu1 %v5302_v5 }
 0x90e   : > { %8536 = vmatpush3.msra.mxu0 %v11045_v21  ;;  %7932 = vmatprep.subr.mxu1 %v5317_v42  ;;  %v5311_v21 = vld [vmem:[%s12319_s26 + $0xb8] sm:$0xff] }
 0x90f   : > { %8537 = vmatprep.subr.mxu0 %v9120_v1  ;;  %7933 = vmatpush3.msra.mxu1 %v5301_v60 }
 0x910   : > { %8538 = vmatpush3.msra.mxu0 %v11052_v28  ;;  %7934 = vmatprep.subr.mxu1 %v5316_v7  ;;  %v5294_v28 = vld [vmem:[%s12319_s26 + $0x30] sm:$0xff] }
 0x911   : > { %8539 = vmatprep.subr.mxu0 %v9120_v1  ;;  %7935 = vmatpush3.msra.mxu1 %v5300_v51  ;;  %v5334_v7 = vld [vmem:[%s12319_s26 + $0x170] sm:$0xff] }
 0x912   : > { %8540 = vmatpush3.msra.mxu0 %v11059_v52  ;;  %7936 = vmatprep.subr.mxu1 %v5315_v11  ;;  %v5308_v52 = vld [vmem:[%s12319_s26 + $0xa0] sm:$0xff]  ;;  %v5333_v11 = vld [vmem:[%s12319_s26 + $0x168] sm:$0xff] }
 0x913   : > { %8541 = vmatprep.subr.mxu0 %v9120_v1  ;;  %7937 = vmatpush3.msra.mxu1 %v5299_v12  ;;  %v11215_v12 = vld [vmem:[%s12311_s3 + $0x70] sm:$0xff] }
 0x914   : > { %8542 = vmatpush3.msra.mxu0 %v11066_v56  ;;  %7938 = vmatprep.subr.mxu1 %v5314_v48  ;;  %v5291_v56 = vld [vmem:[%s12319_s26 + $0x18] sm:$0xff]  ;;  %v5332_v48 = vld [vmem:[%s12319_s26 + $0x160] sm:$0xff] }
 0x915   : > { %8543 = vmatprep.subr.mxu0 %v9120_v1  ;;  %7939 = vmatpush3.msra.mxu1 %v5298_v15  ;;  %v11222_v15 = vld [vmem:[%s12311_s3 + $0x68] sm:$0xff] }
 0x916   : > { %8544 = vmatpush3.msra.mxu0 %v11073_v53  ;;  %7940 = vmatprep.subr.mxu1 %v5313_v17  ;;  %v5305_v53 = vld [vmem:[%s12319_s26 + $0x88] sm:$0xff]  ;;  %v5331_v17 = vld [vmem:[%s12319_s26 + $0x158] sm:$0xff] }
 0x917   : > { %8545 = vmatprep.subr.mxu0 %v9120_v1  ;;  %7941 = vmatpush3.msra.mxu1 %v5297_v62  ;;  %v11229_v62 = vld [vmem:[%s12311_s3 + $0x60] sm:$0xff] }
 0x918   : > { %8546 = vmatpush3.msra.mxu0 %v11080_v3  ;;  %7942 = vmatprep.subr.mxu1 %v5312_v2  ;;  %v5288_v3 = vld [vmem:[%s12319_s26] sm:$0xff]  ;;  %v5330_v2 = vld [vmem:[%s12319_s26 + $0x150] sm:$0xff] }
 0x919   : > { %8547 = vmatprep.subr.mxu0 %v9120_v1  ;;  %7943 = vmatpush3.msra.mxu1 %v5296_v19  ;;  %v11236_v19 = vld [vmem:[%s12311_s3 + $0x58] sm:$0xff] }
 0x91a   : > { %8548 = vmatpush3.msra.mxu0 %v11087_v9  ;;  %7944 = vmatprep.subr.mxu1 %v5311_v21  ;;  %v5329_v21 = vld [vmem:[%s12319_s26 + $0x148] sm:$0xff] }
 0x91b   : > { %8549 = vmatprep.subr.mxu0 %v9120_v1  ;;  %7945 = vmatpush3.msra.mxu1 %v5295_v24  ;;  %v11243_v24 = vld [vmem:[%s12311_s3 + $0x50] sm:$0xff] }
 0x91c   : > { %8550 = vmatpush3.msra.mxu0 %v11094_v16  ;;  %7946 = vmatprep.subr.mxu1 %v5310_v26  ;;  %v5328_v26 = vld [vmem:[%s12319_s26 + $0x140] sm:$0xff] }
 0x91d   : > { %8551 = vmatprep.subr.mxu0 %v9120_v1  ;;  %7947 = vmatpush3.msra.mxu1 %v5294_v28  ;;  %v11250_v28 = vld [vmem:[%s12311_s3 + $0x48] sm:$0xff] }
 0x91e   : > { %8552 = vmatpush3.msra.mxu0 %v9012_v23  ;;  %7948 = vmatprep.subr.mxu1 %v5309_v49  ;;  %v5327_v49 = vld [vmem:[%s12319_s26 + $0x138] sm:$0xff] }
 0x91f   : > { %8553 = vmatprep.subr.mxu0 %v9120_v1  ;;  %7949 = vmatpush3.msra.mxu1 %v5293_v54  ;;  %v11257_v54 = vld [vmem:[%s12311_s3 + $0x40] sm:$0xff] }
 0x920   : > { %8554 = vmatpush3.msra.mxu0 %v9013_v31  ;;  %7950 = vmatprep.subr.mxu1 %v5308_v52  ;;  %v3259_v31 = vadd.f32 %v10475_v29, %v10334_v50  ;;  %v5326_v52 = vld [vmem:[%s12319_s26 + $0x130] sm:$0xff] }
 0x921   : > { %8555 = vmatprep.subr.mxu0 %v9120_v1  ;;  %7951 = vmatpush3.msra.mxu1 %v5292_v55  ;;  %v11264_v55 = vld [vmem:[%s12311_s3 + $0x38] sm:$0xff] }
 0x922   : > { %8556 = vmatpush3.msra.mxu0 %v9014_v36  ;;  %7952 = vmatprep.subr.mxu1 %v5307_v58  ;;  %v3268_v36 = vrot.slane %v3263_v30, %v9496_v57  ;;  %v3262_v47 = vadd.f32 %v3259_v31, %v1717_v34  ;;  %v5325_v58 = vld [vmem:[%s12319_s26 + $0x128] sm:$0xff]  ;;  %v5655_v31 = vld [vmem:[%s12321_s2 + $0xe0] sm:$0xff]  ;;  %v5654_v34 = vld [vmem:[%s12321_s2 + $0xd8] sm:$0xff] }
 0x923   : > { %8557 = vmatprep.subr.mxu0 %v9120_v1  ;;  %7953 = vmatpush3.msra.mxu1 %v5291_v56  ;;  %v11271_v56 = vld [vmem:[%s12311_s3 + $0x30] sm:$0xff]  ;;  %v5640_v30 = vld [vmem:[%s12321_s2 + $0x68] sm:$0xff] }
 0x924   : > { %8558 = vmatpush3.msra.mxu0 %v9015_v44  ;;  %7954 = vmatprep.subr.mxu1 %v5306_v63  ;;  %v3275_v29 = vadd.f32 %v3268_v36, %v10337_v59  ;;  %v3276_v5 = vadd.f32 %v3272_v61, %v3262_v47  ;;  %v11204_v59 = vld [vmem:[%s12311_s3 + $0x78] sm:$0xff]  ;;  %v5324_v63 = vld [vmem:[%s12319_s26 + $0x120] sm:$0xff]  ;;  %v5653_v61 = vld [vmem:[%s12321_s2 + $0xd0] sm:$0xff] }
 0x925   : > { %8559 = vmatprep.subr.mxu0 %v9120_v1  ;;  %7955 = vmatpush3.msra.mxu1 %v5290_v22  ;;  %v11278_v22 = vld [vmem:[%s12311_s3 + $0x28] sm:$0xff]  ;;  %v5638_v36 = vld [vmem:[%s12321_s2 + $0x58] sm:$0xff] }
 0x926   : > { %8560 = vmatpush3.msra.mxu0 %v9016_v27  ;;  %7956 = vmatprep.subr.mxu1 %v5305_v53  ;;  %v5323_v53 = vld [vmem:[%s12319_s26 + $0x118] sm:$0xff]  ;;  %v5636_v47 = vld [vmem:[%s12321_s2 + $0x48] sm:$0xff] }
 0x927   : > { %8561 = vmatprep.subr.mxu0 %v9120_v1  ;;  %7957 = vmatpush3.msra.mxu1 %v5289_v4  ;;  %v11285_v4 = vld [vmem:[%s12311_s3 + $0x20] sm:$0xff] }
 0x928   : > { %8562 = vmatpush3.msra.mxu0 %v9017_v41  ;;  %7958 = vmatprep.subr.mxu1 %v5304_v45  ;;  %v11291_v45 = vld [vmem:[%s12311_s3 + $0x18] sm:$0xff] }
 0x929   : > { %8566 = vmatprep.subr.mxu0 %v9120_v1  ;;  %7959 = vmatpush3.msra.mxu1 %v5288_v3  ;;  %v11297_v3 = vld [vmem:[%s12311_s3 + $0x10] sm:$0xff] }
 0x92a   : > { %8601 = vmatprep.subr.mxu1 %v9120_v1 }
 0x986   : > { %v4909_v6 = vpop.f32.mrf.mxu0  ;;  %v4980_v37 = vpop.f32.mrf.mxu1 }
 0x987   : > { %v4981_v9 = vadd.f32 %v4980_v37, %v4909_v6  ;;  %v11304_v6 = vld [vmem:[%s12311_s3 + $0x8] sm:$0xff]  ;;  %v11309_v37 = vld [vmem:[%s12311_s3] sm:$0xff] }
 0x988   : > { %v4911_v39 = vpop.f32.mrf.mxu0  ;;  %v4982_v13 = vpop.f32.mrf.mxu1 }
 0x989   : > { %v4983_v16 = vadd.f32 %v4982_v13, %v4911_v39  ;;  %v5321_v39 = vld [vmem:[%s12319_s26 + $0x108] sm:$0xff]  ;;  %v5320_v13 = vld [vmem:[%s12319_s26 + $0x100] sm:$0xff] }
 0x9a7   : > { %v5122_v23 = vpop.f32.mrf.mxu1 }
 0x9a9   : > { %v5124_v32 = vpop.f32.mrf.mxu1 }
 0x9c8   : > { %v5051_v38 = vpop.f32.mrf.mxu0  ;;  %v5210_v44 = vpop.f32.mrf.mxu1 }
 0x9c9   : > { %v5052_v27 = vadd.f32 %v5051_v38, %v4981_v9  ;;  %v5214_v40 = vmul.f32 0.95, %v5210_v44  ;;  %v5322_v9 = vld [vmem:[%s12319_s26 + $0x110] sm:$0xff]  ;;  %v5652_v44 = vld [vmem:[%s12321_s2 + $0xc8] sm:$0xff] }
 0x9ca   : > { %v5053_v41 = vpop.f32.mrf.mxu0  ;;  %v8530_v50 = vpop.f32.mrf.mxu1  ;;  %v5637_v38 = vld [vmem:[%s12321_s2 + $0x50] sm:$0xff] }
 0x9cb   : > { %v5123_v14 = vadd.f32 %v5122_v23, %v5052_v27  ;;  %v5215_v8 = vadd.f32 %v5214_v40, %v11194_v43  ;;  %v5054_v0 = vadd.f32 %v5053_v41, %v4983_v16  ;;  %v5658_v16 = vld [vmem:[%s12321_s2 + $0xf8] sm:$0xff]  ;;  %v5641_v23 = vld [vmem:[%s12321_s2 + $0x70] sm:$0xff]  ;;  %v5651_v27 = vld [vmem:[%s12321_s2 + $0xc0] sm:$0xff] }
 0x9cc   : > { %v5635_v40 = vld [vmem:[%s12321_s2 + $0x40] sm:$0xff]  ;;  %v5650_v41 = vld [vmem:[%s12321_s2 + $0xb8] sm:$0xff] }
 0x9cd   : > { %v5125_v42 = vadd.f32 %v5124_v32, %v5054_v0  ;;  %8564 = vmatmul.mubr.f32.vlgmr.msra.gmra.mxu0 %v5215_v8  ;;  %5407 = vmatprep.mubr.f32.mxu1 %v5215_v8  ;;  %v11199_v60 = vadd.f32 %v5123_v14, %v3275_v29  ;;  %v5639_v32 = vld [vmem:[%s12321_s2 + $0x60] sm:$0xff]  ;;  %v5634_v50 = vld [vmem:[%s12321_s2 + $0x38] sm:$0xff]  ;;  %v5649_v29 = vld [vmem:[%s12321_s2 + $0xb0] sm:$0xff] }
 0x9ce   : > { %5408 = vmatmul.mubr.f32.vlgmr.msra.gmra.mxu1 %v10953_v35  ;;  %8567 = vmatpush3.msra.mxu0 %v5335_v10  ;;  %v5633_v14 = vld [vmem:[%s12321_s2 + $0x30] sm:$0xff]  ;;  %v5648_v8 = vld [vmem:[%s12321_s2 + $0xa8] sm:$0xff]  ;;  %v5647_v10 = vld [vmem:[%s12321_s2 + $0xa0] sm:$0xff] }
 0x9cf   : > { %8602 = vmatpush3.msra.mxu1 %v11204_v59  ;;  %8633 = vmatprep.mubr.msk.f32.mxu1 %vm9121_vm0, %v9120_v1  ;;  %v11209_v51 = vadd.f32 %v5125_v42, %v3276_v5  ;;  %v5632_v0 = vld [vmem:[%s12321_s2 + $0x28] sm:$0xff]  ;;  %v5631_v5 = vld [vmem:[%s12321_s2 + $0x20] sm:$0xff]  ;;  %v5646_v42 = vld [vmem:[%s12321_s2 + $0x98] sm:$0xff] }
 0x9d0   : > { %8603 = vmatprep.subr.mxu1 %v9120_v1  ;;  %8568 = vmatprep.subr.mxu0 %v9120_v1 }
 0x9d1   : > { %8604 = vmatpush3.msra.mxu1 %v11215_v12  ;;  %8569 = vmatpush3.msra.mxu0 %v5334_v7  ;;  %v5630_v7 = vld [vmem:[%s12321_s2 + $0x18] sm:$0xff] }
 0x9d2   : > { %8605 = vmatprep.subr.mxu1 %v9120_v1  ;;  %8570 = vmatprep.subr.mxu0 %v9120_v1 }
 0x9d3   : > { %8606 = vmatpush3.msra.mxu1 %v11222_v15  ;;  %8571 = vmatpush3.msra.mxu0 %v5333_v11  ;;  %v5645_v11 = vld [vmem:[%s12321_s2 + $0x90] sm:$0xff] }
 0x9d4   : > { %8607 = vmatprep.subr.mxu1 %v9120_v1  ;;  %8572 = vmatprep.subr.mxu0 %v9120_v1 }
 0x9d5   : > { %8608 = vmatpush3.msra.mxu1 %v11229_v62  ;;  %8573 = vmatpush3.msra.mxu0 %v5332_v48  ;;  %v5629_v48 = vld [vmem:[%s12321_s2 + $0x10] sm:$0xff] }
 0x9d6   : > { %8609 = vmatprep.subr.mxu1 %v9120_v1  ;;  %8574 = vmatprep.subr.mxu0 %v9120_v1 }
 0x9d7   : > { %8610 = vmatpush3.msra.mxu1 %v11236_v19  ;;  %8575 = vmatpush3.msra.mxu0 %v5331_v17  ;;  %v5644_v17 = vld [vmem:[%s12321_s2 + $0x88] sm:$0xff] }
 0x9d8   : > { %8611 = vmatprep.subr.mxu1 %v9120_v1  ;;  %8576 = vmatprep.subr.mxu0 %v9120_v1 }
 0x9d9   : > { %8612 = vmatpush3.msra.mxu1 %v11243_v24  ;;  %8577 = vmatpush3.msra.mxu0 %v5330_v2  ;;  %v5628_v2 = vld [vmem:[%s12321_s2 + $0x8] sm:$0xff] }
 0x9da   : > { %8613 = vmatprep.subr.mxu1 %v9120_v1  ;;  %8578 = vmatprep.subr.mxu0 %v9120_v1 }
 0x9db   : > { %8614 = vmatpush3.msra.mxu1 %v11250_v28  ;;  %8579 = vmatpush3.msra.mxu0 %v5329_v21  ;;  %v5643_v21 = vld [vmem:[%s12321_s2 + $0x80] sm:$0xff] }
 0x9dc   : > { %8615 = vmatprep.subr.mxu1 %v9120_v1  ;;  %8580 = vmatprep.subr.mxu0 %v9120_v1 }
 0x9dd   : > { %8616 = vmatpush3.msra.mxu1 %v11257_v54  ;;  %8581 = vmatpush3.msra.mxu0 %v5328_v26  ;;  %v5627_v26 = vld [vmem:[%s12321_s2] sm:$0xff] }
 0x9de   : > { %8617 = vmatprep.subr.mxu1 %v9120_v1  ;;  %8582 = vmatprep.subr.mxu0 %v9120_v1 }
 0x9df   : > { %8618 = vmatpush3.msra.mxu1 %v11264_v55  ;;  %8583 = vmatpush3.msra.mxu0 %v5327_v49 }
 0x9e0   : > { %8619 = vmatprep.subr.mxu1 %v9120_v1  ;;  %8584 = vmatprep.subr.mxu0 %v9120_v1 }
 0x9e1   : > { %8620 = vmatpush3.msra.mxu1 %v11271_v56  ;;  %8585 = vmatpush3.msra.mxu0 %v5326_v52 }
 0x9e2   : > { %8621 = vmatprep.subr.mxu1 %v9120_v1  ;;  %8586 = vmatprep.subr.mxu0 %v9120_v1 }
 0x9e3   : > { %8622 = vmatpush3.msra.mxu1 %v11278_v22  ;;  %8587 = vmatpush3.msra.mxu0 %v5325_v58 }
 0x9e4   : > { %8623 = vmatprep.subr.mxu1 %v9120_v1  ;;  %8588 = vmatprep.subr.mxu0 %v9120_v1 }
 0x9e5   : > { %8624 = vmatpush3.msra.mxu1 %v11285_v4  ;;  %8589 = vmatpush3.msra.mxu0 %v5324_v63 }
 0x9e6   : > { %8625 = vmatprep.subr.mxu1 %v9120_v1  ;;  %8590 = vmatprep.subr.mxu0 %v9120_v1 }
 0x9e7   : > { %8626 = vmatpush3.msra.mxu1 %v11291_v45  ;;  %8591 = vmatpush3.msra.mxu0 %v5323_v53 }
 0x9e8   : > { %8627 = vmatprep.subr.mxu1 %v9120_v1  ;;  %8592 = vmatprep.subr.mxu0 %v9120_v1 }
 0x9e9   : > { %8628 = vmatpush3.msra.mxu1 %v11297_v3  ;;  %8598 = vmatprep.mubr.msk.f32.mxu0 %vm9121_vm0, %v9120_v1 }
 0x9ea   : > { %8629 = vmatprep.subr.mxu1 %v9120_v1  ;;  %8593 = vmatpush3.msra.mxu0 %v5322_v9 }
 0x9eb   : > { %8630 = vmatpush3.msra.mxu1 %v11304_v6  ;;  %8594 = vmatprep.subr.mxu0 %v9120_v1 }
 0x9ec   : > { %8631 = vmatprep.subr.mxu1 %v9120_v1  ;;  %8595 = vmatpush3.msra.mxu0 %v5321_v39 }
 0x9ed   : > { %8632 = vmatpush3.msra.mxu1 %v11309_v37  ;;  %8596 = vmatprep.subr.mxu0 %v9120_v1 }
 0x9ee   : > { %8634 = vmatmul.mubr.f32.vlgmr.msra.gmra.mxu1 %v10953_v35  ;;  %8597 = vmatpush3.msra.mxu0 %v5320_v13  ;;  %v5661_v13 = vld [vmem:[%s12321_s2 + $0x110] sm:$0xff] }
 0x9ef   : > { %8636 = vmatprep.subr.mxu0 %v9120_v1  ;;  %8014 = vmatprep.subr.mxu1 %v5658_v16  ;;  %v5660_v16 = vld [vmem:[%s12321_s2 + $0x108] sm:$0xff] }
 0x9f0   : > { %8015 = vmatpush3.msra.mxu1 %v5642_v18  ;;  %v5659_v18 = vld [vmem:[%s12321_s2 + $0x100] sm:$0xff] }
 0x9f1   : > { %8016 = vmatprep.subr.mxu1 %v5657_v20  ;;  %v7700_v20 = vld [vmem:[%s12322_s7] ss:$0 sm:$0xff]  ;;  %s12327_s7 = sld [smem:[#allocation20_spill]] }
 0x9f2   : > { %8017 = vmatpush3.msra.mxu1 %v5641_v23 }
 0x9f3   : > { %8018 = vmatprep.subr.mxu1 %v5656_v25 }
 0x9f4   : > { %8019 = vmatpush3.msra.mxu1 %v5640_v30 }
 0x9f5   : > { %8020 = vmatprep.subr.mxu1 %v5655_v31 }
 0x9f6   : > { %8021 = vmatpush3.msra.mxu1 %v5639_v32 }
 0x9f7   : > { %8022 = vmatprep.subr.mxu1 %v5654_v34 }
 0x9f8   : > { %8023 = vmatpush3.msra.mxu1 %v5638_v36 }
 0x9f9   : > { %8024 = vmatprep.subr.mxu1 %v5653_v61 }
 0x9fa   : > { %8025 = vmatpush3.msra.mxu1 %v5637_v38 }
 0x9fb   : > { %8026 = vmatprep.subr.mxu1 %v5652_v44 }
 0x9fc   : > { %8027 = vmatpush3.msra.mxu1 %v5636_v47 }
 0x9fd   : > { %8028 = vmatprep.subr.mxu1 %v5651_v27  ;;  %v7701_v27 = vld [vmem:[%s12323_s10] ss:$0 sm:$0xff]  ;;  %s12328_s10 = sld [smem:[#allocation22_spill]] }
 0x9fe   : > { %8029 = vmatpush3.msra.mxu1 %v5635_v40 }
 0x9ff   : > { %8030 = vmatprep.subr.mxu1 %v5650_v41 }
 0xa00   : > { %8031 = vmatpush3.msra.mxu1 %v5634_v50 }
 0xa01   : > { %8032 = vmatprep.subr.mxu1 %v5649_v29 }
 0xa02   : > { %8033 = vmatpush3.msra.mxu1 %v5633_v14 }
 0xa03   : > { %8034 = vmatprep.subr.mxu1 %v5648_v8 }
 0xa04   : > { %8035 = vmatpush3.msra.mxu1 %v5632_v0  ;;  %v5900_v0 = vld [vmem:[%s12324_s11 + $0xf8] sm:$0xff] }
 0xa05   : > { %8036 = vmatprep.subr.mxu1 %v5647_v10  ;;  %v5964_v10 = vld [vmem:[%s12324_s11 + $0x2f8] sm:$0xff] }
 0xa06   : > { %8037 = vmatpush3.msra.mxu1 %v5631_v5  ;;  %v5899_v5 = vld [vmem:[%s12324_s11 + $0xf0] sm:$0xff] }
 0xa07   : > { %8038 = vmatprep.subr.mxu1 %v5646_v42  ;;  %v5963_v42 = vld [vmem:[%s12324_s11 + $0x2f0] sm:$0xff] }
 0xa08   : > { %8039 = vmatpush3.msra.mxu1 %v5630_v7  ;;  %v5898_v7 = vld [vmem:[%s12324_s11 + $0xe8] sm:$0xff] }
 0xa09   : > { %8040 = vmatprep.subr.mxu1 %v5645_v11  ;;  %v5962_v11 = vld [vmem:[%s12324_s11 + $0x2e8] sm:$0xff] }
 0xa0a   : > { %8041 = vmatpush3.msra.mxu1 %v5629_v48  ;;  %v5961_v48 = vld [vmem:[%s12324_s11 + $0x2e0] sm:$0xff] }
 0xa0b   : > { %8042 = vmatprep.subr.mxu1 %v5644_v17  ;;  %v5896_v17 = vld [vmem:[%s12324_s11 + $0xd8] sm:$0xff] }
 0xa0c   : > { %8043 = vmatpush3.msra.mxu1 %v5628_v2  ;;  %v5960_v2 = vld [vmem:[%s12324_s11 + $0x2d8] sm:$0xff] }
 0xa0d   : > { %8044 = vmatprep.subr.mxu1 %v5643_v21  ;;  %v5895_v21 = vld [vmem:[%s12324_s11 + $0xd0] sm:$0xff] }
 0xa0e   : > { %8045 = vmatpush3.msra.mxu1 %v5627_v26  ;;  %v5959_v26 = vld [vmem:[%s12324_s11 + $0x2d0] sm:$0xff] }
 0xa0f   : > { %6105 = vmatprep.subr.mxu1 %v5900_v0 }
 0xa8d   : > { %v5282_v49 = vpop.f32.mrf.mxu0 }
 0xa8e   : > { %v5286_v52 = vmul.f32 0.95, %v5282_v49  ;;  %v7960_v58 = vpop.f32.mrf.mxu1  ;;  %v5894_v49 = vld [vmem:[%s12324_s11 + $0xc8] sm:$0xff] }
 0xa8f   : > { %v8565_v63 = vpop.f32.mrf.mxu0 }
 0xa90   : > { %v5287_v53 = vadd.f32 %v5286_v52, %v11194_v43  ;;  %v7961_v9 = vpop.f32.mrf.mxu1  ;;  %v5958_v52 = vld [vmem:[%s12324_s11 + $0x2c8] sm:$0xff]  ;;  %v5957_v63 = vld [vmem:[%s12324_s11 + $0x2c0] sm:$0xff] }
 0xa91   : > { %v11352_v39 = vadd.f32 %v7961_v9, %v7960_v58  ;;  %v5893_v58 = vld [vmem:[%s12324_s11 + $0xc0] sm:$0xff]  ;;  %v5956_v9 = vld [vmem:[%s12324_s11 + $0x2b8] sm:$0xff] }
 0xa92   : > { %8599 = vmatmul.mubr.f32.vlgmr.msra.gmra.mxu0 %v5287_v53  ;;  %v5892_v53 = vld [vmem:[%s12324_s11 + $0xb8] sm:$0xff] }
 0xa93   : > { %8637 = vmatpush3.msra.mxu0 %v11204_v59  ;;  %8668 = vmatprep.mubr.msk.f32.mxu0 %vm9121_vm0, %v9120_v1  ;;  %v5410_v23 = vadd.f32 %v11352_v39, %v7700_v20  ;;  %v5891_v39 = vld [vmem:[%s12324_s11 + $0xb0] sm:$0xff]  ;;  %v5945_v20 = vld [vmem:[%s12324_s11 + $0x260] sm:$0xff] }
 0xa94   : > { %8638 = vmatprep.subr.mxu0 %v9120_v1 }
 0xa95   : > { %8639 = vmatpush3.msra.mxu0 %v11215_v12 }
 0xa96   : > { %8640 = vmatprep.subr.mxu0 %v9120_v1 }
 0xa97   : > { %8641 = vmatpush3.msra.mxu0 %v11222_v15 }
 0xa98   : > { %8642 = vmatprep.subr.mxu0 %v9120_v1 }
 0xa99   : > { %8643 = vmatpush3.msra.mxu0 %v11229_v62 }
 0xa9a   : > { %8644 = vmatprep.subr.mxu0 %v9120_v1 }
 0xa9b   : > { %8645 = vmatpush3.msra.mxu0 %v11236_v19  ;;  %v5674_v19 = vld [vmem:[%s12321_s2 + $0x178] sm:$0xff] }
 0xa9c   : > { %8646 = vmatprep.subr.mxu0 %v9120_v1 }
 0xa9d   : > { %8647 = vmatpush3.msra.mxu0 %v11243_v24  ;;  %v5673_v24 = vld [vmem:[%s12321_s2 + $0x170] sm:$0xff] }
 0xa9e   : > { %8648 = vmatprep.subr.mxu0 %v9120_v1 }
 0xa9f   : > { %8649 = vmatpush3.msra.mxu0 %v11250_v28  ;;  %v5672_v28 = vld [vmem:[%s12321_s2 + $0x168] sm:$0xff] }
 0xaa0   : > { %8650 = vmatprep.subr.mxu0 %v9120_v1 }
 0xaa1   : > { %8651 = vmatpush3.msra.mxu0 %v11257_v54  ;;  %v5671_v54 = vld [vmem:[%s12321_s2 + $0x160] sm:$0xff] }
 0xaa2   : > { %8652 = vmatprep.subr.mxu0 %v9120_v1 }
 0xaa3   : > { %8653 = vmatpush3.msra.mxu0 %v11264_v55  ;;  %v5669_v55 = vld [vmem:[%s12321_s2 + $0x150] sm:$0xff] }
 0xaa4   : > { %8654 = vmatprep.subr.mxu0 %v9120_v1 }
 0xaa5   : > { %8655 = vmatpush3.msra.mxu0 %v11271_v56  ;;  %v5668_v56 = vld [vmem:[%s12321_s2 + $0x148] sm:$0xff] }
 0xaa6   : > { %8656 = vmatprep.subr.mxu0 %v9120_v1 }
 0xaa7   : > { %8657 = vmatpush3.msra.mxu0 %v11278_v22  ;;  %v5667_v22 = vld [vmem:[%s12321_s2 + $0x140] sm:$0xff] }
 0xaa8   : > { %8658 = vmatprep.subr.mxu0 %v9120_v1 }
 0xaa9   : > { %8659 = vmatpush3.msra.mxu0 %v11285_v4  ;;  %v5666_v4 = vld [vmem:[%s12321_s2 + $0x138] sm:$0xff] }
 0xaaa   : > { %8660 = vmatprep.subr.mxu0 %v9120_v1 }
 0xaab   : > { %8661 = vmatpush3.msra.mxu0 %v11291_v45  ;;  %v5665_v45 = vld [vmem:[%s12321_s2 + $0x130] sm:$0xff] }
 0xaac   : > { %8662 = vmatprep.subr.mxu0 %v9120_v1 }
 0xaad   : > { %8663 = vmatpush3.msra.mxu0 %v11297_v3  ;;  %v5664_v3 = vld [vmem:[%s12321_s2 + $0x128] sm:$0xff] }
 0xaae   : > { %v5549_v59 = vpop.f32.mrf.mxu1  ;;  %8664 = vmatprep.subr.mxu0 %v9120_v1 }
 0xaaf   : > { %v5553_v12 = vmul.f32 0.95, %v5549_v59  ;;  %8665 = vmatpush3.msra.mxu0 %v11304_v6  ;;  %v5663_v6 = vld [vmem:[%s12321_s2 + $0x120] sm:$0xff]  ;;  %v5955_v59 = vld [vmem:[%s12324_s11 + $0x2b0] sm:$0xff] }
 0xab0   : > { %v8635_v15 = vpop.f32.mrf.mxu1  ;;  %8666 = vmatprep.subr.mxu0 %v9120_v1 }
 0xab1   : > { %v5554_v62 = vadd.f32 %v5553_v12, %v11194_v43  ;;  %8667 = vmatpush3.msra.mxu0 %v11309_v37  ;;  %v5662_v37 = vld [vmem:[%s12321_s2 + $0x118] sm:$0xff]  ;;  %v5890_v12 = vld [vmem:[%s12324_s11 + $0xa8] sm:$0xff] }
 0xab2   : > { %8671 = vmatprep.subr.mxu0 %v9120_v1  ;;  %v5954_v15 = vld [vmem:[%s12324_s11 + $0x2a8] sm:$0xff] }
 0xab3   : > { %8669 = vmatmul.mubr.f32.vlgmr.msra.gmra.mxu0 %v5554_v62  ;;  %5746 = vmatprep.mubr.f32.mxu1 %v5554_v62  ;;  %v5889_v62 = vld [vmem:[%s12324_s11 + $0xa0] sm:$0xff] }
 0xab4   : > { %5747 = vmatmul.mubr.f32.vlgmr.msra.gmra.mxu1 %v10953_v35  ;;  %8703 = vmatprep.mubr.msk.f32.mxu0 %vm9121_vm0, %v9120_v1  ;;  %v5670_v35 = vld [vmem:[%s12321_s2 + $0x158] sm:$0xff]  ;;  %s12332_s2 = sld [smem:[#allocation23_spill]] }
 0xab5   : > { %8672 = vmatpush3.msra.mxu0 %v5674_v19  ;;  %6106 = vmatpush1.msra.mxu1 %v5899_v5  ;;  %v5953_v19 = vld [vmem:[%s12324_s11 + $0x2a0] sm:$0xff] }
 0xab6   : > { %8673 = vmatprep.subr.mxu0 %v9120_v1  ;;  %6107 = vmatprep.subr.mxu1 %v5898_v7  ;;  %v5875_v7 = vld [vmem:[%s12324_s11 + $0x30] sm:$0xff] }
 0xab7   : > { %8674 = vmatpush3.msra.mxu0 %v5673_v24  ;;  %v5888_v24 = vld [vmem:[%s12324_s11 + $0x98] sm:$0xff] }
 0xab8   : > { %8675 = vmatprep.subr.mxu0 %v9120_v1 }
 0xab9   : > { %8676 = vmatpush3.msra.mxu0 %v5672_v28  ;;  %v5952_v28 = vld [vmem:[%s12324_s11 + $0x298] sm:$0xff] }
 0xaba   : > { %8677 = vmatprep.subr.mxu0 %v9120_v1 }
 0xabb   : > { %8678 = vmatpush3.msra.mxu0 %v5671_v54  ;;  %v5887_v54 = vld [vmem:[%s12324_s11 + $0x90] sm:$0xff] }
 0xabc   : > { %8679 = vmatprep.subr.mxu0 %v9120_v1 }
 0xabd   : > { %8680 = vmatpush3.msra.mxu0 %v5670_v35  ;;  %v5951_v35 = vld [vmem:[%s12324_s11 + $0x290] sm:$0xff] }
 0xabe   : > { %8681 = vmatprep.subr.mxu0 %v9120_v1 }
 0xabf   : > { %8682 = vmatpush3.msra.mxu0 %v5669_v55  ;;  %v5886_v55 = vld [vmem:[%s12324_s11 + $0x88] sm:$0xff] }
 0xac0   : > { %8683 = vmatprep.subr.mxu0 %v9120_v1 }
 0xac1   : > { %8684 = vmatpush3.msra.mxu0 %v5668_v56  ;;  %v5950_v56 = vld [vmem:[%s12324_s11 + $0x288] sm:$0xff] }
 0xac2   : > { %8685 = vmatprep.subr.mxu0 %v9120_v1 }
 0xac3   : > { %8686 = vmatpush3.msra.mxu0 %v5667_v22  ;;  %v5885_v22 = vld [vmem:[%s12324_s11 + $0x80] sm:$0xff] }
 0xac4   : > { %8687 = vmatprep.subr.mxu0 %v9120_v1 }
 0xac5   : > { %8688 = vmatpush3.msra.mxu0 %v5666_v4  ;;  %v5949_v4 = vld [vmem:[%s12324_s11 + $0x280] sm:$0xff] }
 0xac6   : > { %8689 = vmatprep.subr.mxu0 %v9120_v1 }
 0xac7   : > { %8690 = vmatpush3.msra.mxu0 %v5665_v45  ;;  %v5884_v45 = vld [vmem:[%s12324_s11 + $0x78] sm:$0xff] }
 0xac8   : > { %8691 = vmatprep.subr.mxu0 %v9120_v1 }
 0xac9   : > { %8692 = vmatpush3.msra.mxu0 %v5664_v3  ;;  %v5948_v3 = vld [vmem:[%s12324_s11 + $0x278] sm:$0xff] }
 0xaca   : > { %8693 = vmatprep.subr.mxu0 %v9120_v1 }
 0xacb   : > { %8694 = vmatpush3.msra.mxu0 %v5663_v6  ;;  %v5883_v6 = vld [vmem:[%s12324_s11 + $0x70] sm:$0xff] }
 0xacc   : > { %8695 = vmatprep.subr.mxu0 %v9120_v1 }
 0xacd   : > { %8696 = vmatpush3.msra.mxu0 %v5662_v37  ;;  %v5947_v37 = vld [vmem:[%s12324_s11 + $0x270] sm:$0xff] }
 0xace   : > { %8697 = vmatprep.subr.mxu0 %v9120_v1 }
 0xacf   : > { %8698 = vmatpush3.msra.mxu0 %v5661_v13  ;;  %v5882_v13 = vld [vmem:[%s12324_s11 + $0x68] sm:$0xff] }
 0xad0   : > { %8699 = vmatprep.subr.mxu0 %v9120_v1 }
 0xad1   : > { %8700 = vmatpush3.msra.mxu0 %v5660_v16  ;;  %v5946_v16 = vld [vmem:[%s12324_s11 + $0x268] sm:$0xff] }
 0xad2   : > { %8701 = vmatprep.subr.mxu0 %v9120_v1 }
 0xad3   : > { %8702 = vmatpush3.msra.mxu0 %v5659_v18  ;;  %v5881_v18 = vld [vmem:[%s12324_s11 + $0x60] sm:$0xff] }
 0xad4   : > { %6176 = vmatprep.subr.mxu0 %v5964_v10 }
 0xb52   : > { %v5479_v25 = vpop.f32.mrf.mxu0 }
 0xb53   : > { %v5480_v30 = vadd.f32 %v5479_v25, %v5410_v23  ;;  %v5880_v23 = vld [vmem:[%s12324_s11 + $0x58] sm:$0xff] }
 0xb54   : > { %v8600_v31 = vpop.f32.mrf.mxu0  ;;  %v5944_v25 = vld [vmem:[%s12324_s11 + $0x258] sm:$0xff] }
 0xb55   : > { %v5943_v31 = vld [vmem:[%s12324_s11 + $0x250] sm:$0xff] }
 0xb73   : > { %v5621_v32 = vpop.f32.mrf.mxu0 }
 0xb74   : > { %v5625_v34 = vmul.f32 0.95, %v5621_v32  ;;  %v8046_v38 = vpop.f32.mrf.mxu1  ;;  %v5878_v32 = vld [vmem:[%s12324_s11 + $0x48] sm:$0xff] }
 0xb75   : > { %v8670_v36 = vpop.f32.mrf.mxu0 }
 0xb76   : > { %v5626_v61 = vadd.f32 %v5625_v34, %v11194_v43  ;;  %v8047_v44 = vpop.f32.mrf.mxu1  ;;  %v5942_v34 = vld [vmem:[%s12324_s11 + $0x248] sm:$0xff]  ;;  %v5877_v36 = vld [vmem:[%s12324_s11 + $0x40] sm:$0xff] }
 0xb77   : > { %v8048_v47 = vadd.f32 %v8047_v44, %v8046_v38  ;;  %v5876_v38 = vld [vmem:[%s12324_s11 + $0x38] sm:$0xff] }
 0xb78   : > { %8704 = vmatmul.mubr.f32.vlgmr.msra.gmra.mxu0 %v5626_v61  ;;  %v5941_v61 = vld [vmem:[%s12324_s11 + $0x240] sm:$0xff]  ;;  %v5940_v44 = vld [vmem:[%s12324_s11 + $0x238] sm:$0xff] }
 0xb79   : > { %v5749_v40 = vadd.f32 %v8048_v47, %v7701_v27  ;;  %6177 = vmatpush1.msra.mxu0 %v5963_v42 }
 0xb7a   : > { %6178 = vmatprep.subr.mxu0 %v5962_v11  ;;  %v5939_v11 = vld [vmem:[%s12324_s11 + $0x230] sm:$0xff] }
 0xb7b   : > { %6179 = vmatpush1.msra.mxu0 %v5961_v48  ;;  %v5938_v48 = vld [vmem:[%s12324_s11 + $0x228] sm:$0xff] }
 0xb7c   : > { %6180 = vmatprep.subr.mxu0 %v5960_v2  ;;  %v5872_v2 = vld [vmem:[%s12324_s11 + $0x18] sm:$0xff] }
 0xb7d   : > { %6181 = vmatpush1.msra.mxu0 %v5959_v26  ;;  %v5871_v26 = vld [vmem:[%s12324_s11 + $0x10] sm:$0xff] }
 0xb7e   : > { %6182 = vmatprep.subr.mxu0 %v5958_v52  ;;  %v5870_v52 = vld [vmem:[%s12324_s11 + $0x8] sm:$0xff] }
 0xb7f   : > { %6183 = vmatpush1.msra.mxu0 %v5957_v63  ;;  %v5869_v63 = vld [vmem:[%s12324_s11] sm:$0xff] }
 0xb80   : > { %6184 = vmatprep.subr.mxu0 %v5956_v9  ;;  %v5932_v9 = vld [vmem:[%s12324_s11 + $0x1f8] sm:$0xff] }
 0xb81   : > { %6185 = vmatpush1.msra.mxu0 %v5955_v59  ;;  %v5931_v59 = vld [vmem:[%s12324_s11 + $0x1f0] sm:$0xff] }
 0xb82   : > { %6186 = vmatprep.subr.mxu0 %v5954_v15  ;;  %v5930_v15 = vld [vmem:[%s12324_s11 + $0x1e8] sm:$0xff] }
 0xb83   : > { %6187 = vmatpush1.msra.mxu0 %v5953_v19  ;;  %v5929_v19 = vld [vmem:[%s12324_s11 + $0x1e0] sm:$0xff] }
 0xb84   : > { %6188 = vmatprep.subr.mxu0 %v5952_v28  ;;  %v5928_v28 = vld [vmem:[%s12324_s11 + $0x1d8] sm:$0xff] }
 0xb85   : > { %6189 = vmatpush1.msra.mxu0 %v5951_v35  ;;  %v5927_v35 = vld [vmem:[%s12324_s11 + $0x1d0] sm:$0xff] }
 0xb86   : > { %6190 = vmatprep.subr.mxu0 %v5950_v56  ;;  %v5926_v56 = vld [vmem:[%s12324_s11 + $0x1c8] sm:$0xff] }
 0xb87   : > { %6191 = vmatpush1.msra.mxu0 %v5949_v4  ;;  %v5925_v4 = vld [vmem:[%s12324_s11 + $0x1c0] sm:$0xff] }
 0xb88   : > { %6192 = vmatprep.subr.mxu0 %v5948_v3  ;;  %v5924_v3 = vld [vmem:[%s12324_s11 + $0x1b8] sm:$0xff] }
 0xb89   : > { %6193 = vmatpush1.msra.mxu0 %v5947_v37  ;;  %v5923_v37 = vld [vmem:[%s12324_s11 + $0x1b0] sm:$0xff] }
 0xb8a   : > { %6194 = vmatprep.subr.mxu0 %v5946_v16  ;;  %v5922_v16 = vld [vmem:[%s12324_s11 + $0x1a8] sm:$0xff] }
 0xb8b   : > { %6195 = vmatpush1.msra.mxu0 %v5945_v20  ;;  %v5921_v20 = vld [vmem:[%s12324_s11 + $0x1a0] sm:$0xff] }
 0xb8c   : > { %6196 = vmatprep.subr.mxu0 %v5944_v25  ;;  %v5920_v25 = vld [vmem:[%s12324_s11 + $0x198] sm:$0xff] }
 0xb8d   : > { %6197 = vmatpush1.msra.mxu0 %v5943_v31  ;;  %v5919_v31 = vld [vmem:[%s12324_s11 + $0x190] sm:$0xff] }
 0xb8e   : > { %6198 = vmatprep.subr.mxu0 %v5942_v34  ;;  %v5918_v34 = vld [vmem:[%s12324_s11 + $0x188] sm:$0xff] }
 0xb8f   : > { %6199 = vmatpush1.msra.mxu0 %v5941_v61  ;;  %v5917_v61 = vld [vmem:[%s12324_s11 + $0x180] sm:$0xff] }
 0xb90   : > { %6200 = vmatprep.subr.mxu0 %v5940_v44  ;;  %v5916_v44 = vld [vmem:[%s12324_s11 + $0x178] sm:$0xff] }
 0xb91   : > { %6201 = vmatpush1.msra.mxu0 %v5939_v11  ;;  %v5974_v11 = vld [vmem:[%s12324_s11 + $0x348] sm:$0xff] }
 0xb92   : > { %6202 = vmatprep.subr.mxu0 %v5938_v48  ;;  %v5973_v48 = vld [vmem:[%s12324_s11 + $0x340] sm:$0xff] }
 0xc38   : > { %v5818_v41 = vpop.f32.mrf.mxu0 }
 0xc39   : > { %v5819_v50 = vadd.f32 %v5818_v41, %v5749_v40 }
 0xc3a   : > { %v8705_v29 = vpop.f32.mrf.mxu0 }
 0xc3b   : > { %v5822_v14 = vadd.f32 %v5819_v50, %v5480_v30  ;;  %v5879_v30 = vld [vmem:[%s12324_s11 + $0x50] sm:$0xff] }
 0xc3d   : > { %v11428_v8 = vadd.f32 %v5822_v14, %v10787_v46  ;;  %v5897_v46 = vld [vmem:[%s12324_s11 + $0xe0] sm:$0xff] }
 0xc3e   : > { %6108 = vmatpush1.msra.mxu1 %v5897_v46  ;;  %v5874_v46 = vld [vmem:[%s12324_s11 + $0x28] sm:$0xff] }
 0xc3f   : > { %v5824_v43 = vsel %vm1721_vm3, %v11428_v8, 0.0  ;;  %6109 = vmatprep.subr.mxu1 %v5896_v17  ;;  %v5937_v17 = vld [vmem:[%s12324_s11 + $0x220] sm:$0xff] }
 0xc40   : > { %5825 = vadd.xlane.f32.xlu0 %v5824_v43  ;;  %6110 = vmatpush1.msra.mxu1 %v5895_v21  ;;  %v5936_v21 = vld [vmem:[%s12324_s11 + $0x218] sm:$0xff] }
 0xc41   : > { %6111 = vmatprep.subr.mxu1 %v5894_v49  ;;  %6203 = vmatpush1.msra.mxu0 %v5937_v17  ;;  %v5935_v49 = vld [vmem:[%s12324_s11 + $0x210] sm:$0xff]  ;;  %v5972_v17 = vld [vmem:[%s12324_s11 + $0x338] sm:$0xff] }
 0xc42   : > { %6112 = vmatpush1.msra.mxu1 %v5893_v58  ;;  %6204 = vmatprep.subr.mxu0 %v5936_v21  ;;  %v5934_v58 = vld [vmem:[%s12324_s11 + $0x208] sm:$0xff]  ;;  %v5971_v21 = vld [vmem:[%s12324_s11 + $0x330] sm:$0xff] }
 0xc43   : > { %6113 = vmatprep.subr.mxu1 %v5892_v53  ;;  %6205 = vmatpush1.msra.mxu0 %v5935_v49  ;;  %v5933_v53 = vld [vmem:[%s12324_s11 + $0x200] sm:$0xff]  ;;  %v5970_v49 = vld [vmem:[%s12324_s11 + $0x328] sm:$0xff] }
 0xc44   : > { %6114 = vmatpush1.msra.mxu1 %v5891_v39  ;;  %6206 = vmatprep.subr.mxu0 %v5934_v58  ;;  %v5996_v39 = vld [vmem:[%s12324_s11 + $0x3f8] sm:$0xff]  ;;  %v5969_v58 = vld [vmem:[%s12324_s11 + $0x320] sm:$0xff] }
 0xc45   : > { %6115 = vmatprep.subr.mxu1 %v5890_v12  ;;  %6207 = vmatpush1.msra.mxu0 %v5933_v53  ;;  %v5995_v12 = vld [vmem:[%s12324_s11 + $0x3f0] sm:$0xff]  ;;  %v5968_v53 = vld [vmem:[%s12324_s11 + $0x318] sm:$0xff] }
 0xc46   : > { %6116 = vmatpush1.msra.mxu1 %v5889_v62  ;;  %6208 = vmatprep.subr.mxu0 %v5996_v39  ;;  %v5994_v62 = vld [vmem:[%s12324_s11 + $0x3e8] sm:$0xff]  ;;  %v5967_v39 = vld [vmem:[%s12324_s11 + $0x310] sm:$0xff] }
 0xc47   : > { %6117 = vmatprep.subr.mxu1 %v5888_v24  ;;  %6209 = vmatpush2.msra.mxu0 %v5995_v12  ;;  %v5993_v24 = vld [vmem:[%s12324_s11 + $0x3e0] sm:$0xff]  ;;  %v5966_v12 = vld [vmem:[%s12324_s11 + $0x308] sm:$0xff] }
 0xc48   : > { %6118 = vmatpush1.msra.mxu1 %v5887_v54  ;;  %6210 = vmatprep.subr.mxu0 %v5994_v62  ;;  %v5992_v54 = vld [vmem:[%s12324_s11 + $0x3d8] sm:$0xff]  ;;  %v5965_v62 = vld [vmem:[%s12324_s11 + $0x300] sm:$0xff] }
 0xc49   : > { %6119 = vmatprep.subr.mxu1 %v5886_v55  ;;  %6211 = vmatpush2.msra.mxu0 %v5993_v24  ;;  %v5991_v55 = vld [vmem:[%s12324_s11 + $0x3d0] sm:$0xff]  ;;  %v6092_v24 = vld [vmem:[%s12324_s11 + $0x6f8] sm:$0xff] }
 0xc4a   : > { %6120 = vmatpush1.msra.mxu1 %v5885_v22  ;;  %6212 = vmatprep.subr.mxu0 %v5992_v54  ;;  %v5990_v22 = vld [vmem:[%s12324_s11 + $0x3c8] sm:$0xff] }
 0xc4b   : > { %6121 = vmatprep.subr.mxu1 %v5884_v45  ;;  %6213 = vmatpush2.msra.mxu0 %v5991_v55  ;;  %v5989_v45 = vld [vmem:[%s12324_s11 + $0x3c0] sm:$0xff] }
 0xc4c   : > { %6122 = vmatpush1.msra.mxu1 %v5883_v6  ;;  %6214 = vmatprep.subr.mxu0 %v5990_v22  ;;  %v5988_v6 = vld [vmem:[%s12324_s11 + $0x3b8] sm:$0xff] }
 0xc4d   : > { %6123 = vmatprep.subr.mxu1 %v5882_v13  ;;  %6215 = vmatpush2.msra.mxu0 %v5989_v45  ;;  %v5987_v13 = vld [vmem:[%s12324_s11 + $0x3b0] sm:$0xff] }
 0xc4e   : > { %6124 = vmatpush1.msra.mxu1 %v5881_v18  ;;  %6216 = vmatprep.subr.mxu0 %v5988_v6  ;;  %v5986_v18 = vld [vmem:[%s12324_s11 + $0x3a8] sm:$0xff] }
 0xc4f   : > { %6125 = vmatprep.subr.mxu1 %v5880_v23  ;;  %6217 = vmatpush2.msra.mxu0 %v5987_v13  ;;  %v5985_v23 = vld [vmem:[%s12324_s11 + $0x3a0] sm:$0xff] }
 0xc50   : > { %6126 = vmatpush1.msra.mxu1 %v5879_v30  ;;  %6218 = vmatprep.subr.mxu0 %v5986_v18  ;;  %v5984_v30 = vld [vmem:[%s12324_s11 + $0x398] sm:$0xff]  ;;  %v5852_v13 = vld [vmem:[%s12325_s23] sm:$0x7f]  ;;  %s12329_s23 = sld [smem:[#allocation19_spill]] }
 0xc51   : > { %6127 = vmatprep.subr.mxu1 %v5878_v32  ;;  %6219 = vmatpush2.msra.mxu0 %v5985_v23  ;;  %v5983_v32 = vld [vmem:[%s12324_s11 + $0x390] sm:$0xff]  ;;  %v5854_v18 = vld [vmem:[%s12326_s0] sm:$0x7f]  ;;  %s12330_s0 = sld [smem:[#allocation11_spill]] }
 0xc52   : > { %6128 = vmatpush1.msra.mxu1 %v5877_v36  ;;  %6220 = vmatprep.subr.mxu0 %v5984_v30  ;;  %v5982_v36 = vld [vmem:[%s12324_s11 + $0x388] sm:$0xff] }
 0xc53   : > { %6129 = vmatprep.subr.mxu1 %v5876_v38  ;;  %6221 = vmatpush2.msra.mxu0 %v5983_v32  ;;  %v5981_v38 = vld [vmem:[%s12324_s11 + $0x380] sm:$0xff]  ;;  %v6027_v32 = vld [vmem:[%s12324_s11 + $0x4f0] sm:$0xff] }
 0xc54   : > { %6130 = vmatpush1.msra.mxu1 %v5875_v7  ;;  %6222 = vmatprep.subr.mxu0 %v5982_v36  ;;  %v5910_v7 = vld [vmem:[%s12324_s11 + $0x148] sm:$0xff] }
 0xc55   : > { %6131 = vmatprep.subr.mxu1 %v5874_v46  ;;  %6223 = vmatpush2.msra.mxu0 %v5981_v38  ;;  %v5909_v46 = vld [vmem:[%s12324_s11 + $0x140] sm:$0xff] }
 0xc56   : > { %v6025_v38 = vld [vmem:[%s12324_s11 + $0x4e0] sm:$0xff] }
 0xcc9   : > { %v5826_v47 = vpop.xlane.xlu0 %5825 }
 0xcca   : > { %v5827_v27 = vsel %vm1721_vm3, %v5826_v47, 0.0  ;;  %v5980_v47 = vld [vmem:[%s12324_s11 + $0x378] sm:$0xff] }
 0xccb   : > { %v5828_v40 = vrot.slane %v5827_v27, 4  ;;  %6224 = vmatprep.subr.mxu0 %v5980_v47  ;;  %v6024_v47 = vld [vmem:[%s12324_s11 + $0x4d8] sm:$0xff] }
 0xccd   : > { %v5829_v41 = vadd.f32 %v5828_v40, %v5827_v27  ;;  %v5915_v27 = vld [vmem:[%s12324_s11 + $0x170] sm:$0xff] }
 0xcce   : > { %v5979_v40 = vld [vmem:[%s12324_s11 + $0x370] sm:$0xff] }
 0xccf   : > { %v5830_v50 = vrot.slane %v5829_v41, 2  ;;  %6225 = vmatpush2.msra.mxu0 %v5979_v40  ;;  %v6023_v40 = vld [vmem:[%s12324_s11 + $0x4d0] sm:$0xff] }
 0xcd1   : > { %v5831_v29 = vadd.f32 %v5830_v50, %v5829_v41  ;;  %v5914_v41 = vld [vmem:[%s12324_s11 + $0x168] sm:$0xff] }
 0xcd2   : > { %v5978_v50 = vld [vmem:[%s12324_s11 + $0x368] sm:$0xff] }
 0xcd3   : > { %v5832_v14 = vrot.slane %v5831_v29, 1  ;;  %6226 = vmatprep.subr.mxu0 %v5978_v50  ;;  %v6022_v50 = vld [vmem:[%s12324_s11 + $0x4c8] sm:$0xff] }
 0xcd5   : > { %v5833_v43 = vadd.f32 %v5832_v14, %v5831_v29  ;;  %v5913_v29 = vld [vmem:[%s12324_s11 + $0x160] sm:$0xff] }
 0xcd6   : > { %v5977_v14 = vld [vmem:[%s12324_s11 + $0x360] sm:$0xff] }
 0xcd7   : > { %v5835_v0 = vmul.f32 0.0011160715, %v5833_v43  ;;  %6227 = vmatpush2.msra.mxu0 %v5977_v14  ;;  %v5912_v43 = vld [vmem:[%s12324_s11 + $0x158] sm:$0xff]  ;;  %v6021_v14 = vld [vmem:[%s12324_s11 + $0x4c0] sm:$0xff] }
 0xcd9   : > { %v11484_v10 = vsub.f32 %v11428_v8, %v5835_v0  ;;  %v5873_v8 = vld [vmem:[%s12324_s11 + $0x20] sm:$0xff]  ;;  %v5976_v0 = vld [vmem:[%s12324_s11 + $0x358] sm:$0xff] }
 0xcda   : > { %6132 = vmatpush1.msra.mxu1 %v5873_v8  ;;  %6228 = vmatprep.subr.mxu0 %v5976_v0  ;;  %v5908_v8 = vld [vmem:[%s12324_s11 + $0x138] sm:$0xff] }
 0xcdb   : > { %v5837_v5 = vmul.f32 %v11484_v10, %v11484_v10  ;;  %6133 = vmatprep.subr.mxu1 %v5872_v2  ;;  %v5907_v2 = vld [vmem:[%s12324_s11 + $0x130] sm:$0xff]  ;;  %v6020_v0 = vld [vmem:[%s12324_s11 + $0x4b8] sm:$0xff] }
 0xcdc   : > { %6134 = vmatpush1.msra.mxu1 %v5871_v26  ;;  %v5906_v26 = vld [vmem:[%s12324_s11 + $0x128] sm:$0xff] }
 0xcdd   : > { %v5838_v42 = vsel %vm1721_vm3, %v5837_v5, 0.0  ;;  %6135 = vmatprep.subr.mxu1 %v5870_v52  ;;  %v5911_v5 = vld [vmem:[%s12324_s11 + $0x150] sm:$0xff]  ;;  %v5905_v52 = vld [vmem:[%s12324_s11 + $0x120] sm:$0xff] }
 0xcde   : > { %5839 = vadd.xlane.f32.xlu1 %v5838_v42  ;;  %6136 = vmatpush1.msra.mxu1 %v5869_v63  ;;  %v5975_v42 = vld [vmem:[%s12324_s11 + $0x350] sm:$0xff]  ;;  %v5904_v63 = vld [vmem:[%s12324_s11 + $0x118] sm:$0xff] }
 0xcdf   : > { %6137 = vmatprep.subr.mxu1 %v5932_v9  ;;  %6229 = vmatpush2.msra.mxu0 %v5975_v42  ;;  %v5903_v9 = vld [vmem:[%s12324_s11 + $0x110] sm:$0xff] }
 0xce0   : > { %6138 = vmatpush2.msra.mxu1 %v5931_v59  ;;  %6230 = vmatprep.subr.mxu0 %v5974_v11  ;;  %v5902_v59 = vld [vmem:[%s12324_s11 + $0x108] sm:$0xff]  ;;  %v6019_v42 = vld [vmem:[%s12324_s11 + $0x4b0] sm:$0xff] }
 0xce1   : > { %6139 = vmatprep.subr.mxu1 %v5930_v15  ;;  %6231 = vmatpush2.msra.mxu0 %v5973_v48  ;;  %v5901_v15 = vld [vmem:[%s12324_s11 + $0x100] sm:$0xff]  ;;  %v6018_v11 = vld [vmem:[%s12324_s11 + $0x4a8] sm:$0xff] }
 0xce2   : > { %6140 = vmatpush2.msra.mxu1 %v5929_v19  ;;  %6232 = vmatprep.subr.mxu0 %v5972_v17  ;;  %v6028_v19 = vld [vmem:[%s12324_s11 + $0x4f8] sm:$0xff]  ;;  %v6017_v48 = vld [vmem:[%s12324_s11 + $0x4a0] sm:$0xff] }
 0xce3   : > { %6141 = vmatprep.subr.mxu1 %v5928_v28  ;;  %6233 = vmatpush2.msra.mxu0 %v5971_v21  ;;  %v6016_v17 = vld [vmem:[%s12324_s11 + $0x498] sm:$0xff]  ;;  %v6015_v21 = vld [vmem:[%s12324_s11 + $0x490] sm:$0xff] }
 0xce4   : > { %6142 = vmatpush2.msra.mxu1 %v5927_v35  ;;  %6234 = vmatprep.subr.mxu0 %v5970_v49  ;;  %v6014_v49 = vld [vmem:[%s12324_s11 + $0x488] sm:$0xff] }
 0xce5   : > { %6143 = vmatprep.subr.mxu1 %v5926_v56  ;;  %6235 = vmatpush2.msra.mxu0 %v5969_v58  ;;  %v6013_v58 = vld [vmem:[%s12324_s11 + $0x480] sm:$0xff] }
 0xce6   : > { %6144 = vmatpush2.msra.mxu1 %v5925_v4  ;;  %6236 = vmatprep.subr.mxu0 %v5968_v53  ;;  %v6012_v53 = vld [vmem:[%s12324_s11 + $0x478] sm:$0xff] }
 0xce7   : > { %6145 = vmatprep.subr.mxu1 %v5924_v3  ;;  %6237 = vmatpush2.msra.mxu0 %v5967_v39  ;;  %v6011_v39 = vld [vmem:[%s12324_s11 + $0x470] sm:$0xff] }
 0xce8   : > { %6146 = vmatpush2.msra.mxu1 %v5923_v37  ;;  %6238 = vmatprep.subr.mxu0 %v5966_v12  ;;  %v6010_v12 = vld [vmem:[%s12324_s11 + $0x468] sm:$0xff] }
 0xce9   : > { %6147 = vmatprep.subr.mxu1 %v5922_v16  ;;  %6239 = vmatpush2.msra.mxu0 %v5965_v62  ;;  %v6009_v62 = vld [vmem:[%s12324_s11 + $0x460] sm:$0xff] }
 0xcea   : > { %6148 = vmatpush2.msra.mxu1 %v5921_v20  ;;  %6318 = vmatprep.subr.mxu0 %v6092_v24  ;;  %v6008_v24 = vld [vmem:[%s12324_s11 + $0x458] sm:$0xff] }
 0xceb   : > { %6149 = vmatprep.subr.mxu1 %v5920_v25 }
 0xcec   : > { %6150 = vmatpush2.msra.mxu1 %v5919_v31 }
 0xced   : > { %6151 = vmatprep.subr.mxu1 %v5918_v34  ;;  %v6091_v34 = vld [vmem:[%s12324_s11 + $0x6f0] sm:$0xff] }
 0xcee   : > { %6152 = vmatpush2.msra.mxu1 %v5917_v61  ;;  %v6090_v61 = vld [vmem:[%s12324_s11 + $0x6e8] sm:$0xff] }
 0xcef   : > { %6153 = vmatprep.subr.mxu1 %v5916_v44  ;;  %v6089_v44 = vld [vmem:[%s12324_s11 + $0x6e0] sm:$0xff] }
 0xcf0   : > { %6154 = vmatpush2.msra.mxu1 %v5915_v27  ;;  %v6088_v27 = vld [vmem:[%s12324_s11 + $0x6d8] sm:$0xff] }
 0xcf1   : > { %6155 = vmatprep.subr.mxu1 %v5914_v41  ;;  %v6087_v41 = vld [vmem:[%s12324_s11 + $0x6d0] sm:$0xff] }
 0xcf2   : > { %6156 = vmatpush2.msra.mxu1 %v5913_v29  ;;  %v6086_v29 = vld [vmem:[%s12324_s11 + $0x6c8] sm:$0xff] }
 0xcf3   : > { %6157 = vmatprep.subr.mxu1 %v5912_v43  ;;  %v6085_v43 = vld [vmem:[%s12324_s11 + $0x6c0] sm:$0xff] }
 0xcf4   : > { %6158 = vmatpush2.msra.mxu1 %v5911_v5  ;;  %v6084_v5 = vld [vmem:[%s12324_s11 + $0x6b8] sm:$0xff] }
 0xcf5   : > { %6159 = vmatprep.subr.mxu1 %v5910_v7  ;;  %v6083_v7 = vld [vmem:[%s12324_s11 + $0x6b0] sm:$0xff] }
 0xcf6   : > { %6160 = vmatpush2.msra.mxu1 %v5909_v46  ;;  %v6082_v46 = vld [vmem:[%s12324_s11 + $0x6a8] sm:$0xff] }
 0xcf7   : > { %6161 = vmatprep.subr.mxu1 %v5908_v8  ;;  %v6081_v8 = vld [vmem:[%s12324_s11 + $0x6a0] sm:$0xff] }
 0xcf8   : > { %6162 = vmatpush2.msra.mxu1 %v5907_v2  ;;  %v6080_v2 = vld [vmem:[%s12324_s11 + $0x698] sm:$0xff] }
 0xcf9   : > { %6163 = vmatprep.subr.mxu1 %v5906_v26  ;;  %v6079_v26 = vld [vmem:[%s12324_s11 + $0x690] sm:$0xff] }
 0xcfa   : > { %6164 = vmatpush2.msra.mxu1 %v5905_v52  ;;  %v6078_v52 = vld [vmem:[%s12324_s11 + $0x688] sm:$0xff] }
 0xcfb   : > { %6165 = vmatprep.subr.mxu1 %v5904_v63  ;;  %v6077_v63 = vld [vmem:[%s12324_s11 + $0x680] sm:$0xff] }
 0xcfc   : > { %6166 = vmatpush2.msra.mxu1 %v5903_v9  ;;  %v6076_v9 = vld [vmem:[%s12324_s11 + $0x678] sm:$0xff] }
 0xcfd   : > { %6167 = vmatprep.subr.mxu1 %v5902_v59  ;;  %v6075_v59 = vld [vmem:[%s12324_s11 + $0x670] sm:$0xff] }
 0xcfe   : > { %6168 = vmatpush2.msra.mxu1 %v5901_v15  ;;  %v6074_v15 = vld [vmem:[%s12324_s11 + $0x668] sm:$0xff] }
 0xcff   : > { %6247 = vmatprep.subr.mxu1 %v6028_v19  ;;  %v6073_v19 = vld [vmem:[%s12324_s11 + $0x660] sm:$0xff] }
 0xd67   : > { %v5840_v28 = vpop.xlane.xlu1 %5839 }
 0xd68   : > { %v5841_v54 = vsel %vm1721_vm3, %v5840_v28, 0.0  ;;  %v6072_v28 = vld [vmem:[%s12324_s11 + $0x658] sm:$0xff] }
 0xd69   : > { %v5842_v35 = vrot.slane %v5841_v54, 4 }
 0xd6b   : > { %v5843_v55 = vadd.f32 %v5842_v35, %v5841_v54  ;;  %v6007_v54 = vld [vmem:[%s12324_s11 + $0x450] sm:$0xff] }
 0xd6c   : > { %v6071_v35 = vld [vmem:[%s12324_s11 + $0x650] sm:$0xff] }
 0xd6d   : > { %v5844_v56 = vrot.slane %v5843_v55, 2 }
 0xd6f   : > { %v5845_v22 = vadd.f32 %v5844_v56, %v5843_v55  ;;  %v6006_v55 = vld [vmem:[%s12324_s11 + $0x448] sm:$0xff] }
 0xd70   : > { %v6070_v56 = vld [vmem:[%s12324_s11 + $0x648] sm:$0xff] }
 0xd71   : > { %v5846_v4 = vrot.slane %v5845_v22, 1 }
 0xd73   : > { %v5847_v45 = vadd.f32 %v5846_v4, %v5845_v22  ;;  %v6005_v22 = vld [vmem:[%s12324_s11 + $0x440] sm:$0xff] }
 0xd74   : > { %v6069_v4 = vld [vmem:[%s12324_s11 + $0x640] sm:$0xff] }
 0xd75   : > { %v5848_v3 = vmul.f32 0.0011160715, %v5847_v45  ;;  %v6004_v45 = vld [vmem:[%s12324_s11 + $0x438] sm:$0xff] }
 0xd77   : > { %v5849_v6 = vadd.f32 1e-05, %v5848_v3  ;;  %v6068_v3 = vld [vmem:[%s12324_s11 + $0x638] sm:$0xff] }
 0xd79   : > { %8992 = vrsqrt.f32 %v5849_v6  ;;  %v6003_v6 = vld [vmem:[%s12324_s11 + $0x430] sm:$0xff] }
 0xd86   : > { %v8993_v37 = vpop.eup %8992 }
 0xd87   : > { %v5851_v16 = vmul.f32 %v8993_v37, %v11484_v10  ;;  %v6026_v10 = vld [vmem:[%s12324_s11 + $0x4e8] sm:$0xff]  ;;  %v6067_v37 = vld [vmem:[%s12324_s11 + $0x630] sm:$0xff] }
 0xd89   : > { %v5853_v20 = vmul.f32 %v5852_v13, %v5851_v16  ;;  %v6002_v13 = vld [vmem:[%s12324_s11 + $0x428] sm:$0xff] }
 0xd8a   : > { %v6066_v16 = vld [vmem:[%s12324_s11 + $0x628] sm:$0xff] }
 0xd8b   : > { %v11573_v23 = vadd.f32 %v5854_v18, %v5853_v20  ;;  %v6001_v18 = vld [vmem:[%s12324_s11 + $0x420] sm:$0xff] }
 0xd8c   : > { %v6065_v20 = vld [vmem:[%s12324_s11 + $0x620] sm:$0xff] }
 0xd8d   : > { %v5857_v25 = vrot.slane %v11573_v23, 1  ;;  %v5861_v30 = vrot.slane %v11573_v23, 3  ;;  %v5859_v31 = vrot.slane %v11573_v23, 2  ;;  %v5865_v36 = vrot.slane %v11573_v23, 5 }
 0xd8f   : > { %6169 = vmatprep.mubr.f32.mxu1 %v5857_v25  ;;  %6240 = vmatprep.mubr.f32.mxu0 %v5861_v30  ;;  %v6000_v25 = vld [vmem:[%s12324_s11 + $0x418] sm:$0xff] }
 0xd90   : > { %6170 = vmatmul.mubr.f32.vlgmr.msra.gmra.mxu1 %v11573_v23  ;;  %6241 = vmatmul.mubr.f32.vlgmr.msra.gmra.mxu0 %v5859_v31  ;;  %v6064_v30 = vld [vmem:[%s12324_s11 + $0x618] sm:$0xff]  ;;  %v5999_v31 = vld [vmem:[%s12324_s11 + $0x410] sm:$0xff] }
 0xd91   : > { %6248 = vmatpush1.msra.mxu1 %v6027_v32  ;;  %6319 = vmatpush1.msra.mxu0 %v6091_v34  ;;  %v6063_v32 = vld [vmem:[%s12324_s11 + $0x610] sm:$0xff]  ;;  %v5998_v34 = vld [vmem:[%s12324_s11 + $0x408] sm:$0xff] }
 0xd92   : > { %6249 = vmatprep.subr.mxu1 %v6026_v10  ;;  %6311 = vmatprep.mubr.f32.mxu1 %v5865_v36  ;;  %v6062_v10 = vld [vmem:[%s12324_s11 + $0x608] sm:$0xff]  ;;  %v5997_v36 = vld [vmem:[%s12324_s11 + $0x400] sm:$0xff] }
 0xd93   : > { %6320 = vmatprep.subr.mxu0 %v6090_v61  ;;  %6250 = vmatpush1.msra.mxu1 %v6025_v38  ;;  %v6061_v61 = vld [vmem:[%s12324_s11 + $0x600] sm:$0xff]  ;;  %v6060_v38 = vld [vmem:[%s12324_s11 + $0x5f8] sm:$0xff] }
 0xd94   : > { %6321 = vmatpush1.msra.mxu0 %v6089_v44  ;;  %6251 = vmatprep.subr.mxu1 %v6024_v47  ;;  %v5867_v44 = vrot.slane %v11573_v23, 6  ;;  %v6059_v47 = vld [vmem:[%s12324_s11 + $0x5f0] sm:$0xff] }
 0xd95   : > { %6322 = vmatprep.subr.mxu0 %v6088_v27  ;;  %6252 = vmatpush1.msra.mxu1 %v6023_v40  ;;  %v6058_v27 = vld [vmem:[%s12324_s11 + $0x5e8] sm:$0xff]  ;;  %v6057_v40 = vld [vmem:[%s12324_s11 + $0x5e0] sm:$0xff] }
 0xd96   : > { %6323 = vmatpush1.msra.mxu0 %v6087_v41  ;;  %6253 = vmatprep.subr.mxu1 %v6022_v50  ;;  %v6056_v41 = vld [vmem:[%s12324_s11 + $0x5d8] sm:$0xff]  ;;  %v6055_v50 = vld [vmem:[%s12324_s11 + $0x5d0] sm:$0xff] }
 0xd97   : > { %6324 = vmatprep.subr.mxu0 %v6086_v29  ;;  %6254 = vmatpush1.msra.mxu1 %v6021_v14  ;;  %v6054_v29 = vld [vmem:[%s12324_s11 + $0x5c8] sm:$0xff]  ;;  %v6053_v14 = vld [vmem:[%s12324_s11 + $0x5c0] sm:$0xff] }
 0xd98   : > { %6325 = vmatpush1.msra.mxu0 %v6085_v43  ;;  %6255 = vmatprep.subr.mxu1 %v6020_v0  ;;  %v6052_v43 = vld [vmem:[%s12324_s11 + $0x5b8] sm:$0xff]  ;;  %v6051_v0 = vld [vmem:[%s12324_s11 + $0x5b0] sm:$0xff] }
 0xd99   : > { %6326 = vmatprep.subr.mxu0 %v6084_v5  ;;  %6256 = vmatpush1.msra.mxu1 %v6019_v42  ;;  %v6050_v5 = vld [vmem:[%s12324_s11 + $0x5a8] sm:$0xff]  ;;  %v6049_v42 = vld [vmem:[%s12324_s11 + $0x5a0] sm:$0xff] }
 0xd9a   : > { %6327 = vmatpush1.msra.mxu0 %v6083_v7  ;;  %6257 = vmatprep.subr.mxu1 %v6018_v11  ;;  %v6048_v7 = vld [vmem:[%s12324_s11 + $0x598] sm:$0xff]  ;;  %v6047_v11 = vld [vmem:[%s12324_s11 + $0x590] sm:$0xff] }
 0xd9b   : > { %6328 = vmatprep.subr.mxu0 %v6082_v46  ;;  %6258 = vmatpush1.msra.mxu1 %v6017_v48  ;;  %v6046_v46 = vld [vmem:[%s12324_s11 + $0x588] sm:$0xff]  ;;  %v6045_v48 = vld [vmem:[%s12324_s11 + $0x580] sm:$0xff] }
 0xd9c   : > { %6329 = vmatpush1.msra.mxu0 %v6081_v8  ;;  %6259 = vmatprep.subr.mxu1 %v6016_v17  ;;  %v6044_v8 = vld [vmem:[%s12324_s11 + $0x578] sm:$0xff]  ;;  %v6043_v17 = vld [vmem:[%s12324_s11 + $0x570] sm:$0xff] }
 0xd9d   : > { %6330 = vmatprep.subr.mxu0 %v6080_v2  ;;  %6260 = vmatpush1.msra.mxu1 %v6015_v21  ;;  %v6042_v2 = vld [vmem:[%s12324_s11 + $0x568] sm:$0xff]  ;;  %v6041_v21 = vld [vmem:[%s12324_s11 + $0x560] sm:$0xff] }
 0xd9e   : > { %6331 = vmatpush1.msra.mxu0 %v6079_v26  ;;  %6261 = vmatprep.subr.mxu1 %v6014_v49  ;;  %v6040_v26 = vld [vmem:[%s12324_s11 + $0x558] sm:$0xff]  ;;  %v6039_v49 = vld [vmem:[%s12324_s11 + $0x550] sm:$0xff] }
 0xd9f   : > { %6332 = vmatprep.subr.mxu0 %v6078_v52  ;;  %6262 = vmatpush1.msra.mxu1 %v6013_v58  ;;  %v6038_v52 = vld [vmem:[%s12324_s11 + $0x548] sm:$0xff]  ;;  %v6037_v58 = vld [vmem:[%s12324_s11 + $0x540] sm:$0xff] }
 0xda0   : > { %6333 = vmatpush1.msra.mxu0 %v6077_v63  ;;  %6263 = vmatprep.subr.mxu1 %v6012_v53  ;;  %v6036_v63 = vld [vmem:[%s12324_s11 + $0x538] sm:$0xff]  ;;  %v6035_v53 = vld [vmem:[%s12324_s11 + $0x530] sm:$0xff] }
 0xda1   : > { %6334 = vmatprep.subr.mxu0 %v6076_v9  ;;  %6264 = vmatpush1.msra.mxu1 %v6011_v39  ;;  %v6034_v9 = vld [vmem:[%s12324_s11 + $0x528] sm:$0xff]  ;;  %v6033_v39 = vld [vmem:[%s12324_s11 + $0x520] sm:$0xff] }
 0xda2   : > { %6335 = vmatpush1.msra.mxu0 %v6075_v59  ;;  %6265 = vmatprep.subr.mxu1 %v6010_v12  ;;  %v6032_v59 = vld [vmem:[%s12324_s11 + $0x518] sm:$0xff]  ;;  %v6031_v12 = vld [vmem:[%s12324_s11 + $0x510] sm:$0xff] }
 0xda3   : > { %6336 = vmatprep.subr.mxu0 %v6074_v15  ;;  %6266 = vmatpush1.msra.mxu1 %v6009_v62  ;;  %v6030_v15 = vld [vmem:[%s12324_s11 + $0x508] sm:$0xff]  ;;  %v6029_v62 = vld [vmem:[%s12324_s11 + $0x500] sm:$0xff] }
 0xda4   : > { %6337 = vmatpush1.msra.mxu0 %v6073_v19  ;;  %6267 = vmatprep.subr.mxu1 %v6008_v24  ;;  %v5863_v19 = vrot.slane %v11573_v23, 4  ;;  %v11682_v24 = vld [vmem:[%s9160_s29 + $0x78] sm:$0xff]  ;;  %v7230_v23 = vld [vmem:[%s12334_s5 + $0xc0] sm:$0xff] }
 0xda5   : > { %6338 = vmatprep.subr.mxu0 %v6072_v28  ;;  %6268 = vmatpush1.msra.mxu1 %v6007_v54  ;;  %v11689_v28 = vld [vmem:[%s9160_s29 + $0x70] sm:$0xff]  ;;  %v11694_v54 = vld [vmem:[%s9160_s29 + $0x68] sm:$0xff] }
 0xda6   : > { %6339 = vmatpush1.msra.mxu0 %v6071_v35  ;;  %6269 = vmatprep.subr.mxu1 %v6006_v55  ;;  %v11699_v35 = vld [vmem:[%s9160_s29 + $0x60] sm:$0xff]  ;;  %v11704_v55 = vld [vmem:[%s9160_s29 + $0x58] sm:$0xff] }
 0xda7   : > { %6340 = vmatprep.subr.mxu0 %v6070_v56  ;;  %6270 = vmatpush1.msra.mxu1 %v6005_v22  ;;  %v11709_v56 = vld [vmem:[%s9160_s29 + $0x50] sm:$0xff]  ;;  %v11714_v22 = vld [vmem:[%s9160_s29 + $0x48] sm:$0xff] }
 0xda8   : > { %6341 = vmatpush1.msra.mxu0 %v6069_v4  ;;  %6271 = vmatprep.subr.mxu1 %v6004_v45  ;;  %v11719_v4 = vld [vmem:[%s9160_s29 + $0x40] sm:$0xff]  ;;  %v11724_v45 = vld [vmem:[%s9160_s29 + $0x38] sm:$0xff] }
 0xda9   : > { %6342 = vmatprep.subr.mxu0 %v6068_v3  ;;  %6272 = vmatpush1.msra.mxu1 %v6003_v6  ;;  %v11729_v3 = vld [vmem:[%s9160_s29 + $0x30] sm:$0xff]  ;;  %v11734_v6 = vld [vmem:[%s9160_s29 + $0x28] sm:$0xff] }
 0xdaa   : > { %6343 = vmatpush1.msra.mxu0 %v6067_v37  ;;  %6273 = vmatprep.subr.mxu1 %v6002_v13  ;;  %v11739_v37 = vld [vmem:[%s9160_s29 + $0x20] sm:$0xff]  ;;  %v11744_v13 = vld [vmem:[%s9160_s29 + $0x18] sm:$0xff] }
 0xdab   : > { %6344 = vmatprep.subr.mxu0 %v6066_v16  ;;  %6274 = vmatpush1.msra.mxu1 %v6001_v18  ;;  %v11749_v16 = vld [vmem:[%s9160_s29 + $0x10] sm:$0xff]  ;;  %v11754_v18 = vld [vmem:[%s9160_s29 + $0x8] sm:$0xff] }
 0xdac   : > { %6345 = vmatpush1.msra.mxu0 %v6065_v20  ;;  %6275 = vmatprep.subr.mxu1 %v6000_v25  ;;  %v11759_v20 = vld [vmem:[%s9160_s29] sm:$0xff]  ;;  %v6428_v25 = vld [vmem:[%s12327_s7 + $0xf8] sm:$0xff] }
 0xdad   : > { %6346 = vmatprep.subr.mxu0 %v6064_v30  ;;  %6276 = vmatpush1.msra.mxu1 %v5999_v31  ;;  %v6427_v30 = vld [vmem:[%s12327_s7 + $0xf0] sm:$0xff]  ;;  %v6426_v31 = vld [vmem:[%s12327_s7 + $0xe8] sm:$0xff] }
 0xdae   : > { %6347 = vmatpush1.msra.mxu0 %v6063_v32  ;;  %6277 = vmatprep.subr.mxu1 %v5998_v34  ;;  %v6425_v32 = vld [vmem:[%s12327_s7 + $0xe0] sm:$0xff]  ;;  %v6424_v34 = vld [vmem:[%s12327_s7 + $0xd8] sm:$0xff] }
 0xdaf   : > { %6348 = vmatprep.subr.mxu0 %v6062_v10  ;;  %6278 = vmatpush1.msra.mxu1 %v5997_v36  ;;  %v6423_v10 = vld [vmem:[%s12327_s7 + $0xd0] sm:$0xff]  ;;  %v6422_v36 = vld [vmem:[%s12327_s7 + $0xc8] sm:$0xff] }
 0xdb0   : > { %6349 = vmatpush1.msra.mxu0 %v6061_v61  ;;  %6382 = vmatprep.mubr.f32.mxu0 %v9120_v1  ;;  %v6421_v61 = vld [vmem:[%s12327_s7 + $0xc0] sm:$0xff] }
 0xdb1   : > { %6279 = vmatprep.subr.mxu1 %v6060_v38  ;;  %6383 = vmatmul.mubr.f32.vlgmr.msra.gmra.mxu0 %v5867_v44  ;;  %v6420_v38 = vld [vmem:[%s12327_s7 + $0xb8] sm:$0xff] }
 0xdb2   : > { %6280 = vmatpush2.msra.mxu1 %v6059_v47  ;;  %6493 = vmatprep.mubr.f32.mxu0 %v9120_v1  ;;  %v6419_v47 = vld [vmem:[%s12327_s7 + $0xb0] sm:$0xff] }
 0xdb3   : > { %6281 = vmatprep.subr.mxu1 %v6058_v27  ;;  %6429 = vmatprep.subr.mxu0 %v6428_v25  ;;  %v6418_v27 = vld [vmem:[%s12327_s7 + $0xa8] sm:$0xff] }
 0xdb4   : > { %6282 = vmatpush2.msra.mxu1 %v6057_v40  ;;  %6430 = vmatpush1.msra.mxu0 %v6427_v30  ;;  %v6417_v40 = vld [vmem:[%s12327_s7 + $0xa0] sm:$0xff] }
 0xdb5   : > { %6283 = vmatprep.subr.mxu1 %v6056_v41  ;;  %6431 = vmatprep.subr.mxu0 %v6426_v31  ;;  %v6416_v41 = vld [vmem:[%s12327_s7 + $0x98] sm:$0xff] }
 0xdb6   : > { %6284 = vmatpush2.msra.mxu1 %v6055_v50  ;;  %6432 = vmatpush1.msra.mxu0 %v6425_v32  ;;  %v6415_v50 = vld [vmem:[%s12327_s7 + $0x90] sm:$0xff] }
 0xdb7   : > { %6285 = vmatprep.subr.mxu1 %v6054_v29  ;;  %6433 = vmatprep.subr.mxu0 %v6424_v34  ;;  %v6414_v29 = vld [vmem:[%s12327_s7 + $0x88] sm:$0xff] }
 0xdb8   : > { %6286 = vmatpush2.msra.mxu1 %v6053_v14  ;;  %6434 = vmatpush1.msra.mxu0 %v6423_v10  ;;  %v6413_v14 = vld [vmem:[%s12327_s7 + $0x80] sm:$0xff] }
 0xdb9   : > { %6287 = vmatprep.subr.mxu1 %v6052_v43  ;;  %6435 = vmatprep.subr.mxu0 %v6422_v36  ;;  %v6412_v43 = vld [vmem:[%s12327_s7 + $0x78] sm:$0xff] }
 0xdba   : > { %6288 = vmatpush2.msra.mxu1 %v6051_v0  ;;  %6436 = vmatpush1.msra.mxu0 %v6421_v61  ;;  %v6411_v0 = vld [vmem:[%s12327_s7 + $0x70] sm:$0xff] }
 0xdbb   : > { %6289 = vmatprep.subr.mxu1 %v6050_v5  ;;  %6437 = vmatprep.subr.mxu0 %v6420_v38  ;;  %v6410_v5 = vld [vmem:[%s12327_s7 + $0x68] sm:$0xff] }
 0xdbc   : > { %6290 = vmatpush2.msra.mxu1 %v6049_v42  ;;  %6438 = vmatpush1.msra.mxu0 %v6419_v47  ;;  %v6409_v42 = vld [vmem:[%s12327_s7 + $0x60] sm:$0xff] }
 0xdbd   : > { %6291 = vmatprep.subr.mxu1 %v6048_v7  ;;  %6439 = vmatprep.subr.mxu0 %v6418_v27  ;;  %v6408_v7 = vld [vmem:[%s12327_s7 + $0x58] sm:$0xff] }
 0xdbe   : > { %6292 = vmatpush2.msra.mxu1 %v6047_v11  ;;  %6440 = vmatpush1.msra.mxu0 %v6417_v40  ;;  %v6407_v11 = vld [vmem:[%s12327_s7 + $0x50] sm:$0xff] }
 0xdbf   : > { %6293 = vmatprep.subr.mxu1 %v6046_v46  ;;  %6441 = vmatprep.subr.mxu0 %v6416_v41  ;;  %v6406_v46 = vld [vmem:[%s12327_s7 + $0x48] sm:$0xff] }
 0xdc0   : > { %6294 = vmatpush2.msra.mxu1 %v6045_v48  ;;  %6442 = vmatpush1.msra.mxu0 %v6415_v50  ;;  %v6405_v48 = vld [vmem:[%s12327_s7 + $0x40] sm:$0xff] }
 0xdc1   : > { %6295 = vmatprep.subr.mxu1 %v6044_v8  ;;  %6443 = vmatprep.subr.mxu0 %v6414_v29  ;;  %v6404_v8 = vld [vmem:[%s12327_s7 + $0x38] sm:$0xff] }
 0xdc2   : > { %6296 = vmatpush2.msra.mxu1 %v6043_v17  ;;  %6444 = vmatpush1.msra.mxu0 %v6413_v14  ;;  %v6403_v17 = vld [vmem:[%s12327_s7 + $0x30] sm:$0xff] }
 0xdc3   : > { %6297 = vmatprep.subr.mxu1 %v6042_v2  ;;  %6445 = vmatprep.subr.mxu0 %v6412_v43  ;;  %v6402_v2 = vld [vmem:[%s12327_s7 + $0x28] sm:$0xff] }
 0xdc4   : > { %6298 = vmatpush2.msra.mxu1 %v6041_v21  ;;  %6446 = vmatpush1.msra.mxu0 %v6411_v0  ;;  %v6401_v21 = vld [vmem:[%s12327_s7 + $0x20] sm:$0xff]  ;;  %v6676_v0 = vld [vmem:[%s12328_s10 + $0x78] sm:$0xff] }
 0xdc5   : > { %6299 = vmatprep.subr.mxu1 %v6040_v26  ;;  %6447 = vmatprep.subr.mxu0 %v6410_v5  ;;  %v6400_v26 = vld [vmem:[%s12327_s7 + $0x18] sm:$0xff]  ;;  %v6691_v5 = vld [vmem:[%s12328_s10 + $0xf0] sm:$0xff] }
 0xdc6   : > { %6300 = vmatpush2.msra.mxu1 %v6039_v49  ;;  %6448 = vmatpush1.msra.mxu0 %v6409_v42  ;;  %v6399_v49 = vld [vmem:[%s12327_s7 + $0x10] sm:$0xff] }
 0xdc7   : > { %6301 = vmatprep.subr.mxu1 %v6038_v52  ;;  %6449 = vmatprep.subr.mxu0 %v6408_v7  ;;  %v6398_v52 = vld [vmem:[%s12327_s7 + $0x8] sm:$0xff]  ;;  %v6675_v42 = vld [vmem:[%s12328_s10 + $0x70] sm:$0xff] }
 0xdc8   : > { %6302 = vmatpush2.msra.mxu1 %v6037_v58  ;;  %6450 = vmatpush1.msra.mxu0 %v6407_v11  ;;  %v6397_v58 = vld [vmem:[%s12327_s7] sm:$0xff]  ;;  %v6690_v7 = vld [vmem:[%s12328_s10 + $0xe8] sm:$0xff] }
 0xdc9   : > { %6303 = vmatprep.subr.mxu1 %v6036_v63  ;;  %6451 = vmatprep.subr.mxu0 %v6406_v46  ;;  %v6692_v63 = vld [vmem:[%s12328_s10 + $0xf8] sm:$0xff]  ;;  %v6674_v11 = vld [vmem:[%s12328_s10 + $0x68] sm:$0xff]  ;;  %v6689_v46 = vld [vmem:[%s12328_s10 + $0xe0] sm:$0xff] }
 0xdca   : > { %6304 = vmatpush2.msra.mxu1 %v6035_v53  ;;  %6452 = vmatpush1.msra.mxu0 %v6405_v48  ;;  %v6673_v48 = vld [vmem:[%s12328_s10 + $0x60] sm:$0xff] }
 0xdcb   : > { %6305 = vmatprep.subr.mxu1 %v6034_v9  ;;  %6453 = vmatprep.subr.mxu0 %v6404_v8  ;;  %v6093_v9 = vld [vmem:[%s12329_s23] sm:$0x3]  ;;  %v6672_v8 = vld [vmem:[%s12328_s10 + $0x58] sm:$0xff]  ;;  %s12331_s23 = sld [smem:[#allocation24_spill]] }
 0xdcc   : > { %6306 = vmatpush2.msra.mxu1 %v6033_v39  ;;  %6454 = vmatpush1.msra.mxu0 %v6403_v17  ;;  %v6102_v39 = vrot.slane %v6093_v9, %v9408_v33  ;;  %v6098_v36 = vrot.slane %v6093_v9, %v9496_v57  ;;  %v6671_v17 = vld [vmem:[%s12328_s10 + $0x50] sm:$0xff] }
 0xdcd   : > { %6307 = vmatprep.subr.mxu1 %v6032_v59  ;;  %6455 = vmatprep.subr.mxu0 %v6402_v2  ;;  %v6670_v2 = vld [vmem:[%s12328_s10 + $0x48] sm:$0xff] }
 0xdce   : > { %6308 = vmatpush2.msra.mxu1 %v6031_v12  ;;  %6456 = vmatpush1.msra.mxu0 %v6401_v21  ;;  %v6669_v21 = vld [vmem:[%s12328_s10 + $0x40] sm:$0xff] }
 0xdcf   : > { %6309 = vmatprep.subr.mxu1 %v6030_v15  ;;  %6457 = vmatprep.subr.mxu0 %v6400_v26  ;;  %v6668_v26 = vld [vmem:[%s12328_s10 + $0x38] sm:$0xff] }
 0xdd0   : > { %6310 = vmatpush2.msra.mxu1 %v6029_v62  ;;  %6458 = vmatpush1.msra.mxu0 %v6399_v49  ;;  %v6667_v49 = vld [vmem:[%s12328_s10 + $0x30] sm:$0xff] }
 0xdd1   : > { %6312 = vmatmul.mubr.f32.vlgmr.msra.gmra.mxu1 %v5863_v19  ;;  %8706 = vmatprep.subr.mxu1 %v9120_v1 }
 0xdd2   : > { %8707 = vmatpush3.msra.mxu1 %v11682_v24  ;;  %8738 = vmatprep.mubr.msk.f32.mxu1 %vm9121_vm0, %v9120_v1 }
 0xdd3   : > { %8708 = vmatprep.subr.mxu1 %v9120_v1  ;;  %6459 = vmatprep.subr.mxu0 %v6398_v52  ;;  %v6666_v52 = vld [vmem:[%s12328_s10 + $0x28] sm:$0xff] }
 0xdd4   : > { %8709 = vmatpush3.msra.mxu1 %v11689_v28  ;;  %6460 = vmatpush1.msra.mxu0 %v6397_v58  ;;  %v6665_v58 = vld [vmem:[%s12328_s10 + $0x20] sm:$0xff] }
 0xdd5   : > { %8710 = vmatprep.subr.mxu1 %v9120_v1  ;;  %8741 = vmatprep.subr.mxu0 %v9120_v1 }
 0xdd6   : > { %8711 = vmatpush3.msra.mxu1 %v11694_v54 }
 0xdd7   : > { %8712 = vmatprep.subr.mxu1 %v9120_v1 }
 0xdd8   : > { %8713 = vmatpush3.msra.mxu1 %v11699_v35 }
 0xdd9   : > { %8714 = vmatprep.subr.mxu1 %v9120_v1 }
 0xdda   : > { %8715 = vmatpush3.msra.mxu1 %v11704_v55 }
 0xddb   : > { %8716 = vmatprep.subr.mxu1 %v9120_v1 }
 0xddc   : > { %8717 = vmatpush3.msra.mxu1 %v11709_v56 }
 0xddd   : > { %8718 = vmatprep.subr.mxu1 %v9120_v1 }
 0xdde   : > { %8719 = vmatpush3.msra.mxu1 %v11714_v22 }
 0xddf   : > { %8720 = vmatprep.subr.mxu1 %v9120_v1 }
 0xde0   : > { %8721 = vmatpush3.msra.mxu1 %v11719_v4 }
 0xde1   : > { %8722 = vmatprep.subr.mxu1 %v9120_v1 }
 0xde2   : > { %8723 = vmatpush3.msra.mxu1 %v11724_v45 }
 0xde3   : > { %8724 = vmatprep.subr.mxu1 %v9120_v1 }
 0xde4   : > { %8725 = vmatpush3.msra.mxu1 %v11729_v3 }
 0xde5   : > { %8726 = vmatprep.subr.mxu1 %v9120_v1 }
 0xde6   : > { %8727 = vmatpush3.msra.mxu1 %v11734_v6 }
 0xde7   : > { %8728 = vmatprep.subr.mxu1 %v9120_v1 }
 0xde8   : > { %8729 = vmatpush3.msra.mxu1 %v11739_v37 }
 0xde9   : > { %8730 = vmatprep.subr.mxu1 %v9120_v1 }
 0xdea   : > { %8731 = vmatpush3.msra.mxu1 %v11744_v13 }
 0xdeb   : > { %8732 = vmatprep.subr.mxu1 %v9120_v1 }
 0xdec   : > { %8733 = vmatpush3.msra.mxu1 %v11749_v16 }
 0xded   : > { %8734 = vmatprep.subr.mxu1 %v9120_v1 }
 0xdee   : > { %8735 = vmatpush3.msra.mxu1 %v11754_v18 }
 0xdef   : > { %8736 = vmatprep.subr.mxu1 %v9120_v1 }
 0xdf0   : > { %8737 = vmatpush3.msra.mxu1 %v11759_v20 }
 0xdf1   : > { %8100 = vmatprep.subr.mxu1 %v6692_v63  ;;  %v6664_v63 = vld [vmem:[%s12328_s10 + $0x18] sm:$0xff] }
 0xe50   : > { %v6171_v53 = vpop.f32.mrf.mxu1  ;;  %v6242_v59 = vpop.f32.mrf.mxu0 }
 0xe51   : > { %v6172_v38 = vadd.f32 %v6171_v53, %v6098_v36  ;;  %v6679_v53 = vld [vmem:[%s12328_s10 + $0x90] sm:$0xff]  ;;  %v11898_v36 = vld [vmem:[%s12311_s3 + $0x68] sm:$0xff] }
 0xe52   : > { %v6173_v12 = vpop.f32.mrf.mxu1  ;;  %v6244_v62 = vpop.f32.mrf.mxu0 }
 0xe53   : > { %v6174_v15 = vadd.f32 %v6173_v12, %v6102_v39  ;;  %v6243_v47 = vadd.f32 %v6242_v59, %v6172_v38  ;;  %v11905_v38 = vld [vmem:[%s12311_s3 + $0x60] sm:$0xff] }
 0xe55   : > { %v6245_v30 = vadd.f32 %v6244_v62, %v6174_v15 }
 0xe71   : > { %v6384_v19 = vpop.f32.mrf.mxu0 }
 0xe73   : > { %v6386_v34 = vpop.f32.mrf.mxu0 }
 0xe91   : > { %v6313_v25 = vpop.f32.mrf.mxu1 }
 0xe92   : > { %v6314_v27 = vadd.f32 %v6313_v25, %v6243_v47  ;;  %v6703_v47 = vld [vmem:[%s12328_s10 + $0x150] sm:$0xff] }
 0xe93   : > { %v6315_v31 = vpop.f32.mrf.mxu1 }
 0xe94   : > { %v6316_v32 = vadd.f32 %v6315_v31, %v6245_v30  ;;  %v6385_v40 = vadd.f32 %v6384_v19, %v6314_v27  ;;  %v6708_v30 = vld [vmem:[%s12328_s10 + $0x178] sm:$0xff] }
 0xe95   : > { %v11882_v31 = vld [vmem:[%s12311_s3 + $0x78] sm:$0xff] }
 0xe96   : > { %v6387_v10 = vadd.f32 %v6386_v34, %v6316_v32  ;;  %v6706_v32 = vld [vmem:[%s12328_s10 + $0x168] sm:$0xff]  ;;  %v11891_v34 = vld [vmem:[%s12311_s3 + $0x70] sm:$0xff]  ;;  %v11912_v27 = vld [vmem:[%s12311_s3 + $0x58] sm:$0xff] }
 0xe98   : > { %v7702_v61 = vmul.f32 -1.442695, %v6387_v10  ;;  %v6705_v10 = vld [vmem:[%s12328_s10 + $0x160] sm:$0xff] }
 0xe9a   : > { %8994 = vpow2.f32 %v7702_v61  ;;  %v6704_v61 = vld [vmem:[%s12328_s10 + $0x158] sm:$0xff] }
 0xe9b   : > { %8996 = vtanh.f32 %v6385_v40  ;;  %v6702_v40 = vld [vmem:[%s12328_s10 + $0x148] sm:$0xff] }
 0xea7   : > { %v8995_v41 = vpop.eup %8994 }
 0xea8   : > { %v6393_v50 = vadd.f32 1.0, %v8995_v41  ;;  %v8997_v29 = vpop.eup %8996  ;;  %v11919_v41 = vld [vmem:[%s12311_s3 + $0x50] sm:$0xff] }
 0xeaa   : > { %8998 = vrcp.f32 %v6393_v50  ;;  %v6701_v50 = vld [vmem:[%s12328_s10 + $0x140] sm:$0xff] }
 0xeb7   : > { %v8999_v14 = vpop.eup %8998 }
 0xeb8   : > { %v11799_v43 = vmul.f32 %v8999_v14, %v8997_v29  ;;  %v11926_v29 = vld [vmem:[%s12311_s3 + $0x48] sm:$0xff]  ;;  %v6700_v14 = vld [vmem:[%s12328_s10 + $0x138] sm:$0xff] }
 0xeba   : > { %6494 = vmatmul.mubr.f32.vlgmr.msra.gmra.mxu0 %v11799_v43  ;;  %8739 = vmatmul.mubr.f32.vlgmr.msra.gmra.mxu1 %v11799_v43  ;;  %v11875_v15 = vmul.f32 0.05, %v11799_v43 }
 0xebb   : > { %8742 = vmatpush3.msra.mxu0 %v11682_v24  ;;  %8101 = vmatpush3.msra.mxu1 %v6676_v0  ;;  %v6688_v24 = vld [vmem:[%s12328_s10 + $0xd8] sm:$0xff]  ;;  %v11933_v0 = vld [vmem:[%s12311_s3 + $0x40] sm:$0xff] }
 0xebc   : > { %8743 = vmatprep.subr.mxu0 %v9120_v1  ;;  %8102 = vmatprep.subr.mxu1 %v6691_v5  ;;  %v6699_v5 = vld [vmem:[%s12328_s10 + $0x130] sm:$0xff] }
 0xebd   : > { %8744 = vmatpush3.msra.mxu0 %v11689_v28  ;;  %8103 = vmatpush3.msra.mxu1 %v6675_v42  ;;  %v6687_v28 = vld [vmem:[%s12328_s10 + $0xd0] sm:$0xff]  ;;  %v11940_v42 = vld [vmem:[%s12311_s3 + $0x38] sm:$0xff] }
 0xebe   : > { %8745 = vmatprep.subr.mxu0 %v9120_v1  ;;  %8104 = vmatprep.subr.mxu1 %v6690_v7  ;;  %v6698_v7 = vld [vmem:[%s12328_s10 + $0x128] sm:$0xff] }
 0xebf   : > { %8746 = vmatpush3.msra.mxu0 %v11694_v54  ;;  %8105 = vmatpush3.msra.mxu1 %v6674_v11  ;;  %v6686_v54 = vld [vmem:[%s12328_s10 + $0xc8] sm:$0xff]  ;;  %v11947_v11 = vld [vmem:[%s12311_s3 + $0x30] sm:$0xff] }
 0xec0   : > { %8747 = vmatprep.subr.mxu0 %v9120_v1  ;;  %8106 = vmatprep.subr.mxu1 %v6689_v46  ;;  %v6697_v46 = vld [vmem:[%s12328_s10 + $0x120] sm:$0xff] }
 0xec1   : > { %8748 = vmatpush3.msra.mxu0 %v11699_v35  ;;  %8107 = vmatpush3.msra.mxu1 %v6673_v48  ;;  %v6685_v35 = vld [vmem:[%s12328_s10 + $0xc0] sm:$0xff]  ;;  %v11954_v48 = vld [vmem:[%s12311_s3 + $0x28] sm:$0xff] }
 0xec2   : > { %8749 = vmatprep.subr.mxu0 %v9120_v1  ;;  %8108 = vmatprep.subr.mxu1 %v6688_v24  ;;  %v6696_v24 = vld [vmem:[%s12328_s10 + $0x118] sm:$0xff] }
 0xec3   : > { %8750 = vmatpush3.msra.mxu0 %v11704_v55  ;;  %8109 = vmatpush3.msra.mxu1 %v6672_v8  ;;  %v6684_v55 = vld [vmem:[%s12328_s10 + $0xb8] sm:$0xff]  ;;  %v11961_v8 = vld [vmem:[%s12311_s3 + $0x20] sm:$0xff] }
 0xec4   : > { %8751 = vmatprep.subr.mxu0 %v9120_v1  ;;  %8110 = vmatprep.subr.mxu1 %v6687_v28  ;;  %v11967_v28 = vld [vmem:[%s12311_s3 + $0x18] sm:$0xff] }
 0xec5   : > { %8752 = vmatpush3.msra.mxu0 %v11709_v56  ;;  %8111 = vmatpush3.msra.mxu1 %v6671_v17  ;;  %v6683_v56 = vld [vmem:[%s12328_s10 + $0xb0] sm:$0xff] }
 0xec6   : > { %8753 = vmatprep.subr.mxu0 %v9120_v1  ;;  %8112 = vmatprep.subr.mxu1 %v6686_v54  ;;  %v11973_v17 = vld [vmem:[%s12311_s3 + $0x10] sm:$0xff]  ;;  %v11980_v54 = vld [vmem:[%s12311_s3 + $0x8] sm:$0xff] }
 0xec7   : > { %8754 = vmatpush3.msra.mxu0 %v11714_v22  ;;  %8113 = vmatpush3.msra.mxu1 %v6670_v2  ;;  %v6682_v22 = vld [vmem:[%s12328_s10 + $0xa8] sm:$0xff]  ;;  %v11985_v2 = vld [vmem:[%s12311_s3] sm:$0xff]  ;;  %s12333_s3 = sld [smem:[#allocation25_spill]] }
 0xec8   : > { %8755 = vmatprep.subr.mxu0 %v9120_v1  ;;  %8114 = vmatprep.subr.mxu1 %v6685_v35  ;;  %v6695_v35 = vld [vmem:[%s12328_s10 + $0x110] sm:$0xff] }
 0xec9   : > { %8756 = vmatpush3.msra.mxu0 %v11719_v4  ;;  %8115 = vmatpush3.msra.mxu1 %v6669_v21  ;;  %v6681_v4 = vld [vmem:[%s12328_s10 + $0xa0] sm:$0xff]  ;;  %v6694_v21 = vld [vmem:[%s12328_s10 + $0x108] sm:$0xff] }
 0xeca   : > { %8757 = vmatprep.subr.mxu0 %v9120_v1  ;;  %8116 = vmatprep.subr.mxu1 %v6684_v55  ;;  %v6693_v55 = vld [vmem:[%s12328_s10 + $0x100] sm:$0xff] }
 0xecb   : > { %8758 = vmatpush3.msra.mxu0 %v11724_v45  ;;  %8117 = vmatpush3.msra.mxu1 %v6668_v26  ;;  %v6680_v45 = vld [vmem:[%s12328_s10 + $0x98] sm:$0xff] }
 0xecc   : > { %8759 = vmatprep.subr.mxu0 %v9120_v1  ;;  %8118 = vmatprep.subr.mxu1 %v6683_v56  ;;  %v7025_v26 = vld [vmem:[%s12331_s23 + $0xf8] sm:$0xff] }
 0xecd   : > { %8760 = vmatpush3.msra.mxu0 %v11729_v3  ;;  %8119 = vmatpush3.msra.mxu1 %v6667_v49  ;;  %v6663_v3 = vld [vmem:[%s12328_s10 + $0x10] sm:$0xff]  ;;  %v7009_v56 = vld [vmem:[%s12331_s23 + $0x78] sm:$0xff] }
 0xece   : > { %8761 = vmatprep.subr.mxu0 %v9120_v1  ;;  %8120 = vmatprep.subr.mxu1 %v6682_v22  ;;  %v7024_v49 = vld [vmem:[%s12331_s23 + $0xf0] sm:$0xff] }
 0xecf   : > { %8762 = vmatpush3.msra.mxu0 %v11734_v6  ;;  %8121 = vmatpush3.msra.mxu1 %v6666_v52  ;;  %v6678_v6 = vld [vmem:[%s12328_s10 + $0x88] sm:$0xff]  ;;  %v7008_v22 = vld [vmem:[%s12331_s23 + $0x70] sm:$0xff] }
 0xed0   : > { %8763 = vmatprep.subr.mxu0 %v9120_v1  ;;  %8122 = vmatprep.subr.mxu1 %v6681_v4  ;;  %v7023_v52 = vld [vmem:[%s12331_s23 + $0xe8] sm:$0xff] }
 0xed1   : > { %8764 = vmatpush3.msra.mxu0 %v11739_v37  ;;  %8123 = vmatpush3.msra.mxu1 %v6665_v58  ;;  %v6662_v37 = vld [vmem:[%s12328_s10 + $0x8] sm:$0xff]  ;;  %v7022_v58 = vld [vmem:[%s12331_s23 + $0xe0] sm:$0xff] }
 0xed2   : > { %8765 = vmatprep.subr.mxu0 %v9120_v1  ;;  %8124 = vmatprep.subr.mxu1 %v6680_v45  ;;  %v7007_v4 = vld [vmem:[%s12331_s23 + $0x68] sm:$0xff]  ;;  %v7006_v45 = vld [vmem:[%s12331_s23 + $0x60] sm:$0xff] }
 0xed3   : > { %8766 = vmatpush3.msra.mxu0 %v11744_v13  ;;  %8125 = vmatpush3.msra.mxu1 %v6664_v63  ;;  %v6677_v13 = vld [vmem:[%s12328_s10 + $0x80] sm:$0xff]  ;;  %v7021_v63 = vld [vmem:[%s12331_s23 + $0xd8] sm:$0xff] }
 0xed4   : > { %8767 = vmatprep.subr.mxu0 %v9120_v1  ;;  %8126 = vmatprep.subr.mxu1 %v6679_v53  ;;  %v7005_v53 = vld [vmem:[%s12331_s23 + $0x58] sm:$0xff] }
 0xed5   : > { %8768 = vmatpush3.msra.mxu0 %v11749_v16  ;;  %8773 = vmatprep.mubr.msk.f32.mxu0 %vm9121_vm0, %v9120_v1  ;;  %v6661_v16 = vld [vmem:[%s12328_s10] sm:$0xff] }
 0xed6   : > { %8769 = vmatprep.subr.mxu0 %v9120_v1  ;;  %8127 = vmatpush3.msra.mxu1 %v6663_v3  ;;  %v7020_v3 = vld [vmem:[%s12331_s23 + $0xd0] sm:$0xff] }
 0xed7   : > { %8770 = vmatpush3.msra.mxu0 %v11754_v18  ;;  %8128 = vmatprep.subr.mxu1 %v6678_v6  ;;  %v5129_v18 = vld [vmem:[%s12330_s0] sm:$0x3]  ;;  %v7004_v6 = vld [vmem:[%s12331_s23 + $0x50] sm:$0xff] }
 0xed8   : > { %8771 = vmatprep.subr.mxu0 %v9120_v1  ;;  %8129 = vmatpush3.msra.mxu1 %v6662_v37  ;;  %v7019_v37 = vld [vmem:[%s12331_s23 + $0xc8] sm:$0xff] }
 0xed9   : > { %8772 = vmatpush3.msra.mxu0 %v11759_v20  ;;  %8130 = vmatprep.subr.mxu1 %v6677_v13  ;;  %v5134_v20 = vrot.slane %v5129_v18, %v9496_v57  ;;  %v7003_v13 = vld [vmem:[%s12331_s23 + $0x48] sm:$0xff]  ;;  %v7002_v18 = vld [vmem:[%s12331_s23 + $0x40] sm:$0xff] }
 0xeda   : > { %8776 = vmatprep.subr.mxu0 %v9120_v1  ;;  %8131 = vmatpush3.msra.mxu1 %v6661_v16  ;;  %v7018_v16 = vld [vmem:[%s12331_s23 + $0xc0] sm:$0xff] }
 0xedb   : > { %8811 = vmatprep.subr.mxu1 %v9120_v1  ;;  %v5141_v9 = vadd.f32 %v5134_v20, %v11199_v60  ;;  %v6707_v60 = vld [vmem:[%s12328_s10 + $0x170] sm:$0xff]  ;;  %v7017_v20 = vld [vmem:[%s12331_s23 + $0xb8] sm:$0xff] }
 0xf7a   : > { %v6495_v39 = vpop.f32.mrf.mxu0  ;;  %v6583_v59 = vpop.f32.mrf.mxu1 }
 0xf7b   : > { %v11872_v12 = vadd.f32 %v6495_v39, %v5141_v9  ;;  %v6587_v62 = vmul.f32 0.95, %v6583_v59  ;;  %v7001_v9 = vld [vmem:[%s12331_s23 + $0x38] sm:$0xff]  ;;  %v7016_v39 = vld [vmem:[%s12331_s23 + $0xb0] sm:$0xff] }
 0xf7c   : > { %v8740_v19 = vpop.f32.mrf.mxu1  ;;  %v7000_v59 = vld [vmem:[%s12331_s23 + $0x30] sm:$0xff] }
 0xf7d   : > { %v6588_v25 = vadd.f32 %v6587_v62, %v11875_v15  ;;  %v7015_v62 = vld [vmem:[%s12331_s23 + $0xa8] sm:$0xff] }
 0xf7e   : > { %v6999_v19 = vld [vmem:[%s12331_s23 + $0x28] sm:$0xff] }
 0xf7f   : > { %8774 = vmatmul.mubr.f32.vlgmr.msra.gmra.mxu0 %v6588_v25  ;;  %6774 = vmatprep.mubr.f32.mxu1 %v6588_v25  ;;  %v7014_v25 = vld [vmem:[%s12331_s23 + $0xa0] sm:$0xff] }
 0xf80   : > { %6775 = vmatmul.mubr.f32.vlgmr.msra.gmra.mxu1 %v11799_v43  ;;  %8777 = vmatpush3.msra.mxu0 %v6708_v30  ;;  %v6998_v30 = vld [vmem:[%s12331_s23 + $0x20] sm:$0xff] }
 0xf81   : > { %8812 = vmatpush3.msra.mxu1 %v11882_v31  ;;  %8843 = vmatprep.mubr.msk.f32.mxu1 %vm9121_vm0, %v9120_v1 }
 0xf82   : > { %8813 = vmatprep.subr.mxu1 %v9120_v1  ;;  %8778 = vmatprep.subr.mxu0 %v9120_v1 }
 0xf83   : > { %8814 = vmatpush3.msra.mxu1 %v11891_v34  ;;  %8779 = vmatpush3.msra.mxu0 %v6707_v60  ;;  %v7013_v60 = vld [vmem:[%s12331_s23 + $0x98] sm:$0xff] }
 0xf84   : > { %8815 = vmatprep.subr.mxu1 %v9120_v1  ;;  %8780 = vmatprep.subr.mxu0 %v9120_v1 }
 0xf85   : > { %8816 = vmatpush3.msra.mxu1 %v11898_v36  ;;  %8781 = vmatpush3.msra.mxu0 %v6706_v32  ;;  %v6997_v32 = vld [vmem:[%s12331_s23 + $0x18] sm:$0xff] }
 0xf86   : > { %8817 = vmatprep.subr.mxu1 %v9120_v1  ;;  %8782 = vmatprep.subr.mxu0 %v9120_v1 }
 0xf87   : > { %8818 = vmatpush3.msra.mxu1 %v11905_v38  ;;  %8783 = vmatpush3.msra.mxu0 %v6705_v10  ;;  %v7012_v10 = vld [vmem:[%s12331_s23 + $0x90] sm:$0xff] }
 0xf88   : > { %8819 = vmatprep.subr.mxu1 %v9120_v1  ;;  %8784 = vmatprep.subr.mxu0 %v9120_v1 }
 0xf89   : > { %8820 = vmatpush3.msra.mxu1 %v11912_v27  ;;  %8785 = vmatpush3.msra.mxu0 %v6704_v61  ;;  %v6996_v61 = vld [vmem:[%s12331_s23 + $0x10] sm:$0xff] }
 0xf8a   : > { %8821 = vmatprep.subr.mxu1 %v9120_v1  ;;  %8786 = vmatprep.subr.mxu0 %v9120_v1 }
 0xf8b   : > { %8822 = vmatpush3.msra.mxu1 %v11919_v41  ;;  %8787 = vmatpush3.msra.mxu0 %v6703_v47  ;;  %v7011_v47 = vld [vmem:[%s12331_s23 + $0x88] sm:$0xff] }
 0xf8c   : > { %8823 = vmatprep.subr.mxu1 %v9120_v1  ;;  %8788 = vmatprep.subr.mxu0 %v9120_v1 }
 0xf8d   : > { %8824 = vmatpush3.msra.mxu1 %v11926_v29  ;;  %8789 = vmatpush3.msra.mxu0 %v6702_v40  ;;  %v6995_v40 = vld [vmem:[%s12331_s23 + $0x8] sm:$0xff] }
 0xf8e   : > { %8825 = vmatprep.subr.mxu1 %v9120_v1  ;;  %8790 = vmatprep.subr.mxu0 %v9120_v1 }
 0xf8f   : > { %8826 = vmatpush3.msra.mxu1 %v11933_v0  ;;  %8791 = vmatpush3.msra.mxu0 %v6701_v50  ;;  %v7010_v50 = vld [vmem:[%s12331_s23 + $0x80] sm:$0xff] }
 0xf90   : > { %8827 = vmatprep.subr.mxu1 %v9120_v1  ;;  %8792 = vmatprep.subr.mxu0 %v9120_v1 }
 0xf91   : > { %8828 = vmatpush3.msra.mxu1 %v11940_v42  ;;  %8793 = vmatpush3.msra.mxu0 %v6700_v14  ;;  %v6994_v14 = vld [vmem:[%s12331_s23] sm:$0xff] }
 0xf92   : > { %8829 = vmatprep.subr.mxu1 %v9120_v1  ;;  %8794 = vmatprep.subr.mxu0 %v9120_v1 }
 0xf93   : > { %8830 = vmatpush3.msra.mxu1 %v11947_v11  ;;  %8795 = vmatpush3.msra.mxu0 %v6699_v5  ;;  %v12027_v5 = vpop.f32.mrf.mxu0 }
 0xf94   : > { %8831 = vmatprep.subr.mxu1 %v9120_v1  ;;  %8796 = vmatprep.subr.mxu0 %v9120_v1 }
 0xf95   : > { %8832 = vmatpush3.msra.mxu1 %v11954_v48  ;;  %8797 = vmatpush3.msra.mxu0 %v6698_v7 }
 0xf96   : > { %8833 = vmatprep.subr.mxu1 %v9120_v1  ;;  %8798 = vmatprep.subr.mxu0 %v9120_v1 }
 0xf97   : > { %8834 = vmatpush3.msra.mxu1 %v11961_v8  ;;  %8799 = vmatpush3.msra.mxu0 %v6697_v46 }
 0xf98   : > { %8835 = vmatprep.subr.mxu1 %v9120_v1  ;;  %8800 = vmatprep.subr.mxu0 %v9120_v1 }
 0xf99   : > { %8836 = vmatpush3.msra.mxu1 %v11967_v28  ;;  %8801 = vmatpush3.msra.mxu0 %v6696_v24 }
 0xf9a   : > { %8837 = vmatprep.subr.mxu1 %v9120_v1  ;;  %8802 = vmatprep.subr.mxu0 %v9120_v1 }
 0xf9b   : > { %8838 = vmatpush3.msra.mxu1 %v11973_v17  ;;  %8808 = vmatprep.mubr.msk.f32.mxu0 %vm9121_vm0, %v9120_v1 }
 0xf9c   : > { %8839 = vmatprep.subr.mxu1 %v9120_v1  ;;  %8803 = vmatpush3.msra.mxu0 %v6695_v35 }
 0xf9d   : > { %8840 = vmatpush3.msra.mxu1 %v11980_v54  ;;  %8804 = vmatprep.subr.mxu0 %v9120_v1 }
 0xf9e   : > { %8841 = vmatprep.subr.mxu1 %v9120_v1  ;;  %8805 = vmatpush3.msra.mxu0 %v6694_v21 }
 0xf9f   : > { %8842 = vmatpush3.msra.mxu1 %v11985_v2  ;;  %8806 = vmatprep.subr.mxu0 %v9120_v1 }
 0xfa0   : > { %8844 = vmatmul.mubr.f32.vlgmr.msra.gmra.mxu1 %v11799_v43  ;;  %8807 = vmatpush3.msra.mxu0 %v6693_v55 }
 0xfa1   : > { %8846 = vmatprep.subr.mxu0 %v9120_v1  ;;  %8186 = vmatprep.subr.mxu1 %v7025_v26 }
 0xfa2   : > { %8187 = vmatpush3.msra.mxu1 %v7009_v56  ;;  %v7028_v56 = vld [vmem:[%s12331_s23 + $0x110] sm:$0xff] }
 0xfa3   : > { %8188 = vmatprep.subr.mxu1 %v7024_v49  ;;  %v7027_v49 = vld [vmem:[%s12331_s23 + $0x108] sm:$0xff] }
 0xfa4   : > { %8189 = vmatpush3.msra.mxu1 %v7008_v22  ;;  %v7026_v22 = vld [vmem:[%s12331_s23 + $0x100] sm:$0xff] }
 0xfa5   : > { %8190 = vmatprep.subr.mxu1 %v7023_v52  ;;  %v6709_v52 = vld [vmem:[%s12332_s2] sm:$0x1]  ;;  %s12336_s2 = sld [smem:[#allocation26_spill]] }
 0xfa6   : > { %8191 = vmatpush3.msra.mxu1 %v7007_v4 }
 0xfa7   : > { %8192 = vmatprep.subr.mxu1 %v7022_v58 }
 0xfa8   : > { %8193 = vmatpush3.msra.mxu1 %v7006_v45 }
 0xfa9   : > { %8194 = vmatprep.subr.mxu1 %v7021_v63 }
 0xfaa   : > { %8195 = vmatpush3.msra.mxu1 %v7005_v53 }
 0xfab   : > { %8196 = vmatprep.subr.mxu1 %v7020_v3 }
 0xfac   : > { %8197 = vmatpush3.msra.mxu1 %v7004_v6 }
 0xfad   : > { %8198 = vmatprep.subr.mxu1 %v7019_v37 }
 0xfae   : > { %8199 = vmatpush3.msra.mxu1 %v7003_v13 }
 0xfaf   : > { %8200 = vmatprep.subr.mxu1 %v7018_v16 }
 0xfb0   : > { %8201 = vmatpush3.msra.mxu1 %v7002_v18  ;;  %v7042_v18 = vld [vmem:[%s12333_s3] sm:$0x1]  ;;  %s12335_s3 = sld [smem:[#allocation30_spill]] }
 0xfb1   : > { %8202 = vmatprep.subr.mxu1 %v7017_v20 }
 0xfb2   : > { %8203 = vmatpush3.msra.mxu1 %v7001_v9 }
 0xfb3   : > { %8204 = vmatprep.subr.mxu1 %v7016_v39 }
 0xfb4   : > { %8205 = vmatpush3.msra.mxu1 %v7000_v59 }
 0xfb5   : > { %8206 = vmatprep.subr.mxu1 %v7015_v62 }
 0xfb6   : > { %8207 = vmatpush3.msra.mxu1 %v6999_v19 }
 0xfb7   : > { %8208 = vmatprep.subr.mxu1 %v7014_v25  ;;  %v7237_v25 = vld [vmem:[%s12334_s5 + $0xf8] sm:$0xff] }
 0xfb8   : > { %8209 = vmatpush3.msra.mxu1 %v6998_v30  ;;  %v7236_v30 = vld [vmem:[%s12334_s5 + $0xf0] sm:$0xff] }
 0xfb9   : > { %8210 = vmatprep.subr.mxu1 %v7013_v60  ;;  %v7235_v60 = vld [vmem:[%s12334_s5 + $0xe8] sm:$0xff] }
 0xfba   : > { %8211 = vmatpush3.msra.mxu1 %v6997_v32  ;;  %v7234_v32 = vld [vmem:[%s12334_s5 + $0xe0] sm:$0xff] }
 0xfbb   : > { %8212 = vmatprep.subr.mxu1 %v7012_v10  ;;  %v7233_v10 = vld [vmem:[%s12334_s5 + $0xd8] sm:$0xff] }
 0xfbc   : > { %8213 = vmatpush3.msra.mxu1 %v6996_v61  ;;  %v7232_v61 = vld [vmem:[%s12334_s5 + $0xd0] sm:$0xff] }
 0xfbd   : > { %8214 = vmatprep.subr.mxu1 %v7011_v47  ;;  %v7231_v47 = vld [vmem:[%s12334_s5 + $0xc8] sm:$0xff] }
 0xfbe   : > { %8215 = vmatpush3.msra.mxu1 %v6995_v40 }
 0xfbf   : > { %8216 = vmatprep.subr.mxu1 %v7010_v50 }
 0xfc0   : > { %8217 = vmatpush3.msra.mxu1 %v6994_v14 }
 0xfc1   : > { %7238 = vmatprep.subr.mxu1 %v7237_v25  ;;  %v7336_v25 = vld [vmem:[%s12335_s3 + $0x48] sm:$0xff] }
0x103f   : > { %v6655_v7 = vpop.f32.mrf.mxu0 }
0x1040   : > { %v6659_v46 = vmul.f32 0.95, %v6655_v7  ;;  %v8132_v24 = vpop.f32.mrf.mxu1 }
0x1041   : > { %v8775_v35 = vpop.f32.mrf.mxu0 }
0x1042   : > { %v6660_v21 = vadd.f32 %v6659_v46, %v11875_v15  ;;  %v8133_v55 = vpop.f32.mrf.mxu1  ;;  %v7229_v46 = vld [vmem:[%s12334_s5 + $0xb8] sm:$0xff]  ;;  %v7227_v35 = vld [vmem:[%s12334_s5 + $0xa8] sm:$0xff] }
0x1043   : > { %v12030_v26 = vadd.f32 %v8133_v55, %v8132_v24  ;;  %v7228_v24 = vld [vmem:[%s12334_s5 + $0xb0] sm:$0xff]  ;;  %v7225_v55 = vld [vmem:[%s12334_s5 + $0x98] sm:$0xff] }
0x1044   : > { %8809 = vmatmul.mubr.f32.vlgmr.msra.gmra.mxu0 %v6660_v21  ;;  %v7226_v21 = vld [vmem:[%s12334_s5 + $0xa0] sm:$0xff] }
0x1045   : > { %8847 = vmatpush3.msra.mxu0 %v11882_v31  ;;  %8878 = vmatprep.mubr.msk.f32.mxu0 %vm9121_vm0, %v9120_v1  ;;  %v6777_v4 = vadd.f32 %v12030_v26, %v6709_v52  ;;  %v7224_v26 = vld [vmem:[%s12334_s5 + $0x90] sm:$0xff]  ;;  %v7356_v52 = vld [vmem:[%s12335_s3 + $0xe8] sm:$0xff] }
0x1046   : > { %8848 = vmatprep.subr.mxu0 %v9120_v1 }
0x1047   : > { %8849 = vmatpush3.msra.mxu0 %v11891_v34 }
0x1048   : > { %8850 = vmatprep.subr.mxu0 %v9120_v1 }
0x1049   : > { %8851 = vmatpush3.msra.mxu0 %v11898_v36 }
0x104a   : > { %8852 = vmatprep.subr.mxu0 %v9120_v1 }
0x104b   : > { %8853 = vmatpush3.msra.mxu0 %v11905_v38 }
0x104c   : > { %8854 = vmatprep.subr.mxu0 %v9120_v1 }
0x104d   : > { %8855 = vmatpush3.msra.mxu0 %v11912_v27  ;;  %v7041_v27 = vld [vmem:[%s12331_s23 + $0x178] sm:$0xff] }
0x104e   : > { %8856 = vmatprep.subr.mxu0 %v9120_v1 }
0x104f   : > { %8857 = vmatpush3.msra.mxu0 %v11919_v41  ;;  %v7040_v41 = vld [vmem:[%s12331_s23 + $0x170] sm:$0xff] }
0x1050   : > { %8858 = vmatprep.subr.mxu0 %v9120_v1 }
0x1051   : > { %8859 = vmatpush3.msra.mxu0 %v11926_v29  ;;  %v7039_v29 = vld [vmem:[%s12331_s23 + $0x168] sm:$0xff] }
0x1052   : > { %8860 = vmatprep.subr.mxu0 %v9120_v1 }
0x1053   : > { %8861 = vmatpush3.msra.mxu0 %v11933_v0  ;;  %v7038_v0 = vld [vmem:[%s12331_s23 + $0x160] sm:$0xff] }
0x1054   : > { %8862 = vmatprep.subr.mxu0 %v9120_v1 }
0x1055   : > { %8863 = vmatpush3.msra.mxu0 %v11940_v42  ;;  %v7036_v42 = vld [vmem:[%s12331_s23 + $0x150] sm:$0xff] }
0x1056   : > { %8864 = vmatprep.subr.mxu0 %v9120_v1 }
0x1057   : > { %8865 = vmatpush3.msra.mxu0 %v11947_v11  ;;  %v7035_v11 = vld [vmem:[%s12331_s23 + $0x148] sm:$0xff] }
0x1058   : > { %8866 = vmatprep.subr.mxu0 %v9120_v1 }
0x1059   : > { %8867 = vmatpush3.msra.mxu0 %v11954_v48  ;;  %v7034_v48 = vld [vmem:[%s12331_s23 + $0x140] sm:$0xff] }
0x105a   : > { %8868 = vmatprep.subr.mxu0 %v9120_v1 }
0x105b   : > { %8869 = vmatpush3.msra.mxu0 %v11961_v8  ;;  %v7033_v8 = vld [vmem:[%s12331_s23 + $0x138] sm:$0xff] }
0x105c   : > { %8870 = vmatprep.subr.mxu0 %v9120_v1 }
0x105d   : > { %8871 = vmatpush3.msra.mxu0 %v11967_v28  ;;  %v7032_v28 = vld [vmem:[%s12331_s23 + $0x130] sm:$0xff] }
0x105e   : > { %8872 = vmatprep.subr.mxu0 %v9120_v1 }
0x105f   : > { %8873 = vmatpush3.msra.mxu0 %v11973_v17  ;;  %v7031_v17 = vld [vmem:[%s12331_s23 + $0x128] sm:$0xff] }
0x1060   : > { %v6916_v31 = vpop.f32.mrf.mxu1  ;;  %8874 = vmatprep.subr.mxu0 %v9120_v1 }
0x1061   : > { %v6920_v34 = vmul.f32 0.95, %v6916_v31  ;;  %8875 = vmatpush3.msra.mxu0 %v11980_v54  ;;  %v7030_v54 = vld [vmem:[%s12331_s23 + $0x120] sm:$0xff]  ;;  %v7223_v31 = vld [vmem:[%s12334_s5 + $0x88] sm:$0xff] }
0x1062   : > { %v8845_v36 = vpop.f32.mrf.mxu1  ;;  %8876 = vmatprep.subr.mxu0 %v9120_v1 }
0x1063   : > { %v6921_v38 = vadd.f32 %v6920_v34, %v11875_v15  ;;  %8877 = vmatpush3.msra.mxu0 %v11985_v2  ;;  %v7029_v2 = vld [vmem:[%s12331_s23 + $0x118] sm:$0xff]  ;;  %v7222_v34 = vld [vmem:[%s12334_s5 + $0x80] sm:$0xff] }
0x1064   : > { %8881 = vmatprep.subr.mxu0 %v9120_v1  ;;  %v7221_v36 = vld [vmem:[%s12334_s5 + $0x78] sm:$0xff] }
0x1065   : > { %8879 = vmatmul.mubr.f32.vlgmr.msra.gmra.mxu0 %v6921_v38  ;;  %7107 = vmatprep.mubr.f32.mxu1 %v6921_v38  ;;  %v7220_v38 = vld [vmem:[%s12334_s5 + $0x70] sm:$0xff] }
0x1066   : > { %7108 = vmatmul.mubr.f32.vlgmr.msra.gmra.mxu1 %v11799_v43  ;;  %8913 = vmatprep.mubr.msk.f32.mxu0 %vm9121_vm0, %v9120_v1  ;;  %v7037_v43 = vld [vmem:[%s12331_s23 + $0x158] sm:$0xff] }
0x1067   : > { %7302 = vmatprep.mubr.f32.mxu1 %v9120_v1  ;;  %8882 = vmatpush3.msra.mxu0 %v7041_v27  ;;  %v7219_v27 = vld [vmem:[%s12334_s5 + $0x68] sm:$0xff] }
0x1068   : > { %8883 = vmatprep.subr.mxu0 %v9120_v1  ;;  %7239 = vmatpush1.msra.mxu1 %v7236_v30  ;;  %v7335_v30 = vld [vmem:[%s12335_s3 + $0x40] sm:$0xff] }
0x1069   : > { %8884 = vmatpush3.msra.mxu0 %v7040_v41  ;;  %7240 = vmatprep.subr.mxu1 %v7235_v60  ;;  %v7218_v41 = vld [vmem:[%s12334_s5 + $0x60] sm:$0xff]  ;;  %v7334_v60 = vld [vmem:[%s12335_s3 + $0x38] sm:$0xff] }
0x106a   : > { %8885 = vmatprep.subr.mxu0 %v9120_v1  ;;  %7241 = vmatpush1.msra.mxu1 %v7234_v32  ;;  %v7333_v32 = vld [vmem:[%s12335_s3 + $0x30] sm:$0xff] }
0x106b   : > { %8886 = vmatpush3.msra.mxu0 %v7039_v29  ;;  %7242 = vmatprep.subr.mxu1 %v7233_v10  ;;  %v7217_v29 = vld [vmem:[%s12334_s5 + $0x58] sm:$0xff]  ;;  %v7332_v10 = vld [vmem:[%s12335_s3 + $0x28] sm:$0xff] }
0x106c   : > { %8887 = vmatprep.subr.mxu0 %v9120_v1  ;;  %7243 = vmatpush1.msra.mxu1 %v7232_v61  ;;  %v7331_v61 = vld [vmem:[%s12335_s3 + $0x20] sm:$0xff] }
0x106d   : > { %8888 = vmatpush3.msra.mxu0 %v7038_v0  ;;  %7244 = vmatprep.subr.mxu1 %v7231_v47  ;;  %v7216_v0 = vld [vmem:[%s12334_s5 + $0x50] sm:$0xff]  ;;  %v7330_v47 = vld [vmem:[%s12335_s3 + $0x18] sm:$0xff] }
0x106e   : > { %8889 = vmatprep.subr.mxu0 %v9120_v1  ;;  %7245 = vmatpush1.msra.mxu1 %v7230_v23  ;;  %v7329_v23 = vld [vmem:[%s12335_s3 + $0x10] sm:$0xff] }
0x106f   : > { %8890 = vmatpush3.msra.mxu0 %v7037_v43  ;;  %7246 = vmatprep.subr.mxu1 %v7229_v46  ;;  %v7215_v43 = vld [vmem:[%s12334_s5 + $0x48] sm:$0xff] }
0x1070   : > { %8891 = vmatprep.subr.mxu0 %v9120_v1  ;;  %7247 = vmatpush1.msra.mxu1 %v7228_v24  ;;  %v7388_v46 = vld [vmem:[%s12335_s3 + $0x1e8] sm:$0xff]  ;;  %v7387_v24 = vld [vmem:[%s12335_s3 + $0x1e0] sm:$0xff] }
0x1071   : > { %8892 = vmatpush3.msra.mxu0 %v7036_v42  ;;  %7248 = vmatprep.subr.mxu1 %v7227_v35  ;;  %v7214_v42 = vld [vmem:[%s12334_s5 + $0x40] sm:$0xff]  ;;  %v7386_v35 = vld [vmem:[%s12335_s3 + $0x1d8] sm:$0xff] }
0x1072   : > { %8893 = vmatprep.subr.mxu0 %v9120_v1  ;;  %7249 = vmatpush1.msra.mxu1 %v7226_v21  ;;  %v7385_v21 = vld [vmem:[%s12335_s3 + $0x1d0] sm:$0xff] }
0x1073   : > { %8894 = vmatpush3.msra.mxu0 %v7035_v11  ;;  %7250 = vmatprep.subr.mxu1 %v7225_v55  ;;  %v7213_v11 = vld [vmem:[%s12334_s5 + $0x38] sm:$0xff]  ;;  %v7384_v55 = vld [vmem:[%s12335_s3 + $0x1c8] sm:$0xff] }
0x1074   : > { %8895 = vmatprep.subr.mxu0 %v9120_v1  ;;  %7251 = vmatpush1.msra.mxu1 %v7224_v26  ;;  %v7383_v26 = vld [vmem:[%s12335_s3 + $0x1c0] sm:$0xff] }
0x1075   : > { %8896 = vmatpush3.msra.mxu0 %v7034_v48  ;;  %7252 = vmatprep.subr.mxu1 %v7223_v31  ;;  %v7212_v48 = vld [vmem:[%s12334_s5 + $0x30] sm:$0xff]  ;;  %v7382_v31 = vld [vmem:[%s12335_s3 + $0x1b8] sm:$0xff] }
0x1076   : > { %8897 = vmatprep.subr.mxu0 %v9120_v1  ;;  %7253 = vmatpush1.msra.mxu1 %v7222_v34  ;;  %v7381_v34 = vld [vmem:[%s12335_s3 + $0x1b0] sm:$0xff] }
0x1077   : > { %8898 = vmatpush3.msra.mxu0 %v7033_v8  ;;  %7254 = vmatprep.subr.mxu1 %v7221_v36  ;;  %v7211_v8 = vld [vmem:[%s12334_s5 + $0x28] sm:$0xff] }
0x1078   : > { %8899 = vmatprep.subr.mxu0 %v9120_v1  ;;  %7255 = vmatpush1.msra.mxu1 %v7220_v38  ;;  %v7380_v36 = vld [vmem:[%s12335_s3 + $0x1a8] sm:$0xff]  ;;  %v7379_v38 = vld [vmem:[%s12335_s3 + $0x1a0] sm:$0xff] }
0x1079   : > { %8900 = vmatpush3.msra.mxu0 %v7032_v28  ;;  %7256 = vmatprep.subr.mxu1 %v7219_v27  ;;  %v7210_v28 = vld [vmem:[%s12334_s5 + $0x20] sm:$0xff]  ;;  %v7378_v27 = vld [vmem:[%s12335_s3 + $0x198] sm:$0xff] }
0x107a   : > { %8901 = vmatprep.subr.mxu0 %v9120_v1  ;;  %7257 = vmatpush1.msra.mxu1 %v7218_v41  ;;  %v7377_v41 = vld [vmem:[%s12335_s3 + $0x190] sm:$0xff] }
0x107b   : > { %8902 = vmatpush3.msra.mxu0 %v7031_v17  ;;  %7258 = vmatprep.subr.mxu1 %v7217_v29  ;;  %v7209_v17 = vld [vmem:[%s12334_s5 + $0x18] sm:$0xff]  ;;  %v7376_v29 = vld [vmem:[%s12335_s3 + $0x188] sm:$0xff] }
0x107c   : > { %8903 = vmatprep.subr.mxu0 %v9120_v1  ;;  %7259 = vmatpush1.msra.mxu1 %v7216_v0  ;;  %v7375_v0 = vld [vmem:[%s12335_s3 + $0x180] sm:$0xff] }
0x107d   : > { %8904 = vmatpush3.msra.mxu0 %v7030_v54  ;;  %7260 = vmatprep.subr.mxu1 %v7215_v43  ;;  %v7208_v54 = vld [vmem:[%s12334_s5 + $0x10] sm:$0xff]  ;;  %v7374_v43 = vld [vmem:[%s12335_s3 + $0x178] sm:$0xff] }
0x107e   : > { %8905 = vmatprep.subr.mxu0 %v9120_v1  ;;  %7261 = vmatpush1.msra.mxu1 %v7214_v42  ;;  %v7373_v42 = vld [vmem:[%s12335_s3 + $0x170] sm:$0xff] }
0x107f   : > { %8906 = vmatpush3.msra.mxu0 %v7029_v2  ;;  %7262 = vmatprep.subr.mxu1 %v7213_v11  ;;  %v7207_v2 = vld [vmem:[%s12334_s5 + $0x8] sm:$0xff] }
0x1080   : > { %8907 = vmatprep.subr.mxu0 %v9120_v1  ;;  %7263 = vmatpush1.msra.mxu1 %v7212_v48  ;;  %v7372_v11 = vld [vmem:[%s12335_s3 + $0x168] sm:$0xff]  ;;  %v7371_v48 = vld [vmem:[%s12335_s3 + $0x160] sm:$0xff] }
0x1081   : > { %8908 = vmatpush3.msra.mxu0 %v7028_v56  ;;  %7264 = vmatprep.subr.mxu1 %v7211_v8  ;;  %v7206_v56 = vld [vmem:[%s12334_s5] sm:$0xff]  ;;  %s12337_s5 = sld [smem:[#allocation27_spill]]  ;;  %v7370_v8 = vld [vmem:[%s12335_s3 + $0x158] sm:$0xff] }
0x1082   : > { %8909 = vmatprep.subr.mxu0 %v9120_v1  ;;  %7265 = vmatpush1.msra.mxu1 %v7210_v28  ;;  %v7369_v28 = vld [vmem:[%s12335_s3 + $0x150] sm:$0xff] }
0x1083   : > { %8910 = vmatpush3.msra.mxu0 %v7027_v49  ;;  %7266 = vmatprep.subr.mxu1 %v7209_v17  ;;  %v7358_v49 = vld [vmem:[%s12335_s3 + $0xf8] sm:$0xff] }
0x1084   : > { %8911 = vmatprep.subr.mxu0 %v9120_v1  ;;  %7267 = vmatpush1.msra.mxu1 %v7208_v54 }
0x1085   : > { %8912 = vmatpush3.msra.mxu0 %v7026_v22  ;;  %7268 = vmatprep.subr.mxu1 %v7207_v2  ;;  %v7357_v22 = vld [vmem:[%s12335_s3 + $0xf0] sm:$0xff] }
0x1086   : > { %7269 = vmatpush1.msra.mxu1 %v7206_v56  ;;  %7403 = vmatprep.subr.mxu0 %v7358_v49  ;;  %v7202_v49 = vld [vmem:[%s12336_s2] sm:$0x1]  ;;  %s12339_s2 = sld [smem:[#allocation29_spill]] }
0x1104   : > { %v6846_v58 = vpop.f32.mrf.mxu0 }
0x1105   : > { %v6847_v45 = vadd.f32 %v6846_v58, %v6777_v4  ;;  %v7355_v4 = vld [vmem:[%s12335_s3 + $0xe0] sm:$0xff]  ;;  %v7354_v58 = vld [vmem:[%s12335_s3 + $0xd8] sm:$0xff] }
0x1106   : > { %v8810_v63 = vpop.f32.mrf.mxu0 }
0x1107   : > { %v7352_v63 = vld [vmem:[%s12335_s3 + $0xc8] sm:$0xff] }
0x1125   : > { %v6988_v53 = vpop.f32.mrf.mxu0 }
0x1126   : > { %v6992_v3 = vmul.f32 0.95, %v6988_v53  ;;  %v8218_v13 = vpop.f32.mrf.mxu1  ;;  %v7351_v53 = vld [vmem:[%s12335_s3 + $0xc0] sm:$0xff] }
0x1127   : > { %v8880_v6 = vpop.f32.mrf.mxu0 }
0x1128   : > { %v6993_v37 = vadd.f32 %v6992_v3, %v11875_v15  ;;  %v8219_v1 = vpop.f32.mrf.mxu1  ;;  %v7350_v3 = vld [vmem:[%s12335_s3 + $0xb8] sm:$0xff]  ;;  %v7349_v6 = vld [vmem:[%s12335_s3 + $0xb0] sm:$0xff] }
0x1129   : > { %v8220_v16 = vadd.f32 %v8219_v1, %v8218_v13  ;;  %v7347_v13 = vld [vmem:[%s12335_s3 + $0xa0] sm:$0xff]  ;;  %v7346_v1 = vld [vmem:[%s12335_s3 + $0x98] sm:$0xff] }
0x112a   : > { %8914 = vmatmul.mubr.f32.vlgmr.msra.gmra.mxu0 %v6993_v37  ;;  %v7348_v37 = vld [vmem:[%s12335_s3 + $0xa8] sm:$0xff] }
0x112b   : > { %v7110_v20 = vadd.f32 %v8220_v16, %v7042_v18  ;;  %7404 = vmatpush1.msra.mxu0 %v7357_v22  ;;  %v7345_v16 = vld [vmem:[%s12335_s3 + $0x90] sm:$0xff]  ;;  %v7344_v18 = vld [vmem:[%s12335_s3 + $0x88] sm:$0xff] }
0x112c   : > { %7405 = vmatprep.subr.mxu0 %v7356_v52  ;;  %v7204_v52 = vld [vmem:[%s12337_s5] sm:$0x1]  ;;  %s12338_s5 = sld [smem:[#allocation21_spill]] }
0x112d   : > { %7406 = vmatpush1.msra.mxu0 %v7355_v4 }
0x112e   : > { %7407 = vmatprep.subr.mxu0 %v7354_v58 }
0x11ea   : > { %v7179_v9 = vpop.f32.mrf.mxu0 }
0x11eb   : > { %v7180_v39 = vadd.f32 %v7179_v9, %v7110_v20  ;;  %v7343_v20 = vld [vmem:[%s12335_s3 + $0x80] sm:$0xff]  ;;  %v7342_v9 = vld [vmem:[%s12335_s3 + $0x78] sm:$0xff] }
0x11ec   : > { %v8915_v59 = vpop.f32.mrf.mxu0 }
0x11ed   : > { %v7183_v62 = vadd.f32 %v7180_v39, %v6847_v45  ;;  %v7353_v45 = vld [vmem:[%s12335_s3 + $0xd0] sm:$0xff]  ;;  %v7340_v59 = vld [vmem:[%s12335_s3 + $0x68] sm:$0xff] }
0x11ee   : > { %7408 = vmatpush1.msra.mxu0 %v7353_v45  ;;  %v7341_v39 = vld [vmem:[%s12335_s3 + $0x70] sm:$0xff]  ;;  %v7368_v45 = vld [vmem:[%s12335_s3 + $0x148] sm:$0xff] }
0x11ef   : > { %v7184_v15 = vadd.f32 %v7183_v62, %v5867_v44  ;;  %7409 = vmatprep.subr.mxu0 %v7352_v63  ;;  %v7339_v62 = vld [vmem:[%s12335_s3 + $0x60] sm:$0xff] }
0x11f0   : > { %7410 = vmatpush1.msra.mxu0 %v7351_v53  ;;  %v7367_v63 = vld [vmem:[%s12335_s3 + $0x140] sm:$0xff]  ;;  %v7366_v53 = vld [vmem:[%s12335_s3 + $0x138] sm:$0xff] }
0x11f1   : > { %v7186_v19 = vsel %vm7185_vm9, %v7184_v15, 0.0  ;;  %7411 = vmatprep.subr.mxu0 %v7350_v3  ;;  %v7365_v3 = vld [vmem:[%s12335_s3 + $0x130] sm:$0xff] }
0x11f2   : > { %7187 = vadd.xlane.f32.xlu0 %v7186_v19  ;;  %7412 = vmatpush1.msra.mxu0 %v7349_v6  ;;  %v7337_v19 = vld [vmem:[%s12335_s3 + $0x50] sm:$0xff]  ;;  %v7363_v6 = vld [vmem:[%s12335_s3 + $0x120] sm:$0xff] }
0x11f3   : > { %7413 = vmatprep.subr.mxu0 %v7348_v37  ;;  %v7362_v37 = vld [vmem:[%s12335_s3 + $0x118] sm:$0xff] }
0x11f4   : > { %7414 = vmatpush1.msra.mxu0 %v7347_v13  ;;  %v7361_v13 = vld [vmem:[%s12335_s3 + $0x110] sm:$0xff] }
0x11f5   : > { %7415 = vmatprep.subr.mxu0 %v7346_v1  ;;  %v7360_v1 = vld [vmem:[%s12335_s3 + $0x108] sm:$0xff] }
0x11f6   : > { %7416 = vmatpush1.msra.mxu0 %v7345_v16  ;;  %v7359_v16 = vld [vmem:[%s12335_s3 + $0x100] sm:$0xff] }
0x11f7   : > { %7417 = vmatprep.subr.mxu0 %v7344_v18  ;;  %v7507_v18 = vld [vmem:[%s9340_s24 + $0xf8] sm:$0xff] }
0x11f8   : > { %7418 = vmatpush1.msra.mxu0 %v7343_v20  ;;  %v7491_v20 = vld [vmem:[%s9340_s24 + $0x78] sm:$0xff]  ;;  %8238 = vmatprep.subr.mxu1 %v7507_v18  ;;  %v7508_v18 = vld [vmem:[%s9345_s20] sm:$0x1] }
0x11f9   : > { %7419 = vmatprep.subr.mxu0 %v7342_v9  ;;  %v7506_v9 = vld [vmem:[%s9340_s24 + $0xf0] sm:$0xff] }
0x11fa   : > { %7420 = vmatpush1.msra.mxu0 %v7341_v39  ;;  %v7490_v39 = vld [vmem:[%s9340_s24 + $0x70] sm:$0xff] }
0x11fb   : > { %7421 = vmatprep.subr.mxu0 %v7340_v59  ;;  %v7505_v59 = vld [vmem:[%s9340_s24 + $0xe8] sm:$0xff] }
0x11fc   : > { %7422 = vmatpush1.msra.mxu0 %v7339_v62  ;;  %v7489_v62 = vld [vmem:[%s9340_s24 + $0x68] sm:$0xff] }
0x127b   : > { %v7188_v44 = vpop.xlane.xlu0 %7187 }
0x127c   : > { %v7191_v40 = vmul.f32 0.0078125, %v7188_v44  ;;  %v7328_v44 = vld [vmem:[%s12335_s3 + $0x8] sm:$0xff] }
0x127e   : > { %v12117_v50 = vsub.f32 %v7184_v15, %v7191_v40  ;;  %v7338_v15 = vld [vmem:[%s12335_s3 + $0x58] sm:$0xff]  ;;  %v7327_v40 = vld [vmem:[%s12335_s3] sm:$0xff] }
0x127f   : > { %7423 = vmatprep.subr.mxu0 %v7338_v15  ;;  %v7504_v15 = vld [vmem:[%s9340_s24 + $0xe0] sm:$0xff] }
0x1280   : > { %v7193_v14 = vmul.f32 %v12117_v50, %v12117_v50  ;;  %7424 = vmatpush1.msra.mxu0 %v7337_v19  ;;  %v7488_v19 = vld [vmem:[%s9340_s24 + $0x60] sm:$0xff] }
0x1281   : > { %7425 = vmatprep.subr.mxu0 %v7336_v25  ;;  %v7503_v25 = vld [vmem:[%s9340_s24 + $0xd8] sm:$0xff] }
0x1282   : > { %v7194_v7 = vsel %vm7185_vm9, %v7193_v14, 0.0  ;;  %7426 = vmatpush1.msra.mxu0 %v7335_v30  ;;  %v7390_v14 = vld [vmem:[%s12335_s3 + $0x1f8] sm:$0xff] }
0x1283   : > { %7195 = vadd.xlane.f32.xlu1 %v7194_v7  ;;  %7427 = vmatprep.subr.mxu0 %v7334_v60  ;;  %v7389_v7 = vld [vmem:[%s12335_s3 + $0x1f0] sm:$0xff]  ;;  %v7487_v30 = vld [vmem:[%s9340_s24 + $0x58] sm:$0xff] }
0x1284   : > { %7428 = vmatpush1.msra.mxu0 %v7333_v32  ;;  %v7502_v60 = vld [vmem:[%s9340_s24 + $0xd0] sm:$0xff] }
0x1285   : > { %7429 = vmatprep.subr.mxu0 %v7332_v10  ;;  %v7486_v32 = vld [vmem:[%s9340_s24 + $0x50] sm:$0xff]  ;;  %v7501_v10 = vld [vmem:[%s9340_s24 + $0xc8] sm:$0xff] }
0x1286   : > { %7430 = vmatpush1.msra.mxu0 %v7331_v61  ;;  %v7485_v61 = vld [vmem:[%s9340_s24 + $0x48] sm:$0xff] }
0x1287   : > { %7431 = vmatprep.subr.mxu0 %v7330_v47  ;;  %v7500_v47 = vld [vmem:[%s9340_s24 + $0xc0] sm:$0xff] }
0x1288   : > { %7432 = vmatpush1.msra.mxu0 %v7329_v23  ;;  %v7484_v23 = vld [vmem:[%s9340_s24 + $0x40] sm:$0xff] }
0x1289   : > { %7433 = vmatprep.subr.mxu0 %v7328_v44  ;;  %v7499_v44 = vld [vmem:[%s9340_s24 + $0xb8] sm:$0xff] }
0x128a   : > { %7434 = vmatpush1.msra.mxu0 %v7327_v40  ;;  %v7483_v40 = vld [vmem:[%s9340_s24 + $0x38] sm:$0xff] }
0x128b   : > { %7435 = vmatprep.subr.mxu0 %v7390_v14  ;;  %v7498_v14 = vld [vmem:[%s9340_s24 + $0xb0] sm:$0xff] }
0x128c   : > { %7436 = vmatpush2.msra.mxu0 %v7389_v7  ;;  %v7482_v7 = vld [vmem:[%s9340_s24 + $0x30] sm:$0xff] }
0x128d   : > { %7437 = vmatprep.subr.mxu0 %v7388_v46  ;;  %v7497_v46 = vld [vmem:[%s9340_s24 + $0xa8] sm:$0xff] }
0x128e   : > { %7438 = vmatpush2.msra.mxu0 %v7387_v24  ;;  %v7481_v24 = vld [vmem:[%s9340_s24 + $0x28] sm:$0xff] }
0x128f   : > { %7439 = vmatprep.subr.mxu0 %v7386_v35  ;;  %v7496_v35 = vld [vmem:[%s9340_s24 + $0xa0] sm:$0xff] }
0x1290   : > { %7440 = vmatpush2.msra.mxu0 %v7385_v21  ;;  %v7480_v21 = vld [vmem:[%s9340_s24 + $0x20] sm:$0xff] }
0x1291   : > { %7441 = vmatprep.subr.mxu0 %v7384_v55  ;;  %v9067_v55 = vld [vmem:[%s12330_s0] sm:$0x3] }
0x1292   : > { %7442 = vmatpush2.msra.mxu0 %v7383_v26  ;;  %v5138_v26 = vrot.slane %v9067_v55, %v9408_v33 }
0x1293   : > { %7443 = vmatprep.subr.mxu0 %v7382_v31  ;;  %v6502_v31 = vld [vmem:[%s12338_s5] sm:$0x3]  ;;  %s1335_s5 = scalar_lea.vmem %s9350_s27, %s12341_s1 }
0x1294   : > { %7444 = vmatpush2.msra.mxu0 %v7381_v34  ;;  %v5142_v34 = vadd.f32 %v5138_v26, %v11209_v51 }
0x1295   : > { %7445 = vmatprep.subr.mxu0 %v7380_v36  ;;  %v6507_v36 = vrot.slane %v6502_v31, %v9496_v57 }
0x1296   : > { %7446 = vmatpush2.msra.mxu0 %v7379_v38  ;;  %v6501_v38 = vadd.f32 %v12027_v5, %v5142_v34 }
0x1297   : > { %7447 = vmatprep.subr.mxu0 %v7378_v27  ;;  %v7311_v27 = vld [vmem:[%s12339_s2] sm:$0x3] }
0x1298   : > { %7448 = vmatpush2.msra.mxu0 %v7377_v41  ;;  %v6511_v41 = vrot.slane %v6502_v31, %v9408_v33  ;;  %v7320_v51 = vrot.slane %v7311_v27, %v9408_v33 }
0x1299   : > { %7449 = vmatprep.subr.mxu0 %v7376_v29  ;;  %v6514_v29 = vadd.f32 %v6507_v36, %v11872_v12  ;;  %v7495_v12 = vld [vmem:[%s9340_s24 + $0x98] sm:$0xff] }
0x129a   : > { %7450 = vmatpush2.msra.mxu0 %v7375_v0 }
0x129b   : > { %7451 = vmatprep.subr.mxu0 %v7374_v43  ;;  %v7316_v43 = vrot.slane %v7311_v27, %v9496_v57 }
0x129c   : > { %7452 = vmatpush2.msra.mxu0 %v7373_v42 }
0x129d   : > { %7453 = vmatprep.subr.mxu0 %v7372_v11  ;;  %v6515_v11 = vadd.f32 %v6511_v41, %v6501_v38 }
0x129e   : > { %7454 = vmatpush2.msra.mxu0 %v7371_v48 }
0x129f   : > { %7455 = vmatprep.subr.mxu0 %v7370_v8 }
0x12a0   : > { %7456 = vmatpush2.msra.mxu0 %v7369_v28 }
0x12a1   : > { %7457 = vmatprep.subr.mxu0 %v7368_v45  ;;  %v7391_v45 = vld [vmem:[%s9335_s4] sm:$0x3] }
0x12a2   : > { %7458 = vmatpush2.msra.mxu0 %v7367_v63  ;;  %v7396_v63 = vrot.slane %v7391_v45, %v9496_v57 }
0x12a3   : > { %7459 = vmatprep.subr.mxu0 %v7366_v53  ;;  %v7400_v53 = vrot.slane %v7391_v45, %v9408_v33 }
0x12a4   : > { %7460 = vmatpush2.msra.mxu0 %v7365_v3 }
0x130c   : > { %v7196_v17 = vpop.xlane.xlu1 %7195 }
0x130d   : > { %v7198_v54 = vmul.f32 0.0078125, %v7196_v17 }
0x130f   : > { %v7199_v2 = vadd.f32 1e-05, %v7198_v54 }
0x1311   : > { %9000 = vrsqrt.f32 %v7199_v2  ;;  %v7479_v2 = vld [vmem:[%s9340_s24 + $0x18] sm:$0xff] }
0x131e   : > { %v9001_v56 = vpop.eup %9000 }
0x131f   : > { %v7201_v22 = vmul.f32 %v9001_v56, %v12117_v50  ;;  %v7364_v50 = vld [vmem:[%s12335_s3 + $0x128] sm:$0xff]  ;;  %v7494_v56 = vld [vmem:[%s9340_s24 + $0x90] sm:$0xff] }
0x1320   : > { %7461 = vmatprep.subr.mxu0 %v7364_v50 }
0x1321   : > { %v7203_v4 = vmul.f32 %v7202_v49, %v7201_v22  ;;  %7462 = vmatpush2.msra.mxu0 %v7363_v6  ;;  %v7478_v49 = vld [vmem:[%s9340_s24 + $0x10] sm:$0xff]  ;;  %v7493_v22 = vld [vmem:[%s9340_s24 + $0x88] sm:$0xff] }
0x1322   : > { %7463 = vmatprep.subr.mxu0 %v7362_v37 }
0x1323   : > { %v7205_v58 = vadd.f32 %v7204_v52, %v7203_v4  ;;  %7464 = vmatpush2.msra.mxu0 %v7361_v13  ;;  %v7477_v52 = vld [vmem:[%s9340_s24 + $0x8] sm:$0xff]  ;;  %v7492_v4 = vld [vmem:[%s9340_s24 + $0x80] sm:$0xff] }
0x1324   : > { %7465 = vmatprep.subr.mxu0 %v7360_v1 }
0x1325   : > { %7303 = vmatmul.mubr.f32.vlgmr.msra.gmra.mxu1 %v7205_v58  ;;  %7466 = vmatpush2.msra.mxu0 %v7359_v16  ;;  %v7476_v58 = vld [vmem:[%s9340_s24] sm:$0xff] }
0x1326   : > { %8239 = vmatpush3.msra.mxu1 %v7491_v20 }
0x1327   : > { %8240 = vmatprep.subr.mxu1 %v7506_v9 }
0x1328   : > { %8241 = vmatpush3.msra.mxu1 %v7490_v39 }
0x1329   : > { %8242 = vmatprep.subr.mxu1 %v7505_v59 }
0x132a   : > { %8243 = vmatpush3.msra.mxu1 %v7489_v62 }
0x132b   : > { %8244 = vmatprep.subr.mxu1 %v7504_v15 }
0x132c   : > { %8245 = vmatpush3.msra.mxu1 %v7488_v19 }
0x132d   : > { %8246 = vmatprep.subr.mxu1 %v7503_v25 }
0x132e   : > { %8247 = vmatpush3.msra.mxu1 %v7487_v30 }
0x132f   : > { %8248 = vmatprep.subr.mxu1 %v7502_v60 }
0x1330   : > { %8249 = vmatpush3.msra.mxu1 %v7486_v32 }
0x1331   : > { %8250 = vmatprep.subr.mxu1 %v7501_v10 }
0x1332   : > { %8251 = vmatpush3.msra.mxu1 %v7485_v61 }
0x1333   : > { %8252 = vmatprep.subr.mxu1 %v7500_v47 }
0x1334   : > { %8253 = vmatpush3.msra.mxu1 %v7484_v23 }
0x1335   : > { %8254 = vmatprep.subr.mxu1 %v7499_v44 }
0x1336   : > { %8255 = vmatpush3.msra.mxu1 %v7483_v40 }
0x1337   : > { %8256 = vmatprep.subr.mxu1 %v7498_v14 }
0x1338   : > { %8257 = vmatpush3.msra.mxu1 %v7482_v7 }
0x1339   : > { %8258 = vmatprep.subr.mxu1 %v7497_v46 }
0x133a   : > { %8259 = vmatpush3.msra.mxu1 %v7481_v24 }
0x133b   : > { %8260 = vmatprep.subr.mxu1 %v7496_v35 }
0x133c   : > { %8261 = vmatpush3.msra.mxu1 %v7480_v21 }
0x133d   : > { %8262 = vmatprep.subr.mxu1 %v7495_v12 }
0x133e   : > { %8263 = vmatpush3.msra.mxu1 %v7479_v2 }
0x133f   : > { %8264 = vmatprep.subr.mxu1 %v7494_v56 }
0x1340   : > { %8265 = vmatpush3.msra.mxu1 %v7478_v49 }
0x1341   : > { %8266 = vmatprep.subr.mxu1 %v7493_v22 }
0x1342   : > { %8267 = vmatpush3.msra.mxu1 %v7477_v52 }
0x1343   : > { %8268 = vmatprep.subr.mxu1 %v7492_v4 }
0x1344   : > { %8269 = vmatpush3.msra.mxu1 %v7476_v58 }
0x13e5   : > { %v7304_v0 = vpop.f32.mrf.mxu1 }
0x13e6   : > { %v7309_v42 = vadd.f32 %v7304_v0, %v6514_v29 }
0x13e7   : > { %v7306_v48 = vpop.f32.mrf.mxu1 }
0x13e8   : > { %v7310_v8 = vadd.f32 %v7306_v48, %v6515_v11  ;;  %v7323_v5 = vadd.f32 %v7316_v43, %v7309_v42 }
0x13ea   : > { %v7324_v28 = vadd.f32 %v7320_v51, %v7310_v8  ;;  %v7325_v54 = vmax.f32 %v7323_v5, 0.0 }
0x13ec   : > { %v7326_v17 = vmax.f32 %v7324_v28, 0.0 }
0x13ee   : > { %7467 = vmatprep.mubr.f32.mxu0 %v7326_v17 }
0x13ef   : > { %7468 = vmatmul.mubr.f32.vlgmr.msra.gmra.mxu0 %v7325_v54 }
0x14af   : > { %v7469_v3 = vpop.f32.mrf.mxu0 }
0x14b0   : > { %v7470_v50 = vadd.f32 %v7469_v3, %v7396_v63 }
0x14b1   : > { %v7471_v6 = vpop.f32.mrf.mxu0 }
0x14b2   : > { %v7472_v37 = vadd.f32 %v7471_v6, %v7400_v53  ;;  %v7474_v1 = vmax.f32 %v7470_v50, 0.0 }
0x14b4   : > { %v7475_v13 = vmax.f32 %v7472_v37, 0.0 }
0x14b6   : > { %7573 = vmatprep.mubr.f32.mxu1 %v7475_v13 }
0x14b7   : > { %7574 = vmatmul.mubr.f32.vlgmr.msra.gmra.mxu1 %v7474_v1 }
0x1577   : > { %v8270_v16 = vpop.f32.mrf.mxu1 }
0x1579   : > { %v8271_v20 = vpop.f32.mrf.mxu1 }
0x157a   : > { %v8272_v9 = vadd.f32 %v8271_v20, %v8270_v16 }
0x157c   : > { %v7576_v39 = vadd.f32 %v8272_v9, %v7508_v18 }
0x157e   : > { %7580 = vst.msk [vmem:[%s1335_s5] sm:$0x1] %vm7579_vm10, %v7576_v39 }
0x157f PF: > { %s99_s28 = sadd.s32 1, %s9074_s28  }
0x1580   : > { %p96_p4 = scmp.ge.s32.totalorder %s99_s28, 4  }
0x1582   :  { %98 = sbr.rel (!%p96_p4) target bundleno = 81 (0x51), region = 273 }

</bundles_post_ra>
